<compile_context>
chip_gen: v6e
topology: v6e:2x2x1
jax: 0.10.0
libtpu: 0.0.40
codegen_flags: <defaults>
</compile_context>

<pallas_src>
import functools

import jax
import jax.numpy as jnp
from jax.experimental import pallas as pl
from jax.experimental.pallas import tpu as pltpu

_TAPS = tuple((ky, kx) for ky in range(3) for kx in range(3))    # t = ky*3 + kx
_C1, _C2, _C3 = 32, 64, 64        # real channel widths (kept dense, no 128 padding)
_K1 = 16                          # conv1 packed K (9 taps -> pad to 16)
_K2 = 384                         # conv2 packed K (9*32 = 288 -> pad to 384)
_K3 = 640                         # conv3 packed K (9*64 = 576 -> pad to 640)
_NC_PAD = 128                     # logits padded to a lane-dense 128 columns


# ---------------------------------------------------------------------------
# Fused forward kernel (one grid step == B images)
# ---------------------------------------------------------------------------

def _fused_forward_kernel(p1_ref, w1_ref, b1_ref, w2_ref, b2_ref, w3_ref, b3_ref,
                          wf1_ref, bf1_ref, wf2_ref, bf2_ref, out_ref,
                          c1_ref, a1p_ref, l2_ref, c2_ref, a2p_ref, l3_ref,
                          c3_ref, ft_ref, *, B, H, W):
    f32, bf16 = jnp.float32, jnp.bfloat16
    H2, W2 = H // 2, W // 2
    H4, W4 = H // 4, W // 4
    pnum = H4 * W4

    # --- scratch init (every step: scratch starts uninitialized, and under megacore
    #     splitting of the parallel batch axis step 0 only runs on one core) ---------
    a1p_ref[...] = jnp.zeros((B, H2 + 2, W2 + 2, _C1), f32)        # zero-padded border
    a2p_ref[...] = jnp.zeros((B, H4 + 2, W4 + 2, _C2), f32)
    l2_ref[:, 9 * _C1:] = jnp.zeros((B * H2 * W2, _K2 - 9 * _C1), bf16)  # K pad cols
    l3_ref[:, 9 * _C2:] = jnp.zeros((B * H4 * W4, _K3 - 9 * _C2), bf16)

    # --- conv1 + ReLU: one MXU dot, K = 16 packed taps (Cin = 1), M = B*H*W ---------
    z1 = jnp.dot(p1_ref[...], w1_ref[...], preferred_element_type=f32)
    c1_ref[...] = jnp.maximum(z1 + b1_ref[...], 0.0)

    # --- maxpool 2x2 #1 -> interior of the zero-padded conv2 input ------------------
    for b in range(B):
        base = b * H * W
        for py in range(H2):
            r0 = base + (2 * py) * W
            r1 = r0 + W
            v = jnp.maximum(
                jnp.maximum(c1_ref[pl.ds(r0, W2, stride=2), :],
                            c1_ref[pl.ds(r0 + 1, W2, stride=2), :]),
                jnp.maximum(c1_ref[pl.ds(r1, W2, stride=2), :],
                            c1_ref[pl.ds(r1 + 1, W2, stride=2), :]))
            a1p_ref[b, py + 1, 1:1 + W2, :] = v

    # --- conv2 + ReLU: K-packed im2col (cols [t*32, (t+1)*32) = tap t), single dot ---
    for t, (ky, kx) in enumerate(_TAPS):
        col = t * _C1
        for b in range(B):
            for y in range(H2):
                row = (b * H2 + y) * W2
                l2_ref[row:row + W2, col:col + _C1] = \
                    a1p_ref[b, y + ky, kx:kx + W2, :].astype(bf16)
    z2 = jnp.dot(l2_ref[...], w2_ref[...], preferred_element_type=f32)
    c2_ref[...] = jnp.maximum(z2 + b2_ref[...], 0.0)

    # --- maxpool 2x2 #2 -> interior of the zero-padded conv3 input ------------------
    for b in range(B):
        base = b * H2 * W2
        for py in range(H4):
            r0 = base + (2 * py) * W2
            r1 = r0 + W2
            v = jnp.maximum(
                jnp.maximum(c2_ref[pl.ds(r0, W4, stride=2), :],
                            c2_ref[pl.ds(r0 + 1, W4, stride=2), :]),
                jnp.maximum(c2_ref[pl.ds(r1, W4, stride=2), :],
                            c2_ref[pl.ds(r1 + 1, W4, stride=2), :]))
            a2p_ref[b, py + 1, 1:1 + W4, :] = v

    # --- conv3 + ReLU: same K-packed scheme, single (B*pnum, 640) x (640, 64) dot ----
    for t, (ky, kx) in enumerate(_TAPS):
        col = t * _C2
        for b in range(B):
            for y in range(H4):
                row = (b * H4 + y) * W4
                l3_ref[row:row + W4, col:col + _C2] = \
                    a2p_ref[b, y + ky, kx:kx + W4, :].astype(bf16)
    z3 = jnp.dot(l3_ref[...], w3_ref[...], preferred_element_type=f32)
    c3_ref[...] = jnp.maximum(z3 + b3_ref[...], 0.0)

    # --- Flatten: strided-sublane gather of each spatial position's (B, 64) rows into
    #     a lane-packed (B, pnum*64) slab (torch NCHW order folded into wf1 packing) --
    for p in range(pnum):
        ft_ref[:, p * _C3:(p + 1) * _C3] = \
            c3_ref[pl.ds(p, B, stride=pnum), :].astype(bf16)

    # --- fc1 + ReLU: single dot, M = B, K = pnum*64 ----------------------------------
    h1 = jnp.dot(ft_ref[...], wf1_ref[...], preferred_element_type=f32)
    h1 = jnp.maximum(h1 + bf1_ref[...], 0.0).astype(bf16)

    # --- fc2 (logit columns >= num_classes are zero weights; sliced off in wrapper) --
    out_ref[...] = jnp.dot(h1, wf2_ref[...], preferred_element_type=f32) + bf2_ref[...]


# ---------------------------------------------------------------------------
# Parameter init (torch-equivalent layout) and one-time packing
# ---------------------------------------------------------------------------

def init_params(key, num_classes, image_size):
    feat = 64 * (image_size // 4) * (image_size // 4)
    ks = jax.random.split(key, 10)

    def w(k, shape, fan_in):
        return jax.random.normal(k, shape, jnp.float32) * (1.0 / jnp.sqrt(fan_in))

    # NOTE: fc weights are stored here as (in, out); a real torch nn.Linear checkpoint
    # stores (out, in) and would need a transpose before pack_params.
    return {
        "conv1_w": w(ks[0], (32, 1, 3, 3), 1 * 9),
        "conv1_b": w(ks[1], (32,), 1 * 9),
        "conv2_w": w(ks[2], (64, 32, 3, 3), 32 * 9),
        "conv2_b": w(ks[3], (64,), 32 * 9),
        "conv3_w": w(ks[4], (64, 64, 3, 3), 64 * 9),
        "conv3_b": w(ks[5], (64,), 64 * 9),
        "fc1_w": w(ks[6], (feat, 64), feat),
        "fc1_b": w(ks[7], (64,), feat),
        "fc2_w": w(ks[8], (64, num_classes), 64),
        "fc2_b": w(ks[9], (num_classes,), 64),
    }


def pack_params(params, num_classes, image_size):
    """K-pack conv weights (row = (ky*3+kx)*Cin + ci), keep channels dense, bf16 MXU
    operands, fold torch's NCHW flatten order into fc1, pad fc2 columns to 128."""
    assert num_classes <= _NC_PAD
    h4 = image_size // 4
    pnum = h4 * h4
    bf16 = jnp.bfloat16

    def pack_conv(w_torch, kpad):                       # (Cout, Cin, 3, 3) -> (kpad, Cout)
        cout, cin = int(w_torch.shape[0]), int(w_torch.shape[1])
        wm = jnp.transpose(w_torch, (2, 3, 1, 0)).reshape(9 * cin, cout)
        return jnp.pad(wm, ((0, kpad - 9 * cin), (0, 0))).astype(bf16)

    def bias_row(b, width=None):
        b = jnp.asarray(b, jnp.float32)
        if width is not None:
            b = jnp.pad(b, (0, width - int(b.shape[0])))
        return b.reshape(1, -1)

    # conv1: Cin == 1 -> (9, 32) taps, padded to 16 rows for the MXU K dim.
    w1 = jnp.transpose(params["conv1_w"], (2, 3, 1, 0)).reshape(9, _C1)
    w1 = jnp.pad(w1, ((0, _K1 - 9), (0, 0))).astype(bf16)

    # fc1: torch flatten index = c*pnum + p  ->  kernel K index = p*64 + c.
    f1 = params["fc1_w"].reshape(_C3, pnum, 64)         # (c, p, o)
    f1 = jnp.transpose(f1, (1, 0, 2)).reshape(pnum * _C3, 64).astype(bf16)

    f2 = jnp.pad(params["fc2_w"], ((0, 0), (0, _NC_PAD - num_classes))).astype(bf16)

    return {
        "w1": w1, "b1": bias_row(params["conv1_b"]),
        "w2": pack_conv(params["conv2_w"], _K2), "b2": bias_row(params["conv2_b"]),
        "w3": pack_conv(params["conv3_w"], _K3), "b3": bias_row(params["conv3_b"]),
        "wf1": f1, "bf1": bias_row(params["fc1_b"]),
        "wf2": f2, "bf2": bias_row(params["fc2_b"], _NC_PAD),
    }


# ---------------------------------------------------------------------------
# Forward
# ---------------------------------------------------------------------------

def _conv1_patches(x_nchw, n_pad):
    """1-channel im2col for conv1: (N,1,H,W) -> (n_pad*H*W, 16) bf16 (cols 9..15 zero)."""
    n, _, h, w = x_nchw.shape
    x = x_nchw.reshape(n, h, w).astype(jnp.float32)
    if n_pad > n:
        x = jnp.pad(x, ((0, n_pad - n), (0, 0), (0, 0)))
    xp = jnp.pad(x, ((0, 0), (1, 1), (1, 1)))
    cols = [xp[:, ky:ky + h, kx:kx + w] for (ky, kx) in _TAPS]
    p = jnp.stack(cols, axis=-1)                        # (n_pad, h, w, 9)
    p = jnp.pad(p, ((0, 0), (0, 0), (0, 0), (0, _K1 - 9)))
    return p.reshape(n_pad * h * w, _K1).astype(jnp.bfloat16)


def _arr_bytes(a):
    sz = jnp.dtype(a.dtype).itemsize
    for d in a.shape:
        sz *= int(d)
    return sz


def _shape_bytes(shape, dtype):
    sz = jnp.dtype(dtype).itemsize
    for d in shape:
        sz *= int(d)
    return sz


def conv2d_model_forward(packed, x_nchw, num_classes):
    """x_nchw: (N, 1, H, W) float32 -> logits (N, num_classes) float32."""
    n, c, h, w = x_nchw.shape
    assert c == 1, "Conv2dModel expects single-channel input"
    assert h % 4 == 0 and w % 4 == 0, "two 2x2 maxpools need spatial dims divisible by 4"
    h2, w2, h4, w4 = h // 2, w // 2, h // 4, w // 4
    pnum = h4 * w4
    assert packed["wf1"].shape[0] == pnum * _C3, "packed params built for a different image size"

    # images per grid step (block second-to-last dims must stay 8-aligned or full)
    if n <= 8:
        bimg, n_pad = n, n
    else:
        bimg = 8
        n_pad = ((n + 7) // 8) * 8
    steps = n_pad // bimg

    patches = _conv1_patches(x_nchw, n_pad)             # (n_pad*h*w, 16) bf16
    kernel = functools.partial(_fused_forward_kernel, B=bimg, H=h, W=w)

    operands = (patches, packed["w1"], packed["b1"], packed["w2"], packed["b2"],
                packed["w3"], packed["b3"], packed["wf1"], packed["bf1"],
                packed["wf2"], packed["bf2"])

    scratch_defs = [
        ((bimg * h * w, _C1), jnp.float32),              # conv1 output (pre-pool)
        ((bimg, h2 + 2, w2 + 2, _C1), jnp.float32),      # pooled1, zero-padded
        ((bimg * h2 * w2, _K2), jnp.bfloat16),           # conv2 K-packed im2col
        ((bimg * h2 * w2, _C2), jnp.float32),            # conv2 output (pre-pool)
        ((bimg, h4 + 2, w4 + 2, _C2), jnp.float32),      # pooled2, zero-padded
        ((bimg * h4 * w4, _K3), jnp.bfloat16),           # conv3 K-packed im2col
        ((bimg * h4 * w4, _C3), jnp.float32),            # conv3 output (post-ReLU)
        ((bimg, pnum * _C3), jnp.bfloat16),              # flattened fc1 input
    ]
    scratch = [pltpu.VMEM(s, d) for s, d in scratch_defs]

    weight_bytes = sum(_arr_bytes(a) for a in operands[1:])
    block_bytes = bimg * h * w * _K1 * 2 + bimg * _NC_PAD * 4
    scratch_bytes = sum(_shape_bytes(s, d) for s, d in scratch_defs)
    est = 2 * weight_bytes + 2 * block_bytes + scratch_bytes
    vmem_limit = int(min(64 * 2 ** 20, max(32 * 2 ** 20, 2 * est)))

    flops = n_pad * (2 * h * w * 9 * 32
                     + 2 * h2 * w2 * 9 * 32 * 64
                     + 2 * h4 * w4 * 9 * 64 * 64
                     + 2 * pnum * 64 * 64
                     + 2 * 64 * num_classes)
    bytes_accessed = weight_bytes + n_pad * h * w * _K1 * 2 + n_pad * _NC_PAD * 4

    const2 = lambda g: (0, 0)                            # resident weights: DMA'd once

    out = pl.pallas_call(
        kernel,
        out_shape=jax.ShapeDtypeStruct((n_pad, _NC_PAD), jnp.float32),
        grid_spec=pltpu.PrefetchScalarGridSpec(
            num_scalar_prefetch=0,
            grid=(steps,),
            in_specs=[
                pl.BlockSpec((bimg * h * w, _K1), lambda g: (g, 0)),   # conv1 patches
                pl.BlockSpec((_K1, _C1), const2),                      # conv1 w (bf16)
                pl.BlockSpec((1, _C1), const2),                        # conv1 b
                pl.BlockSpec((_K2, _C2), const2),                      # conv2 w (K-packed)
                pl.BlockSpec((1, _C2), const2),                        # conv2 b
                pl.BlockSpec((_K3, _C3), const2),                      # conv3 w (K-packed)
                pl.BlockSpec((1, _C3), const2),                        # conv3 b
                pl.BlockSpec((pnum * _C3, 64), const2),                # fc1 w (flatten-folded)
                pl.BlockSpec((1, 64), const2),                         # fc1 b
                pl.BlockSpec((64, _NC_PAD), const2),                   # fc2 w
                pl.BlockSpec((1, _NC_PAD), const2),                    # fc2 b
            ],
            out_specs=pl.BlockSpec((bimg, _NC_PAD), lambda g: (g, 0)),
            scratch_shapes=scratch),
        compiler_params=pltpu.CompilerParams(
            dimension_semantics=("parallel",),
            vmem_limit_bytes=vmem_limit),
        cost_estimate=pl.CostEstimate(flops=flops, transcendentals=0,
                                      bytes_accessed=bytes_accessed),
    )(*operands)

    return out[:n, :num_classes]


def predict(packed, x_nchw, num_classes):
    return jnp.argmax(conv2d_model_forward(packed, x_nchw, num_classes), axis=1)


if __name__ == "__main__":
    num_classes = 10
    clip_len = 8          # unused in forward (matches the PyTorch module)
    image_size = 16
    batch = 2

    key = jax.random.PRNGKey(0)
    pkey, xkey = jax.random.split(key)
    params = init_params(pkey, num_classes, image_size)
    packed = pack_params(params, num_classes, image_size)
    x = jax.random.normal(xkey, (batch, 1, image_size, image_size), jnp.float32)

    fwd = jax.jit(conv2d_model_forward, static_argnums=(2,))
    logits = jax.block_until_ready(fwd(packed, x, num_classes))
    assert logits.shape == (batch, num_classes)
    assert logits.dtype == jnp.float32

    pred_fn = jax.jit(predict, static_argnums=(2,))
    preds = jax.block_until_ready(pred_fn(packed, x, num_classes))
    assert preds.shape == (batch,)
    print("KERNEL_OK")
</pallas_src>

<mosaic_0001>
module attributes {stable_mosaic.version = 11 : i64} {
  func.func @_fused_forward_kernel(%arg0: i32, %arg1: memref<512x16xbf16, #tpu.memory_space<vmem>>, %arg2: memref<16x32xbf16, #tpu.memory_space<vmem>>, %arg3: memref<1x32xf32, #tpu.memory_space<vmem>>, %arg4: memref<384x64xbf16, #tpu.memory_space<vmem>>, %arg5: memref<1x64xf32, #tpu.memory_space<vmem>>, %arg6: memref<640x64xbf16, #tpu.memory_space<vmem>>, %arg7: memref<1x64xf32, #tpu.memory_space<vmem>>, %arg8: memref<1024x64xbf16, #tpu.memory_space<vmem>>, %arg9: memref<1x64xf32, #tpu.memory_space<vmem>>, %arg10: memref<64x128xbf16, #tpu.memory_space<vmem>>, %arg11: memref<1x128xf32, #tpu.memory_space<vmem>>, %arg12: memref<2x128xf32, #tpu.memory_space<vmem>>, %arg13: memref<512x32xf32, #tpu.memory_space<vmem>>, %arg14: memref<2x10x10x32xf32, #tpu.memory_space<vmem>>, %arg15: memref<128x384xbf16, #tpu.memory_space<vmem>>, %arg16: memref<128x64xf32, #tpu.memory_space<vmem>>, %arg17: memref<2x6x6x64xf32, #tpu.memory_space<vmem>>, %arg18: memref<32x640xbf16, #tpu.memory_space<vmem>>, %arg19: memref<32x64xf32, #tpu.memory_space<vmem>>, %arg20: memref<2x1024xbf16, #tpu.memory_space<vmem>>) attributes {dimension_semantics = [#tpu.dimension_semantics<parallel>], iteration_bounds = array<i64: 1>, scalar_prefetch = 0 : i64, scratch_operands = 8 : i64, tpu.core_type = #tpu.core_type<tc>, window_params = [{transform_indices = @transform_0, window_bounds = array<i64: 512, 16>}, {pipeline_mode = #tpu.pipeline_mode<synchronous>, transform_indices = @transform_1, window_bounds = array<i64: 16, 32>}, {pipeline_mode = #tpu.pipeline_mode<synchronous>, transform_indices = @transform_2, window_bounds = array<i64: 1, 32>}, {pipeline_mode = #tpu.pipeline_mode<synchronous>, transform_indices = @transform_3, window_bounds = array<i64: 384, 64>}, {pipeline_mode = #tpu.pipeline_mode<synchronous>, transform_indices = @transform_4, window_bounds = array<i64: 1, 64>}, {pipeline_mode = #tpu.pipeline_mode<synchronous>, transform_indices = @transform_5, window_bounds = array<i64: 640, 64>}, {pipeline_mode = #tpu.pipeline_mode<synchronous>, transform_indices = @transform_6, window_bounds = array<i64: 1, 64>}, {pipeline_mode = #tpu.pipeline_mode<synchronous>, transform_indices = @transform_7, window_bounds = array<i64: 1024, 64>}, {pipeline_mode = #tpu.pipeline_mode<synchronous>, transform_indices = @transform_8, window_bounds = array<i64: 1, 64>}, {pipeline_mode = #tpu.pipeline_mode<synchronous>, transform_indices = @transform_9, window_bounds = array<i64: 64, 128>}, {pipeline_mode = #tpu.pipeline_mode<synchronous>, transform_indices = @transform_10, window_bounds = array<i64: 1, 128>}, {transform_indices = @transform_11, window_bounds = array<i64: 2, 128>}]} {
    %cst = arith.constant 0.000000e+00 : f32
    %0 = vector.broadcast %cst : f32 to vector<2x10x10x32xf32>
    %c0 = arith.constant 0 : index
    %c0_0 = arith.constant 0 : index
    %c0_1 = arith.constant 0 : index
    %c0_2 = arith.constant 0 : index
    %1 = vector.load %arg14[%c0, %c0_0, %c0_1, %c0_2] : memref<2x10x10x32xf32, #tpu.memory_space<vmem>>, vector<2x10x10x32xf32>
    tpu.vector_store %arg14[%c0, %c0_0, %c0_1, %c0_2], %0 {strides = array<i32>} : memref<2x10x10x32xf32, #tpu.memory_space<vmem>>, vector<2x10x10x32xf32>,
    %cst_3 = arith.constant 0.000000e+00 : f32
    %2 = vector.broadcast %cst_3 : f32 to vector<2x6x6x64xf32>
    %c0_4 = arith.constant 0 : index
    %c0_5 = arith.constant 0 : index
    %c0_6 = arith.constant 0 : index
    %c0_7 = arith.constant 0 : index
    %3 = vector.load %arg17[%c0_4, %c0_5, %c0_6, %c0_7] : memref<2x6x6x64xf32, #tpu.memory_space<vmem>>, vector<2x6x6x64xf32>
    tpu.vector_store %arg17[%c0_4, %c0_5, %c0_6, %c0_7], %2 {strides = array<i32>} : memref<2x6x6x64xf32, #tpu.memory_space<vmem>>, vector<2x6x6x64xf32>,
    %cst_8 = arith.constant 0.000000e+00 : bf16
    %4 = vector.broadcast %cst_8 : bf16 to vector<128x96xbf16>
    %c0_9 = arith.constant 0 : index
    %c288 = arith.constant 288 : index
    %5 = vector.load %arg15[%c0_9, %c288] : memref<128x384xbf16, #tpu.memory_space<vmem>>, vector<128x96xbf16>
    tpu.vector_store %arg15[%c0_9, %c288], %4 {strides = array<i32>} : memref<128x384xbf16, #tpu.memory_space<vmem>>, vector<128x96xbf16>,
    %cst_10 = arith.constant 0.000000e+00 : bf16
    %6 = vector.broadcast %cst_10 : bf16 to vector<32x64xbf16>
    %c0_11 = arith.constant 0 : index
    %c576 = arith.constant 576 : index
    %7 = vector.load %arg18[%c0_11, %c576] : memref<32x640xbf16, #tpu.memory_space<vmem>>, vector<32x64xbf16>
    tpu.vector_store %arg18[%c0_11, %c576], %6 {strides = array<i32>} : memref<32x640xbf16, #tpu.memory_space<vmem>>, vector<32x64xbf16>,
    %c0_12 = arith.constant 0 : index
    %c0_13 = arith.constant 0 : index
    %8 = vector.load %arg1[%c0_12, %c0_13] : memref<512x16xbf16, #tpu.memory_space<vmem>>, vector<512x16xbf16>
    %c0_14 = arith.constant 0 : index
    %c0_15 = arith.constant 0 : index
    %9 = vector.load %arg2[%c0_14, %c0_15] : memref<16x32xbf16, #tpu.memory_space<vmem>>, vector<16x32xbf16>
    %cst_16 = arith.constant dense<0.000000e+00> : vector<512x32xf32>
    %10 = tpu.matmul %8, %9, %cst_16 {dimension_numbers = #tpu.dot_dimension_numbers<[1], [0], [0], [1], [0, 0, 1, 1], [], []>} : vector<512x16xbf16>, vector<16x32xbf16>, vector<512x32xf32> -> vector<512x32xf32>
    %c0_17 = arith.constant 0 : index
    %c0_18 = arith.constant 0 : index
    %11 = vector.load %arg3[%c0_17, %c0_18] : memref<1x32xf32, #tpu.memory_space<vmem>>, vector<1x32xf32>
    %12 = vector.broadcast %11 : vector<1x32xf32> to vector<512x32xf32>
    %13 = arith.addf %10, %12 : vector<512x32xf32>
    %cst_19 = arith.constant 0.000000e+00 : f32
    %14 = vector.broadcast %cst_19 : f32 to vector<512x32xf32>
    %15 = arith.maximumf %13, %14 : vector<512x32xf32>
    %c0_20 = arith.constant 0 : index
    %c0_21 = arith.constant 0 : index
    %16 = vector.load %arg13[%c0_20, %c0_21] : memref<512x32xf32, #tpu.memory_space<vmem>>, vector<512x32xf32>
    tpu.vector_store %arg13[%c0_20, %c0_21], %15 {strides = array<i32>} : memref<512x32xf32, #tpu.memory_space<vmem>>, vector<512x32xf32>,
    %c0_22 = arith.constant 0 : index
    %c0_23 = arith.constant 0 : index
    %17 = tpu.strided_load %arg13[%c0_22, %c0_23] {strides = array<i32: 2, 1>} : memref<512x32xf32, #tpu.memory_space<vmem>>, vector<8x32xf32>
    %c1 = arith.constant 1 : index
    %c0_24 = arith.constant 0 : index
    %18 = tpu.strided_load %arg13[%c1, %c0_24] {strides = array<i32: 2, 1>} : memref<512x32xf32, #tpu.memory_space<vmem>>, vector<8x32xf32>
    %19 = arith.maximumf %17, %18 : vector<8x32xf32>
    %c16 = arith.constant 16 : index
    %c0_25 = arith.constant 0 : index
    %20 = tpu.strided_load %arg13[%c16, %c0_25] {strides = array<i32: 2, 1>} : memref<512x32xf32, #tpu.memory_space<vmem>>, vector<8x32xf32>
    %c17 = arith.constant 17 : index
    %c0_26 = arith.constant 0 : index
    %21 = tpu.strided_load %arg13[%c17, %c0_26] {strides = array<i32: 2, 1>} : memref<512x32xf32, #tpu.memory_space<vmem>>, vector<8x32xf32>
    %22 = arith.maximumf %20, %21 : vector<8x32xf32>
    %23 = arith.maximumf %19, %22 : vector<8x32xf32>
    %c0_27 = arith.constant 0 : index
    %c1_28 = arith.constant 1 : index
    %c1_29 = arith.constant 1 : index
    %c0_30 = arith.constant 0 : index
    %24 = vector.load %arg14[%c0_27, %c1_28, %c1_29, %c0_30] : memref<2x10x10x32xf32, #tpu.memory_space<vmem>>, vector<1x1x8x32xf32>
    %25 = vector.shape_cast %24 : vector<1x1x8x32xf32> to vector<8x32xf32>
    %26 = vector.shape_cast %23 : vector<8x32xf32> to vector<1x1x8x32xf32>
    tpu.vector_store %arg14[%c0_27, %c1_28, %c1_29, %c0_30], %26 {strides = array<i32>} : memref<2x10x10x32xf32, #tpu.memory_space<vmem>>, vector<1x1x8x32xf32>,
    %c32 = arith.constant 32 : index
    %c0_31 = arith.constant 0 : index
    %27 = tpu.strided_load %arg13[%c32, %c0_31] {strides = array<i32: 2, 1>} : memref<512x32xf32, #tpu.memory_space<vmem>>, vector<8x32xf32>
    %c33 = arith.constant 33 : index
    %c0_32 = arith.constant 0 : index
    %28 = tpu.strided_load %arg13[%c33, %c0_32] {strides = array<i32: 2, 1>} : memref<512x32xf32, #tpu.memory_space<vmem>>, vector<8x32xf32>
    %29 = arith.maximumf %27, %28 : vector<8x32xf32>
    %c48 = arith.constant 48 : index
    %c0_33 = arith.constant 0 : index
    %30 = tpu.strided_load %arg13[%c48, %c0_33] {strides = array<i32: 2, 1>} : memref<512x32xf32, #tpu.memory_space<vmem>>, vector<8x32xf32>
    %c49 = arith.constant 49 : index
    %c0_34 = arith.constant 0 : index
    %31 = tpu.strided_load %arg13[%c49, %c0_34] {strides = array<i32: 2, 1>} : memref<512x32xf32, #tpu.memory_space<vmem>>, vector<8x32xf32>
    %32 = arith.maximumf %30, %31 : vector<8x32xf32>
    %33 = arith.maximumf %29, %32 : vector<8x32xf32>
    %c0_35 = arith.constant 0 : index
    %c2 = arith.constant 2 : index
    %c1_36 = arith.constant 1 : index
    %c0_37 = arith.constant 0 : index
    %34 = vector.load %arg14[%c0_35, %c2, %c1_36, %c0_37] : memref<2x10x10x32xf32, #tpu.memory_space<vmem>>, vector<1x1x8x32xf32>
    %35 = vector.shape_cast %34 : vector<1x1x8x32xf32> to vector<8x32xf32>
    %36 = vector.shape_cast %33 : vector<8x32xf32> to vector<1x1x8x32xf32>
    tpu.vector_store %arg14[%c0_35, %c2, %c1_36, %c0_37], %36 {strides = array<i32>} : memref<2x10x10x32xf32, #tpu.memory_space<vmem>>, vector<1x1x8x32xf32>,
    %c64 = arith.constant 64 : index
    %c0_38 = arith.constant 0 : index
    %37 = tpu.strided_load %arg13[%c64, %c0_38] {strides = array<i32: 2, 1>} : memref<512x32xf32, #tpu.memory_space<vmem>>, vector<8x32xf32>
    %c65 = arith.constant 65 : index
    %c0_39 = arith.constant 0 : index
    %38 = tpu.strided_load %arg13[%c65, %c0_39] {strides = array<i32: 2, 1>} : memref<512x32xf32, #tpu.memory_space<vmem>>, vector<8x32xf32>
    %39 = arith.maximumf %37, %38 : vector<8x32xf32>
    %c80 = arith.constant 80 : index
    %c0_40 = arith.constant 0 : index
    %40 = tpu.strided_load %arg13[%c80, %c0_40] {strides = array<i32: 2, 1>} : memref<512x32xf32, #tpu.memory_space<vmem>>, vector<8x32xf32>
    %c81 = arith.constant 81 : index
    %c0_41 = arith.constant 0 : index
    %41 = tpu.strided_load %arg13[%c81, %c0_41] {strides = array<i32: 2, 1>} : memref<512x32xf32, #tpu.memory_space<vmem>>, vector<8x32xf32>
    %42 = arith.maximumf %40, %41 : vector<8x32xf32>
    %43 = arith.maximumf %39, %42 : vector<8x32xf32>
    %c0_42 = arith.constant 0 : index
    %c3 = arith.constant 3 : index
    %c1_43 = arith.constant 1 : index
    %c0_44 = arith.constant 0 : index
    %44 = vector.load %arg14[%c0_42, %c3, %c1_43, %c0_44] : memref<2x10x10x32xf32, #tpu.memory_space<vmem>>, vector<1x1x8x32xf32>
    %45 = vector.shape_cast %44 : vector<1x1x8x32xf32> to vector<8x32xf32>
    %46 = vector.shape_cast %43 : vector<8x32xf32> to vector<1x1x8x32xf32>
    tpu.vector_store %arg14[%c0_42, %c3, %c1_43, %c0_44], %46 {strides = array<i32>} : memref<2x10x10x32xf32, #tpu.memory_space<vmem>>, vector<1x1x8x32xf32>,
    %c96 = arith.constant 96 : index
    %c0_45 = arith.constant 0 : index
    %47 = tpu.strided_load %arg13[%c96, %c0_45] {strides = array<i32: 2, 1>} : memref<512x32xf32, #tpu.memory_space<vmem>>, vector<8x32xf32>
    %c97 = arith.constant 97 : index
    %c0_46 = arith.constant 0 : index
    %48 = tpu.strided_load %arg13[%c97, %c0_46] {strides = array<i32: 2, 1>} : memref<512x32xf32, #tpu.memory_space<vmem>>, vector<8x32xf32>
    %49 = arith.maximumf %47, %48 : vector<8x32xf32>
    %c112 = arith.constant 112 : index
    %c0_47 = arith.constant 0 : index
    %50 = tpu.strided_load %arg13[%c112, %c0_47] {strides = array<i32: 2, 1>} : memref<512x32xf32, #tpu.memory_space<vmem>>, vector<8x32xf32>
    %c113 = arith.constant 113 : index
    %c0_48 = arith.constant 0 : index
    %51 = tpu.strided_load %arg13[%c113, %c0_48] {strides = array<i32: 2, 1>} : memref<512x32xf32, #tpu.memory_space<vmem>>, vector<8x32xf32>
    %52 = arith.maximumf %50, %51 : vector<8x32xf32>
    %53 = arith.maximumf %49, %52 : vector<8x32xf32>
    %c0_49 = arith.constant 0 : index
    %c4 = arith.constant 4 : index
    %c1_50 = arith.constant 1 : index
    %c0_51 = arith.constant 0 : index
    %54 = vector.load %arg14[%c0_49, %c4, %c1_50, %c0_51] : memref<2x10x10x32xf32, #tpu.memory_space<vmem>>, vector<1x1x8x32xf32>
    %55 = vector.shape_cast %54 : vector<1x1x8x32xf32> to vector<8x32xf32>
    %56 = vector.shape_cast %53 : vector<8x32xf32> to vector<1x1x8x32xf32>
    tpu.vector_store %arg14[%c0_49, %c4, %c1_50, %c0_51], %56 {strides = array<i32>} : memref<2x10x10x32xf32, #tpu.memory_space<vmem>>, vector<1x1x8x32xf32>,
    %c128 = arith.constant 128 : index
    %c0_52 = arith.constant 0 : index
    %57 = tpu.strided_load %arg13[%c128, %c0_52] {strides = array<i32: 2, 1>} : memref<512x32xf32, #tpu.memory_space<vmem>>, vector<8x32xf32>
    %c129 = arith.constant 129 : index
    %c0_53 = arith.constant 0 : index
    %58 = tpu.strided_load %arg13[%c129, %c0_53] {strides = array<i32: 2, 1>} : memref<512x32xf32, #tpu.memory_space<vmem>>, vector<8x32xf32>
    %59 = arith.maximumf %57, %58 : vector<8x32xf32>
    %c144 = arith.constant 144 : index
    %c0_54 = arith.constant 0 : index
    %60 = tpu.strided_load %arg13[%c144, %c0_54] {strides = array<i32: 2, 1>} : memref<512x32xf32, #tpu.memory_space<vmem>>, vector<8x32xf32>
    %c145 = arith.constant 145 : index
    %c0_55 = arith.constant 0 : index
    %61 = tpu.strided_load %arg13[%c145, %c0_55] {strides = array<i32: 2, 1>} : memref<512x32xf32, #tpu.memory_space<vmem>>, vector<8x32xf32>
    %62 = arith.maximumf %60, %61 : vector<8x32xf32>
    %63 = arith.maximumf %59, %62 : vector<8x32xf32>
    %c0_56 = arith.constant 0 : index
    %c5 = arith.constant 5 : index
    %c1_57 = arith.constant 1 : index
    %c0_58 = arith.constant 0 : index
    %64 = vector.load %arg14[%c0_56, %c5, %c1_57, %c0_58] : memref<2x10x10x32xf32, #tpu.memory_space<vmem>>, vector<1x1x8x32xf32>
    %65 = vector.shape_cast %64 : vector<1x1x8x32xf32> to vector<8x32xf32>
    %66 = vector.shape_cast %63 : vector<8x32xf32> to vector<1x1x8x32xf32>
    tpu.vector_store %arg14[%c0_56, %c5, %c1_57, %c0_58], %66 {strides = array<i32>} : memref<2x10x10x32xf32, #tpu.memory_space<vmem>>, vector<1x1x8x32xf32>,
    %c160 = arith.constant 160 : index
    %c0_59 = arith.constant 0 : index
    %67 = tpu.strided_load %arg13[%c160, %c0_59] {strides = array<i32: 2, 1>} : memref<512x32xf32, #tpu.memory_space<vmem>>, vector<8x32xf32>
    %c161 = arith.constant 161 : index
    %c0_60 = arith.constant 0 : index
    %68 = tpu.strided_load %arg13[%c161, %c0_60] {strides = array<i32: 2, 1>} : memref<512x32xf32, #tpu.memory_space<vmem>>, vector<8x32xf32>
    %69 = arith.maximumf %67, %68 : vector<8x32xf32>
    %c176 = arith.constant 176 : index
    %c0_61 = arith.constant 0 : index
    %70 = tpu.strided_load %arg13[%c176, %c0_61] {strides = array<i32: 2, 1>} : memref<512x32xf32, #tpu.memory_space<vmem>>, vector<8x32xf32>
    %c177 = arith.constant 177 : index
    %c0_62 = arith.constant 0 : index
    %71 = tpu.strided_load %arg13[%c177, %c0_62] {strides = array<i32: 2, 1>} : memref<512x32xf32, #tpu.memory_space<vmem>>, vector<8x32xf32>
    %72 = arith.maximumf %70, %71 : vector<8x32xf32>
    %73 = arith.maximumf %69, %72 : vector<8x32xf32>
    %c0_63 = arith.constant 0 : index
    %c6 = arith.constant 6 : index
    %c1_64 = arith.constant 1 : index
    %c0_65 = arith.constant 0 : index
    %74 = vector.load %arg14[%c0_63, %c6, %c1_64, %c0_65] : memref<2x10x10x32xf32, #tpu.memory_space<vmem>>, vector<1x1x8x32xf32>
    %75 = vector.shape_cast %74 : vector<1x1x8x32xf32> to vector<8x32xf32>
    %76 = vector.shape_cast %73 : vector<8x32xf32> to vector<1x1x8x32xf32>
    tpu.vector_store %arg14[%c0_63, %c6, %c1_64, %c0_65], %76 {strides = array<i32>} : memref<2x10x10x32xf32, #tpu.memory_space<vmem>>, vector<1x1x8x32xf32>,
    %c192 = arith.constant 192 : index
    %c0_66 = arith.constant 0 : index
    %77 = tpu.strided_load %arg13[%c192, %c0_66] {strides = array<i32: 2, 1>} : memref<512x32xf32, #tpu.memory_space<vmem>>, vector<8x32xf32>
    %c193 = arith.constant 193 : index
    %c0_67 = arith.constant 0 : index
    %78 = tpu.strided_load %arg13[%c193, %c0_67] {strides = array<i32: 2, 1>} : memref<512x32xf32, #tpu.memory_space<vmem>>, vector<8x32xf32>
    %79 = arith.maximumf %77, %78 : vector<8x32xf32>
    %c208 = arith.constant 208 : index
    %c0_68 = arith.constant 0 : index
    %80 = tpu.strided_load %arg13[%c208, %c0_68] {strides = array<i32: 2, 1>} : memref<512x32xf32, #tpu.memory_space<vmem>>, vector<8x32xf32>
    %c209 = arith.constant 209 : index
    %c0_69 = arith.constant 0 : index
    %81 = tpu.strided_load %arg13[%c209, %c0_69] {strides = array<i32: 2, 1>} : memref<512x32xf32, #tpu.memory_space<vmem>>, vector<8x32xf32>
    %82 = arith.maximumf %80, %81 : vector<8x32xf32>
    %83 = arith.maximumf %79, %82 : vector<8x32xf32>
    %c0_70 = arith.constant 0 : index
    %c7 = arith.constant 7 : index
    %c1_71 = arith.constant 1 : index
    %c0_72 = arith.constant 0 : index
    %84 = vector.load %arg14[%c0_70, %c7, %c1_71, %c0_72] : memref<2x10x10x32xf32, #tpu.memory_space<vmem>>, vector<1x1x8x32xf32>
    %85 = vector.shape_cast %84 : vector<1x1x8x32xf32> to vector<8x32xf32>
    %86 = vector.shape_cast %83 : vector<8x32xf32> to vector<1x1x8x32xf32>
    tpu.vector_store %arg14[%c0_70, %c7, %c1_71, %c0_72], %86 {strides = array<i32>} : memref<2x10x10x32xf32, #tpu.memory_space<vmem>>, vector<1x1x8x32xf32>,
    %c224 = arith.constant 224 : index
    %c0_73 = arith.constant 0 : index
    %87 = tpu.strided_load %arg13[%c224, %c0_73] {strides = array<i32: 2, 1>} : memref<512x32xf32, #tpu.memory_space<vmem>>, vector<8x32xf32>
    %c225 = arith.constant 225 : index
    %c0_74 = arith.constant 0 : index
    %88 = tpu.strided_load %arg13[%c225, %c0_74] {strides = array<i32: 2, 1>} : memref<512x32xf32, #tpu.memory_space<vmem>>, vector<8x32xf32>
    %89 = arith.maximumf %87, %88 : vector<8x32xf32>
    %c240 = arith.constant 240 : index
    %c0_75 = arith.constant 0 : index
    %90 = tpu.strided_load %arg13[%c240, %c0_75] {strides = array<i32: 2, 1>} : memref<512x32xf32, #tpu.memory_space<vmem>>, vector<8x32xf32>
    %c241 = arith.constant 241 : index
    %c0_76 = arith.constant 0 : index
    %91 = tpu.strided_load %arg13[%c241, %c0_76] {strides = array<i32: 2, 1>} : memref<512x32xf32, #tpu.memory_space<vmem>>, vector<8x32xf32>
    %92 = arith.maximumf %90, %91 : vector<8x32xf32>
    %93 = arith.maximumf %89, %92 : vector<8x32xf32>
    %c0_77 = arith.constant 0 : index
    %c8 = arith.constant 8 : index
    %c1_78 = arith.constant 1 : index
    %c0_79 = arith.constant 0 : index
    %94 = vector.load %arg14[%c0_77, %c8, %c1_78, %c0_79] : memref<2x10x10x32xf32, #tpu.memory_space<vmem>>, vector<1x1x8x32xf32>
    %95 = vector.shape_cast %94 : vector<1x1x8x32xf32> to vector<8x32xf32>
    %96 = vector.shape_cast %93 : vector<8x32xf32> to vector<1x1x8x32xf32>
    tpu.vector_store %arg14[%c0_77, %c8, %c1_78, %c0_79], %96 {strides = array<i32>} : memref<2x10x10x32xf32, #tpu.memory_space<vmem>>, vector<1x1x8x32xf32>,
    %c256 = arith.constant 256 : index
    %c0_80 = arith.constant 0 : index
    %97 = tpu.strided_load %arg13[%c256, %c0_80] {strides = array<i32: 2, 1>} : memref<512x32xf32, #tpu.memory_space<vmem>>, vector<8x32xf32>
    %c257 = arith.constant 257 : index
    %c0_81 = arith.constant 0 : index
    %98 = tpu.strided_load %arg13[%c257, %c0_81] {strides = array<i32: 2, 1>} : memref<512x32xf32, #tpu.memory_space<vmem>>, vector<8x32xf32>
    %99 = arith.maximumf %97, %98 : vector<8x32xf32>
    %c272 = arith.constant 272 : index
    %c0_82 = arith.constant 0 : index
    %100 = tpu.strided_load %arg13[%c272, %c0_82] {strides = array<i32: 2, 1>} : memref<512x32xf32, #tpu.memory_space<vmem>>, vector<8x32xf32>
    %c273 = arith.constant 273 : index
    %c0_83 = arith.constant 0 : index
    %101 = tpu.strided_load %arg13[%c273, %c0_83] {strides = array<i32: 2, 1>} : memref<512x32xf32, #tpu.memory_space<vmem>>, vector<8x32xf32>
    %102 = arith.maximumf %100, %101 : vector<8x32xf32>
    %103 = arith.maximumf %99, %102 : vector<8x32xf32>
    %c1_84 = arith.constant 1 : index
    %c1_85 = arith.constant 1 : index
    %c1_86 = arith.constant 1 : index
    %c0_87 = arith.constant 0 : index
    %104 = vector.load %arg14[%c1_84, %c1_85, %c1_86, %c0_87] : memref<2x10x10x32xf32, #tpu.memory_space<vmem>>, vector<1x1x8x32xf32>
    %105 = vector.shape_cast %104 : vector<1x1x8x32xf32> to vector<8x32xf32>
    %106 = vector.shape_cast %103 : vector<8x32xf32> to vector<1x1x8x32xf32>
    tpu.vector_store %arg14[%c1_84, %c1_85, %c1_86, %c0_87], %106 {strides = array<i32>} : memref<2x10x10x32xf32, #tpu.memory_space<vmem>>, vector<1x1x8x32xf32>,
    %c288_88 = arith.constant 288 : index
    %c0_89 = arith.constant 0 : index
    %107 = tpu.strided_load %arg13[%c288_88, %c0_89] {strides = array<i32: 2, 1>} : memref<512x32xf32, #tpu.memory_space<vmem>>, vector<8x32xf32>
    %c289 = arith.constant 289 : index
    %c0_90 = arith.constant 0 : index
    %108 = tpu.strided_load %arg13[%c289, %c0_90] {strides = array<i32: 2, 1>} : memref<512x32xf32, #tpu.memory_space<vmem>>, vector<8x32xf32>
    %109 = arith.maximumf %107, %108 : vector<8x32xf32>
    %c304 = arith.constant 304 : index
    %c0_91 = arith.constant 0 : index
    %110 = tpu.strided_load %arg13[%c304, %c0_91] {strides = array<i32: 2, 1>} : memref<512x32xf32, #tpu.memory_space<vmem>>, vector<8x32xf32>
    %c305 = arith.constant 305 : index
    %c0_92 = arith.constant 0 : index
    %111 = tpu.strided_load %arg13[%c305, %c0_92] {strides = array<i32: 2, 1>} : memref<512x32xf32, #tpu.memory_space<vmem>>, vector<8x32xf32>
    %112 = arith.maximumf %110, %111 : vector<8x32xf32>
    %113 = arith.maximumf %109, %112 : vector<8x32xf32>
    %c1_93 = arith.constant 1 : index
    %c2_94 = arith.constant 2 : index
    %c1_95 = arith.constant 1 : index
    %c0_96 = arith.constant 0 : index
    %114 = vector.load %arg14[%c1_93, %c2_94, %c1_95, %c0_96] : memref<2x10x10x32xf32, #tpu.memory_space<vmem>>, vector<1x1x8x32xf32>
    %115 = vector.shape_cast %114 : vector<1x1x8x32xf32> to vector<8x32xf32>
    %116 = vector.shape_cast %113 : vector<8x32xf32> to vector<1x1x8x32xf32>
    tpu.vector_store %arg14[%c1_93, %c2_94, %c1_95, %c0_96], %116 {strides = array<i32>} : memref<2x10x10x32xf32, #tpu.memory_space<vmem>>, vector<1x1x8x32xf32>,
    %c320 = arith.constant 320 : index
    %c0_97 = arith.constant 0 : index
    %117 = tpu.strided_load %arg13[%c320, %c0_97] {strides = array<i32: 2, 1>} : memref<512x32xf32, #tpu.memory_space<vmem>>, vector<8x32xf32>
    %c321 = arith.constant 321 : index
    %c0_98 = arith.constant 0 : index
    %118 = tpu.strided_load %arg13[%c321, %c0_98] {strides = array<i32: 2, 1>} : memref<512x32xf32, #tpu.memory_space<vmem>>, vector<8x32xf32>
    %119 = arith.maximumf %117, %118 : vector<8x32xf32>
    %c336 = arith.constant 336 : index
    %c0_99 = arith.constant 0 : index
    %120 = tpu.strided_load %arg13[%c336, %c0_99] {strides = array<i32: 2, 1>} : memref<512x32xf32, #tpu.memory_space<vmem>>, vector<8x32xf32>
    %c337 = arith.constant 337 : index
    %c0_100 = arith.constant 0 : index
    %121 = tpu.strided_load %arg13[%c337, %c0_100] {strides = array<i32: 2, 1>} : memref<512x32xf32, #tpu.memory_space<vmem>>, vector<8x32xf32>
    %122 = arith.maximumf %120, %121 : vector<8x32xf32>
    %123 = arith.maximumf %119, %122 : vector<8x32xf32>
    %c1_101 = arith.constant 1 : index
    %c3_102 = arith.constant 3 : index
    %c1_103 = arith.constant 1 : index
    %c0_104 = arith.constant 0 : index
    %124 = vector.load %arg14[%c1_101, %c3_102, %c1_103, %c0_104] : memref<2x10x10x32xf32, #tpu.memory_space<vmem>>, vector<1x1x8x32xf32>
    %125 = vector.shape_cast %124 : vector<1x1x8x32xf32> to vector<8x32xf32>
    %126 = vector.shape_cast %123 : vector<8x32xf32> to vector<1x1x8x32xf32>
    tpu.vector_store %arg14[%c1_101, %c3_102, %c1_103, %c0_104], %126 {strides = array<i32>} : memref<2x10x10x32xf32, #tpu.memory_space<vmem>>, vector<1x1x8x32xf32>,
    %c352 = arith.constant 352 : index
    %c0_105 = arith.constant 0 : index
    %127 = tpu.strided_load %arg13[%c352, %c0_105] {strides = array<i32: 2, 1>} : memref<512x32xf32, #tpu.memory_space<vmem>>, vector<8x32xf32>
    %c353 = arith.constant 353 : index
    %c0_106 = arith.constant 0 : index
    %128 = tpu.strided_load %arg13[%c353, %c0_106] {strides = array<i32: 2, 1>} : memref<512x32xf32, #tpu.memory_space<vmem>>, vector<8x32xf32>
    %129 = arith.maximumf %127, %128 : vector<8x32xf32>
    %c368 = arith.constant 368 : index
    %c0_107 = arith.constant 0 : index
    %130 = tpu.strided_load %arg13[%c368, %c0_107] {strides = array<i32: 2, 1>} : memref<512x32xf32, #tpu.memory_space<vmem>>, vector<8x32xf32>
    %c369 = arith.constant 369 : index
    %c0_108 = arith.constant 0 : index
    %131 = tpu.strided_load %arg13[%c369, %c0_108] {strides = array<i32: 2, 1>} : memref<512x32xf32, #tpu.memory_space<vmem>>, vector<8x32xf32>
    %132 = arith.maximumf %130, %131 : vector<8x32xf32>
    %133 = arith.maximumf %129, %132 : vector<8x32xf32>
    %c1_109 = arith.constant 1 : index
    %c4_110 = arith.constant 4 : index
    %c1_111 = arith.constant 1 : index
    %c0_112 = arith.constant 0 : index
    %134 = vector.load %arg14[%c1_109, %c4_110, %c1_111, %c0_112] : memref<2x10x10x32xf32, #tpu.memory_space<vmem>>, vector<1x1x8x32xf32>
    %135 = vector.shape_cast %134 : vector<1x1x8x32xf32> to vector<8x32xf32>
    %136 = vector.shape_cast %133 : vector<8x32xf32> to vector<1x1x8x32xf32>
    tpu.vector_store %arg14[%c1_109, %c4_110, %c1_111, %c0_112], %136 {strides = array<i32>} : memref<2x10x10x32xf32, #tpu.memory_space<vmem>>, vector<1x1x8x32xf32>,
    %c384 = arith.constant 384 : index
    %c0_113 = arith.constant 0 : index
    %137 = tpu.strided_load %arg13[%c384, %c0_113] {strides = array<i32: 2, 1>} : memref<512x32xf32, #tpu.memory_space<vmem>>, vector<8x32xf32>
    %c385 = arith.constant 385 : index
    %c0_114 = arith.constant 0 : index
    %138 = tpu.strided_load %arg13[%c385, %c0_114] {strides = array<i32: 2, 1>} : memref<512x32xf32, #tpu.memory_space<vmem>>, vector<8x32xf32>
    %139 = arith.maximumf %137, %138 : vector<8x32xf32>
    %c400 = arith.constant 400 : index
    %c0_115 = arith.constant 0 : index
    %140 = tpu.strided_load %arg13[%c400, %c0_115] {strides = array<i32: 2, 1>} : memref<512x32xf32, #tpu.memory_space<vmem>>, vector<8x32xf32>
    %c401 = arith.constant 401 : index
    %c0_116 = arith.constant 0 : index
    %141 = tpu.strided_load %arg13[%c401, %c0_116] {strides = array<i32: 2, 1>} : memref<512x32xf32, #tpu.memory_space<vmem>>, vector<8x32xf32>
    %142 = arith.maximumf %140, %141 : vector<8x32xf32>
    %143 = arith.maximumf %139, %142 : vector<8x32xf32>
    %c1_117 = arith.constant 1 : index
    %c5_118 = arith.constant 5 : index
    %c1_119 = arith.constant 1 : index
    %c0_120 = arith.constant 0 : index
    %144 = vector.load %arg14[%c1_117, %c5_118, %c1_119, %c0_120] : memref<2x10x10x32xf32, #tpu.memory_space<vmem>>, vector<1x1x8x32xf32>
    %145 = vector.shape_cast %144 : vector<1x1x8x32xf32> to vector<8x32xf32>
    %146 = vector.shape_cast %143 : vector<8x32xf32> to vector<1x1x8x32xf32>
    tpu.vector_store %arg14[%c1_117, %c5_118, %c1_119, %c0_120], %146 {strides = array<i32>} : memref<2x10x10x32xf32, #tpu.memory_space<vmem>>, vector<1x1x8x32xf32>,
    %c416 = arith.constant 416 : index
    %c0_121 = arith.constant 0 : index
    %147 = tpu.strided_load %arg13[%c416, %c0_121] {strides = array<i32: 2, 1>} : memref<512x32xf32, #tpu.memory_space<vmem>>, vector<8x32xf32>
    %c417 = arith.constant 417 : index
    %c0_122 = arith.constant 0 : index
    %148 = tpu.strided_load %arg13[%c417, %c0_122] {strides = array<i32: 2, 1>} : memref<512x32xf32, #tpu.memory_space<vmem>>, vector<8x32xf32>
    %149 = arith.maximumf %147, %148 : vector<8x32xf32>
    %c432 = arith.constant 432 : index
    %c0_123 = arith.constant 0 : index
    %150 = tpu.strided_load %arg13[%c432, %c0_123] {strides = array<i32: 2, 1>} : memref<512x32xf32, #tpu.memory_space<vmem>>, vector<8x32xf32>
    %c433 = arith.constant 433 : index
    %c0_124 = arith.constant 0 : index
    %151 = tpu.strided_load %arg13[%c433, %c0_124] {strides = array<i32: 2, 1>} : memref<512x32xf32, #tpu.memory_space<vmem>>, vector<8x32xf32>
    %152 = arith.maximumf %150, %151 : vector<8x32xf32>
    %153 = arith.maximumf %149, %152 : vector<8x32xf32>
    %c1_125 = arith.constant 1 : index
    %c6_126 = arith.constant 6 : index
    %c1_127 = arith.constant 1 : index
    %c0_128 = arith.constant 0 : index
    %154 = vector.load %arg14[%c1_125, %c6_126, %c1_127, %c0_128] : memref<2x10x10x32xf32, #tpu.memory_space<vmem>>, vector<1x1x8x32xf32>
    %155 = vector.shape_cast %154 : vector<1x1x8x32xf32> to vector<8x32xf32>
    %156 = vector.shape_cast %153 : vector<8x32xf32> to vector<1x1x8x32xf32>
    tpu.vector_store %arg14[%c1_125, %c6_126, %c1_127, %c0_128], %156 {strides = array<i32>} : memref<2x10x10x32xf32, #tpu.memory_space<vmem>>, vector<1x1x8x32xf32>,
    %c448 = arith.constant 448 : index
    %c0_129 = arith.constant 0 : index
    %157 = tpu.strided_load %arg13[%c448, %c0_129] {strides = array<i32: 2, 1>} : memref<512x32xf32, #tpu.memory_space<vmem>>, vector<8x32xf32>
    %c449 = arith.constant 449 : index
    %c0_130 = arith.constant 0 : index
    %158 = tpu.strided_load %arg13[%c449, %c0_130] {strides = array<i32: 2, 1>} : memref<512x32xf32, #tpu.memory_space<vmem>>, vector<8x32xf32>
    %159 = arith.maximumf %157, %158 : vector<8x32xf32>
    %c464 = arith.constant 464 : index
    %c0_131 = arith.constant 0 : index
    %160 = tpu.strided_load %arg13[%c464, %c0_131] {strides = array<i32: 2, 1>} : memref<512x32xf32, #tpu.memory_space<vmem>>, vector<8x32xf32>
    %c465 = arith.constant 465 : index
    %c0_132 = arith.constant 0 : index
    %161 = tpu.strided_load %arg13[%c465, %c0_132] {strides = array<i32: 2, 1>} : memref<512x32xf32, #tpu.memory_space<vmem>>, vector<8x32xf32>
    %162 = arith.maximumf %160, %161 : vector<8x32xf32>
    %163 = arith.maximumf %159, %162 : vector<8x32xf32>
    %c1_133 = arith.constant 1 : index
    %c7_134 = arith.constant 7 : index
    %c1_135 = arith.constant 1 : index
    %c0_136 = arith.constant 0 : index
    %164 = vector.load %arg14[%c1_133, %c7_134, %c1_135, %c0_136] : memref<2x10x10x32xf32, #tpu.memory_space<vmem>>, vector<1x1x8x32xf32>
    %165 = vector.shape_cast %164 : vector<1x1x8x32xf32> to vector<8x32xf32>
    %166 = vector.shape_cast %163 : vector<8x32xf32> to vector<1x1x8x32xf32>
    tpu.vector_store %arg14[%c1_133, %c7_134, %c1_135, %c0_136], %166 {strides = array<i32>} : memref<2x10x10x32xf32, #tpu.memory_space<vmem>>, vector<1x1x8x32xf32>,
    %c480 = arith.constant 480 : index
    %c0_137 = arith.constant 0 : index
    %167 = tpu.strided_load %arg13[%c480, %c0_137] {strides = array<i32: 2, 1>} : memref<512x32xf32, #tpu.memory_space<vmem>>, vector<8x32xf32>
    %c481 = arith.constant 481 : index
    %c0_138 = arith.constant 0 : index
    %168 = tpu.strided_load %arg13[%c481, %c0_138] {strides = array<i32: 2, 1>} : memref<512x32xf32, #tpu.memory_space<vmem>>, vector<8x32xf32>
    %169 = arith.maximumf %167, %168 : vector<8x32xf32>
    %c496 = arith.constant 496 : index
    %c0_139 = arith.constant 0 : index
    %170 = tpu.strided_load %arg13[%c496, %c0_139] {strides = array<i32: 2, 1>} : memref<512x32xf32, #tpu.memory_space<vmem>>, vector<8x32xf32>
    %c497 = arith.constant 497 : index
    %c0_140 = arith.constant 0 : index
    %171 = tpu.strided_load %arg13[%c497, %c0_140] {strides = array<i32: 2, 1>} : memref<512x32xf32, #tpu.memory_space<vmem>>, vector<8x32xf32>
    %172 = arith.maximumf %170, %171 : vector<8x32xf32>
    %173 = arith.maximumf %169, %172 : vector<8x32xf32>
    %c1_141 = arith.constant 1 : index
    %c8_142 = arith.constant 8 : index
    %c1_143 = arith.constant 1 : index
    %c0_144 = arith.constant 0 : index
    %174 = vector.load %arg14[%c1_141, %c8_142, %c1_143, %c0_144] : memref<2x10x10x32xf32, #tpu.memory_space<vmem>>, vector<1x1x8x32xf32>
    %175 = vector.shape_cast %174 : vector<1x1x8x32xf32> to vector<8x32xf32>
    %176 = vector.shape_cast %173 : vector<8x32xf32> to vector<1x1x8x32xf32>
    tpu.vector_store %arg14[%c1_141, %c8_142, %c1_143, %c0_144], %176 {strides = array<i32>} : memref<2x10x10x32xf32, #tpu.memory_space<vmem>>, vector<1x1x8x32xf32>,
    %c0_145 = arith.constant 0 : index
    %c0_146 = arith.constant 0 : index
    %c0_147 = arith.constant 0 : index
    %c0_148 = arith.constant 0 : index
    %177 = vector.load %arg14[%c0_145, %c0_146, %c0_147, %c0_148] : memref<2x10x10x32xf32, #tpu.memory_space<vmem>>, vector<1x1x8x32xf32>
    %178 = vector.shape_cast %177 : vector<1x1x8x32xf32> to vector<8x32xf32>
    %179 = arith.truncf %178 : vector<8x32xf32> to vector<8x32xbf16>
    %c0_149 = arith.constant 0 : index
    %c0_150 = arith.constant 0 : index
    %180 = vector.load %arg15[%c0_149, %c0_150] : memref<128x384xbf16, #tpu.memory_space<vmem>>, vector<8x32xbf16>
    tpu.vector_store %arg15[%c0_149, %c0_150], %179 {strides = array<i32>} : memref<128x384xbf16, #tpu.memory_space<vmem>>, vector<8x32xbf16>,
    %c0_151 = arith.constant 0 : index
    %c1_152 = arith.constant 1 : index
    %c0_153 = arith.constant 0 : index
    %c0_154 = arith.constant 0 : index
    %181 = vector.load %arg14[%c0_151, %c1_152, %c0_153, %c0_154] : memref<2x10x10x32xf32, #tpu.memory_space<vmem>>, vector<1x1x8x32xf32>
    %182 = vector.shape_cast %181 : vector<1x1x8x32xf32> to vector<8x32xf32>
    %183 = arith.truncf %182 : vector<8x32xf32> to vector<8x32xbf16>
    %c8_155 = arith.constant 8 : index
    %c0_156 = arith.constant 0 : index
    %184 = vector.load %arg15[%c8_155, %c0_156] : memref<128x384xbf16, #tpu.memory_space<vmem>>, vector<8x32xbf16>
    tpu.vector_store %arg15[%c8_155, %c0_156], %183 {strides = array<i32>} : memref<128x384xbf16, #tpu.memory_space<vmem>>, vector<8x32xbf16>,
    %c0_157 = arith.constant 0 : index
    %c2_158 = arith.constant 2 : index
    %c0_159 = arith.constant 0 : index
    %c0_160 = arith.constant 0 : index
    %185 = vector.load %arg14[%c0_157, %c2_158, %c0_159, %c0_160] : memref<2x10x10x32xf32, #tpu.memory_space<vmem>>, vector<1x1x8x32xf32>
    %186 = vector.shape_cast %185 : vector<1x1x8x32xf32> to vector<8x32xf32>
    %187 = arith.truncf %186 : vector<8x32xf32> to vector<8x32xbf16>
    %c16_161 = arith.constant 16 : index
    %c0_162 = arith.constant 0 : index
    %188 = vector.load %arg15[%c16_161, %c0_162] : memref<128x384xbf16, #tpu.memory_space<vmem>>, vector<8x32xbf16>
    tpu.vector_store %arg15[%c16_161, %c0_162], %187 {strides = array<i32>} : memref<128x384xbf16, #tpu.memory_space<vmem>>, vector<8x32xbf16>,
    %c0_163 = arith.constant 0 : index
    %c3_164 = arith.constant 3 : index
    %c0_165 = arith.constant 0 : index
    %c0_166 = arith.constant 0 : index
    %189 = vector.load %arg14[%c0_163, %c3_164, %c0_165, %c0_166] : memref<2x10x10x32xf32, #tpu.memory_space<vmem>>, vector<1x1x8x32xf32>
    %190 = vector.shape_cast %189 : vector<1x1x8x32xf32> to vector<8x32xf32>
    %191 = arith.truncf %190 : vector<8x32xf32> to vector<8x32xbf16>
    %c24 = arith.constant 24 : index
    %c0_167 = arith.constant 0 : index
    %192 = vector.load %arg15[%c24, %c0_167] : memref<128x384xbf16, #tpu.memory_space<vmem>>, vector<8x32xbf16>
    tpu.vector_store %arg15[%c24, %c0_167], %191 {strides = array<i32>} : memref<128x384xbf16, #tpu.memory_space<vmem>>, vector<8x32xbf16>,
    %c0_168 = arith.constant 0 : index
    %c4_169 = arith.constant 4 : index
    %c0_170 = arith.constant 0 : index
    %c0_171 = arith.constant 0 : index
    %193 = vector.load %arg14[%c0_168, %c4_169, %c0_170, %c0_171] : memref<2x10x10x32xf32, #tpu.memory_space<vmem>>, vector<1x1x8x32xf32>
    %194 = vector.shape_cast %193 : vector<1x1x8x32xf32> to vector<8x32xf32>
    %195 = arith.truncf %194 : vector<8x32xf32> to vector<8x32xbf16>
    %c32_172 = arith.constant 32 : index
    %c0_173 = arith.constant 0 : index
    %196 = vector.load %arg15[%c32_172, %c0_173] : memref<128x384xbf16, #tpu.memory_space<vmem>>, vector<8x32xbf16>
    tpu.vector_store %arg15[%c32_172, %c0_173], %195 {strides = array<i32>} : memref<128x384xbf16, #tpu.memory_space<vmem>>, vector<8x32xbf16>,
    %c0_174 = arith.constant 0 : index
    %c5_175 = arith.constant 5 : index
    %c0_176 = arith.constant 0 : index
    %c0_177 = arith.constant 0 : index
    %197 = vector.load %arg14[%c0_174, %c5_175, %c0_176, %c0_177] : memref<2x10x10x32xf32, #tpu.memory_space<vmem>>, vector<1x1x8x32xf32>
    %198 = vector.shape_cast %197 : vector<1x1x8x32xf32> to vector<8x32xf32>
    %199 = arith.truncf %198 : vector<8x32xf32> to vector<8x32xbf16>
    %c40 = arith.constant 40 : index
    %c0_178 = arith.constant 0 : index
    %200 = vector.load %arg15[%c40, %c0_178] : memref<128x384xbf16, #tpu.memory_space<vmem>>, vector<8x32xbf16>
    tpu.vector_store %arg15[%c40, %c0_178], %199 {strides = array<i32>} : memref<128x384xbf16, #tpu.memory_space<vmem>>, vector<8x32xbf16>,
    %c0_179 = arith.constant 0 : index
    %c6_180 = arith.constant 6 : index
    %c0_181 = arith.constant 0 : index
    %c0_182 = arith.constant 0 : index
    %201 = vector.load %arg14[%c0_179, %c6_180, %c0_181, %c0_182] : memref<2x10x10x32xf32, #tpu.memory_space<vmem>>, vector<1x1x8x32xf32>
    %202 = vector.shape_cast %201 : vector<1x1x8x32xf32> to vector<8x32xf32>
    %203 = arith.truncf %202 : vector<8x32xf32> to vector<8x32xbf16>
    %c48_183 = arith.constant 48 : index
    %c0_184 = arith.constant 0 : index
    %204 = vector.load %arg15[%c48_183, %c0_184] : memref<128x384xbf16, #tpu.memory_space<vmem>>, vector<8x32xbf16>
    tpu.vector_store %arg15[%c48_183, %c0_184], %203 {strides = array<i32>} : memref<128x384xbf16, #tpu.memory_space<vmem>>, vector<8x32xbf16>,
    %c0_185 = arith.constant 0 : index
    %c7_186 = arith.constant 7 : index
    %c0_187 = arith.constant 0 : index
    %c0_188 = arith.constant 0 : index
    %205 = vector.load %arg14[%c0_185, %c7_186, %c0_187, %c0_188] : memref<2x10x10x32xf32, #tpu.memory_space<vmem>>, vector<1x1x8x32xf32>
    %206 = vector.shape_cast %205 : vector<1x1x8x32xf32> to vector<8x32xf32>
    %207 = arith.truncf %206 : vector<8x32xf32> to vector<8x32xbf16>
    %c56 = arith.constant 56 : index
    %c0_189 = arith.constant 0 : index
    %208 = vector.load %arg15[%c56, %c0_189] : memref<128x384xbf16, #tpu.memory_space<vmem>>, vector<8x32xbf16>
    tpu.vector_store %arg15[%c56, %c0_189], %207 {strides = array<i32>} : memref<128x384xbf16, #tpu.memory_space<vmem>>, vector<8x32xbf16>,
    %c1_190 = arith.constant 1 : index
    %c0_191 = arith.constant 0 : index
    %c0_192 = arith.constant 0 : index
    %c0_193 = arith.constant 0 : index
    %209 = vector.load %arg14[%c1_190, %c0_191, %c0_192, %c0_193] : memref<2x10x10x32xf32, #tpu.memory_space<vmem>>, vector<1x1x8x32xf32>
    %210 = vector.shape_cast %209 : vector<1x1x8x32xf32> to vector<8x32xf32>
    %211 = arith.truncf %210 : vector<8x32xf32> to vector<8x32xbf16>
    %c64_194 = arith.constant 64 : index
    %c0_195 = arith.constant 0 : index
    %212 = vector.load %arg15[%c64_194, %c0_195] : memref<128x384xbf16, #tpu.memory_space<vmem>>, vector<8x32xbf16>
    tpu.vector_store %arg15[%c64_194, %c0_195], %211 {strides = array<i32>} : memref<128x384xbf16, #tpu.memory_space<vmem>>, vector<8x32xbf16>,
    %c1_196 = arith.constant 1 : index
    %c1_197 = arith.constant 1 : index
    %c0_198 = arith.constant 0 : index
    %c0_199 = arith.constant 0 : index
    %213 = vector.load %arg14[%c1_196, %c1_197, %c0_198, %c0_199] : memref<2x10x10x32xf32, #tpu.memory_space<vmem>>, vector<1x1x8x32xf32>
    %214 = vector.shape_cast %213 : vector<1x1x8x32xf32> to vector<8x32xf32>
    %215 = arith.truncf %214 : vector<8x32xf32> to vector<8x32xbf16>
    %c72 = arith.constant 72 : index
    %c0_200 = arith.constant 0 : index
    %216 = vector.load %arg15[%c72, %c0_200] : memref<128x384xbf16, #tpu.memory_space<vmem>>, vector<8x32xbf16>
    tpu.vector_store %arg15[%c72, %c0_200], %215 {strides = array<i32>} : memref<128x384xbf16, #tpu.memory_space<vmem>>, vector<8x32xbf16>,
    %c1_201 = arith.constant 1 : index
    %c2_202 = arith.constant 2 : index
    %c0_203 = arith.constant 0 : index
    %c0_204 = arith.constant 0 : index
    %217 = vector.load %arg14[%c1_201, %c2_202, %c0_203, %c0_204] : memref<2x10x10x32xf32, #tpu.memory_space<vmem>>, vector<1x1x8x32xf32>
    %218 = vector.shape_cast %217 : vector<1x1x8x32xf32> to vector<8x32xf32>
    %219 = arith.truncf %218 : vector<8x32xf32> to vector<8x32xbf16>
    %c80_205 = arith.constant 80 : index
    %c0_206 = arith.constant 0 : index
    %220 = vector.load %arg15[%c80_205, %c0_206] : memref<128x384xbf16, #tpu.memory_space<vmem>>, vector<8x32xbf16>
    tpu.vector_store %arg15[%c80_205, %c0_206], %219 {strides = array<i32>} : memref<128x384xbf16, #tpu.memory_space<vmem>>, vector<8x32xbf16>,
    %c1_207 = arith.constant 1 : index
    %c3_208 = arith.constant 3 : index
    %c0_209 = arith.constant 0 : index
    %c0_210 = arith.constant 0 : index
    %221 = vector.load %arg14[%c1_207, %c3_208, %c0_209, %c0_210] : memref<2x10x10x32xf32, #tpu.memory_space<vmem>>, vector<1x1x8x32xf32>
    %222 = vector.shape_cast %221 : vector<1x1x8x32xf32> to vector<8x32xf32>
    %223 = arith.truncf %222 : vector<8x32xf32> to vector<8x32xbf16>
    %c88 = arith.constant 88 : index
    %c0_211 = arith.constant 0 : index
    %224 = vector.load %arg15[%c88, %c0_211] : memref<128x384xbf16, #tpu.memory_space<vmem>>, vector<8x32xbf16>
    tpu.vector_store %arg15[%c88, %c0_211], %223 {strides = array<i32>} : memref<128x384xbf16, #tpu.memory_space<vmem>>, vector<8x32xbf16>,
    %c1_212 = arith.constant 1 : index
    %c4_213 = arith.constant 4 : index
    %c0_214 = arith.constant 0 : index
    %c0_215 = arith.constant 0 : index
    %225 = vector.load %arg14[%c1_212, %c4_213, %c0_214, %c0_215] : memref<2x10x10x32xf32, #tpu.memory_space<vmem>>, vector<1x1x8x32xf32>
    %226 = vector.shape_cast %225 : vector<1x1x8x32xf32> to vector<8x32xf32>
    %227 = arith.truncf %226 : vector<8x32xf32> to vector<8x32xbf16>
    %c96_216 = arith.constant 96 : index
    %c0_217 = arith.constant 0 : index
    %228 = vector.load %arg15[%c96_216, %c0_217] : memref<128x384xbf16, #tpu.memory_space<vmem>>, vector<8x32xbf16>
    tpu.vector_store %arg15[%c96_216, %c0_217], %227 {strides = array<i32>} : memref<128x384xbf16, #tpu.memory_space<vmem>>, vector<8x32xbf16>,
    %c1_218 = arith.constant 1 : index
    %c5_219 = arith.constant 5 : index
    %c0_220 = arith.constant 0 : index
    %c0_221 = arith.constant 0 : index
    %229 = vector.load %arg14[%c1_218, %c5_219, %c0_220, %c0_221] : memref<2x10x10x32xf32, #tpu.memory_space<vmem>>, vector<1x1x8x32xf32>
    %230 = vector.shape_cast %229 : vector<1x1x8x32xf32> to vector<8x32xf32>
    %231 = arith.truncf %230 : vector<8x32xf32> to vector<8x32xbf16>
    %c104 = arith.constant 104 : index
    %c0_222 = arith.constant 0 : index
    %232 = vector.load %arg15[%c104, %c0_222] : memref<128x384xbf16, #tpu.memory_space<vmem>>, vector<8x32xbf16>
    tpu.vector_store %arg15[%c104, %c0_222], %231 {strides = array<i32>} : memref<128x384xbf16, #tpu.memory_space<vmem>>, vector<8x32xbf16>,
    %c1_223 = arith.constant 1 : index
    %c6_224 = arith.constant 6 : index
    %c0_225 = arith.constant 0 : index
    %c0_226 = arith.constant 0 : index
    %233 = vector.load %arg14[%c1_223, %c6_224, %c0_225, %c0_226] : memref<2x10x10x32xf32, #tpu.memory_space<vmem>>, vector<1x1x8x32xf32>
    %234 = vector.shape_cast %233 : vector<1x1x8x32xf32> to vector<8x32xf32>
    %235 = arith.truncf %234 : vector<8x32xf32> to vector<8x32xbf16>
    %c112_227 = arith.constant 112 : index
    %c0_228 = arith.constant 0 : index
    %236 = vector.load %arg15[%c112_227, %c0_228] : memref<128x384xbf16, #tpu.memory_space<vmem>>, vector<8x32xbf16>
    tpu.vector_store %arg15[%c112_227, %c0_228], %235 {strides = array<i32>} : memref<128x384xbf16, #tpu.memory_space<vmem>>, vector<8x32xbf16>,
    %c1_229 = arith.constant 1 : index
    %c7_230 = arith.constant 7 : index
    %c0_231 = arith.constant 0 : index
    %c0_232 = arith.constant 0 : index
    %237 = vector.load %arg14[%c1_229, %c7_230, %c0_231, %c0_232] : memref<2x10x10x32xf32, #tpu.memory_space<vmem>>, vector<1x1x8x32xf32>
    %238 = vector.shape_cast %237 : vector<1x1x8x32xf32> to vector<8x32xf32>
    %239 = arith.truncf %238 : vector<8x32xf32> to vector<8x32xbf16>
    %c120 = arith.constant 120 : index
    %c0_233 = arith.constant 0 : index
    %240 = vector.load %arg15[%c120, %c0_233] : memref<128x384xbf16, #tpu.memory_space<vmem>>, vector<8x32xbf16>
    tpu.vector_store %arg15[%c120, %c0_233], %239 {strides = array<i32>} : memref<128x384xbf16, #tpu.memory_space<vmem>>, vector<8x32xbf16>,
    %c0_234 = arith.constant 0 : index
    %c0_235 = arith.constant 0 : index
    %c1_236 = arith.constant 1 : index
    %c0_237 = arith.constant 0 : index
    %241 = vector.load %arg14[%c0_234, %c0_235, %c1_236, %c0_237] : memref<2x10x10x32xf32, #tpu.memory_space<vmem>>, vector<1x1x8x32xf32>
    %242 = vector.shape_cast %241 : vector<1x1x8x32xf32> to vector<8x32xf32>
    %243 = arith.truncf %242 : vector<8x32xf32> to vector<8x32xbf16>
    %c0_238 = arith.constant 0 : index
    %c32_239 = arith.constant 32 : index
    %244 = vector.load %arg15[%c0_238, %c32_239] : memref<128x384xbf16, #tpu.memory_space<vmem>>, vector<8x32xbf16>
    tpu.vector_store %arg15[%c0_238, %c32_239], %243 {strides = array<i32>} : memref<128x384xbf16, #tpu.memory_space<vmem>>, vector<8x32xbf16>,
    %c0_240 = arith.constant 0 : index
    %c1_241 = arith.constant 1 : index
    %c1_242 = arith.constant 1 : index
    %c0_243 = arith.constant 0 : index
    %245 = vector.load %arg14[%c0_240, %c1_241, %c1_242, %c0_243] : memref<2x10x10x32xf32, #tpu.memory_space<vmem>>, vector<1x1x8x32xf32>
    %246 = vector.shape_cast %245 : vector<1x1x8x32xf32> to vector<8x32xf32>
    %247 = arith.truncf %246 : vector<8x32xf32> to vector<8x32xbf16>
    %c8_244 = arith.constant 8 : index
    %c32_245 = arith.constant 32 : index
    %248 = vector.load %arg15[%c8_244, %c32_245] : memref<128x384xbf16, #tpu.memory_space<vmem>>, vector<8x32xbf16>
    tpu.vector_store %arg15[%c8_244, %c32_245], %247 {strides = array<i32>} : memref<128x384xbf16, #tpu.memory_space<vmem>>, vector<8x32xbf16>,
    %c0_246 = arith.constant 0 : index
    %c2_247 = arith.constant 2 : index
    %c1_248 = arith.constant 1 : index
    %c0_249 = arith.constant 0 : index
    %249 = vector.load %arg14[%c0_246, %c2_247, %c1_248, %c0_249] : memref<2x10x10x32xf32, #tpu.memory_space<vmem>>, vector<1x1x8x32xf32>
    %250 = vector.shape_cast %249 : vector<1x1x8x32xf32> to vector<8x32xf32>
    %251 = arith.truncf %250 : vector<8x32xf32> to vector<8x32xbf16>
    %c16_250 = arith.constant 16 : index
    %c32_251 = arith.constant 32 : index
    %252 = vector.load %arg15[%c16_250, %c32_251] : memref<128x384xbf16, #tpu.memory_space<vmem>>, vector<8x32xbf16>
    tpu.vector_store %arg15[%c16_250, %c32_251], %251 {strides = array<i32>} : memref<128x384xbf16, #tpu.memory_space<vmem>>, vector<8x32xbf16>,
    %c0_252 = arith.constant 0 : index
    %c3_253 = arith.constant 3 : index
    %c1_254 = arith.constant 1 : index
    %c0_255 = arith.constant 0 : index
    %253 = vector.load %arg14[%c0_252, %c3_253, %c1_254, %c0_255] : memref<2x10x10x32xf32, #tpu.memory_space<vmem>>, vector<1x1x8x32xf32>
    %254 = vector.shape_cast %253 : vector<1x1x8x32xf32> to vector<8x32xf32>
    %255 = arith.truncf %254 : vector<8x32xf32> to vector<8x32xbf16>
    %c24_256 = arith.constant 24 : index
    %c32_257 = arith.constant 32 : index
    %256 = vector.load %arg15[%c24_256, %c32_257] : memref<128x384xbf16, #tpu.memory_space<vmem>>, vector<8x32xbf16>
    tpu.vector_store %arg15[%c24_256, %c32_257], %255 {strides = array<i32>} : memref<128x384xbf16, #tpu.memory_space<vmem>>, vector<8x32xbf16>,
    %c0_258 = arith.constant 0 : index
    %c4_259 = arith.constant 4 : index
    %c1_260 = arith.constant 1 : index
    %c0_261 = arith.constant 0 : index
    %257 = vector.load %arg14[%c0_258, %c4_259, %c1_260, %c0_261] : memref<2x10x10x32xf32, #tpu.memory_space<vmem>>, vector<1x1x8x32xf32>
    %258 = vector.shape_cast %257 : vector<1x1x8x32xf32> to vector<8x32xf32>
    %259 = arith.truncf %258 : vector<8x32xf32> to vector<8x32xbf16>
    %c32_262 = arith.constant 32 : index
    %c32_263 = arith.constant 32 : index
    %260 = vector.load %arg15[%c32_262, %c32_263] : memref<128x384xbf16, #tpu.memory_space<vmem>>, vector<8x32xbf16>
    tpu.vector_store %arg15[%c32_262, %c32_263], %259 {strides = array<i32>} : memref<128x384xbf16, #tpu.memory_space<vmem>>, vector<8x32xbf16>,
    %c0_264 = arith.constant 0 : index
    %c5_265 = arith.constant 5 : index
    %c1_266 = arith.constant 1 : index
    %c0_267 = arith.constant 0 : index
    %261 = vector.load %arg14[%c0_264, %c5_265, %c1_266, %c0_267] : memref<2x10x10x32xf32, #tpu.memory_space<vmem>>, vector<1x1x8x32xf32>
    %262 = vector.shape_cast %261 : vector<1x1x8x32xf32> to vector<8x32xf32>
    %263 = arith.truncf %262 : vector<8x32xf32> to vector<8x32xbf16>
    %c40_268 = arith.constant 40 : index
    %c32_269 = arith.constant 32 : index
    %264 = vector.load %arg15[%c40_268, %c32_269] : memref<128x384xbf16, #tpu.memory_space<vmem>>, vector<8x32xbf16>
    tpu.vector_store %arg15[%c40_268, %c32_269], %263 {strides = array<i32>} : memref<128x384xbf16, #tpu.memory_space<vmem>>, vector<8x32xbf16>,
    %c0_270 = arith.constant 0 : index
    %c6_271 = arith.constant 6 : index
    %c1_272 = arith.constant 1 : index
    %c0_273 = arith.constant 0 : index
    %265 = vector.load %arg14[%c0_270, %c6_271, %c1_272, %c0_273] : memref<2x10x10x32xf32, #tpu.memory_space<vmem>>, vector<1x1x8x32xf32>
    %266 = vector.shape_cast %265 : vector<1x1x8x32xf32> to vector<8x32xf32>
    %267 = arith.truncf %266 : vector<8x32xf32> to vector<8x32xbf16>
    %c48_274 = arith.constant 48 : index
    %c32_275 = arith.constant 32 : index
    %268 = vector.load %arg15[%c48_274, %c32_275] : memref<128x384xbf16, #tpu.memory_space<vmem>>, vector<8x32xbf16>
    tpu.vector_store %arg15[%c48_274, %c32_275], %267 {strides = array<i32>} : memref<128x384xbf16, #tpu.memory_space<vmem>>, vector<8x32xbf16>,
    %c0_276 = arith.constant 0 : index
    %c7_277 = arith.constant 7 : index
    %c1_278 = arith.constant 1 : index
    %c0_279 = arith.constant 0 : index
    %269 = vector.load %arg14[%c0_276, %c7_277, %c1_278, %c0_279] : memref<2x10x10x32xf32, #tpu.memory_space<vmem>>, vector<1x1x8x32xf32>
    %270 = vector.shape_cast %269 : vector<1x1x8x32xf32> to vector<8x32xf32>
    %271 = arith.truncf %270 : vector<8x32xf32> to vector<8x32xbf16>
    %c56_280 = arith.constant 56 : index
    %c32_281 = arith.constant 32 : index
    %272 = vector.load %arg15[%c56_280, %c32_281] : memref<128x384xbf16, #tpu.memory_space<vmem>>, vector<8x32xbf16>
    tpu.vector_store %arg15[%c56_280, %c32_281], %271 {strides = array<i32>} : memref<128x384xbf16, #tpu.memory_space<vmem>>, vector<8x32xbf16>,
    %c1_282 = arith.constant 1 : index
    %c0_283 = arith.constant 0 : index
    %c1_284 = arith.constant 1 : index
    %c0_285 = arith.constant 0 : index
    %273 = vector.load %arg14[%c1_282, %c0_283, %c1_284, %c0_285] : memref<2x10x10x32xf32, #tpu.memory_space<vmem>>, vector<1x1x8x32xf32>
    %274 = vector.shape_cast %273 : vector<1x1x8x32xf32> to vector<8x32xf32>
    %275 = arith.truncf %274 : vector<8x32xf32> to vector<8x32xbf16>
    %c64_286 = arith.constant 64 : index
    %c32_287 = arith.constant 32 : index
    %276 = vector.load %arg15[%c64_286, %c32_287] : memref<128x384xbf16, #tpu.memory_space<vmem>>, vector<8x32xbf16>
    tpu.vector_store %arg15[%c64_286, %c32_287], %275 {strides = array<i32>} : memref<128x384xbf16, #tpu.memory_space<vmem>>, vector<8x32xbf16>,
    %c1_288 = arith.constant 1 : index
    %c1_289 = arith.constant 1 : index
    %c1_290 = arith.constant 1 : index
    %c0_291 = arith.constant 0 : index
    %277 = vector.load %arg14[%c1_288, %c1_289, %c1_290, %c0_291] : memref<2x10x10x32xf32, #tpu.memory_space<vmem>>, vector<1x1x8x32xf32>
    %278 = vector.shape_cast %277 : vector<1x1x8x32xf32> to vector<8x32xf32>
    %279 = arith.truncf %278 : vector<8x32xf32> to vector<8x32xbf16>
    %c72_292 = arith.constant 72 : index
    %c32_293 = arith.constant 32 : index
    %280 = vector.load %arg15[%c72_292, %c32_293] : memref<128x384xbf16, #tpu.memory_space<vmem>>, vector<8x32xbf16>
    tpu.vector_store %arg15[%c72_292, %c32_293], %279 {strides = array<i32>} : memref<128x384xbf16, #tpu.memory_space<vmem>>, vector<8x32xbf16>,
    %c1_294 = arith.constant 1 : index
    %c2_295 = arith.constant 2 : index
    %c1_296 = arith.constant 1 : index
    %c0_297 = arith.constant 0 : index
    %281 = vector.load %arg14[%c1_294, %c2_295, %c1_296, %c0_297] : memref<2x10x10x32xf32, #tpu.memory_space<vmem>>, vector<1x1x8x32xf32>
    %282 = vector.shape_cast %281 : vector<1x1x8x32xf32> to vector<8x32xf32>
    %283 = arith.truncf %282 : vector<8x32xf32> to vector<8x32xbf16>
    %c80_298 = arith.constant 80 : index
    %c32_299 = arith.constant 32 : index
    %284 = vector.load %arg15[%c80_298, %c32_299] : memref<128x384xbf16, #tpu.memory_space<vmem>>, vector<8x32xbf16>
    tpu.vector_store %arg15[%c80_298, %c32_299], %283 {strides = array<i32>} : memref<128x384xbf16, #tpu.memory_space<vmem>>, vector<8x32xbf16>,
    %c1_300 = arith.constant 1 : index
    %c3_301 = arith.constant 3 : index
    %c1_302 = arith.constant 1 : index
    %c0_303 = arith.constant 0 : index
    %285 = vector.load %arg14[%c1_300, %c3_301, %c1_302, %c0_303] : memref<2x10x10x32xf32, #tpu.memory_space<vmem>>, vector<1x1x8x32xf32>
    %286 = vector.shape_cast %285 : vector<1x1x8x32xf32> to vector<8x32xf32>
    %287 = arith.truncf %286 : vector<8x32xf32> to vector<8x32xbf16>
    %c88_304 = arith.constant 88 : index
    %c32_305 = arith.constant 32 : index
    %288 = vector.load %arg15[%c88_304, %c32_305] : memref<128x384xbf16, #tpu.memory_space<vmem>>, vector<8x32xbf16>
    tpu.vector_store %arg15[%c88_304, %c32_305], %287 {strides = array<i32>} : memref<128x384xbf16, #tpu.memory_space<vmem>>, vector<8x32xbf16>,
    %c1_306 = arith.constant 1 : index
    %c4_307 = arith.constant 4 : index
    %c1_308 = arith.constant 1 : index
    %c0_309 = arith.constant 0 : index
    %289 = vector.load %arg14[%c1_306, %c4_307, %c1_308, %c0_309] : memref<2x10x10x32xf32, #tpu.memory_space<vmem>>, vector<1x1x8x32xf32>
    %290 = vector.shape_cast %289 : vector<1x1x8x32xf32> to vector<8x32xf32>
    %291 = arith.truncf %290 : vector<8x32xf32> to vector<8x32xbf16>
    %c96_310 = arith.constant 96 : index
    %c32_311 = arith.constant 32 : index
    %292 = vector.load %arg15[%c96_310, %c32_311] : memref<128x384xbf16, #tpu.memory_space<vmem>>, vector<8x32xbf16>
    tpu.vector_store %arg15[%c96_310, %c32_311], %291 {strides = array<i32>} : memref<128x384xbf16, #tpu.memory_space<vmem>>, vector<8x32xbf16>,
    %c1_312 = arith.constant 1 : index
    %c5_313 = arith.constant 5 : index
    %c1_314 = arith.constant 1 : index
    %c0_315 = arith.constant 0 : index
    %293 = vector.load %arg14[%c1_312, %c5_313, %c1_314, %c0_315] : memref<2x10x10x32xf32, #tpu.memory_space<vmem>>, vector<1x1x8x32xf32>
    %294 = vector.shape_cast %293 : vector<1x1x8x32xf32> to vector<8x32xf32>
    %295 = arith.truncf %294 : vector<8x32xf32> to vector<8x32xbf16>
    %c104_316 = arith.constant 104 : index
    %c32_317 = arith.constant 32 : index
    %296 = vector.load %arg15[%c104_316, %c32_317] : memref<128x384xbf16, #tpu.memory_space<vmem>>, vector<8x32xbf16>
    tpu.vector_store %arg15[%c104_316, %c32_317], %295 {strides = array<i32>} : memref<128x384xbf16, #tpu.memory_space<vmem>>, vector<8x32xbf16>,
    %c1_318 = arith.constant 1 : index
    %c6_319 = arith.constant 6 : index
    %c1_320 = arith.constant 1 : index
    %c0_321 = arith.constant 0 : index
    %297 = vector.load %arg14[%c1_318, %c6_319, %c1_320, %c0_321] : memref<2x10x10x32xf32, #tpu.memory_space<vmem>>, vector<1x1x8x32xf32>
    %298 = vector.shape_cast %297 : vector<1x1x8x32xf32> to vector<8x32xf32>
    %299 = arith.truncf %298 : vector<8x32xf32> to vector<8x32xbf16>
    %c112_322 = arith.constant 112 : index
    %c32_323 = arith.constant 32 : index
    %300 = vector.load %arg15[%c112_322, %c32_323] : memref<128x384xbf16, #tpu.memory_space<vmem>>, vector<8x32xbf16>
    tpu.vector_store %arg15[%c112_322, %c32_323], %299 {strides = array<i32>} : memref<128x384xbf16, #tpu.memory_space<vmem>>, vector<8x32xbf16>,
    %c1_324 = arith.constant 1 : index
    %c7_325 = arith.constant 7 : index
    %c1_326 = arith.constant 1 : index
    %c0_327 = arith.constant 0 : index
    %301 = vector.load %arg14[%c1_324, %c7_325, %c1_326, %c0_327] : memref<2x10x10x32xf32, #tpu.memory_space<vmem>>, vector<1x1x8x32xf32>
    %302 = vector.shape_cast %301 : vector<1x1x8x32xf32> to vector<8x32xf32>
    %303 = arith.truncf %302 : vector<8x32xf32> to vector<8x32xbf16>
    %c120_328 = arith.constant 120 : index
    %c32_329 = arith.constant 32 : index
    %304 = vector.load %arg15[%c120_328, %c32_329] : memref<128x384xbf16, #tpu.memory_space<vmem>>, vector<8x32xbf16>
    tpu.vector_store %arg15[%c120_328, %c32_329], %303 {strides = array<i32>} : memref<128x384xbf16, #tpu.memory_space<vmem>>, vector<8x32xbf16>,
    %c0_330 = arith.constant 0 : index
    %c0_331 = arith.constant 0 : index
    %c2_332 = arith.constant 2 : index
    %c0_333 = arith.constant 0 : index
    %305 = vector.load %arg14[%c0_330, %c0_331, %c2_332, %c0_333] : memref<2x10x10x32xf32, #tpu.memory_space<vmem>>, vector<1x1x8x32xf32>
    %306 = vector.shape_cast %305 : vector<1x1x8x32xf32> to vector<8x32xf32>
    %307 = arith.truncf %306 : vector<8x32xf32> to vector<8x32xbf16>
    %c0_334 = arith.constant 0 : index
    %c64_335 = arith.constant 64 : index
    %308 = vector.load %arg15[%c0_334, %c64_335] : memref<128x384xbf16, #tpu.memory_space<vmem>>, vector<8x32xbf16>
    tpu.vector_store %arg15[%c0_334, %c64_335], %307 {strides = array<i32>} : memref<128x384xbf16, #tpu.memory_space<vmem>>, vector<8x32xbf16>,
    %c0_336 = arith.constant 0 : index
    %c1_337 = arith.constant 1 : index
    %c2_338 = arith.constant 2 : index
    %c0_339 = arith.constant 0 : index
    %309 = vector.load %arg14[%c0_336, %c1_337, %c2_338, %c0_339] : memref<2x10x10x32xf32, #tpu.memory_space<vmem>>, vector<1x1x8x32xf32>
    %310 = vector.shape_cast %309 : vector<1x1x8x32xf32> to vector<8x32xf32>
    %311 = arith.truncf %310 : vector<8x32xf32> to vector<8x32xbf16>
    %c8_340 = arith.constant 8 : index
    %c64_341 = arith.constant 64 : index
    %312 = vector.load %arg15[%c8_340, %c64_341] : memref<128x384xbf16, #tpu.memory_space<vmem>>, vector<8x32xbf16>
    tpu.vector_store %arg15[%c8_340, %c64_341], %311 {strides = array<i32>} : memref<128x384xbf16, #tpu.memory_space<vmem>>, vector<8x32xbf16>,
    %c0_342 = arith.constant 0 : index
    %c2_343 = arith.constant 2 : index
    %c2_344 = arith.constant 2 : index
    %c0_345 = arith.constant 0 : index
    %313 = vector.load %arg14[%c0_342, %c2_343, %c2_344, %c0_345] : memref<2x10x10x32xf32, #tpu.memory_space<vmem>>, vector<1x1x8x32xf32>
    %314 = vector.shape_cast %313 : vector<1x1x8x32xf32> to vector<8x32xf32>
    %315 = arith.truncf %314 : vector<8x32xf32> to vector<8x32xbf16>
    %c16_346 = arith.constant 16 : index
    %c64_347 = arith.constant 64 : index
    %316 = vector.load %arg15[%c16_346, %c64_347] : memref<128x384xbf16, #tpu.memory_space<vmem>>, vector<8x32xbf16>
    tpu.vector_store %arg15[%c16_346, %c64_347], %315 {strides = array<i32>} : memref<128x384xbf16, #tpu.memory_space<vmem>>, vector<8x32xbf16>,
    %c0_348 = arith.constant 0 : index
    %c3_349 = arith.constant 3 : index
    %c2_350 = arith.constant 2 : index
    %c0_351 = arith.constant 0 : index
    %317 = vector.load %arg14[%c0_348, %c3_349, %c2_350, %c0_351] : memref<2x10x10x32xf32, #tpu.memory_space<vmem>>, vector<1x1x8x32xf32>
    %318 = vector.shape_cast %317 : vector<1x1x8x32xf32> to vector<8x32xf32>
    %319 = arith.truncf %318 : vector<8x32xf32> to vector<8x32xbf16>
    %c24_352 = arith.constant 24 : index
    %c64_353 = arith.constant 64 : index
    %320 = vector.load %arg15[%c24_352, %c64_353] : memref<128x384xbf16, #tpu.memory_space<vmem>>, vector<8x32xbf16>
    tpu.vector_store %arg15[%c24_352, %c64_353], %319 {strides = array<i32>} : memref<128x384xbf16, #tpu.memory_space<vmem>>, vector<8x32xbf16>,
    %c0_354 = arith.constant 0 : index
    %c4_355 = arith.constant 4 : index
    %c2_356 = arith.constant 2 : index
    %c0_357 = arith.constant 0 : index
    %321 = vector.load %arg14[%c0_354, %c4_355, %c2_356, %c0_357] : memref<2x10x10x32xf32, #tpu.memory_space<vmem>>, vector<1x1x8x32xf32>
    %322 = vector.shape_cast %321 : vector<1x1x8x32xf32> to vector<8x32xf32>
    %323 = arith.truncf %322 : vector<8x32xf32> to vector<8x32xbf16>
    %c32_358 = arith.constant 32 : index
    %c64_359 = arith.constant 64 : index
    %324 = vector.load %arg15[%c32_358, %c64_359] : memref<128x384xbf16, #tpu.memory_space<vmem>>, vector<8x32xbf16>
    tpu.vector_store %arg15[%c32_358, %c64_359], %323 {strides = array<i32>} : memref<128x384xbf16, #tpu.memory_space<vmem>>, vector<8x32xbf16>,
    %c0_360 = arith.constant 0 : index
    %c5_361 = arith.constant 5 : index
    %c2_362 = arith.constant 2 : index
    %c0_363 = arith.constant 0 : index
    %325 = vector.load %arg14[%c0_360, %c5_361, %c2_362, %c0_363] : memref<2x10x10x32xf32, #tpu.memory_space<vmem>>, vector<1x1x8x32xf32>
    %326 = vector.shape_cast %325 : vector<1x1x8x32xf32> to vector<8x32xf32>
    %327 = arith.truncf %326 : vector<8x32xf32> to vector<8x32xbf16>
    %c40_364 = arith.constant 40 : index
    %c64_365 = arith.constant 64 : index
    %328 = vector.load %arg15[%c40_364, %c64_365] : memref<128x384xbf16, #tpu.memory_space<vmem>>, vector<8x32xbf16>
    tpu.vector_store %arg15[%c40_364, %c64_365], %327 {strides = array<i32>} : memref<128x384xbf16, #tpu.memory_space<vmem>>, vector<8x32xbf16>,
    %c0_366 = arith.constant 0 : index
    %c6_367 = arith.constant 6 : index
    %c2_368 = arith.constant 2 : index
    %c0_369 = arith.constant 0 : index
    %329 = vector.load %arg14[%c0_366, %c6_367, %c2_368, %c0_369] : memref<2x10x10x32xf32, #tpu.memory_space<vmem>>, vector<1x1x8x32xf32>
    %330 = vector.shape_cast %329 : vector<1x1x8x32xf32> to vector<8x32xf32>
    %331 = arith.truncf %330 : vector<8x32xf32> to vector<8x32xbf16>
    %c48_370 = arith.constant 48 : index
    %c64_371 = arith.constant 64 : index
    %332 = vector.load %arg15[%c48_370, %c64_371] : memref<128x384xbf16, #tpu.memory_space<vmem>>, vector<8x32xbf16>
    tpu.vector_store %arg15[%c48_370, %c64_371], %331 {strides = array<i32>} : memref<128x384xbf16, #tpu.memory_space<vmem>>, vector<8x32xbf16>,
    %c0_372 = arith.constant 0 : index
    %c7_373 = arith.constant 7 : index
    %c2_374 = arith.constant 2 : index
    %c0_375 = arith.constant 0 : index
    %333 = vector.load %arg14[%c0_372, %c7_373, %c2_374, %c0_375] : memref<2x10x10x32xf32, #tpu.memory_space<vmem>>, vector<1x1x8x32xf32>
    %334 = vector.shape_cast %333 : vector<1x1x8x32xf32> to vector<8x32xf32>
    %335 = arith.truncf %334 : vector<8x32xf32> to vector<8x32xbf16>
    %c56_376 = arith.constant 56 : index
    %c64_377 = arith.constant 64 : index
    %336 = vector.load %arg15[%c56_376, %c64_377] : memref<128x384xbf16, #tpu.memory_space<vmem>>, vector<8x32xbf16>
    tpu.vector_store %arg15[%c56_376, %c64_377], %335 {strides = array<i32>} : memref<128x384xbf16, #tpu.memory_space<vmem>>, vector<8x32xbf16>,
    %c1_378 = arith.constant 1 : index
    %c0_379 = arith.constant 0 : index
    %c2_380 = arith.constant 2 : index
    %c0_381 = arith.constant 0 : index
    %337 = vector.load %arg14[%c1_378, %c0_379, %c2_380, %c0_381] : memref<2x10x10x32xf32, #tpu.memory_space<vmem>>, vector<1x1x8x32xf32>
    %338 = vector.shape_cast %337 : vector<1x1x8x32xf32> to vector<8x32xf32>
    %339 = arith.truncf %338 : vector<8x32xf32> to vector<8x32xbf16>
    %c64_382 = arith.constant 64 : index
    %c64_383 = arith.constant 64 : index
    %340 = vector.load %arg15[%c64_382, %c64_383] : memref<128x384xbf16, #tpu.memory_space<vmem>>, vector<8x32xbf16>
    tpu.vector_store %arg15[%c64_382, %c64_383], %339 {strides = array<i32>} : memref<128x384xbf16, #tpu.memory_space<vmem>>, vector<8x32xbf16>,
    %c1_384 = arith.constant 1 : index
    %c1_385 = arith.constant 1 : index
    %c2_386 = arith.constant 2 : index
    %c0_387 = arith.constant 0 : index
    %341 = vector.load %arg14[%c1_384, %c1_385, %c2_386, %c0_387] : memref<2x10x10x32xf32, #tpu.memory_space<vmem>>, vector<1x1x8x32xf32>
    %342 = vector.shape_cast %341 : vector<1x1x8x32xf32> to vector<8x32xf32>
    %343 = arith.truncf %342 : vector<8x32xf32> to vector<8x32xbf16>
    %c72_388 = arith.constant 72 : index
    %c64_389 = arith.constant 64 : index
    %344 = vector.load %arg15[%c72_388, %c64_389] : memref<128x384xbf16, #tpu.memory_space<vmem>>, vector<8x32xbf16>
    tpu.vector_store %arg15[%c72_388, %c64_389], %343 {strides = array<i32>} : memref<128x384xbf16, #tpu.memory_space<vmem>>, vector<8x32xbf16>,
    %c1_390 = arith.constant 1 : index
    %c2_391 = arith.constant 2 : index
    %c2_392 = arith.constant 2 : index
    %c0_393 = arith.constant 0 : index
    %345 = vector.load %arg14[%c1_390, %c2_391, %c2_392, %c0_393] : memref<2x10x10x32xf32, #tpu.memory_space<vmem>>, vector<1x1x8x32xf32>
    %346 = vector.shape_cast %345 : vector<1x1x8x32xf32> to vector<8x32xf32>
    %347 = arith.truncf %346 : vector<8x32xf32> to vector<8x32xbf16>
    %c80_394 = arith.constant 80 : index
    %c64_395 = arith.constant 64 : index
    %348 = vector.load %arg15[%c80_394, %c64_395] : memref<128x384xbf16, #tpu.memory_space<vmem>>, vector<8x32xbf16>
    tpu.vector_store %arg15[%c80_394, %c64_395], %347 {strides = array<i32>} : memref<128x384xbf16, #tpu.memory_space<vmem>>, vector<8x32xbf16>,
    %c1_396 = arith.constant 1 : index
    %c3_397 = arith.constant 3 : index
    %c2_398 = arith.constant 2 : index
    %c0_399 = arith.constant 0 : index
    %349 = vector.load %arg14[%c1_396, %c3_397, %c2_398, %c0_399] : memref<2x10x10x32xf32, #tpu.memory_space<vmem>>, vector<1x1x8x32xf32>
    %350 = vector.shape_cast %349 : vector<1x1x8x32xf32> to vector<8x32xf32>
    %351 = arith.truncf %350 : vector<8x32xf32> to vector<8x32xbf16>
    %c88_400 = arith.constant 88 : index
    %c64_401 = arith.constant 64 : index
    %352 = vector.load %arg15[%c88_400, %c64_401] : memref<128x384xbf16, #tpu.memory_space<vmem>>, vector<8x32xbf16>
    tpu.vector_store %arg15[%c88_400, %c64_401], %351 {strides = array<i32>} : memref<128x384xbf16, #tpu.memory_space<vmem>>, vector<8x32xbf16>,
    %c1_402 = arith.constant 1 : index
    %c4_403 = arith.constant 4 : index
    %c2_404 = arith.constant 2 : index
    %c0_405 = arith.constant 0 : index
    %353 = vector.load %arg14[%c1_402, %c4_403, %c2_404, %c0_405] : memref<2x10x10x32xf32, #tpu.memory_space<vmem>>, vector<1x1x8x32xf32>
    %354 = vector.shape_cast %353 : vector<1x1x8x32xf32> to vector<8x32xf32>
    %355 = arith.truncf %354 : vector<8x32xf32> to vector<8x32xbf16>
    %c96_406 = arith.constant 96 : index
    %c64_407 = arith.constant 64 : index
    %356 = vector.load %arg15[%c96_406, %c64_407] : memref<128x384xbf16, #tpu.memory_space<vmem>>, vector<8x32xbf16>
    tpu.vector_store %arg15[%c96_406, %c64_407], %355 {strides = array<i32>} : memref<128x384xbf16, #tpu.memory_space<vmem>>, vector<8x32xbf16>,
    %c1_408 = arith.constant 1 : index
    %c5_409 = arith.constant 5 : index
    %c2_410 = arith.constant 2 : index
    %c0_411 = arith.constant 0 : index
    %357 = vector.load %arg14[%c1_408, %c5_409, %c2_410, %c0_411] : memref<2x10x10x32xf32, #tpu.memory_space<vmem>>, vector<1x1x8x32xf32>
    %358 = vector.shape_cast %357 : vector<1x1x8x32xf32> to vector<8x32xf32>
    %359 = arith.truncf %358 : vector<8x32xf32> to vector<8x32xbf16>
    %c104_412 = arith.constant 104 : index
    %c64_413 = arith.constant 64 : index
    %360 = vector.load %arg15[%c104_412, %c64_413] : memref<128x384xbf16, #tpu.memory_space<vmem>>, vector<8x32xbf16>
    tpu.vector_store %arg15[%c104_412, %c64_413], %359 {strides = array<i32>} : memref<128x384xbf16, #tpu.memory_space<vmem>>, vector<8x32xbf16>,
    %c1_414 = arith.constant 1 : index
    %c6_415 = arith.constant 6 : index
    %c2_416 = arith.constant 2 : index
    %c0_417 = arith.constant 0 : index
    %361 = vector.load %arg14[%c1_414, %c6_415, %c2_416, %c0_417] : memref<2x10x10x32xf32, #tpu.memory_space<vmem>>, vector<1x1x8x32xf32>
    %362 = vector.shape_cast %361 : vector<1x1x8x32xf32> to vector<8x32xf32>
    %363 = arith.truncf %362 : vector<8x32xf32> to vector<8x32xbf16>
    %c112_418 = arith.constant 112 : index
    %c64_419 = arith.constant 64 : index
    %364 = vector.load %arg15[%c112_418, %c64_419] : memref<128x384xbf16, #tpu.memory_space<vmem>>, vector<8x32xbf16>
    tpu.vector_store %arg15[%c112_418, %c64_419], %363 {strides = array<i32>} : memref<128x384xbf16, #tpu.memory_space<vmem>>, vector<8x32xbf16>,
    %c1_420 = arith.constant 1 : index
    %c7_421 = arith.constant 7 : index
    %c2_422 = arith.constant 2 : index
    %c0_423 = arith.constant 0 : index
    %365 = vector.load %arg14[%c1_420, %c7_421, %c2_422, %c0_423] : memref<2x10x10x32xf32, #tpu.memory_space<vmem>>, vector<1x1x8x32xf32>
    %366 = vector.shape_cast %365 : vector<1x1x8x32xf32> to vector<8x32xf32>
    %367 = arith.truncf %366 : vector<8x32xf32> to vector<8x32xbf16>
    %c120_424 = arith.constant 120 : index
    %c64_425 = arith.constant 64 : index
    %368 = vector.load %arg15[%c120_424, %c64_425] : memref<128x384xbf16, #tpu.memory_space<vmem>>, vector<8x32xbf16>
    tpu.vector_store %arg15[%c120_424, %c64_425], %367 {strides = array<i32>} : memref<128x384xbf16, #tpu.memory_space<vmem>>, vector<8x32xbf16>,
    %c0_426 = arith.constant 0 : index
    %c1_427 = arith.constant 1 : index
    %c0_428 = arith.constant 0 : index
    %c0_429 = arith.constant 0 : index
    %369 = vector.load %arg14[%c0_426, %c1_427, %c0_428, %c0_429] : memref<2x10x10x32xf32, #tpu.memory_space<vmem>>, vector<1x1x8x32xf32>
    %370 = vector.shape_cast %369 : vector<1x1x8x32xf32> to vector<8x32xf32>
    %371 = arith.truncf %370 : vector<8x32xf32> to vector<8x32xbf16>
    %c0_430 = arith.constant 0 : index
    %c96_431 = arith.constant 96 : index
    %372 = vector.load %arg15[%c0_430, %c96_431] : memref<128x384xbf16, #tpu.memory_space<vmem>>, vector<8x32xbf16>
    tpu.vector_store %arg15[%c0_430, %c96_431], %371 {strides = array<i32>} : memref<128x384xbf16, #tpu.memory_space<vmem>>, vector<8x32xbf16>,
    %c0_432 = arith.constant 0 : index
    %c2_433 = arith.constant 2 : index
    %c0_434 = arith.constant 0 : index
    %c0_435 = arith.constant 0 : index
    %373 = vector.load %arg14[%c0_432, %c2_433, %c0_434, %c0_435] : memref<2x10x10x32xf32, #tpu.memory_space<vmem>>, vector<1x1x8x32xf32>
    %374 = vector.shape_cast %373 : vector<1x1x8x32xf32> to vector<8x32xf32>
    %375 = arith.truncf %374 : vector<8x32xf32> to vector<8x32xbf16>
    %c8_436 = arith.constant 8 : index
    %c96_437 = arith.constant 96 : index
    %376 = vector.load %arg15[%c8_436, %c96_437] : memref<128x384xbf16, #tpu.memory_space<vmem>>, vector<8x32xbf16>
    tpu.vector_store %arg15[%c8_436, %c96_437], %375 {strides = array<i32>} : memref<128x384xbf16, #tpu.memory_space<vmem>>, vector<8x32xbf16>,
    %c0_438 = arith.constant 0 : index
    %c3_439 = arith.constant 3 : index
    %c0_440 = arith.constant 0 : index
    %c0_441 = arith.constant 0 : index
    %377 = vector.load %arg14[%c0_438, %c3_439, %c0_440, %c0_441] : memref<2x10x10x32xf32, #tpu.memory_space<vmem>>, vector<1x1x8x32xf32>
    %378 = vector.shape_cast %377 : vector<1x1x8x32xf32> to vector<8x32xf32>
    %379 = arith.truncf %378 : vector<8x32xf32> to vector<8x32xbf16>
    %c16_442 = arith.constant 16 : index
    %c96_443 = arith.constant 96 : index
    %380 = vector.load %arg15[%c16_442, %c96_443] : memref<128x384xbf16, #tpu.memory_space<vmem>>, vector<8x32xbf16>
    tpu.vector_store %arg15[%c16_442, %c96_443], %379 {strides = array<i32>} : memref<128x384xbf16, #tpu.memory_space<vmem>>, vector<8x32xbf16>,
    %c0_444 = arith.constant 0 : index
    %c4_445 = arith.constant 4 : index
    %c0_446 = arith.constant 0 : index
    %c0_447 = arith.constant 0 : index
    %381 = vector.load %arg14[%c0_444, %c4_445, %c0_446, %c0_447] : memref<2x10x10x32xf32, #tpu.memory_space<vmem>>, vector<1x1x8x32xf32>
    %382 = vector.shape_cast %381 : vector<1x1x8x32xf32> to vector<8x32xf32>
    %383 = arith.truncf %382 : vector<8x32xf32> to vector<8x32xbf16>
    %c24_448 = arith.constant 24 : index
    %c96_449 = arith.constant 96 : index
    %384 = vector.load %arg15[%c24_448, %c96_449] : memref<128x384xbf16, #tpu.memory_space<vmem>>, vector<8x32xbf16>
    tpu.vector_store %arg15[%c24_448, %c96_449], %383 {strides = array<i32>} : memref<128x384xbf16, #tpu.memory_space<vmem>>, vector<8x32xbf16>,
    %c0_450 = arith.constant 0 : index
    %c5_451 = arith.constant 5 : index
    %c0_452 = arith.constant 0 : index
    %c0_453 = arith.constant 0 : index
    %385 = vector.load %arg14[%c0_450, %c5_451, %c0_452, %c0_453] : memref<2x10x10x32xf32, #tpu.memory_space<vmem>>, vector<1x1x8x32xf32>
    %386 = vector.shape_cast %385 : vector<1x1x8x32xf32> to vector<8x32xf32>
    %387 = arith.truncf %386 : vector<8x32xf32> to vector<8x32xbf16>
    %c32_454 = arith.constant 32 : index
    %c96_455 = arith.constant 96 : index
    %388 = vector.load %arg15[%c32_454, %c96_455] : memref<128x384xbf16, #tpu.memory_space<vmem>>, vector<8x32xbf16>
    tpu.vector_store %arg15[%c32_454, %c96_455], %387 {strides = array<i32>} : memref<128x384xbf16, #tpu.memory_space<vmem>>, vector<8x32xbf16>,
    %c0_456 = arith.constant 0 : index
    %c6_457 = arith.constant 6 : index
    %c0_458 = arith.constant 0 : index
    %c0_459 = arith.constant 0 : index
    %389 = vector.load %arg14[%c0_456, %c6_457, %c0_458, %c0_459] : memref<2x10x10x32xf32, #tpu.memory_space<vmem>>, vector<1x1x8x32xf32>
    %390 = vector.shape_cast %389 : vector<1x1x8x32xf32> to vector<8x32xf32>
    %391 = arith.truncf %390 : vector<8x32xf32> to vector<8x32xbf16>
    %c40_460 = arith.constant 40 : index
    %c96_461 = arith.constant 96 : index
    %392 = vector.load %arg15[%c40_460, %c96_461] : memref<128x384xbf16, #tpu.memory_space<vmem>>, vector<8x32xbf16>
    tpu.vector_store %arg15[%c40_460, %c96_461], %391 {strides = array<i32>} : memref<128x384xbf16, #tpu.memory_space<vmem>>, vector<8x32xbf16>,
    %c0_462 = arith.constant 0 : index
    %c7_463 = arith.constant 7 : index
    %c0_464 = arith.constant 0 : index
    %c0_465 = arith.constant 0 : index
    %393 = vector.load %arg14[%c0_462, %c7_463, %c0_464, %c0_465] : memref<2x10x10x32xf32, #tpu.memory_space<vmem>>, vector<1x1x8x32xf32>
    %394 = vector.shape_cast %393 : vector<1x1x8x32xf32> to vector<8x32xf32>
    %395 = arith.truncf %394 : vector<8x32xf32> to vector<8x32xbf16>
    %c48_466 = arith.constant 48 : index
    %c96_467 = arith.constant 96 : index
    %396 = vector.load %arg15[%c48_466, %c96_467] : memref<128x384xbf16, #tpu.memory_space<vmem>>, vector<8x32xbf16>
    tpu.vector_store %arg15[%c48_466, %c96_467], %395 {strides = array<i32>} : memref<128x384xbf16, #tpu.memory_space<vmem>>, vector<8x32xbf16>,
    %c0_468 = arith.constant 0 : index
    %c8_469 = arith.constant 8 : index
    %c0_470 = arith.constant 0 : index
    %c0_471 = arith.constant 0 : index
    %397 = vector.load %arg14[%c0_468, %c8_469, %c0_470, %c0_471] : memref<2x10x10x32xf32, #tpu.memory_space<vmem>>, vector<1x1x8x32xf32>
    %398 = vector.shape_cast %397 : vector<1x1x8x32xf32> to vector<8x32xf32>
    %399 = arith.truncf %398 : vector<8x32xf32> to vector<8x32xbf16>
    %c56_472 = arith.constant 56 : index
    %c96_473 = arith.constant 96 : index
    %400 = vector.load %arg15[%c56_472, %c96_473] : memref<128x384xbf16, #tpu.memory_space<vmem>>, vector<8x32xbf16>
    tpu.vector_store %arg15[%c56_472, %c96_473], %399 {strides = array<i32>} : memref<128x384xbf16, #tpu.memory_space<vmem>>, vector<8x32xbf16>,
    %c1_474 = arith.constant 1 : index
    %c1_475 = arith.constant 1 : index
    %c0_476 = arith.constant 0 : index
    %c0_477 = arith.constant 0 : index
    %401 = vector.load %arg14[%c1_474, %c1_475, %c0_476, %c0_477] : memref<2x10x10x32xf32, #tpu.memory_space<vmem>>, vector<1x1x8x32xf32>
    %402 = vector.shape_cast %401 : vector<1x1x8x32xf32> to vector<8x32xf32>
    %403 = arith.truncf %402 : vector<8x32xf32> to vector<8x32xbf16>
    %c64_478 = arith.constant 64 : index
    %c96_479 = arith.constant 96 : index
    %404 = vector.load %arg15[%c64_478, %c96_479] : memref<128x384xbf16, #tpu.memory_space<vmem>>, vector<8x32xbf16>
    tpu.vector_store %arg15[%c64_478, %c96_479], %403 {strides = array<i32>} : memref<128x384xbf16, #tpu.memory_space<vmem>>, vector<8x32xbf16>,
    %c1_480 = arith.constant 1 : index
    %c2_481 = arith.constant 2 : index
    %c0_482 = arith.constant 0 : index
    %c0_483 = arith.constant 0 : index
    %405 = vector.load %arg14[%c1_480, %c2_481, %c0_482, %c0_483] : memref<2x10x10x32xf32, #tpu.memory_space<vmem>>, vector<1x1x8x32xf32>
    %406 = vector.shape_cast %405 : vector<1x1x8x32xf32> to vector<8x32xf32>
    %407 = arith.truncf %406 : vector<8x32xf32> to vector<8x32xbf16>
    %c72_484 = arith.constant 72 : index
    %c96_485 = arith.constant 96 : index
    %408 = vector.load %arg15[%c72_484, %c96_485] : memref<128x384xbf16, #tpu.memory_space<vmem>>, vector<8x32xbf16>
    tpu.vector_store %arg15[%c72_484, %c96_485], %407 {strides = array<i32>} : memref<128x384xbf16, #tpu.memory_space<vmem>>, vector<8x32xbf16>,
    %c1_486 = arith.constant 1 : index
    %c3_487 = arith.constant 3 : index
    %c0_488 = arith.constant 0 : index
    %c0_489 = arith.constant 0 : index
    %409 = vector.load %arg14[%c1_486, %c3_487, %c0_488, %c0_489] : memref<2x10x10x32xf32, #tpu.memory_space<vmem>>, vector<1x1x8x32xf32>
    %410 = vector.shape_cast %409 : vector<1x1x8x32xf32> to vector<8x32xf32>
    %411 = arith.truncf %410 : vector<8x32xf32> to vector<8x32xbf16>
    %c80_490 = arith.constant 80 : index
    %c96_491 = arith.constant 96 : index
    %412 = vector.load %arg15[%c80_490, %c96_491] : memref<128x384xbf16, #tpu.memory_space<vmem>>, vector<8x32xbf16>
    tpu.vector_store %arg15[%c80_490, %c96_491], %411 {strides = array<i32>} : memref<128x384xbf16, #tpu.memory_space<vmem>>, vector<8x32xbf16>,
    %c1_492 = arith.constant 1 : index
    %c4_493 = arith.constant 4 : index
    %c0_494 = arith.constant 0 : index
    %c0_495 = arith.constant 0 : index
    %413 = vector.load %arg14[%c1_492, %c4_493, %c0_494, %c0_495] : memref<2x10x10x32xf32, #tpu.memory_space<vmem>>, vector<1x1x8x32xf32>
    %414 = vector.shape_cast %413 : vector<1x1x8x32xf32> to vector<8x32xf32>
    %415 = arith.truncf %414 : vector<8x32xf32> to vector<8x32xbf16>
    %c88_496 = arith.constant 88 : index
    %c96_497 = arith.constant 96 : index
    %416 = vector.load %arg15[%c88_496, %c96_497] : memref<128x384xbf16, #tpu.memory_space<vmem>>, vector<8x32xbf16>
    tpu.vector_store %arg15[%c88_496, %c96_497], %415 {strides = array<i32>} : memref<128x384xbf16, #tpu.memory_space<vmem>>, vector<8x32xbf16>,
    %c1_498 = arith.constant 1 : index
    %c5_499 = arith.constant 5 : index
    %c0_500 = arith.constant 0 : index
    %c0_501 = arith.constant 0 : index
    %417 = vector.load %arg14[%c1_498, %c5_499, %c0_500, %c0_501] : memref<2x10x10x32xf32, #tpu.memory_space<vmem>>, vector<1x1x8x32xf32>
    %418 = vector.shape_cast %417 : vector<1x1x8x32xf32> to vector<8x32xf32>
    %419 = arith.truncf %418 : vector<8x32xf32> to vector<8x32xbf16>
    %c96_502 = arith.constant 96 : index
    %c96_503 = arith.constant 96 : index
    %420 = vector.load %arg15[%c96_502, %c96_503] : memref<128x384xbf16, #tpu.memory_space<vmem>>, vector<8x32xbf16>
    tpu.vector_store %arg15[%c96_502, %c96_503], %419 {strides = array<i32>} : memref<128x384xbf16, #tpu.memory_space<vmem>>, vector<8x32xbf16>,
    %c1_504 = arith.constant 1 : index
    %c6_505 = arith.constant 6 : index
    %c0_506 = arith.constant 0 : index
    %c0_507 = arith.constant 0 : index
    %421 = vector.load %arg14[%c1_504, %c6_505, %c0_506, %c0_507] : memref<2x10x10x32xf32, #tpu.memory_space<vmem>>, vector<1x1x8x32xf32>
    %422 = vector.shape_cast %421 : vector<1x1x8x32xf32> to vector<8x32xf32>
    %423 = arith.truncf %422 : vector<8x32xf32> to vector<8x32xbf16>
    %c104_508 = arith.constant 104 : index
    %c96_509 = arith.constant 96 : index
    %424 = vector.load %arg15[%c104_508, %c96_509] : memref<128x384xbf16, #tpu.memory_space<vmem>>, vector<8x32xbf16>
    tpu.vector_store %arg15[%c104_508, %c96_509], %423 {strides = array<i32>} : memref<128x384xbf16, #tpu.memory_space<vmem>>, vector<8x32xbf16>,
    %c1_510 = arith.constant 1 : index
    %c7_511 = arith.constant 7 : index
    %c0_512 = arith.constant 0 : index
    %c0_513 = arith.constant 0 : index
    %425 = vector.load %arg14[%c1_510, %c7_511, %c0_512, %c0_513] : memref<2x10x10x32xf32, #tpu.memory_space<vmem>>, vector<1x1x8x32xf32>
    %426 = vector.shape_cast %425 : vector<1x1x8x32xf32> to vector<8x32xf32>
    %427 = arith.truncf %426 : vector<8x32xf32> to vector<8x32xbf16>
    %c112_514 = arith.constant 112 : index
    %c96_515 = arith.constant 96 : index
    %428 = vector.load %arg15[%c112_514, %c96_515] : memref<128x384xbf16, #tpu.memory_space<vmem>>, vector<8x32xbf16>
    tpu.vector_store %arg15[%c112_514, %c96_515], %427 {strides = array<i32>} : memref<128x384xbf16, #tpu.memory_space<vmem>>, vector<8x32xbf16>,
    %c1_516 = arith.constant 1 : index
    %c8_517 = arith.constant 8 : index
    %c0_518 = arith.constant 0 : index
    %c0_519 = arith.constant 0 : index
    %429 = vector.load %arg14[%c1_516, %c8_517, %c0_518, %c0_519] : memref<2x10x10x32xf32, #tpu.memory_space<vmem>>, vector<1x1x8x32xf32>
    %430 = vector.shape_cast %429 : vector<1x1x8x32xf32> to vector<8x32xf32>
    %431 = arith.truncf %430 : vector<8x32xf32> to vector<8x32xbf16>
    %c120_520 = arith.constant 120 : index
    %c96_521 = arith.constant 96 : index
    %432 = vector.load %arg15[%c120_520, %c96_521] : memref<128x384xbf16, #tpu.memory_space<vmem>>, vector<8x32xbf16>
    tpu.vector_store %arg15[%c120_520, %c96_521], %431 {strides = array<i32>} : memref<128x384xbf16, #tpu.memory_space<vmem>>, vector<8x32xbf16>,
    %c0_522 = arith.constant 0 : index
    %c1_523 = arith.constant 1 : index
    %c1_524 = arith.constant 1 : index
    %c0_525 = arith.constant 0 : index
    %433 = vector.load %arg14[%c0_522, %c1_523, %c1_524, %c0_525] : memref<2x10x10x32xf32, #tpu.memory_space<vmem>>, vector<1x1x8x32xf32>
    %434 = vector.shape_cast %433 : vector<1x1x8x32xf32> to vector<8x32xf32>
    %435 = arith.truncf %434 : vector<8x32xf32> to vector<8x32xbf16>
    %c0_526 = arith.constant 0 : index
    %c128_527 = arith.constant 128 : index
    %436 = vector.load %arg15[%c0_526, %c128_527] : memref<128x384xbf16, #tpu.memory_space<vmem>>, vector<8x32xbf16>
    tpu.vector_store %arg15[%c0_526, %c128_527], %435 {strides = array<i32>} : memref<128x384xbf16, #tpu.memory_space<vmem>>, vector<8x32xbf16>,
    %c0_528 = arith.constant 0 : index
    %c2_529 = arith.constant 2 : index
    %c1_530 = arith.constant 1 : index
    %c0_531 = arith.constant 0 : index
    %437 = vector.load %arg14[%c0_528, %c2_529, %c1_530, %c0_531] : memref<2x10x10x32xf32, #tpu.memory_space<vmem>>, vector<1x1x8x32xf32>
    %438 = vector.shape_cast %437 : vector<1x1x8x32xf32> to vector<8x32xf32>
    %439 = arith.truncf %438 : vector<8x32xf32> to vector<8x32xbf16>
    %c8_532 = arith.constant 8 : index
    %c128_533 = arith.constant 128 : index
    %440 = vector.load %arg15[%c8_532, %c128_533] : memref<128x384xbf16, #tpu.memory_space<vmem>>, vector<8x32xbf16>
    tpu.vector_store %arg15[%c8_532, %c128_533], %439 {strides = array<i32>} : memref<128x384xbf16, #tpu.memory_space<vmem>>, vector<8x32xbf16>,
    %c0_534 = arith.constant 0 : index
    %c3_535 = arith.constant 3 : index
    %c1_536 = arith.constant 1 : index
    %c0_537 = arith.constant 0 : index
    %441 = vector.load %arg14[%c0_534, %c3_535, %c1_536, %c0_537] : memref<2x10x10x32xf32, #tpu.memory_space<vmem>>, vector<1x1x8x32xf32>
    %442 = vector.shape_cast %441 : vector<1x1x8x32xf32> to vector<8x32xf32>
    %443 = arith.truncf %442 : vector<8x32xf32> to vector<8x32xbf16>
    %c16_538 = arith.constant 16 : index
    %c128_539 = arith.constant 128 : index
    %444 = vector.load %arg15[%c16_538, %c128_539] : memref<128x384xbf16, #tpu.memory_space<vmem>>, vector<8x32xbf16>
    tpu.vector_store %arg15[%c16_538, %c128_539], %443 {strides = array<i32>} : memref<128x384xbf16, #tpu.memory_space<vmem>>, vector<8x32xbf16>,
    %c0_540 = arith.constant 0 : index
    %c4_541 = arith.constant 4 : index
    %c1_542 = arith.constant 1 : index
    %c0_543 = arith.constant 0 : index
    %445 = vector.load %arg14[%c0_540, %c4_541, %c1_542, %c0_543] : memref<2x10x10x32xf32, #tpu.memory_space<vmem>>, vector<1x1x8x32xf32>
    %446 = vector.shape_cast %445 : vector<1x1x8x32xf32> to vector<8x32xf32>
    %447 = arith.truncf %446 : vector<8x32xf32> to vector<8x32xbf16>
    %c24_544 = arith.constant 24 : index
    %c128_545 = arith.constant 128 : index
    %448 = vector.load %arg15[%c24_544, %c128_545] : memref<128x384xbf16, #tpu.memory_space<vmem>>, vector<8x32xbf16>
    tpu.vector_store %arg15[%c24_544, %c128_545], %447 {strides = array<i32>} : memref<128x384xbf16, #tpu.memory_space<vmem>>, vector<8x32xbf16>,
    %c0_546 = arith.constant 0 : index
    %c5_547 = arith.constant 5 : index
    %c1_548 = arith.constant 1 : index
    %c0_549 = arith.constant 0 : index
    %449 = vector.load %arg14[%c0_546, %c5_547, %c1_548, %c0_549] : memref<2x10x10x32xf32, #tpu.memory_space<vmem>>, vector<1x1x8x32xf32>
    %450 = vector.shape_cast %449 : vector<1x1x8x32xf32> to vector<8x32xf32>
    %451 = arith.truncf %450 : vector<8x32xf32> to vector<8x32xbf16>
    %c32_550 = arith.constant 32 : index
    %c128_551 = arith.constant 128 : index
    %452 = vector.load %arg15[%c32_550, %c128_551] : memref<128x384xbf16, #tpu.memory_space<vmem>>, vector<8x32xbf16>
    tpu.vector_store %arg15[%c32_550, %c128_551], %451 {strides = array<i32>} : memref<128x384xbf16, #tpu.memory_space<vmem>>, vector<8x32xbf16>,
    %c0_552 = arith.constant 0 : index
    %c6_553 = arith.constant 6 : index
    %c1_554 = arith.constant 1 : index
    %c0_555 = arith.constant 0 : index
    %453 = vector.load %arg14[%c0_552, %c6_553, %c1_554, %c0_555] : memref<2x10x10x32xf32, #tpu.memory_space<vmem>>, vector<1x1x8x32xf32>
    %454 = vector.shape_cast %453 : vector<1x1x8x32xf32> to vector<8x32xf32>
    %455 = arith.truncf %454 : vector<8x32xf32> to vector<8x32xbf16>
    %c40_556 = arith.constant 40 : index
    %c128_557 = arith.constant 128 : index
    %456 = vector.load %arg15[%c40_556, %c128_557] : memref<128x384xbf16, #tpu.memory_space<vmem>>, vector<8x32xbf16>
    tpu.vector_store %arg15[%c40_556, %c128_557], %455 {strides = array<i32>} : memref<128x384xbf16, #tpu.memory_space<vmem>>, vector<8x32xbf16>,
    %c0_558 = arith.constant 0 : index
    %c7_559 = arith.constant 7 : index
    %c1_560 = arith.constant 1 : index
    %c0_561 = arith.constant 0 : index
    %457 = vector.load %arg14[%c0_558, %c7_559, %c1_560, %c0_561] : memref<2x10x10x32xf32, #tpu.memory_space<vmem>>, vector<1x1x8x32xf32>
    %458 = vector.shape_cast %457 : vector<1x1x8x32xf32> to vector<8x32xf32>
    %459 = arith.truncf %458 : vector<8x32xf32> to vector<8x32xbf16>
    %c48_562 = arith.constant 48 : index
    %c128_563 = arith.constant 128 : index
    %460 = vector.load %arg15[%c48_562, %c128_563] : memref<128x384xbf16, #tpu.memory_space<vmem>>, vector<8x32xbf16>
    tpu.vector_store %arg15[%c48_562, %c128_563], %459 {strides = array<i32>} : memref<128x384xbf16, #tpu.memory_space<vmem>>, vector<8x32xbf16>,
    %c0_564 = arith.constant 0 : index
    %c8_565 = arith.constant 8 : index
    %c1_566 = arith.constant 1 : index
    %c0_567 = arith.constant 0 : index
    %461 = vector.load %arg14[%c0_564, %c8_565, %c1_566, %c0_567] : memref<2x10x10x32xf32, #tpu.memory_space<vmem>>, vector<1x1x8x32xf32>
    %462 = vector.shape_cast %461 : vector<1x1x8x32xf32> to vector<8x32xf32>
    %463 = arith.truncf %462 : vector<8x32xf32> to vector<8x32xbf16>
    %c56_568 = arith.constant 56 : index
    %c128_569 = arith.constant 128 : index
    %464 = vector.load %arg15[%c56_568, %c128_569] : memref<128x384xbf16, #tpu.memory_space<vmem>>, vector<8x32xbf16>
    tpu.vector_store %arg15[%c56_568, %c128_569], %463 {strides = array<i32>} : memref<128x384xbf16, #tpu.memory_space<vmem>>, vector<8x32xbf16>,
    %c1_570 = arith.constant 1 : index
    %c1_571 = arith.constant 1 : index
    %c1_572 = arith.constant 1 : index
    %c0_573 = arith.constant 0 : index
    %465 = vector.load %arg14[%c1_570, %c1_571, %c1_572, %c0_573] : memref<2x10x10x32xf32, #tpu.memory_space<vmem>>, vector<1x1x8x32xf32>
    %466 = vector.shape_cast %465 : vector<1x1x8x32xf32> to vector<8x32xf32>
    %467 = arith.truncf %466 : vector<8x32xf32> to vector<8x32xbf16>
    %c64_574 = arith.constant 64 : index
    %c128_575 = arith.constant 128 : index
    %468 = vector.load %arg15[%c64_574, %c128_575] : memref<128x384xbf16, #tpu.memory_space<vmem>>, vector<8x32xbf16>
    tpu.vector_store %arg15[%c64_574, %c128_575], %467 {strides = array<i32>} : memref<128x384xbf16, #tpu.memory_space<vmem>>, vector<8x32xbf16>,
    %c1_576 = arith.constant 1 : index
    %c2_577 = arith.constant 2 : index
    %c1_578 = arith.constant 1 : index
    %c0_579 = arith.constant 0 : index
    %469 = vector.load %arg14[%c1_576, %c2_577, %c1_578, %c0_579] : memref<2x10x10x32xf32, #tpu.memory_space<vmem>>, vector<1x1x8x32xf32>
    %470 = vector.shape_cast %469 : vector<1x1x8x32xf32> to vector<8x32xf32>
    %471 = arith.truncf %470 : vector<8x32xf32> to vector<8x32xbf16>
    %c72_580 = arith.constant 72 : index
    %c128_581 = arith.constant 128 : index
    %472 = vector.load %arg15[%c72_580, %c128_581] : memref<128x384xbf16, #tpu.memory_space<vmem>>, vector<8x32xbf16>
    tpu.vector_store %arg15[%c72_580, %c128_581], %471 {strides = array<i32>} : memref<128x384xbf16, #tpu.memory_space<vmem>>, vector<8x32xbf16>,
    %c1_582 = arith.constant 1 : index
    %c3_583 = arith.constant 3 : index
    %c1_584 = arith.constant 1 : index
    %c0_585 = arith.constant 0 : index
    %473 = vector.load %arg14[%c1_582, %c3_583, %c1_584, %c0_585] : memref<2x10x10x32xf32, #tpu.memory_space<vmem>>, vector<1x1x8x32xf32>
    %474 = vector.shape_cast %473 : vector<1x1x8x32xf32> to vector<8x32xf32>
    %475 = arith.truncf %474 : vector<8x32xf32> to vector<8x32xbf16>
    %c80_586 = arith.constant 80 : index
    %c128_587 = arith.constant 128 : index
    %476 = vector.load %arg15[%c80_586, %c128_587] : memref<128x384xbf16, #tpu.memory_space<vmem>>, vector<8x32xbf16>
    tpu.vector_store %arg15[%c80_586, %c128_587], %475 {strides = array<i32>} : memref<128x384xbf16, #tpu.memory_space<vmem>>, vector<8x32xbf16>,
    %c1_588 = arith.constant 1 : index
    %c4_589 = arith.constant 4 : index
    %c1_590 = arith.constant 1 : index
    %c0_591 = arith.constant 0 : index
    %477 = vector.load %arg14[%c1_588, %c4_589, %c1_590, %c0_591] : memref<2x10x10x32xf32, #tpu.memory_space<vmem>>, vector<1x1x8x32xf32>
    %478 = vector.shape_cast %477 : vector<1x1x8x32xf32> to vector<8x32xf32>
    %479 = arith.truncf %478 : vector<8x32xf32> to vector<8x32xbf16>
    %c88_592 = arith.constant 88 : index
    %c128_593 = arith.constant 128 : index
    %480 = vector.load %arg15[%c88_592, %c128_593] : memref<128x384xbf16, #tpu.memory_space<vmem>>, vector<8x32xbf16>
    tpu.vector_store %arg15[%c88_592, %c128_593], %479 {strides = array<i32>} : memref<128x384xbf16, #tpu.memory_space<vmem>>, vector<8x32xbf16>,
    %c1_594 = arith.constant 1 : index
    %c5_595 = arith.constant 5 : index
    %c1_596 = arith.constant 1 : index
    %c0_597 = arith.constant 0 : index
    %481 = vector.load %arg14[%c1_594, %c5_595, %c1_596, %c0_597] : memref<2x10x10x32xf32, #tpu.memory_space<vmem>>, vector<1x1x8x32xf32>
    %482 = vector.shape_cast %481 : vector<1x1x8x32xf32> to vector<8x32xf32>
    %483 = arith.truncf %482 : vector<8x32xf32> to vector<8x32xbf16>
    %c96_598 = arith.constant 96 : index
    %c128_599 = arith.constant 128 : index
    %484 = vector.load %arg15[%c96_598, %c128_599] : memref<128x384xbf16, #tpu.memory_space<vmem>>, vector<8x32xbf16>
    tpu.vector_store %arg15[%c96_598, %c128_599], %483 {strides = array<i32>} : memref<128x384xbf16, #tpu.memory_space<vmem>>, vector<8x32xbf16>,
    %c1_600 = arith.constant 1 : index
    %c6_601 = arith.constant 6 : index
    %c1_602 = arith.constant 1 : index
    %c0_603 = arith.constant 0 : index
    %485 = vector.load %arg14[%c1_600, %c6_601, %c1_602, %c0_603] : memref<2x10x10x32xf32, #tpu.memory_space<vmem>>, vector<1x1x8x32xf32>
    %486 = vector.shape_cast %485 : vector<1x1x8x32xf32> to vector<8x32xf32>
    %487 = arith.truncf %486 : vector<8x32xf32> to vector<8x32xbf16>
    %c104_604 = arith.constant 104 : index
    %c128_605 = arith.constant 128 : index
    %488 = vector.load %arg15[%c104_604, %c128_605] : memref<128x384xbf16, #tpu.memory_space<vmem>>, vector<8x32xbf16>
    tpu.vector_store %arg15[%c104_604, %c128_605], %487 {strides = array<i32>} : memref<128x384xbf16, #tpu.memory_space<vmem>>, vector<8x32xbf16>,
    %c1_606 = arith.constant 1 : index
    %c7_607 = arith.constant 7 : index
    %c1_608 = arith.constant 1 : index
    %c0_609 = arith.constant 0 : index
    %489 = vector.load %arg14[%c1_606, %c7_607, %c1_608, %c0_609] : memref<2x10x10x32xf32, #tpu.memory_space<vmem>>, vector<1x1x8x32xf32>
    %490 = vector.shape_cast %489 : vector<1x1x8x32xf32> to vector<8x32xf32>
    %491 = arith.truncf %490 : vector<8x32xf32> to vector<8x32xbf16>
    %c112_610 = arith.constant 112 : index
    %c128_611 = arith.constant 128 : index
    %492 = vector.load %arg15[%c112_610, %c128_611] : memref<128x384xbf16, #tpu.memory_space<vmem>>, vector<8x32xbf16>
    tpu.vector_store %arg15[%c112_610, %c128_611], %491 {strides = array<i32>} : memref<128x384xbf16, #tpu.memory_space<vmem>>, vector<8x32xbf16>,
    %c1_612 = arith.constant 1 : index
    %c8_613 = arith.constant 8 : index
    %c1_614 = arith.constant 1 : index
    %c0_615 = arith.constant 0 : index
    %493 = vector.load %arg14[%c1_612, %c8_613, %c1_614, %c0_615] : memref<2x10x10x32xf32, #tpu.memory_space<vmem>>, vector<1x1x8x32xf32>
    %494 = vector.shape_cast %493 : vector<1x1x8x32xf32> to vector<8x32xf32>
    %495 = arith.truncf %494 : vector<8x32xf32> to vector<8x32xbf16>
    %c120_616 = arith.constant 120 : index
    %c128_617 = arith.constant 128 : index
    %496 = vector.load %arg15[%c120_616, %c128_617] : memref<128x384xbf16, #tpu.memory_space<vmem>>, vector<8x32xbf16>
    tpu.vector_store %arg15[%c120_616, %c128_617], %495 {strides = array<i32>} : memref<128x384xbf16, #tpu.memory_space<vmem>>, vector<8x32xbf16>,
    %c0_618 = arith.constant 0 : index
    %c1_619 = arith.constant 1 : index
    %c2_620 = arith.constant 2 : index
    %c0_621 = arith.constant 0 : index
    %497 = vector.load %arg14[%c0_618, %c1_619, %c2_620, %c0_621] : memref<2x10x10x32xf32, #tpu.memory_space<vmem>>, vector<1x1x8x32xf32>
    %498 = vector.shape_cast %497 : vector<1x1x8x32xf32> to vector<8x32xf32>
    %499 = arith.truncf %498 : vector<8x32xf32> to vector<8x32xbf16>
    %c0_622 = arith.constant 0 : index
    %c160_623 = arith.constant 160 : index
    %500 = vector.load %arg15[%c0_622, %c160_623] : memref<128x384xbf16, #tpu.memory_space<vmem>>, vector<8x32xbf16>
    tpu.vector_store %arg15[%c0_622, %c160_623], %499 {strides = array<i32>} : memref<128x384xbf16, #tpu.memory_space<vmem>>, vector<8x32xbf16>,
    %c0_624 = arith.constant 0 : index
    %c2_625 = arith.constant 2 : index
    %c2_626 = arith.constant 2 : index
    %c0_627 = arith.constant 0 : index
    %501 = vector.load %arg14[%c0_624, %c2_625, %c2_626, %c0_627] : memref<2x10x10x32xf32, #tpu.memory_space<vmem>>, vector<1x1x8x32xf32>
    %502 = vector.shape_cast %501 : vector<1x1x8x32xf32> to vector<8x32xf32>
    %503 = arith.truncf %502 : vector<8x32xf32> to vector<8x32xbf16>
    %c8_628 = arith.constant 8 : index
    %c160_629 = arith.constant 160 : index
    %504 = vector.load %arg15[%c8_628, %c160_629] : memref<128x384xbf16, #tpu.memory_space<vmem>>, vector<8x32xbf16>
    tpu.vector_store %arg15[%c8_628, %c160_629], %503 {strides = array<i32>} : memref<128x384xbf16, #tpu.memory_space<vmem>>, vector<8x32xbf16>,
    %c0_630 = arith.constant 0 : index
    %c3_631 = arith.constant 3 : index
    %c2_632 = arith.constant 2 : index
    %c0_633 = arith.constant 0 : index
    %505 = vector.load %arg14[%c0_630, %c3_631, %c2_632, %c0_633] : memref<2x10x10x32xf32, #tpu.memory_space<vmem>>, vector<1x1x8x32xf32>
    %506 = vector.shape_cast %505 : vector<1x1x8x32xf32> to vector<8x32xf32>
    %507 = arith.truncf %506 : vector<8x32xf32> to vector<8x32xbf16>
    %c16_634 = arith.constant 16 : index
    %c160_635 = arith.constant 160 : index
    %508 = vector.load %arg15[%c16_634, %c160_635] : memref<128x384xbf16, #tpu.memory_space<vmem>>, vector<8x32xbf16>
    tpu.vector_store %arg15[%c16_634, %c160_635], %507 {strides = array<i32>} : memref<128x384xbf16, #tpu.memory_space<vmem>>, vector<8x32xbf16>,
    %c0_636 = arith.constant 0 : index
    %c4_637 = arith.constant 4 : index
    %c2_638 = arith.constant 2 : index
    %c0_639 = arith.constant 0 : index
    %509 = vector.load %arg14[%c0_636, %c4_637, %c2_638, %c0_639] : memref<2x10x10x32xf32, #tpu.memory_space<vmem>>, vector<1x1x8x32xf32>
    %510 = vector.shape_cast %509 : vector<1x1x8x32xf32> to vector<8x32xf32>
    %511 = arith.truncf %510 : vector<8x32xf32> to vector<8x32xbf16>
    %c24_640 = arith.constant 24 : index
    %c160_641 = arith.constant 160 : index
    %512 = vector.load %arg15[%c24_640, %c160_641] : memref<128x384xbf16, #tpu.memory_space<vmem>>, vector<8x32xbf16>
    tpu.vector_store %arg15[%c24_640, %c160_641], %511 {strides = array<i32>} : memref<128x384xbf16, #tpu.memory_space<vmem>>, vector<8x32xbf16>,
    %c0_642 = arith.constant 0 : index
    %c5_643 = arith.constant 5 : index
    %c2_644 = arith.constant 2 : index
    %c0_645 = arith.constant 0 : index
    %513 = vector.load %arg14[%c0_642, %c5_643, %c2_644, %c0_645] : memref<2x10x10x32xf32, #tpu.memory_space<vmem>>, vector<1x1x8x32xf32>
    %514 = vector.shape_cast %513 : vector<1x1x8x32xf32> to vector<8x32xf32>
    %515 = arith.truncf %514 : vector<8x32xf32> to vector<8x32xbf16>
    %c32_646 = arith.constant 32 : index
    %c160_647 = arith.constant 160 : index
    %516 = vector.load %arg15[%c32_646, %c160_647] : memref<128x384xbf16, #tpu.memory_space<vmem>>, vector<8x32xbf16>
    tpu.vector_store %arg15[%c32_646, %c160_647], %515 {strides = array<i32>} : memref<128x384xbf16, #tpu.memory_space<vmem>>, vector<8x32xbf16>,
    %c0_648 = arith.constant 0 : index
    %c6_649 = arith.constant 6 : index
    %c2_650 = arith.constant 2 : index
    %c0_651 = arith.constant 0 : index
    %517 = vector.load %arg14[%c0_648, %c6_649, %c2_650, %c0_651] : memref<2x10x10x32xf32, #tpu.memory_space<vmem>>, vector<1x1x8x32xf32>
    %518 = vector.shape_cast %517 : vector<1x1x8x32xf32> to vector<8x32xf32>
    %519 = arith.truncf %518 : vector<8x32xf32> to vector<8x32xbf16>
    %c40_652 = arith.constant 40 : index
    %c160_653 = arith.constant 160 : index
    %520 = vector.load %arg15[%c40_652, %c160_653] : memref<128x384xbf16, #tpu.memory_space<vmem>>, vector<8x32xbf16>
    tpu.vector_store %arg15[%c40_652, %c160_653], %519 {strides = array<i32>} : memref<128x384xbf16, #tpu.memory_space<vmem>>, vector<8x32xbf16>,
    %c0_654 = arith.constant 0 : index
    %c7_655 = arith.constant 7 : index
    %c2_656 = arith.constant 2 : index
    %c0_657 = arith.constant 0 : index
    %521 = vector.load %arg14[%c0_654, %c7_655, %c2_656, %c0_657] : memref<2x10x10x32xf32, #tpu.memory_space<vmem>>, vector<1x1x8x32xf32>
    %522 = vector.shape_cast %521 : vector<1x1x8x32xf32> to vector<8x32xf32>
    %523 = arith.truncf %522 : vector<8x32xf32> to vector<8x32xbf16>
    %c48_658 = arith.constant 48 : index
    %c160_659 = arith.constant 160 : index
    %524 = vector.load %arg15[%c48_658, %c160_659] : memref<128x384xbf16, #tpu.memory_space<vmem>>, vector<8x32xbf16>
    tpu.vector_store %arg15[%c48_658, %c160_659], %523 {strides = array<i32>} : memref<128x384xbf16, #tpu.memory_space<vmem>>, vector<8x32xbf16>,
    %c0_660 = arith.constant 0 : index
    %c8_661 = arith.constant 8 : index
    %c2_662 = arith.constant 2 : index
    %c0_663 = arith.constant 0 : index
    %525 = vector.load %arg14[%c0_660, %c8_661, %c2_662, %c0_663] : memref<2x10x10x32xf32, #tpu.memory_space<vmem>>, vector<1x1x8x32xf32>
    %526 = vector.shape_cast %525 : vector<1x1x8x32xf32> to vector<8x32xf32>
    %527 = arith.truncf %526 : vector<8x32xf32> to vector<8x32xbf16>
    %c56_664 = arith.constant 56 : index
    %c160_665 = arith.constant 160 : index
    %528 = vector.load %arg15[%c56_664, %c160_665] : memref<128x384xbf16, #tpu.memory_space<vmem>>, vector<8x32xbf16>
    tpu.vector_store %arg15[%c56_664, %c160_665], %527 {strides = array<i32>} : memref<128x384xbf16, #tpu.memory_space<vmem>>, vector<8x32xbf16>,
    %c1_666 = arith.constant 1 : index
    %c1_667 = arith.constant 1 : index
    %c2_668 = arith.constant 2 : index
    %c0_669 = arith.constant 0 : index
    %529 = vector.load %arg14[%c1_666, %c1_667, %c2_668, %c0_669] : memref<2x10x10x32xf32, #tpu.memory_space<vmem>>, vector<1x1x8x32xf32>
    %530 = vector.shape_cast %529 : vector<1x1x8x32xf32> to vector<8x32xf32>
    %531 = arith.truncf %530 : vector<8x32xf32> to vector<8x32xbf16>
    %c64_670 = arith.constant 64 : index
    %c160_671 = arith.constant 160 : index
    %532 = vector.load %arg15[%c64_670, %c160_671] : memref<128x384xbf16, #tpu.memory_space<vmem>>, vector<8x32xbf16>
    tpu.vector_store %arg15[%c64_670, %c160_671], %531 {strides = array<i32>} : memref<128x384xbf16, #tpu.memory_space<vmem>>, vector<8x32xbf16>,
    %c1_672 = arith.constant 1 : index
    %c2_673 = arith.constant 2 : index
    %c2_674 = arith.constant 2 : index
    %c0_675 = arith.constant 0 : index
    %533 = vector.load %arg14[%c1_672, %c2_673, %c2_674, %c0_675] : memref<2x10x10x32xf32, #tpu.memory_space<vmem>>, vector<1x1x8x32xf32>
    %534 = vector.shape_cast %533 : vector<1x1x8x32xf32> to vector<8x32xf32>
    %535 = arith.truncf %534 : vector<8x32xf32> to vector<8x32xbf16>
    %c72_676 = arith.constant 72 : index
    %c160_677 = arith.constant 160 : index
    %536 = vector.load %arg15[%c72_676, %c160_677] : memref<128x384xbf16, #tpu.memory_space<vmem>>, vector<8x32xbf16>
    tpu.vector_store %arg15[%c72_676, %c160_677], %535 {strides = array<i32>} : memref<128x384xbf16, #tpu.memory_space<vmem>>, vector<8x32xbf16>,
    %c1_678 = arith.constant 1 : index
    %c3_679 = arith.constant 3 : index
    %c2_680 = arith.constant 2 : index
    %c0_681 = arith.constant 0 : index
    %537 = vector.load %arg14[%c1_678, %c3_679, %c2_680, %c0_681] : memref<2x10x10x32xf32, #tpu.memory_space<vmem>>, vector<1x1x8x32xf32>
    %538 = vector.shape_cast %537 : vector<1x1x8x32xf32> to vector<8x32xf32>
    %539 = arith.truncf %538 : vector<8x32xf32> to vector<8x32xbf16>
    %c80_682 = arith.constant 80 : index
    %c160_683 = arith.constant 160 : index
    %540 = vector.load %arg15[%c80_682, %c160_683] : memref<128x384xbf16, #tpu.memory_space<vmem>>, vector<8x32xbf16>
    tpu.vector_store %arg15[%c80_682, %c160_683], %539 {strides = array<i32>} : memref<128x384xbf16, #tpu.memory_space<vmem>>, vector<8x32xbf16>,
    %c1_684 = arith.constant 1 : index
    %c4_685 = arith.constant 4 : index
    %c2_686 = arith.constant 2 : index
    %c0_687 = arith.constant 0 : index
    %541 = vector.load %arg14[%c1_684, %c4_685, %c2_686, %c0_687] : memref<2x10x10x32xf32, #tpu.memory_space<vmem>>, vector<1x1x8x32xf32>
    %542 = vector.shape_cast %541 : vector<1x1x8x32xf32> to vector<8x32xf32>
    %543 = arith.truncf %542 : vector<8x32xf32> to vector<8x32xbf16>
    %c88_688 = arith.constant 88 : index
    %c160_689 = arith.constant 160 : index
    %544 = vector.load %arg15[%c88_688, %c160_689] : memref<128x384xbf16, #tpu.memory_space<vmem>>, vector<8x32xbf16>
    tpu.vector_store %arg15[%c88_688, %c160_689], %543 {strides = array<i32>} : memref<128x384xbf16, #tpu.memory_space<vmem>>, vector<8x32xbf16>,
    %c1_690 = arith.constant 1 : index
    %c5_691 = arith.constant 5 : index
    %c2_692 = arith.constant 2 : index
    %c0_693 = arith.constant 0 : index
    %545 = vector.load %arg14[%c1_690, %c5_691, %c2_692, %c0_693] : memref<2x10x10x32xf32, #tpu.memory_space<vmem>>, vector<1x1x8x32xf32>
    %546 = vector.shape_cast %545 : vector<1x1x8x32xf32> to vector<8x32xf32>
    %547 = arith.truncf %546 : vector<8x32xf32> to vector<8x32xbf16>
    %c96_694 = arith.constant 96 : index
    %c160_695 = arith.constant 160 : index
    %548 = vector.load %arg15[%c96_694, %c160_695] : memref<128x384xbf16, #tpu.memory_space<vmem>>, vector<8x32xbf16>
    tpu.vector_store %arg15[%c96_694, %c160_695], %547 {strides = array<i32>} : memref<128x384xbf16, #tpu.memory_space<vmem>>, vector<8x32xbf16>,
    %c1_696 = arith.constant 1 : index
    %c6_697 = arith.constant 6 : index
    %c2_698 = arith.constant 2 : index
    %c0_699 = arith.constant 0 : index
    %549 = vector.load %arg14[%c1_696, %c6_697, %c2_698, %c0_699] : memref<2x10x10x32xf32, #tpu.memory_space<vmem>>, vector<1x1x8x32xf32>
    %550 = vector.shape_cast %549 : vector<1x1x8x32xf32> to vector<8x32xf32>
    %551 = arith.truncf %550 : vector<8x32xf32> to vector<8x32xbf16>
    %c104_700 = arith.constant 104 : index
    %c160_701 = arith.constant 160 : index
    %552 = vector.load %arg15[%c104_700, %c160_701] : memref<128x384xbf16, #tpu.memory_space<vmem>>, vector<8x32xbf16>
    tpu.vector_store %arg15[%c104_700, %c160_701], %551 {strides = array<i32>} : memref<128x384xbf16, #tpu.memory_space<vmem>>, vector<8x32xbf16>,
    %c1_702 = arith.constant 1 : index
    %c7_703 = arith.constant 7 : index
    %c2_704 = arith.constant 2 : index
    %c0_705 = arith.constant 0 : index
    %553 = vector.load %arg14[%c1_702, %c7_703, %c2_704, %c0_705] : memref<2x10x10x32xf32, #tpu.memory_space<vmem>>, vector<1x1x8x32xf32>
    %554 = vector.shape_cast %553 : vector<1x1x8x32xf32> to vector<8x32xf32>
    %555 = arith.truncf %554 : vector<8x32xf32> to vector<8x32xbf16>
    %c112_706 = arith.constant 112 : index
    %c160_707 = arith.constant 160 : index
    %556 = vector.load %arg15[%c112_706, %c160_707] : memref<128x384xbf16, #tpu.memory_space<vmem>>, vector<8x32xbf16>
    tpu.vector_store %arg15[%c112_706, %c160_707], %555 {strides = array<i32>} : memref<128x384xbf16, #tpu.memory_space<vmem>>, vector<8x32xbf16>,
    %c1_708 = arith.constant 1 : index
    %c8_709 = arith.constant 8 : index
    %c2_710 = arith.constant 2 : index
    %c0_711 = arith.constant 0 : index
    %557 = vector.load %arg14[%c1_708, %c8_709, %c2_710, %c0_711] : memref<2x10x10x32xf32, #tpu.memory_space<vmem>>, vector<1x1x8x32xf32>
    %558 = vector.shape_cast %557 : vector<1x1x8x32xf32> to vector<8x32xf32>
    %559 = arith.truncf %558 : vector<8x32xf32> to vector<8x32xbf16>
    %c120_712 = arith.constant 120 : index
    %c160_713 = arith.constant 160 : index
    %560 = vector.load %arg15[%c120_712, %c160_713] : memref<128x384xbf16, #tpu.memory_space<vmem>>, vector<8x32xbf16>
    tpu.vector_store %arg15[%c120_712, %c160_713], %559 {strides = array<i32>} : memref<128x384xbf16, #tpu.memory_space<vmem>>, vector<8x32xbf16>,
    %c0_714 = arith.constant 0 : index
    %c2_715 = arith.constant 2 : index
    %c0_716 = arith.constant 0 : index
    %c0_717 = arith.constant 0 : index
    %561 = vector.load %arg14[%c0_714, %c2_715, %c0_716, %c0_717] : memref<2x10x10x32xf32, #tpu.memory_space<vmem>>, vector<1x1x8x32xf32>
    %562 = vector.shape_cast %561 : vector<1x1x8x32xf32> to vector<8x32xf32>
    %563 = arith.truncf %562 : vector<8x32xf32> to vector<8x32xbf16>
    %c0_718 = arith.constant 0 : index
    %c192_719 = arith.constant 192 : index
    %564 = vector.load %arg15[%c0_718, %c192_719] : memref<128x384xbf16, #tpu.memory_space<vmem>>, vector<8x32xbf16>
    tpu.vector_store %arg15[%c0_718, %c192_719], %563 {strides = array<i32>} : memref<128x384xbf16, #tpu.memory_space<vmem>>, vector<8x32xbf16>,
    %c0_720 = arith.constant 0 : index
    %c3_721 = arith.constant 3 : index
    %c0_722 = arith.constant 0 : index
    %c0_723 = arith.constant 0 : index
    %565 = vector.load %arg14[%c0_720, %c3_721, %c0_722, %c0_723] : memref<2x10x10x32xf32, #tpu.memory_space<vmem>>, vector<1x1x8x32xf32>
    %566 = vector.shape_cast %565 : vector<1x1x8x32xf32> to vector<8x32xf32>
    %567 = arith.truncf %566 : vector<8x32xf32> to vector<8x32xbf16>
    %c8_724 = arith.constant 8 : index
    %c192_725 = arith.constant 192 : index
    %568 = vector.load %arg15[%c8_724, %c192_725] : memref<128x384xbf16, #tpu.memory_space<vmem>>, vector<8x32xbf16>
    tpu.vector_store %arg15[%c8_724, %c192_725], %567 {strides = array<i32>} : memref<128x384xbf16, #tpu.memory_space<vmem>>, vector<8x32xbf16>,
    %c0_726 = arith.constant 0 : index
    %c4_727 = arith.constant 4 : index
    %c0_728 = arith.constant 0 : index
    %c0_729 = arith.constant 0 : index
    %569 = vector.load %arg14[%c0_726, %c4_727, %c0_728, %c0_729] : memref<2x10x10x32xf32, #tpu.memory_space<vmem>>, vector<1x1x8x32xf32>
    %570 = vector.shape_cast %569 : vector<1x1x8x32xf32> to vector<8x32xf32>
    %571 = arith.truncf %570 : vector<8x32xf32> to vector<8x32xbf16>
    %c16_730 = arith.constant 16 : index
    %c192_731 = arith.constant 192 : index
    %572 = vector.load %arg15[%c16_730, %c192_731] : memref<128x384xbf16, #tpu.memory_space<vmem>>, vector<8x32xbf16>
    tpu.vector_store %arg15[%c16_730, %c192_731], %571 {strides = array<i32>} : memref<128x384xbf16, #tpu.memory_space<vmem>>, vector<8x32xbf16>,
    %c0_732 = arith.constant 0 : index
    %c5_733 = arith.constant 5 : index
    %c0_734 = arith.constant 0 : index
    %c0_735 = arith.constant 0 : index
    %573 = vector.load %arg14[%c0_732, %c5_733, %c0_734, %c0_735] : memref<2x10x10x32xf32, #tpu.memory_space<vmem>>, vector<1x1x8x32xf32>
    %574 = vector.shape_cast %573 : vector<1x1x8x32xf32> to vector<8x32xf32>
    %575 = arith.truncf %574 : vector<8x32xf32> to vector<8x32xbf16>
    %c24_736 = arith.constant 24 : index
    %c192_737 = arith.constant 192 : index
    %576 = vector.load %arg15[%c24_736, %c192_737] : memref<128x384xbf16, #tpu.memory_space<vmem>>, vector<8x32xbf16>
    tpu.vector_store %arg15[%c24_736, %c192_737], %575 {strides = array<i32>} : memref<128x384xbf16, #tpu.memory_space<vmem>>, vector<8x32xbf16>,
    %c0_738 = arith.constant 0 : index
    %c6_739 = arith.constant 6 : index
    %c0_740 = arith.constant 0 : index
    %c0_741 = arith.constant 0 : index
    %577 = vector.load %arg14[%c0_738, %c6_739, %c0_740, %c0_741] : memref<2x10x10x32xf32, #tpu.memory_space<vmem>>, vector<1x1x8x32xf32>
    %578 = vector.shape_cast %577 : vector<1x1x8x32xf32> to vector<8x32xf32>
    %579 = arith.truncf %578 : vector<8x32xf32> to vector<8x32xbf16>
    %c32_742 = arith.constant 32 : index
    %c192_743 = arith.constant 192 : index
    %580 = vector.load %arg15[%c32_742, %c192_743] : memref<128x384xbf16, #tpu.memory_space<vmem>>, vector<8x32xbf16>
    tpu.vector_store %arg15[%c32_742, %c192_743], %579 {strides = array<i32>} : memref<128x384xbf16, #tpu.memory_space<vmem>>, vector<8x32xbf16>,
    %c0_744 = arith.constant 0 : index
    %c7_745 = arith.constant 7 : index
    %c0_746 = arith.constant 0 : index
    %c0_747 = arith.constant 0 : index
    %581 = vector.load %arg14[%c0_744, %c7_745, %c0_746, %c0_747] : memref<2x10x10x32xf32, #tpu.memory_space<vmem>>, vector<1x1x8x32xf32>
    %582 = vector.shape_cast %581 : vector<1x1x8x32xf32> to vector<8x32xf32>
    %583 = arith.truncf %582 : vector<8x32xf32> to vector<8x32xbf16>
    %c40_748 = arith.constant 40 : index
    %c192_749 = arith.constant 192 : index
    %584 = vector.load %arg15[%c40_748, %c192_749] : memref<128x384xbf16, #tpu.memory_space<vmem>>, vector<8x32xbf16>
    tpu.vector_store %arg15[%c40_748, %c192_749], %583 {strides = array<i32>} : memref<128x384xbf16, #tpu.memory_space<vmem>>, vector<8x32xbf16>,
    %c0_750 = arith.constant 0 : index
    %c8_751 = arith.constant 8 : index
    %c0_752 = arith.constant 0 : index
    %c0_753 = arith.constant 0 : index
    %585 = vector.load %arg14[%c0_750, %c8_751, %c0_752, %c0_753] : memref<2x10x10x32xf32, #tpu.memory_space<vmem>>, vector<1x1x8x32xf32>
    %586 = vector.shape_cast %585 : vector<1x1x8x32xf32> to vector<8x32xf32>
    %587 = arith.truncf %586 : vector<8x32xf32> to vector<8x32xbf16>
    %c48_754 = arith.constant 48 : index
    %c192_755 = arith.constant 192 : index
    %588 = vector.load %arg15[%c48_754, %c192_755] : memref<128x384xbf16, #tpu.memory_space<vmem>>, vector<8x32xbf16>
    tpu.vector_store %arg15[%c48_754, %c192_755], %587 {strides = array<i32>} : memref<128x384xbf16, #tpu.memory_space<vmem>>, vector<8x32xbf16>,
    %c0_756 = arith.constant 0 : index
    %c9 = arith.constant 9 : index
    %c0_757 = arith.constant 0 : index
    %c0_758 = arith.constant 0 : index
    %589 = vector.load %arg14[%c0_756, %c9, %c0_757, %c0_758] : memref<2x10x10x32xf32, #tpu.memory_space<vmem>>, vector<1x1x8x32xf32>
    %590 = vector.shape_cast %589 : vector<1x1x8x32xf32> to vector<8x32xf32>
    %591 = arith.truncf %590 : vector<8x32xf32> to vector<8x32xbf16>
    %c56_759 = arith.constant 56 : index
    %c192_760 = arith.constant 192 : index
    %592 = vector.load %arg15[%c56_759, %c192_760] : memref<128x384xbf16, #tpu.memory_space<vmem>>, vector<8x32xbf16>
    tpu.vector_store %arg15[%c56_759, %c192_760], %591 {strides = array<i32>} : memref<128x384xbf16, #tpu.memory_space<vmem>>, vector<8x32xbf16>,
    %c1_761 = arith.constant 1 : index
    %c2_762 = arith.constant 2 : index
    %c0_763 = arith.constant 0 : index
    %c0_764 = arith.constant 0 : index
    %593 = vector.load %arg14[%c1_761, %c2_762, %c0_763, %c0_764] : memref<2x10x10x32xf32, #tpu.memory_space<vmem>>, vector<1x1x8x32xf32>
    %594 = vector.shape_cast %593 : vector<1x1x8x32xf32> to vector<8x32xf32>
    %595 = arith.truncf %594 : vector<8x32xf32> to vector<8x32xbf16>
    %c64_765 = arith.constant 64 : index
    %c192_766 = arith.constant 192 : index
    %596 = vector.load %arg15[%c64_765, %c192_766] : memref<128x384xbf16, #tpu.memory_space<vmem>>, vector<8x32xbf16>
    tpu.vector_store %arg15[%c64_765, %c192_766], %595 {strides = array<i32>} : memref<128x384xbf16, #tpu.memory_space<vmem>>, vector<8x32xbf16>,
    %c1_767 = arith.constant 1 : index
    %c3_768 = arith.constant 3 : index
    %c0_769 = arith.constant 0 : index
    %c0_770 = arith.constant 0 : index
    %597 = vector.load %arg14[%c1_767, %c3_768, %c0_769, %c0_770] : memref<2x10x10x32xf32, #tpu.memory_space<vmem>>, vector<1x1x8x32xf32>
    %598 = vector.shape_cast %597 : vector<1x1x8x32xf32> to vector<8x32xf32>
    %599 = arith.truncf %598 : vector<8x32xf32> to vector<8x32xbf16>
    %c72_771 = arith.constant 72 : index
    %c192_772 = arith.constant 192 : index
    %600 = vector.load %arg15[%c72_771, %c192_772] : memref<128x384xbf16, #tpu.memory_space<vmem>>, vector<8x32xbf16>
    tpu.vector_store %arg15[%c72_771, %c192_772], %599 {strides = array<i32>} : memref<128x384xbf16, #tpu.memory_space<vmem>>, vector<8x32xbf16>,
    %c1_773 = arith.constant 1 : index
    %c4_774 = arith.constant 4 : index
    %c0_775 = arith.constant 0 : index
    %c0_776 = arith.constant 0 : index
    %601 = vector.load %arg14[%c1_773, %c4_774, %c0_775, %c0_776] : memref<2x10x10x32xf32, #tpu.memory_space<vmem>>, vector<1x1x8x32xf32>
    %602 = vector.shape_cast %601 : vector<1x1x8x32xf32> to vector<8x32xf32>
    %603 = arith.truncf %602 : vector<8x32xf32> to vector<8x32xbf16>
    %c80_777 = arith.constant 80 : index
    %c192_778 = arith.constant 192 : index
    %604 = vector.load %arg15[%c80_777, %c192_778] : memref<128x384xbf16, #tpu.memory_space<vmem>>, vector<8x32xbf16>
    tpu.vector_store %arg15[%c80_777, %c192_778], %603 {strides = array<i32>} : memref<128x384xbf16, #tpu.memory_space<vmem>>, vector<8x32xbf16>,
    %c1_779 = arith.constant 1 : index
    %c5_780 = arith.constant 5 : index
    %c0_781 = arith.constant 0 : index
    %c0_782 = arith.constant 0 : index
    %605 = vector.load %arg14[%c1_779, %c5_780, %c0_781, %c0_782] : memref<2x10x10x32xf32, #tpu.memory_space<vmem>>, vector<1x1x8x32xf32>
    %606 = vector.shape_cast %605 : vector<1x1x8x32xf32> to vector<8x32xf32>
    %607 = arith.truncf %606 : vector<8x32xf32> to vector<8x32xbf16>
    %c88_783 = arith.constant 88 : index
    %c192_784 = arith.constant 192 : index
    %608 = vector.load %arg15[%c88_783, %c192_784] : memref<128x384xbf16, #tpu.memory_space<vmem>>, vector<8x32xbf16>
    tpu.vector_store %arg15[%c88_783, %c192_784], %607 {strides = array<i32>} : memref<128x384xbf16, #tpu.memory_space<vmem>>, vector<8x32xbf16>,
    %c1_785 = arith.constant 1 : index
    %c6_786 = arith.constant 6 : index
    %c0_787 = arith.constant 0 : index
    %c0_788 = arith.constant 0 : index
    %609 = vector.load %arg14[%c1_785, %c6_786, %c0_787, %c0_788] : memref<2x10x10x32xf32, #tpu.memory_space<vmem>>, vector<1x1x8x32xf32>
    %610 = vector.shape_cast %609 : vector<1x1x8x32xf32> to vector<8x32xf32>
    %611 = arith.truncf %610 : vector<8x32xf32> to vector<8x32xbf16>
    %c96_789 = arith.constant 96 : index
    %c192_790 = arith.constant 192 : index
    %612 = vector.load %arg15[%c96_789, %c192_790] : memref<128x384xbf16, #tpu.memory_space<vmem>>, vector<8x32xbf16>
    tpu.vector_store %arg15[%c96_789, %c192_790], %611 {strides = array<i32>} : memref<128x384xbf16, #tpu.memory_space<vmem>>, vector<8x32xbf16>,
    %c1_791 = arith.constant 1 : index
    %c7_792 = arith.constant 7 : index
    %c0_793 = arith.constant 0 : index
    %c0_794 = arith.constant 0 : index
    %613 = vector.load %arg14[%c1_791, %c7_792, %c0_793, %c0_794] : memref<2x10x10x32xf32, #tpu.memory_space<vmem>>, vector<1x1x8x32xf32>
    %614 = vector.shape_cast %613 : vector<1x1x8x32xf32> to vector<8x32xf32>
    %615 = arith.truncf %614 : vector<8x32xf32> to vector<8x32xbf16>
    %c104_795 = arith.constant 104 : index
    %c192_796 = arith.constant 192 : index
    %616 = vector.load %arg15[%c104_795, %c192_796] : memref<128x384xbf16, #tpu.memory_space<vmem>>, vector<8x32xbf16>
    tpu.vector_store %arg15[%c104_795, %c192_796], %615 {strides = array<i32>} : memref<128x384xbf16, #tpu.memory_space<vmem>>, vector<8x32xbf16>,
    %c1_797 = arith.constant 1 : index
    %c8_798 = arith.constant 8 : index
    %c0_799 = arith.constant 0 : index
    %c0_800 = arith.constant 0 : index
    %617 = vector.load %arg14[%c1_797, %c8_798, %c0_799, %c0_800] : memref<2x10x10x32xf32, #tpu.memory_space<vmem>>, vector<1x1x8x32xf32>
    %618 = vector.shape_cast %617 : vector<1x1x8x32xf32> to vector<8x32xf32>
    %619 = arith.truncf %618 : vector<8x32xf32> to vector<8x32xbf16>
    %c112_801 = arith.constant 112 : index
    %c192_802 = arith.constant 192 : index
    %620 = vector.load %arg15[%c112_801, %c192_802] : memref<128x384xbf16, #tpu.memory_space<vmem>>, vector<8x32xbf16>
    tpu.vector_store %arg15[%c112_801, %c192_802], %619 {strides = array<i32>} : memref<128x384xbf16, #tpu.memory_space<vmem>>, vector<8x32xbf16>,
    %c1_803 = arith.constant 1 : index
    %c9_804 = arith.constant 9 : index
    %c0_805 = arith.constant 0 : index
    %c0_806 = arith.constant 0 : index
    %621 = vector.load %arg14[%c1_803, %c9_804, %c0_805, %c0_806] : memref<2x10x10x32xf32, #tpu.memory_space<vmem>>, vector<1x1x8x32xf32>
    %622 = vector.shape_cast %621 : vector<1x1x8x32xf32> to vector<8x32xf32>
    %623 = arith.truncf %622 : vector<8x32xf32> to vector<8x32xbf16>
    %c120_807 = arith.constant 120 : index
    %c192_808 = arith.constant 192 : index
    %624 = vector.load %arg15[%c120_807, %c192_808] : memref<128x384xbf16, #tpu.memory_space<vmem>>, vector<8x32xbf16>
    tpu.vector_store %arg15[%c120_807, %c192_808], %623 {strides = array<i32>} : memref<128x384xbf16, #tpu.memory_space<vmem>>, vector<8x32xbf16>,
    %c0_809 = arith.constant 0 : index
    %c2_810 = arith.constant 2 : index
    %c1_811 = arith.constant 1 : index
    %c0_812 = arith.constant 0 : index
    %625 = vector.load %arg14[%c0_809, %c2_810, %c1_811, %c0_812] : memref<2x10x10x32xf32, #tpu.memory_space<vmem>>, vector<1x1x8x32xf32>
    %626 = vector.shape_cast %625 : vector<1x1x8x32xf32> to vector<8x32xf32>
    %627 = arith.truncf %626 : vector<8x32xf32> to vector<8x32xbf16>
    %c0_813 = arith.constant 0 : index
    %c224_814 = arith.constant 224 : index
    %628 = vector.load %arg15[%c0_813, %c224_814] : memref<128x384xbf16, #tpu.memory_space<vmem>>, vector<8x32xbf16>
    tpu.vector_store %arg15[%c0_813, %c224_814], %627 {strides = array<i32>} : memref<128x384xbf16, #tpu.memory_space<vmem>>, vector<8x32xbf16>,
    %c0_815 = arith.constant 0 : index
    %c3_816 = arith.constant 3 : index
    %c1_817 = arith.constant 1 : index
    %c0_818 = arith.constant 0 : index
    %629 = vector.load %arg14[%c0_815, %c3_816, %c1_817, %c0_818] : memref<2x10x10x32xf32, #tpu.memory_space<vmem>>, vector<1x1x8x32xf32>
    %630 = vector.shape_cast %629 : vector<1x1x8x32xf32> to vector<8x32xf32>
    %631 = arith.truncf %630 : vector<8x32xf32> to vector<8x32xbf16>
    %c8_819 = arith.constant 8 : index
    %c224_820 = arith.constant 224 : index
    %632 = vector.load %arg15[%c8_819, %c224_820] : memref<128x384xbf16, #tpu.memory_space<vmem>>, vector<8x32xbf16>
    tpu.vector_store %arg15[%c8_819, %c224_820], %631 {strides = array<i32>} : memref<128x384xbf16, #tpu.memory_space<vmem>>, vector<8x32xbf16>,
    %c0_821 = arith.constant 0 : index
    %c4_822 = arith.constant 4 : index
    %c1_823 = arith.constant 1 : index
    %c0_824 = arith.constant 0 : index
    %633 = vector.load %arg14[%c0_821, %c4_822, %c1_823, %c0_824] : memref<2x10x10x32xf32, #tpu.memory_space<vmem>>, vector<1x1x8x32xf32>
    %634 = vector.shape_cast %633 : vector<1x1x8x32xf32> to vector<8x32xf32>
    %635 = arith.truncf %634 : vector<8x32xf32> to vector<8x32xbf16>
    %c16_825 = arith.constant 16 : index
    %c224_826 = arith.constant 224 : index
    %636 = vector.load %arg15[%c16_825, %c224_826] : memref<128x384xbf16, #tpu.memory_space<vmem>>, vector<8x32xbf16>
    tpu.vector_store %arg15[%c16_825, %c224_826], %635 {strides = array<i32>} : memref<128x384xbf16, #tpu.memory_space<vmem>>, vector<8x32xbf16>,
    %c0_827 = arith.constant 0 : index
    %c5_828 = arith.constant 5 : index
    %c1_829 = arith.constant 1 : index
    %c0_830 = arith.constant 0 : index
    %637 = vector.load %arg14[%c0_827, %c5_828, %c1_829, %c0_830] : memref<2x10x10x32xf32, #tpu.memory_space<vmem>>, vector<1x1x8x32xf32>
    %638 = vector.shape_cast %637 : vector<1x1x8x32xf32> to vector<8x32xf32>
    %639 = arith.truncf %638 : vector<8x32xf32> to vector<8x32xbf16>
    %c24_831 = arith.constant 24 : index
    %c224_832 = arith.constant 224 : index
    %640 = vector.load %arg15[%c24_831, %c224_832] : memref<128x384xbf16, #tpu.memory_space<vmem>>, vector<8x32xbf16>
    tpu.vector_store %arg15[%c24_831, %c224_832], %639 {strides = array<i32>} : memref<128x384xbf16, #tpu.memory_space<vmem>>, vector<8x32xbf16>,
    %c0_833 = arith.constant 0 : index
    %c6_834 = arith.constant 6 : index
    %c1_835 = arith.constant 1 : index
    %c0_836 = arith.constant 0 : index
    %641 = vector.load %arg14[%c0_833, %c6_834, %c1_835, %c0_836] : memref<2x10x10x32xf32, #tpu.memory_space<vmem>>, vector<1x1x8x32xf32>
    %642 = vector.shape_cast %641 : vector<1x1x8x32xf32> to vector<8x32xf32>
    %643 = arith.truncf %642 : vector<8x32xf32> to vector<8x32xbf16>
    %c32_837 = arith.constant 32 : index
    %c224_838 = arith.constant 224 : index
    %644 = vector.load %arg15[%c32_837, %c224_838] : memref<128x384xbf16, #tpu.memory_space<vmem>>, vector<8x32xbf16>
    tpu.vector_store %arg15[%c32_837, %c224_838], %643 {strides = array<i32>} : memref<128x384xbf16, #tpu.memory_space<vmem>>, vector<8x32xbf16>,
    %c0_839 = arith.constant 0 : index
    %c7_840 = arith.constant 7 : index
    %c1_841 = arith.constant 1 : index
    %c0_842 = arith.constant 0 : index
    %645 = vector.load %arg14[%c0_839, %c7_840, %c1_841, %c0_842] : memref<2x10x10x32xf32, #tpu.memory_space<vmem>>, vector<1x1x8x32xf32>
    %646 = vector.shape_cast %645 : vector<1x1x8x32xf32> to vector<8x32xf32>
    %647 = arith.truncf %646 : vector<8x32xf32> to vector<8x32xbf16>
    %c40_843 = arith.constant 40 : index
    %c224_844 = arith.constant 224 : index
    %648 = vector.load %arg15[%c40_843, %c224_844] : memref<128x384xbf16, #tpu.memory_space<vmem>>, vector<8x32xbf16>
    tpu.vector_store %arg15[%c40_843, %c224_844], %647 {strides = array<i32>} : memref<128x384xbf16, #tpu.memory_space<vmem>>, vector<8x32xbf16>,
    %c0_845 = arith.constant 0 : index
    %c8_846 = arith.constant 8 : index
    %c1_847 = arith.constant 1 : index
    %c0_848 = arith.constant 0 : index
    %649 = vector.load %arg14[%c0_845, %c8_846, %c1_847, %c0_848] : memref<2x10x10x32xf32, #tpu.memory_space<vmem>>, vector<1x1x8x32xf32>
    %650 = vector.shape_cast %649 : vector<1x1x8x32xf32> to vector<8x32xf32>
    %651 = arith.truncf %650 : vector<8x32xf32> to vector<8x32xbf16>
    %c48_849 = arith.constant 48 : index
    %c224_850 = arith.constant 224 : index
    %652 = vector.load %arg15[%c48_849, %c224_850] : memref<128x384xbf16, #tpu.memory_space<vmem>>, vector<8x32xbf16>
    tpu.vector_store %arg15[%c48_849, %c224_850], %651 {strides = array<i32>} : memref<128x384xbf16, #tpu.memory_space<vmem>>, vector<8x32xbf16>,
    %c0_851 = arith.constant 0 : index
    %c9_852 = arith.constant 9 : index
    %c1_853 = arith.constant 1 : index
    %c0_854 = arith.constant 0 : index
    %653 = vector.load %arg14[%c0_851, %c9_852, %c1_853, %c0_854] : memref<2x10x10x32xf32, #tpu.memory_space<vmem>>, vector<1x1x8x32xf32>
    %654 = vector.shape_cast %653 : vector<1x1x8x32xf32> to vector<8x32xf32>
    %655 = arith.truncf %654 : vector<8x32xf32> to vector<8x32xbf16>
    %c56_855 = arith.constant 56 : index
    %c224_856 = arith.constant 224 : index
    %656 = vector.load %arg15[%c56_855, %c224_856] : memref<128x384xbf16, #tpu.memory_space<vmem>>, vector<8x32xbf16>
    tpu.vector_store %arg15[%c56_855, %c224_856], %655 {strides = array<i32>} : memref<128x384xbf16, #tpu.memory_space<vmem>>, vector<8x32xbf16>,
    %c1_857 = arith.constant 1 : index
    %c2_858 = arith.constant 2 : index
    %c1_859 = arith.constant 1 : index
    %c0_860 = arith.constant 0 : index
    %657 = vector.load %arg14[%c1_857, %c2_858, %c1_859, %c0_860] : memref<2x10x10x32xf32, #tpu.memory_space<vmem>>, vector<1x1x8x32xf32>
    %658 = vector.shape_cast %657 : vector<1x1x8x32xf32> to vector<8x32xf32>
    %659 = arith.truncf %658 : vector<8x32xf32> to vector<8x32xbf16>
    %c64_861 = arith.constant 64 : index
    %c224_862 = arith.constant 224 : index
    %660 = vector.load %arg15[%c64_861, %c224_862] : memref<128x384xbf16, #tpu.memory_space<vmem>>, vector<8x32xbf16>
    tpu.vector_store %arg15[%c64_861, %c224_862], %659 {strides = array<i32>} : memref<128x384xbf16, #tpu.memory_space<vmem>>, vector<8x32xbf16>,
    %c1_863 = arith.constant 1 : index
    %c3_864 = arith.constant 3 : index
    %c1_865 = arith.constant 1 : index
    %c0_866 = arith.constant 0 : index
    %661 = vector.load %arg14[%c1_863, %c3_864, %c1_865, %c0_866] : memref<2x10x10x32xf32, #tpu.memory_space<vmem>>, vector<1x1x8x32xf32>
    %662 = vector.shape_cast %661 : vector<1x1x8x32xf32> to vector<8x32xf32>
    %663 = arith.truncf %662 : vector<8x32xf32> to vector<8x32xbf16>
    %c72_867 = arith.constant 72 : index
    %c224_868 = arith.constant 224 : index
    %664 = vector.load %arg15[%c72_867, %c224_868] : memref<128x384xbf16, #tpu.memory_space<vmem>>, vector<8x32xbf16>
    tpu.vector_store %arg15[%c72_867, %c224_868], %663 {strides = array<i32>} : memref<128x384xbf16, #tpu.memory_space<vmem>>, vector<8x32xbf16>,
    %c1_869 = arith.constant 1 : index
    %c4_870 = arith.constant 4 : index
    %c1_871 = arith.constant 1 : index
    %c0_872 = arith.constant 0 : index
    %665 = vector.load %arg14[%c1_869, %c4_870, %c1_871, %c0_872] : memref<2x10x10x32xf32, #tpu.memory_space<vmem>>, vector<1x1x8x32xf32>
    %666 = vector.shape_cast %665 : vector<1x1x8x32xf32> to vector<8x32xf32>
    %667 = arith.truncf %666 : vector<8x32xf32> to vector<8x32xbf16>
    %c80_873 = arith.constant 80 : index
    %c224_874 = arith.constant 224 : index
    %668 = vector.load %arg15[%c80_873, %c224_874] : memref<128x384xbf16, #tpu.memory_space<vmem>>, vector<8x32xbf16>
    tpu.vector_store %arg15[%c80_873, %c224_874], %667 {strides = array<i32>} : memref<128x384xbf16, #tpu.memory_space<vmem>>, vector<8x32xbf16>,
    %c1_875 = arith.constant 1 : index
    %c5_876 = arith.constant 5 : index
    %c1_877 = arith.constant 1 : index
    %c0_878 = arith.constant 0 : index
    %669 = vector.load %arg14[%c1_875, %c5_876, %c1_877, %c0_878] : memref<2x10x10x32xf32, #tpu.memory_space<vmem>>, vector<1x1x8x32xf32>
    %670 = vector.shape_cast %669 : vector<1x1x8x32xf32> to vector<8x32xf32>
    %671 = arith.truncf %670 : vector<8x32xf32> to vector<8x32xbf16>
    %c88_879 = arith.constant 88 : index
    %c224_880 = arith.constant 224 : index
    %672 = vector.load %arg15[%c88_879, %c224_880] : memref<128x384xbf16, #tpu.memory_space<vmem>>, vector<8x32xbf16>
    tpu.vector_store %arg15[%c88_879, %c224_880], %671 {strides = array<i32>} : memref<128x384xbf16, #tpu.memory_space<vmem>>, vector<8x32xbf16>,
    %c1_881 = arith.constant 1 : index
    %c6_882 = arith.constant 6 : index
    %c1_883 = arith.constant 1 : index
    %c0_884 = arith.constant 0 : index
    %673 = vector.load %arg14[%c1_881, %c6_882, %c1_883, %c0_884] : memref<2x10x10x32xf32, #tpu.memory_space<vmem>>, vector<1x1x8x32xf32>
    %674 = vector.shape_cast %673 : vector<1x1x8x32xf32> to vector<8x32xf32>
    %675 = arith.truncf %674 : vector<8x32xf32> to vector<8x32xbf16>
    %c96_885 = arith.constant 96 : index
    %c224_886 = arith.constant 224 : index
    %676 = vector.load %arg15[%c96_885, %c224_886] : memref<128x384xbf16, #tpu.memory_space<vmem>>, vector<8x32xbf16>
    tpu.vector_store %arg15[%c96_885, %c224_886], %675 {strides = array<i32>} : memref<128x384xbf16, #tpu.memory_space<vmem>>, vector<8x32xbf16>,
    %c1_887 = arith.constant 1 : index
    %c7_888 = arith.constant 7 : index
    %c1_889 = arith.constant 1 : index
    %c0_890 = arith.constant 0 : index
    %677 = vector.load %arg14[%c1_887, %c7_888, %c1_889, %c0_890] : memref<2x10x10x32xf32, #tpu.memory_space<vmem>>, vector<1x1x8x32xf32>
    %678 = vector.shape_cast %677 : vector<1x1x8x32xf32> to vector<8x32xf32>
    %679 = arith.truncf %678 : vector<8x32xf32> to vector<8x32xbf16>
    %c104_891 = arith.constant 104 : index
    %c224_892 = arith.constant 224 : index
    %680 = vector.load %arg15[%c104_891, %c224_892] : memref<128x384xbf16, #tpu.memory_space<vmem>>, vector<8x32xbf16>
    tpu.vector_store %arg15[%c104_891, %c224_892], %679 {strides = array<i32>} : memref<128x384xbf16, #tpu.memory_space<vmem>>, vector<8x32xbf16>,
    %c1_893 = arith.constant 1 : index
    %c8_894 = arith.constant 8 : index
    %c1_895 = arith.constant 1 : index
    %c0_896 = arith.constant 0 : index
    %681 = vector.load %arg14[%c1_893, %c8_894, %c1_895, %c0_896] : memref<2x10x10x32xf32, #tpu.memory_space<vmem>>, vector<1x1x8x32xf32>
    %682 = vector.shape_cast %681 : vector<1x1x8x32xf32> to vector<8x32xf32>
    %683 = arith.truncf %682 : vector<8x32xf32> to vector<8x32xbf16>
    %c112_897 = arith.constant 112 : index
    %c224_898 = arith.constant 224 : index
    %684 = vector.load %arg15[%c112_897, %c224_898] : memref<128x384xbf16, #tpu.memory_space<vmem>>, vector<8x32xbf16>
    tpu.vector_store %arg15[%c112_897, %c224_898], %683 {strides = array<i32>} : memref<128x384xbf16, #tpu.memory_space<vmem>>, vector<8x32xbf16>,
    %c1_899 = arith.constant 1 : index
    %c9_900 = arith.constant 9 : index
    %c1_901 = arith.constant 1 : index
    %c0_902 = arith.constant 0 : index
    %685 = vector.load %arg14[%c1_899, %c9_900, %c1_901, %c0_902] : memref<2x10x10x32xf32, #tpu.memory_space<vmem>>, vector<1x1x8x32xf32>
    %686 = vector.shape_cast %685 : vector<1x1x8x32xf32> to vector<8x32xf32>
    %687 = arith.truncf %686 : vector<8x32xf32> to vector<8x32xbf16>
    %c120_903 = arith.constant 120 : index
    %c224_904 = arith.constant 224 : index
    %688 = vector.load %arg15[%c120_903, %c224_904] : memref<128x384xbf16, #tpu.memory_space<vmem>>, vector<8x32xbf16>
    tpu.vector_store %arg15[%c120_903, %c224_904], %687 {strides = array<i32>} : memref<128x384xbf16, #tpu.memory_space<vmem>>, vector<8x32xbf16>,
    %c0_905 = arith.constant 0 : index
    %c2_906 = arith.constant 2 : index
    %c2_907 = arith.constant 2 : index
    %c0_908 = arith.constant 0 : index
    %689 = vector.load %arg14[%c0_905, %c2_906, %c2_907, %c0_908] : memref<2x10x10x32xf32, #tpu.memory_space<vmem>>, vector<1x1x8x32xf32>
    %690 = vector.shape_cast %689 : vector<1x1x8x32xf32> to vector<8x32xf32>
    %691 = arith.truncf %690 : vector<8x32xf32> to vector<8x32xbf16>
    %c0_909 = arith.constant 0 : index
    %c256_910 = arith.constant 256 : index
    %692 = vector.load %arg15[%c0_909, %c256_910] : memref<128x384xbf16, #tpu.memory_space<vmem>>, vector<8x32xbf16>
    tpu.vector_store %arg15[%c0_909, %c256_910], %691 {strides = array<i32>} : memref<128x384xbf16, #tpu.memory_space<vmem>>, vector<8x32xbf16>,
    %c0_911 = arith.constant 0 : index
    %c3_912 = arith.constant 3 : index
    %c2_913 = arith.constant 2 : index
    %c0_914 = arith.constant 0 : index
    %693 = vector.load %arg14[%c0_911, %c3_912, %c2_913, %c0_914] : memref<2x10x10x32xf32, #tpu.memory_space<vmem>>, vector<1x1x8x32xf32>
    %694 = vector.shape_cast %693 : vector<1x1x8x32xf32> to vector<8x32xf32>
    %695 = arith.truncf %694 : vector<8x32xf32> to vector<8x32xbf16>
    %c8_915 = arith.constant 8 : index
    %c256_916 = arith.constant 256 : index
    %696 = vector.load %arg15[%c8_915, %c256_916] : memref<128x384xbf16, #tpu.memory_space<vmem>>, vector<8x32xbf16>
    tpu.vector_store %arg15[%c8_915, %c256_916], %695 {strides = array<i32>} : memref<128x384xbf16, #tpu.memory_space<vmem>>, vector<8x32xbf16>,
    %c0_917 = arith.constant 0 : index
    %c4_918 = arith.constant 4 : index
    %c2_919 = arith.constant 2 : index
    %c0_920 = arith.constant 0 : index
    %697 = vector.load %arg14[%c0_917, %c4_918, %c2_919, %c0_920] : memref<2x10x10x32xf32, #tpu.memory_space<vmem>>, vector<1x1x8x32xf32>
    %698 = vector.shape_cast %697 : vector<1x1x8x32xf32> to vector<8x32xf32>
    %699 = arith.truncf %698 : vector<8x32xf32> to vector<8x32xbf16>
    %c16_921 = arith.constant 16 : index
    %c256_922 = arith.constant 256 : index
    %700 = vector.load %arg15[%c16_921, %c256_922] : memref<128x384xbf16, #tpu.memory_space<vmem>>, vector<8x32xbf16>
    tpu.vector_store %arg15[%c16_921, %c256_922], %699 {strides = array<i32>} : memref<128x384xbf16, #tpu.memory_space<vmem>>, vector<8x32xbf16>,
    %c0_923 = arith.constant 0 : index
    %c5_924 = arith.constant 5 : index
    %c2_925 = arith.constant 2 : index
    %c0_926 = arith.constant 0 : index
    %701 = vector.load %arg14[%c0_923, %c5_924, %c2_925, %c0_926] : memref<2x10x10x32xf32, #tpu.memory_space<vmem>>, vector<1x1x8x32xf32>
    %702 = vector.shape_cast %701 : vector<1x1x8x32xf32> to vector<8x32xf32>
    %703 = arith.truncf %702 : vector<8x32xf32> to vector<8x32xbf16>
    %c24_927 = arith.constant 24 : index
    %c256_928 = arith.constant 256 : index
    %704 = vector.load %arg15[%c24_927, %c256_928] : memref<128x384xbf16, #tpu.memory_space<vmem>>, vector<8x32xbf16>
    tpu.vector_store %arg15[%c24_927, %c256_928], %703 {strides = array<i32>} : memref<128x384xbf16, #tpu.memory_space<vmem>>, vector<8x32xbf16>,
    %c0_929 = arith.constant 0 : index
    %c6_930 = arith.constant 6 : index
    %c2_931 = arith.constant 2 : index
    %c0_932 = arith.constant 0 : index
    %705 = vector.load %arg14[%c0_929, %c6_930, %c2_931, %c0_932] : memref<2x10x10x32xf32, #tpu.memory_space<vmem>>, vector<1x1x8x32xf32>
    %706 = vector.shape_cast %705 : vector<1x1x8x32xf32> to vector<8x32xf32>
    %707 = arith.truncf %706 : vector<8x32xf32> to vector<8x32xbf16>
    %c32_933 = arith.constant 32 : index
    %c256_934 = arith.constant 256 : index
    %708 = vector.load %arg15[%c32_933, %c256_934] : memref<128x384xbf16, #tpu.memory_space<vmem>>, vector<8x32xbf16>
    tpu.vector_store %arg15[%c32_933, %c256_934], %707 {strides = array<i32>} : memref<128x384xbf16, #tpu.memory_space<vmem>>, vector<8x32xbf16>,
    %c0_935 = arith.constant 0 : index
    %c7_936 = arith.constant 7 : index
    %c2_937 = arith.constant 2 : index
    %c0_938 = arith.constant 0 : index
    %709 = vector.load %arg14[%c0_935, %c7_936, %c2_937, %c0_938] : memref<2x10x10x32xf32, #tpu.memory_space<vmem>>, vector<1x1x8x32xf32>
    %710 = vector.shape_cast %709 : vector<1x1x8x32xf32> to vector<8x32xf32>
    %711 = arith.truncf %710 : vector<8x32xf32> to vector<8x32xbf16>
    %c40_939 = arith.constant 40 : index
    %c256_940 = arith.constant 256 : index
    %712 = vector.load %arg15[%c40_939, %c256_940] : memref<128x384xbf16, #tpu.memory_space<vmem>>, vector<8x32xbf16>
    tpu.vector_store %arg15[%c40_939, %c256_940], %711 {strides = array<i32>} : memref<128x384xbf16, #tpu.memory_space<vmem>>, vector<8x32xbf16>,
    %c0_941 = arith.constant 0 : index
    %c8_942 = arith.constant 8 : index
    %c2_943 = arith.constant 2 : index
    %c0_944 = arith.constant 0 : index
    %713 = vector.load %arg14[%c0_941, %c8_942, %c2_943, %c0_944] : memref<2x10x10x32xf32, #tpu.memory_space<vmem>>, vector<1x1x8x32xf32>
    %714 = vector.shape_cast %713 : vector<1x1x8x32xf32> to vector<8x32xf32>
    %715 = arith.truncf %714 : vector<8x32xf32> to vector<8x32xbf16>
    %c48_945 = arith.constant 48 : index
    %c256_946 = arith.constant 256 : index
    %716 = vector.load %arg15[%c48_945, %c256_946] : memref<128x384xbf16, #tpu.memory_space<vmem>>, vector<8x32xbf16>
    tpu.vector_store %arg15[%c48_945, %c256_946], %715 {strides = array<i32>} : memref<128x384xbf16, #tpu.memory_space<vmem>>, vector<8x32xbf16>,
    %c0_947 = arith.constant 0 : index
    %c9_948 = arith.constant 9 : index
    %c2_949 = arith.constant 2 : index
    %c0_950 = arith.constant 0 : index
    %717 = vector.load %arg14[%c0_947, %c9_948, %c2_949, %c0_950] : memref<2x10x10x32xf32, #tpu.memory_space<vmem>>, vector<1x1x8x32xf32>
    %718 = vector.shape_cast %717 : vector<1x1x8x32xf32> to vector<8x32xf32>
    %719 = arith.truncf %718 : vector<8x32xf32> to vector<8x32xbf16>
    %c56_951 = arith.constant 56 : index
    %c256_952 = arith.constant 256 : index
    %720 = vector.load %arg15[%c56_951, %c256_952] : memref<128x384xbf16, #tpu.memory_space<vmem>>, vector<8x32xbf16>
    tpu.vector_store %arg15[%c56_951, %c256_952], %719 {strides = array<i32>} : memref<128x384xbf16, #tpu.memory_space<vmem>>, vector<8x32xbf16>,
    %c1_953 = arith.constant 1 : index
    %c2_954 = arith.constant 2 : index
    %c2_955 = arith.constant 2 : index
    %c0_956 = arith.constant 0 : index
    %721 = vector.load %arg14[%c1_953, %c2_954, %c2_955, %c0_956] : memref<2x10x10x32xf32, #tpu.memory_space<vmem>>, vector<1x1x8x32xf32>
    %722 = vector.shape_cast %721 : vector<1x1x8x32xf32> to vector<8x32xf32>
    %723 = arith.truncf %722 : vector<8x32xf32> to vector<8x32xbf16>
    %c64_957 = arith.constant 64 : index
    %c256_958 = arith.constant 256 : index
    %724 = vector.load %arg15[%c64_957, %c256_958] : memref<128x384xbf16, #tpu.memory_space<vmem>>, vector<8x32xbf16>
    tpu.vector_store %arg15[%c64_957, %c256_958], %723 {strides = array<i32>} : memref<128x384xbf16, #tpu.memory_space<vmem>>, vector<8x32xbf16>,
    %c1_959 = arith.constant 1 : index
    %c3_960 = arith.constant 3 : index
    %c2_961 = arith.constant 2 : index
    %c0_962 = arith.constant 0 : index
    %725 = vector.load %arg14[%c1_959, %c3_960, %c2_961, %c0_962] : memref<2x10x10x32xf32, #tpu.memory_space<vmem>>, vector<1x1x8x32xf32>
    %726 = vector.shape_cast %725 : vector<1x1x8x32xf32> to vector<8x32xf32>
    %727 = arith.truncf %726 : vector<8x32xf32> to vector<8x32xbf16>
    %c72_963 = arith.constant 72 : index
    %c256_964 = arith.constant 256 : index
    %728 = vector.load %arg15[%c72_963, %c256_964] : memref<128x384xbf16, #tpu.memory_space<vmem>>, vector<8x32xbf16>
    tpu.vector_store %arg15[%c72_963, %c256_964], %727 {strides = array<i32>} : memref<128x384xbf16, #tpu.memory_space<vmem>>, vector<8x32xbf16>,
    %c1_965 = arith.constant 1 : index
    %c4_966 = arith.constant 4 : index
    %c2_967 = arith.constant 2 : index
    %c0_968 = arith.constant 0 : index
    %729 = vector.load %arg14[%c1_965, %c4_966, %c2_967, %c0_968] : memref<2x10x10x32xf32, #tpu.memory_space<vmem>>, vector<1x1x8x32xf32>
    %730 = vector.shape_cast %729 : vector<1x1x8x32xf32> to vector<8x32xf32>
    %731 = arith.truncf %730 : vector<8x32xf32> to vector<8x32xbf16>
    %c80_969 = arith.constant 80 : index
    %c256_970 = arith.constant 256 : index
    %732 = vector.load %arg15[%c80_969, %c256_970] : memref<128x384xbf16, #tpu.memory_space<vmem>>, vector<8x32xbf16>
    tpu.vector_store %arg15[%c80_969, %c256_970], %731 {strides = array<i32>} : memref<128x384xbf16, #tpu.memory_space<vmem>>, vector<8x32xbf16>,
    %c1_971 = arith.constant 1 : index
    %c5_972 = arith.constant 5 : index
    %c2_973 = arith.constant 2 : index
    %c0_974 = arith.constant 0 : index
    %733 = vector.load %arg14[%c1_971, %c5_972, %c2_973, %c0_974] : memref<2x10x10x32xf32, #tpu.memory_space<vmem>>, vector<1x1x8x32xf32>
    %734 = vector.shape_cast %733 : vector<1x1x8x32xf32> to vector<8x32xf32>
    %735 = arith.truncf %734 : vector<8x32xf32> to vector<8x32xbf16>
    %c88_975 = arith.constant 88 : index
    %c256_976 = arith.constant 256 : index
    %736 = vector.load %arg15[%c88_975, %c256_976] : memref<128x384xbf16, #tpu.memory_space<vmem>>, vector<8x32xbf16>
    tpu.vector_store %arg15[%c88_975, %c256_976], %735 {strides = array<i32>} : memref<128x384xbf16, #tpu.memory_space<vmem>>, vector<8x32xbf16>,
    %c1_977 = arith.constant 1 : index
    %c6_978 = arith.constant 6 : index
    %c2_979 = arith.constant 2 : index
    %c0_980 = arith.constant 0 : index
    %737 = vector.load %arg14[%c1_977, %c6_978, %c2_979, %c0_980] : memref<2x10x10x32xf32, #tpu.memory_space<vmem>>, vector<1x1x8x32xf32>
    %738 = vector.shape_cast %737 : vector<1x1x8x32xf32> to vector<8x32xf32>
    %739 = arith.truncf %738 : vector<8x32xf32> to vector<8x32xbf16>
    %c96_981 = arith.constant 96 : index
    %c256_982 = arith.constant 256 : index
    %740 = vector.load %arg15[%c96_981, %c256_982] : memref<128x384xbf16, #tpu.memory_space<vmem>>, vector<8x32xbf16>
    tpu.vector_store %arg15[%c96_981, %c256_982], %739 {strides = array<i32>} : memref<128x384xbf16, #tpu.memory_space<vmem>>, vector<8x32xbf16>,
    %c1_983 = arith.constant 1 : index
    %c7_984 = arith.constant 7 : index
    %c2_985 = arith.constant 2 : index
    %c0_986 = arith.constant 0 : index
    %741 = vector.load %arg14[%c1_983, %c7_984, %c2_985, %c0_986] : memref<2x10x10x32xf32, #tpu.memory_space<vmem>>, vector<1x1x8x32xf32>
    %742 = vector.shape_cast %741 : vector<1x1x8x32xf32> to vector<8x32xf32>
    %743 = arith.truncf %742 : vector<8x32xf32> to vector<8x32xbf16>
    %c104_987 = arith.constant 104 : index
    %c256_988 = arith.constant 256 : index
    %744 = vector.load %arg15[%c104_987, %c256_988] : memref<128x384xbf16, #tpu.memory_space<vmem>>, vector<8x32xbf16>
    tpu.vector_store %arg15[%c104_987, %c256_988], %743 {strides = array<i32>} : memref<128x384xbf16, #tpu.memory_space<vmem>>, vector<8x32xbf16>,
    %c1_989 = arith.constant 1 : index
    %c8_990 = arith.constant 8 : index
    %c2_991 = arith.constant 2 : index
    %c0_992 = arith.constant 0 : index
    %745 = vector.load %arg14[%c1_989, %c8_990, %c2_991, %c0_992] : memref<2x10x10x32xf32, #tpu.memory_space<vmem>>, vector<1x1x8x32xf32>
    %746 = vector.shape_cast %745 : vector<1x1x8x32xf32> to vector<8x32xf32>
    %747 = arith.truncf %746 : vector<8x32xf32> to vector<8x32xbf16>
    %c112_993 = arith.constant 112 : index
    %c256_994 = arith.constant 256 : index
    %748 = vector.load %arg15[%c112_993, %c256_994] : memref<128x384xbf16, #tpu.memory_space<vmem>>, vector<8x32xbf16>
    tpu.vector_store %arg15[%c112_993, %c256_994], %747 {strides = array<i32>} : memref<128x384xbf16, #tpu.memory_space<vmem>>, vector<8x32xbf16>,
    %c1_995 = arith.constant 1 : index
    %c9_996 = arith.constant 9 : index
    %c2_997 = arith.constant 2 : index
    %c0_998 = arith.constant 0 : index
    %749 = vector.load %arg14[%c1_995, %c9_996, %c2_997, %c0_998] : memref<2x10x10x32xf32, #tpu.memory_space<vmem>>, vector<1x1x8x32xf32>
    %750 = vector.shape_cast %749 : vector<1x1x8x32xf32> to vector<8x32xf32>
    %751 = arith.truncf %750 : vector<8x32xf32> to vector<8x32xbf16>
    %c120_999 = arith.constant 120 : index
    %c256_1000 = arith.constant 256 : index
    %752 = vector.load %arg15[%c120_999, %c256_1000] : memref<128x384xbf16, #tpu.memory_space<vmem>>, vector<8x32xbf16>
    tpu.vector_store %arg15[%c120_999, %c256_1000], %751 {strides = array<i32>} : memref<128x384xbf16, #tpu.memory_space<vmem>>, vector<8x32xbf16>,
    %c0_1001 = arith.constant 0 : index
    %c0_1002 = arith.constant 0 : index
    %753 = vector.load %arg15[%c0_1001, %c0_1002] : memref<128x384xbf16, #tpu.memory_space<vmem>>, vector<128x384xbf16>
    %c0_1003 = arith.constant 0 : index
    %c0_1004 = arith.constant 0 : index
    %754 = vector.load %arg4[%c0_1003, %c0_1004] : memref<384x64xbf16, #tpu.memory_space<vmem>>, vector<384x64xbf16>
    %cst_1005 = arith.constant dense<0.000000e+00> : vector<128x64xf32>
    %755 = tpu.matmul %753, %754, %cst_1005 {dimension_numbers = #tpu.dot_dimension_numbers<[1], [0], [0], [1], [0, 0, 1, 1], [], []>} : vector<128x384xbf16>, vector<384x64xbf16>, vector<128x64xf32> -> vector<128x64xf32>
    %c0_1006 = arith.constant 0 : index
    %c0_1007 = arith.constant 0 : index
    %756 = vector.load %arg5[%c0_1006, %c0_1007] : memref<1x64xf32, #tpu.memory_space<vmem>>, vector<1x64xf32>
    %757 = vector.broadcast %756 : vector<1x64xf32> to vector<128x64xf32>
    %758 = arith.addf %755, %757 : vector<128x64xf32>
    %cst_1008 = arith.constant 0.000000e+00 : f32
    %759 = vector.broadcast %cst_1008 : f32 to vector<128x64xf32>
    %760 = arith.maximumf %758, %759 : vector<128x64xf32>
    %c0_1009 = arith.constant 0 : index
    %c0_1010 = arith.constant 0 : index
    %761 = vector.load %arg16[%c0_1009, %c0_1010] : memref<128x64xf32, #tpu.memory_space<vmem>>, vector<128x64xf32>
    tpu.vector_store %arg16[%c0_1009, %c0_1010], %760 {strides = array<i32>} : memref<128x64xf32, #tpu.memory_space<vmem>>, vector<128x64xf32>,
    %c0_1011 = arith.constant 0 : index
    %c0_1012 = arith.constant 0 : index
    %762 = tpu.strided_load %arg16[%c0_1011, %c0_1012] {strides = array<i32: 2, 1>} : memref<128x64xf32, #tpu.memory_space<vmem>>, vector<4x64xf32>
    %c1_1013 = arith.constant 1 : index
    %c0_1014 = arith.constant 0 : index
    %763 = tpu.strided_load %arg16[%c1_1013, %c0_1014] {strides = array<i32: 2, 1>} : memref<128x64xf32, #tpu.memory_space<vmem>>, vector<4x64xf32>
    %764 = arith.maximumf %762, %763 : vector<4x64xf32>
    %c8_1015 = arith.constant 8 : index
    %c0_1016 = arith.constant 0 : index
    %765 = tpu.strided_load %arg16[%c8_1015, %c0_1016] {strides = array<i32: 2, 1>} : memref<128x64xf32, #tpu.memory_space<vmem>>, vector<4x64xf32>
    %c9_1017 = arith.constant 9 : index
    %c0_1018 = arith.constant 0 : index
    %766 = tpu.strided_load %arg16[%c9_1017, %c0_1018] {strides = array<i32: 2, 1>} : memref<128x64xf32, #tpu.memory_space<vmem>>, vector<4x64xf32>
    %767 = arith.maximumf %765, %766 : vector<4x64xf32>
    %768 = arith.maximumf %764, %767 : vector<4x64xf32>
    %c0_1019 = arith.constant 0 : index
    %c1_1020 = arith.constant 1 : index
    %c1_1021 = arith.constant 1 : index
    %c0_1022 = arith.constant 0 : index
    %769 = vector.load %arg17[%c0_1019, %c1_1020, %c1_1021, %c0_1022] : memref<2x6x6x64xf32, #tpu.memory_space<vmem>>, vector<1x1x4x64xf32>
    %770 = vector.shape_cast %769 : vector<1x1x4x64xf32> to vector<4x64xf32>
    %771 = vector.shape_cast %768 : vector<4x64xf32> to vector<1x1x4x64xf32>
    tpu.vector_store %arg17[%c0_1019, %c1_1020, %c1_1021, %c0_1022], %771 {strides = array<i32>} : memref<2x6x6x64xf32, #tpu.memory_space<vmem>>, vector<1x1x4x64xf32>,
    %c16_1023 = arith.constant 16 : index
    %c0_1024 = arith.constant 0 : index
    %772 = tpu.strided_load %arg16[%c16_1023, %c0_1024] {strides = array<i32: 2, 1>} : memref<128x64xf32, #tpu.memory_space<vmem>>, vector<4x64xf32>
    %c17_1025 = arith.constant 17 : index
    %c0_1026 = arith.constant 0 : index
    %773 = tpu.strided_load %arg16[%c17_1025, %c0_1026] {strides = array<i32: 2, 1>} : memref<128x64xf32, #tpu.memory_space<vmem>>, vector<4x64xf32>
    %774 = arith.maximumf %772, %773 : vector<4x64xf32>
    %c24_1027 = arith.constant 24 : index
    %c0_1028 = arith.constant 0 : index
    %775 = tpu.strided_load %arg16[%c24_1027, %c0_1028] {strides = array<i32: 2, 1>} : memref<128x64xf32, #tpu.memory_space<vmem>>, vector<4x64xf32>
    %c25 = arith.constant 25 : index
    %c0_1029 = arith.constant 0 : index
    %776 = tpu.strided_load %arg16[%c25, %c0_1029] {strides = array<i32: 2, 1>} : memref<128x64xf32, #tpu.memory_space<vmem>>, vector<4x64xf32>
    %777 = arith.maximumf %775, %776 : vector<4x64xf32>
    %778 = arith.maximumf %774, %777 : vector<4x64xf32>
    %c0_1030 = arith.constant 0 : index
    %c2_1031 = arith.constant 2 : index
    %c1_1032 = arith.constant 1 : index
    %c0_1033 = arith.constant 0 : index
    %779 = vector.load %arg17[%c0_1030, %c2_1031, %c1_1032, %c0_1033] : memref<2x6x6x64xf32, #tpu.memory_space<vmem>>, vector<1x1x4x64xf32>
    %780 = vector.shape_cast %779 : vector<1x1x4x64xf32> to vector<4x64xf32>
    %781 = vector.shape_cast %778 : vector<4x64xf32> to vector<1x1x4x64xf32>
    tpu.vector_store %arg17[%c0_1030, %c2_1031, %c1_1032, %c0_1033], %781 {strides = array<i32>} : memref<2x6x6x64xf32, #tpu.memory_space<vmem>>, vector<1x1x4x64xf32>,
    %c32_1034 = arith.constant 32 : index
    %c0_1035 = arith.constant 0 : index
    %782 = tpu.strided_load %arg16[%c32_1034, %c0_1035] {strides = array<i32: 2, 1>} : memref<128x64xf32, #tpu.memory_space<vmem>>, vector<4x64xf32>
    %c33_1036 = arith.constant 33 : index
    %c0_1037 = arith.constant 0 : index
    %783 = tpu.strided_load %arg16[%c33_1036, %c0_1037] {strides = array<i32: 2, 1>} : memref<128x64xf32, #tpu.memory_space<vmem>>, vector<4x64xf32>
    %784 = arith.maximumf %782, %783 : vector<4x64xf32>
    %c40_1038 = arith.constant 40 : index
    %c0_1039 = arith.constant 0 : index
    %785 = tpu.strided_load %arg16[%c40_1038, %c0_1039] {strides = array<i32: 2, 1>} : memref<128x64xf32, #tpu.memory_space<vmem>>, vector<4x64xf32>
    %c41 = arith.constant 41 : index
    %c0_1040 = arith.constant 0 : index
    %786 = tpu.strided_load %arg16[%c41, %c0_1040] {strides = array<i32: 2, 1>} : memref<128x64xf32, #tpu.memory_space<vmem>>, vector<4x64xf32>
    %787 = arith.maximumf %785, %786 : vector<4x64xf32>
    %788 = arith.maximumf %784, %787 : vector<4x64xf32>
    %c0_1041 = arith.constant 0 : index
    %c3_1042 = arith.constant 3 : index
    %c1_1043 = arith.constant 1 : index
    %c0_1044 = arith.constant 0 : index
    %789 = vector.load %arg17[%c0_1041, %c3_1042, %c1_1043, %c0_1044] : memref<2x6x6x64xf32, #tpu.memory_space<vmem>>, vector<1x1x4x64xf32>
    %790 = vector.shape_cast %789 : vector<1x1x4x64xf32> to vector<4x64xf32>
    %791 = vector.shape_cast %788 : vector<4x64xf32> to vector<1x1x4x64xf32>
    tpu.vector_store %arg17[%c0_1041, %c3_1042, %c1_1043, %c0_1044], %791 {strides = array<i32>} : memref<2x6x6x64xf32, #tpu.memory_space<vmem>>, vector<1x1x4x64xf32>,
    %c48_1045 = arith.constant 48 : index
    %c0_1046 = arith.constant 0 : index
    %792 = tpu.strided_load %arg16[%c48_1045, %c0_1046] {strides = array<i32: 2, 1>} : memref<128x64xf32, #tpu.memory_space<vmem>>, vector<4x64xf32>
    %c49_1047 = arith.constant 49 : index
    %c0_1048 = arith.constant 0 : index
    %793 = tpu.strided_load %arg16[%c49_1047, %c0_1048] {strides = array<i32: 2, 1>} : memref<128x64xf32, #tpu.memory_space<vmem>>, vector<4x64xf32>
    %794 = arith.maximumf %792, %793 : vector<4x64xf32>
    %c56_1049 = arith.constant 56 : index
    %c0_1050 = arith.constant 0 : index
    %795 = tpu.strided_load %arg16[%c56_1049, %c0_1050] {strides = array<i32: 2, 1>} : memref<128x64xf32, #tpu.memory_space<vmem>>, vector<4x64xf32>
    %c57 = arith.constant 57 : index
    %c0_1051 = arith.constant 0 : index
    %796 = tpu.strided_load %arg16[%c57, %c0_1051] {strides = array<i32: 2, 1>} : memref<128x64xf32, #tpu.memory_space<vmem>>, vector<4x64xf32>
    %797 = arith.maximumf %795, %796 : vector<4x64xf32>
    %798 = arith.maximumf %794, %797 : vector<4x64xf32>
    %c0_1052 = arith.constant 0 : index
    %c4_1053 = arith.constant 4 : index
    %c1_1054 = arith.constant 1 : index
    %c0_1055 = arith.constant 0 : index
    %799 = vector.load %arg17[%c0_1052, %c4_1053, %c1_1054, %c0_1055] : memref<2x6x6x64xf32, #tpu.memory_space<vmem>>, vector<1x1x4x64xf32>
    %800 = vector.shape_cast %799 : vector<1x1x4x64xf32> to vector<4x64xf32>
    %801 = vector.shape_cast %798 : vector<4x64xf32> to vector<1x1x4x64xf32>
    tpu.vector_store %arg17[%c0_1052, %c4_1053, %c1_1054, %c0_1055], %801 {strides = array<i32>} : memref<2x6x6x64xf32, #tpu.memory_space<vmem>>, vector<1x1x4x64xf32>,
    %c64_1056 = arith.constant 64 : index
    %c0_1057 = arith.constant 0 : index
    %802 = tpu.strided_load %arg16[%c64_1056, %c0_1057] {strides = array<i32: 2, 1>} : memref<128x64xf32, #tpu.memory_space<vmem>>, vector<4x64xf32>
    %c65_1058 = arith.constant 65 : index
    %c0_1059 = arith.constant 0 : index
    %803 = tpu.strided_load %arg16[%c65_1058, %c0_1059] {strides = array<i32: 2, 1>} : memref<128x64xf32, #tpu.memory_space<vmem>>, vector<4x64xf32>
    %804 = arith.maximumf %802, %803 : vector<4x64xf32>
    %c72_1060 = arith.constant 72 : index
    %c0_1061 = arith.constant 0 : index
    %805 = tpu.strided_load %arg16[%c72_1060, %c0_1061] {strides = array<i32: 2, 1>} : memref<128x64xf32, #tpu.memory_space<vmem>>, vector<4x64xf32>
    %c73 = arith.constant 73 : index
    %c0_1062 = arith.constant 0 : index
    %806 = tpu.strided_load %arg16[%c73, %c0_1062] {strides = array<i32: 2, 1>} : memref<128x64xf32, #tpu.memory_space<vmem>>, vector<4x64xf32>
    %807 = arith.maximumf %805, %806 : vector<4x64xf32>
    %808 = arith.maximumf %804, %807 : vector<4x64xf32>
    %c1_1063 = arith.constant 1 : index
    %c1_1064 = arith.constant 1 : index
    %c1_1065 = arith.constant 1 : index
    %c0_1066 = arith.constant 0 : index
    %809 = vector.load %arg17[%c1_1063, %c1_1064, %c1_1065, %c0_1066] : memref<2x6x6x64xf32, #tpu.memory_space<vmem>>, vector<1x1x4x64xf32>
    %810 = vector.shape_cast %809 : vector<1x1x4x64xf32> to vector<4x64xf32>
    %811 = vector.shape_cast %808 : vector<4x64xf32> to vector<1x1x4x64xf32>
    tpu.vector_store %arg17[%c1_1063, %c1_1064, %c1_1065, %c0_1066], %811 {strides = array<i32>} : memref<2x6x6x64xf32, #tpu.memory_space<vmem>>, vector<1x1x4x64xf32>,
    %c80_1067 = arith.constant 80 : index
    %c0_1068 = arith.constant 0 : index
    %812 = tpu.strided_load %arg16[%c80_1067, %c0_1068] {strides = array<i32: 2, 1>} : memref<128x64xf32, #tpu.memory_space<vmem>>, vector<4x64xf32>
    %c81_1069 = arith.constant 81 : index
    %c0_1070 = arith.constant 0 : index
    %813 = tpu.strided_load %arg16[%c81_1069, %c0_1070] {strides = array<i32: 2, 1>} : memref<128x64xf32, #tpu.memory_space<vmem>>, vector<4x64xf32>
    %814 = arith.maximumf %812, %813 : vector<4x64xf32>
    %c88_1071 = arith.constant 88 : index
    %c0_1072 = arith.constant 0 : index
    %815 = tpu.strided_load %arg16[%c88_1071, %c0_1072] {strides = array<i32: 2, 1>} : memref<128x64xf32, #tpu.memory_space<vmem>>, vector<4x64xf32>
    %c89 = arith.constant 89 : index
    %c0_1073 = arith.constant 0 : index
    %816 = tpu.strided_load %arg16[%c89, %c0_1073] {strides = array<i32: 2, 1>} : memref<128x64xf32, #tpu.memory_space<vmem>>, vector<4x64xf32>
    %817 = arith.maximumf %815, %816 : vector<4x64xf32>
    %818 = arith.maximumf %814, %817 : vector<4x64xf32>
    %c1_1074 = arith.constant 1 : index
    %c2_1075 = arith.constant 2 : index
    %c1_1076 = arith.constant 1 : index
    %c0_1077 = arith.constant 0 : index
    %819 = vector.load %arg17[%c1_1074, %c2_1075, %c1_1076, %c0_1077] : memref<2x6x6x64xf32, #tpu.memory_space<vmem>>, vector<1x1x4x64xf32>
    %820 = vector.shape_cast %819 : vector<1x1x4x64xf32> to vector<4x64xf32>
    %821 = vector.shape_cast %818 : vector<4x64xf32> to vector<1x1x4x64xf32>
    tpu.vector_store %arg17[%c1_1074, %c2_1075, %c1_1076, %c0_1077], %821 {strides = array<i32>} : memref<2x6x6x64xf32, #tpu.memory_space<vmem>>, vector<1x1x4x64xf32>,
    %c96_1078 = arith.constant 96 : index
    %c0_1079 = arith.constant 0 : index
    %822 = tpu.strided_load %arg16[%c96_1078, %c0_1079] {strides = array<i32: 2, 1>} : memref<128x64xf32, #tpu.memory_space<vmem>>, vector<4x64xf32>
    %c97_1080 = arith.constant 97 : index
    %c0_1081 = arith.constant 0 : index
    %823 = tpu.strided_load %arg16[%c97_1080, %c0_1081] {strides = array<i32: 2, 1>} : memref<128x64xf32, #tpu.memory_space<vmem>>, vector<4x64xf32>
    %824 = arith.maximumf %822, %823 : vector<4x64xf32>
    %c104_1082 = arith.constant 104 : index
    %c0_1083 = arith.constant 0 : index
    %825 = tpu.strided_load %arg16[%c104_1082, %c0_1083] {strides = array<i32: 2, 1>} : memref<128x64xf32, #tpu.memory_space<vmem>>, vector<4x64xf32>
    %c105 = arith.constant 105 : index
    %c0_1084 = arith.constant 0 : index
    %826 = tpu.strided_load %arg16[%c105, %c0_1084] {strides = array<i32: 2, 1>} : memref<128x64xf32, #tpu.memory_space<vmem>>, vector<4x64xf32>
    %827 = arith.maximumf %825, %826 : vector<4x64xf32>
    %828 = arith.maximumf %824, %827 : vector<4x64xf32>
    %c1_1085 = arith.constant 1 : index
    %c3_1086 = arith.constant 3 : index
    %c1_1087 = arith.constant 1 : index
    %c0_1088 = arith.constant 0 : index
    %829 = vector.load %arg17[%c1_1085, %c3_1086, %c1_1087, %c0_1088] : memref<2x6x6x64xf32, #tpu.memory_space<vmem>>, vector<1x1x4x64xf32>
    %830 = vector.shape_cast %829 : vector<1x1x4x64xf32> to vector<4x64xf32>
    %831 = vector.shape_cast %828 : vector<4x64xf32> to vector<1x1x4x64xf32>
    tpu.vector_store %arg17[%c1_1085, %c3_1086, %c1_1087, %c0_1088], %831 {strides = array<i32>} : memref<2x6x6x64xf32, #tpu.memory_space<vmem>>, vector<1x1x4x64xf32>,
    %c112_1089 = arith.constant 112 : index
    %c0_1090 = arith.constant 0 : index
    %832 = tpu.strided_load %arg16[%c112_1089, %c0_1090] {strides = array<i32: 2, 1>} : memref<128x64xf32, #tpu.memory_space<vmem>>, vector<4x64xf32>
    %c113_1091 = arith.constant 113 : index
    %c0_1092 = arith.constant 0 : index
    %833 = tpu.strided_load %arg16[%c113_1091, %c0_1092] {strides = array<i32: 2, 1>} : memref<128x64xf32, #tpu.memory_space<vmem>>, vector<4x64xf32>
    %834 = arith.maximumf %832, %833 : vector<4x64xf32>
    %c120_1093 = arith.constant 120 : index
    %c0_1094 = arith.constant 0 : index
    %835 = tpu.strided_load %arg16[%c120_1093, %c0_1094] {strides = array<i32: 2, 1>} : memref<128x64xf32, #tpu.memory_space<vmem>>, vector<4x64xf32>
    %c121 = arith.constant 121 : index
    %c0_1095 = arith.constant 0 : index
    %836 = tpu.strided_load %arg16[%c121, %c0_1095] {strides = array<i32: 2, 1>} : memref<128x64xf32, #tpu.memory_space<vmem>>, vector<4x64xf32>
    %837 = arith.maximumf %835, %836 : vector<4x64xf32>
    %838 = arith.maximumf %834, %837 : vector<4x64xf32>
    %c1_1096 = arith.constant 1 : index
    %c4_1097 = arith.constant 4 : index
    %c1_1098 = arith.constant 1 : index
    %c0_1099 = arith.constant 0 : index
    %839 = vector.load %arg17[%c1_1096, %c4_1097, %c1_1098, %c0_1099] : memref<2x6x6x64xf32, #tpu.memory_space<vmem>>, vector<1x1x4x64xf32>
    %840 = vector.shape_cast %839 : vector<1x1x4x64xf32> to vector<4x64xf32>
    %841 = vector.shape_cast %838 : vector<4x64xf32> to vector<1x1x4x64xf32>
    tpu.vector_store %arg17[%c1_1096, %c4_1097, %c1_1098, %c0_1099], %841 {strides = array<i32>} : memref<2x6x6x64xf32, #tpu.memory_space<vmem>>, vector<1x1x4x64xf32>,
    %c0_1100 = arith.constant 0 : index
    %c0_1101 = arith.constant 0 : index
    %c0_1102 = arith.constant 0 : index
    %c0_1103 = arith.constant 0 : index
    %842 = vector.load %arg17[%c0_1100, %c0_1101, %c0_1102, %c0_1103] : memref<2x6x6x64xf32, #tpu.memory_space<vmem>>, vector<1x1x4x64xf32>
    %843 = vector.shape_cast %842 : vector<1x1x4x64xf32> to vector<4x64xf32>
    %844 = arith.truncf %843 : vector<4x64xf32> to vector<4x64xbf16>
    %c0_1104 = arith.constant 0 : index
    %c0_1105 = arith.constant 0 : index
    %845 = vector.load %arg18[%c0_1104, %c0_1105] : memref<32x640xbf16, #tpu.memory_space<vmem>>, vector<4x64xbf16>
    tpu.vector_store %arg18[%c0_1104, %c0_1105], %844 {strides = array<i32>} : memref<32x640xbf16, #tpu.memory_space<vmem>>, vector<4x64xbf16>,
    %c0_1106 = arith.constant 0 : index
    %c1_1107 = arith.constant 1 : index
    %c0_1108 = arith.constant 0 : index
    %c0_1109 = arith.constant 0 : index
    %846 = vector.load %arg17[%c0_1106, %c1_1107, %c0_1108, %c0_1109] : memref<2x6x6x64xf32, #tpu.memory_space<vmem>>, vector<1x1x4x64xf32>
    %847 = vector.shape_cast %846 : vector<1x1x4x64xf32> to vector<4x64xf32>
    %848 = arith.truncf %847 : vector<4x64xf32> to vector<4x64xbf16>
    %c4_1110 = arith.constant 4 : index
    %c0_1111 = arith.constant 0 : index
    %849 = vector.load %arg18[%c4_1110, %c0_1111] : memref<32x640xbf16, #tpu.memory_space<vmem>>, vector<4x64xbf16>
    tpu.vector_store %arg18[%c4_1110, %c0_1111], %848 {strides = array<i32>} : memref<32x640xbf16, #tpu.memory_space<vmem>>, vector<4x64xbf16>,
    %c0_1112 = arith.constant 0 : index
    %c2_1113 = arith.constant 2 : index
    %c0_1114 = arith.constant 0 : index
    %c0_1115 = arith.constant 0 : index
    %850 = vector.load %arg17[%c0_1112, %c2_1113, %c0_1114, %c0_1115] : memref<2x6x6x64xf32, #tpu.memory_space<vmem>>, vector<1x1x4x64xf32>
    %851 = vector.shape_cast %850 : vector<1x1x4x64xf32> to vector<4x64xf32>
    %852 = arith.truncf %851 : vector<4x64xf32> to vector<4x64xbf16>
    %c8_1116 = arith.constant 8 : index
    %c0_1117 = arith.constant 0 : index
    %853 = vector.load %arg18[%c8_1116, %c0_1117] : memref<32x640xbf16, #tpu.memory_space<vmem>>, vector<4x64xbf16>
    tpu.vector_store %arg18[%c8_1116, %c0_1117], %852 {strides = array<i32>} : memref<32x640xbf16, #tpu.memory_space<vmem>>, vector<4x64xbf16>,
    %c0_1118 = arith.constant 0 : index
    %c3_1119 = arith.constant 3 : index
    %c0_1120 = arith.constant 0 : index
    %c0_1121 = arith.constant 0 : index
    %854 = vector.load %arg17[%c0_1118, %c3_1119, %c0_1120, %c0_1121] : memref<2x6x6x64xf32, #tpu.memory_space<vmem>>, vector<1x1x4x64xf32>
    %855 = vector.shape_cast %854 : vector<1x1x4x64xf32> to vector<4x64xf32>
    %856 = arith.truncf %855 : vector<4x64xf32> to vector<4x64xbf16>
    %c12 = arith.constant 12 : index
    %c0_1122 = arith.constant 0 : index
    %857 = vector.load %arg18[%c12, %c0_1122] : memref<32x640xbf16, #tpu.memory_space<vmem>>, vector<4x64xbf16>
    tpu.vector_store %arg18[%c12, %c0_1122], %856 {strides = array<i32>} : memref<32x640xbf16, #tpu.memory_space<vmem>>, vector<4x64xbf16>,
    %c1_1123 = arith.constant 1 : index
    %c0_1124 = arith.constant 0 : index
    %c0_1125 = arith.constant 0 : index
    %c0_1126 = arith.constant 0 : index
    %858 = vector.load %arg17[%c1_1123, %c0_1124, %c0_1125, %c0_1126] : memref<2x6x6x64xf32, #tpu.memory_space<vmem>>, vector<1x1x4x64xf32>
    %859 = vector.shape_cast %858 : vector<1x1x4x64xf32> to vector<4x64xf32>
    %860 = arith.truncf %859 : vector<4x64xf32> to vector<4x64xbf16>
    %c16_1127 = arith.constant 16 : index
    %c0_1128 = arith.constant 0 : index
    %861 = vector.load %arg18[%c16_1127, %c0_1128] : memref<32x640xbf16, #tpu.memory_space<vmem>>, vector<4x64xbf16>
    tpu.vector_store %arg18[%c16_1127, %c0_1128], %860 {strides = array<i32>} : memref<32x640xbf16, #tpu.memory_space<vmem>>, vector<4x64xbf16>,
    %c1_1129 = arith.constant 1 : index
    %c1_1130 = arith.constant 1 : index
    %c0_1131 = arith.constant 0 : index
    %c0_1132 = arith.constant 0 : index
    %862 = vector.load %arg17[%c1_1129, %c1_1130, %c0_1131, %c0_1132] : memref<2x6x6x64xf32, #tpu.memory_space<vmem>>, vector<1x1x4x64xf32>
    %863 = vector.shape_cast %862 : vector<1x1x4x64xf32> to vector<4x64xf32>
    %864 = arith.truncf %863 : vector<4x64xf32> to vector<4x64xbf16>
    %c20 = arith.constant 20 : index
    %c0_1133 = arith.constant 0 : index
    %865 = vector.load %arg18[%c20, %c0_1133] : memref<32x640xbf16, #tpu.memory_space<vmem>>, vector<4x64xbf16>
    tpu.vector_store %arg18[%c20, %c0_1133], %864 {strides = array<i32>} : memref<32x640xbf16, #tpu.memory_space<vmem>>, vector<4x64xbf16>,
    %c1_1134 = arith.constant 1 : index
    %c2_1135 = arith.constant 2 : index
    %c0_1136 = arith.constant 0 : index
    %c0_1137 = arith.constant 0 : index
    %866 = vector.load %arg17[%c1_1134, %c2_1135, %c0_1136, %c0_1137] : memref<2x6x6x64xf32, #tpu.memory_space<vmem>>, vector<1x1x4x64xf32>
    %867 = vector.shape_cast %866 : vector<1x1x4x64xf32> to vector<4x64xf32>
    %868 = arith.truncf %867 : vector<4x64xf32> to vector<4x64xbf16>
    %c24_1138 = arith.constant 24 : index
    %c0_1139 = arith.constant 0 : index
    %869 = vector.load %arg18[%c24_1138, %c0_1139] : memref<32x640xbf16, #tpu.memory_space<vmem>>, vector<4x64xbf16>
    tpu.vector_store %arg18[%c24_1138, %c0_1139], %868 {strides = array<i32>} : memref<32x640xbf16, #tpu.memory_space<vmem>>, vector<4x64xbf16>,
    %c1_1140 = arith.constant 1 : index
    %c3_1141 = arith.constant 3 : index
    %c0_1142 = arith.constant 0 : index
    %c0_1143 = arith.constant 0 : index
    %870 = vector.load %arg17[%c1_1140, %c3_1141, %c0_1142, %c0_1143] : memref<2x6x6x64xf32, #tpu.memory_space<vmem>>, vector<1x1x4x64xf32>
    %871 = vector.shape_cast %870 : vector<1x1x4x64xf32> to vector<4x64xf32>
    %872 = arith.truncf %871 : vector<4x64xf32> to vector<4x64xbf16>
    %c28 = arith.constant 28 : index
    %c0_1144 = arith.constant 0 : index
    %873 = vector.load %arg18[%c28, %c0_1144] : memref<32x640xbf16, #tpu.memory_space<vmem>>, vector<4x64xbf16>
    tpu.vector_store %arg18[%c28, %c0_1144], %872 {strides = array<i32>} : memref<32x640xbf16, #tpu.memory_space<vmem>>, vector<4x64xbf16>,
    %c0_1145 = arith.constant 0 : index
    %c0_1146 = arith.constant 0 : index
    %c1_1147 = arith.constant 1 : index
    %c0_1148 = arith.constant 0 : index
    %874 = vector.load %arg17[%c0_1145, %c0_1146, %c1_1147, %c0_1148] : memref<2x6x6x64xf32, #tpu.memory_space<vmem>>, vector<1x1x4x64xf32>
    %875 = vector.shape_cast %874 : vector<1x1x4x64xf32> to vector<4x64xf32>
    %876 = arith.truncf %875 : vector<4x64xf32> to vector<4x64xbf16>
    %c0_1149 = arith.constant 0 : index
    %c64_1150 = arith.constant 64 : index
    %877 = vector.load %arg18[%c0_1149, %c64_1150] : memref<32x640xbf16, #tpu.memory_space<vmem>>, vector<4x64xbf16>
    tpu.vector_store %arg18[%c0_1149, %c64_1150], %876 {strides = array<i32>} : memref<32x640xbf16, #tpu.memory_space<vmem>>, vector<4x64xbf16>,
    %c0_1151 = arith.constant 0 : index
    %c1_1152 = arith.constant 1 : index
    %c1_1153 = arith.constant 1 : index
    %c0_1154 = arith.constant 0 : index
    %878 = vector.load %arg17[%c0_1151, %c1_1152, %c1_1153, %c0_1154] : memref<2x6x6x64xf32, #tpu.memory_space<vmem>>, vector<1x1x4x64xf32>
    %879 = vector.shape_cast %878 : vector<1x1x4x64xf32> to vector<4x64xf32>
    %880 = arith.truncf %879 : vector<4x64xf32> to vector<4x64xbf16>
    %c4_1155 = arith.constant 4 : index
    %c64_1156 = arith.constant 64 : index
    %881 = vector.load %arg18[%c4_1155, %c64_1156] : memref<32x640xbf16, #tpu.memory_space<vmem>>, vector<4x64xbf16>
    tpu.vector_store %arg18[%c4_1155, %c64_1156], %880 {strides = array<i32>} : memref<32x640xbf16, #tpu.memory_space<vmem>>, vector<4x64xbf16>,
    %c0_1157 = arith.constant 0 : index
    %c2_1158 = arith.constant 2 : index
    %c1_1159 = arith.constant 1 : index
    %c0_1160 = arith.constant 0 : index
    %882 = vector.load %arg17[%c0_1157, %c2_1158, %c1_1159, %c0_1160] : memref<2x6x6x64xf32, #tpu.memory_space<vmem>>, vector<1x1x4x64xf32>
    %883 = vector.shape_cast %882 : vector<1x1x4x64xf32> to vector<4x64xf32>
    %884 = arith.truncf %883 : vector<4x64xf32> to vector<4x64xbf16>
    %c8_1161 = arith.constant 8 : index
    %c64_1162 = arith.constant 64 : index
    %885 = vector.load %arg18[%c8_1161, %c64_1162] : memref<32x640xbf16, #tpu.memory_space<vmem>>, vector<4x64xbf16>
    tpu.vector_store %arg18[%c8_1161, %c64_1162], %884 {strides = array<i32>} : memref<32x640xbf16, #tpu.memory_space<vmem>>, vector<4x64xbf16>,
    %c0_1163 = arith.constant 0 : index
    %c3_1164 = arith.constant 3 : index
    %c1_1165 = arith.constant 1 : index
    %c0_1166 = arith.constant 0 : index
    %886 = vector.load %arg17[%c0_1163, %c3_1164, %c1_1165, %c0_1166] : memref<2x6x6x64xf32, #tpu.memory_space<vmem>>, vector<1x1x4x64xf32>
    %887 = vector.shape_cast %886 : vector<1x1x4x64xf32> to vector<4x64xf32>
    %888 = arith.truncf %887 : vector<4x64xf32> to vector<4x64xbf16>
    %c12_1167 = arith.constant 12 : index
    %c64_1168 = arith.constant 64 : index
    %889 = vector.load %arg18[%c12_1167, %c64_1168] : memref<32x640xbf16, #tpu.memory_space<vmem>>, vector<4x64xbf16>
    tpu.vector_store %arg18[%c12_1167, %c64_1168], %888 {strides = array<i32>} : memref<32x640xbf16, #tpu.memory_space<vmem>>, vector<4x64xbf16>,
    %c1_1169 = arith.constant 1 : index
    %c0_1170 = arith.constant 0 : index
    %c1_1171 = arith.constant 1 : index
    %c0_1172 = arith.constant 0 : index
    %890 = vector.load %arg17[%c1_1169, %c0_1170, %c1_1171, %c0_1172] : memref<2x6x6x64xf32, #tpu.memory_space<vmem>>, vector<1x1x4x64xf32>
    %891 = vector.shape_cast %890 : vector<1x1x4x64xf32> to vector<4x64xf32>
    %892 = arith.truncf %891 : vector<4x64xf32> to vector<4x64xbf16>
    %c16_1173 = arith.constant 16 : index
    %c64_1174 = arith.constant 64 : index
    %893 = vector.load %arg18[%c16_1173, %c64_1174] : memref<32x640xbf16, #tpu.memory_space<vmem>>, vector<4x64xbf16>
    tpu.vector_store %arg18[%c16_1173, %c64_1174], %892 {strides = array<i32>} : memref<32x640xbf16, #tpu.memory_space<vmem>>, vector<4x64xbf16>,
    %c1_1175 = arith.constant 1 : index
    %c1_1176 = arith.constant 1 : index
    %c1_1177 = arith.constant 1 : index
    %c0_1178 = arith.constant 0 : index
    %894 = vector.load %arg17[%c1_1175, %c1_1176, %c1_1177, %c0_1178] : memref<2x6x6x64xf32, #tpu.memory_space<vmem>>, vector<1x1x4x64xf32>
    %895 = vector.shape_cast %894 : vector<1x1x4x64xf32> to vector<4x64xf32>
    %896 = arith.truncf %895 : vector<4x64xf32> to vector<4x64xbf16>
    %c20_1179 = arith.constant 20 : index
    %c64_1180 = arith.constant 64 : index
    %897 = vector.load %arg18[%c20_1179, %c64_1180] : memref<32x640xbf16, #tpu.memory_space<vmem>>, vector<4x64xbf16>
    tpu.vector_store %arg18[%c20_1179, %c64_1180], %896 {strides = array<i32>} : memref<32x640xbf16, #tpu.memory_space<vmem>>, vector<4x64xbf16>,
    %c1_1181 = arith.constant 1 : index
    %c2_1182 = arith.constant 2 : index
    %c1_1183 = arith.constant 1 : index
    %c0_1184 = arith.constant 0 : index
    %898 = vector.load %arg17[%c1_1181, %c2_1182, %c1_1183, %c0_1184] : memref<2x6x6x64xf32, #tpu.memory_space<vmem>>, vector<1x1x4x64xf32>
    %899 = vector.shape_cast %898 : vector<1x1x4x64xf32> to vector<4x64xf32>
    %900 = arith.truncf %899 : vector<4x64xf32> to vector<4x64xbf16>
    %c24_1185 = arith.constant 24 : index
    %c64_1186 = arith.constant 64 : index
    %901 = vector.load %arg18[%c24_1185, %c64_1186] : memref<32x640xbf16, #tpu.memory_space<vmem>>, vector<4x64xbf16>
    tpu.vector_store %arg18[%c24_1185, %c64_1186], %900 {strides = array<i32>} : memref<32x640xbf16, #tpu.memory_space<vmem>>, vector<4x64xbf16>,
    %c1_1187 = arith.constant 1 : index
    %c3_1188 = arith.constant 3 : index
    %c1_1189 = arith.constant 1 : index
    %c0_1190 = arith.constant 0 : index
    %902 = vector.load %arg17[%c1_1187, %c3_1188, %c1_1189, %c0_1190] : memref<2x6x6x64xf32, #tpu.memory_space<vmem>>, vector<1x1x4x64xf32>
    %903 = vector.shape_cast %902 : vector<1x1x4x64xf32> to vector<4x64xf32>
    %904 = arith.truncf %903 : vector<4x64xf32> to vector<4x64xbf16>
    %c28_1191 = arith.constant 28 : index
    %c64_1192 = arith.constant 64 : index
    %905 = vector.load %arg18[%c28_1191, %c64_1192] : memref<32x640xbf16, #tpu.memory_space<vmem>>, vector<4x64xbf16>
    tpu.vector_store %arg18[%c28_1191, %c64_1192], %904 {strides = array<i32>} : memref<32x640xbf16, #tpu.memory_space<vmem>>, vector<4x64xbf16>,
    %c0_1193 = arith.constant 0 : index
    %c0_1194 = arith.constant 0 : index
    %c2_1195 = arith.constant 2 : index
    %c0_1196 = arith.constant 0 : index
    %906 = vector.load %arg17[%c0_1193, %c0_1194, %c2_1195, %c0_1196] : memref<2x6x6x64xf32, #tpu.memory_space<vmem>>, vector<1x1x4x64xf32>
    %907 = vector.shape_cast %906 : vector<1x1x4x64xf32> to vector<4x64xf32>
    %908 = arith.truncf %907 : vector<4x64xf32> to vector<4x64xbf16>
    %c0_1197 = arith.constant 0 : index
    %c128_1198 = arith.constant 128 : index
    %909 = vector.load %arg18[%c0_1197, %c128_1198] : memref<32x640xbf16, #tpu.memory_space<vmem>>, vector<4x64xbf16>
    tpu.vector_store %arg18[%c0_1197, %c128_1198], %908 {strides = array<i32>} : memref<32x640xbf16, #tpu.memory_space<vmem>>, vector<4x64xbf16>,
    %c0_1199 = arith.constant 0 : index
    %c1_1200 = arith.constant 1 : index
    %c2_1201 = arith.constant 2 : index
    %c0_1202 = arith.constant 0 : index
    %910 = vector.load %arg17[%c0_1199, %c1_1200, %c2_1201, %c0_1202] : memref<2x6x6x64xf32, #tpu.memory_space<vmem>>, vector<1x1x4x64xf32>
    %911 = vector.shape_cast %910 : vector<1x1x4x64xf32> to vector<4x64xf32>
    %912 = arith.truncf %911 : vector<4x64xf32> to vector<4x64xbf16>
    %c4_1203 = arith.constant 4 : index
    %c128_1204 = arith.constant 128 : index
    %913 = vector.load %arg18[%c4_1203, %c128_1204] : memref<32x640xbf16, #tpu.memory_space<vmem>>, vector<4x64xbf16>
    tpu.vector_store %arg18[%c4_1203, %c128_1204], %912 {strides = array<i32>} : memref<32x640xbf16, #tpu.memory_space<vmem>>, vector<4x64xbf16>,
    %c0_1205 = arith.constant 0 : index
    %c2_1206 = arith.constant 2 : index
    %c2_1207 = arith.constant 2 : index
    %c0_1208 = arith.constant 0 : index
    %914 = vector.load %arg17[%c0_1205, %c2_1206, %c2_1207, %c0_1208] : memref<2x6x6x64xf32, #tpu.memory_space<vmem>>, vector<1x1x4x64xf32>
    %915 = vector.shape_cast %914 : vector<1x1x4x64xf32> to vector<4x64xf32>
    %916 = arith.truncf %915 : vector<4x64xf32> to vector<4x64xbf16>
    %c8_1209 = arith.constant 8 : index
    %c128_1210 = arith.constant 128 : index
    %917 = vector.load %arg18[%c8_1209, %c128_1210] : memref<32x640xbf16, #tpu.memory_space<vmem>>, vector<4x64xbf16>
    tpu.vector_store %arg18[%c8_1209, %c128_1210], %916 {strides = array<i32>} : memref<32x640xbf16, #tpu.memory_space<vmem>>, vector<4x64xbf16>,
    %c0_1211 = arith.constant 0 : index
    %c3_1212 = arith.constant 3 : index
    %c2_1213 = arith.constant 2 : index
    %c0_1214 = arith.constant 0 : index
    %918 = vector.load %arg17[%c0_1211, %c3_1212, %c2_1213, %c0_1214] : memref<2x6x6x64xf32, #tpu.memory_space<vmem>>, vector<1x1x4x64xf32>
    %919 = vector.shape_cast %918 : vector<1x1x4x64xf32> to vector<4x64xf32>
    %920 = arith.truncf %919 : vector<4x64xf32> to vector<4x64xbf16>
    %c12_1215 = arith.constant 12 : index
    %c128_1216 = arith.constant 128 : index
    %921 = vector.load %arg18[%c12_1215, %c128_1216] : memref<32x640xbf16, #tpu.memory_space<vmem>>, vector<4x64xbf16>
    tpu.vector_store %arg18[%c12_1215, %c128_1216], %920 {strides = array<i32>} : memref<32x640xbf16, #tpu.memory_space<vmem>>, vector<4x64xbf16>,
    %c1_1217 = arith.constant 1 : index
    %c0_1218 = arith.constant 0 : index
    %c2_1219 = arith.constant 2 : index
    %c0_1220 = arith.constant 0 : index
    %922 = vector.load %arg17[%c1_1217, %c0_1218, %c2_1219, %c0_1220] : memref<2x6x6x64xf32, #tpu.memory_space<vmem>>, vector<1x1x4x64xf32>
    %923 = vector.shape_cast %922 : vector<1x1x4x64xf32> to vector<4x64xf32>
    %924 = arith.truncf %923 : vector<4x64xf32> to vector<4x64xbf16>
    %c16_1221 = arith.constant 16 : index
    %c128_1222 = arith.constant 128 : index
    %925 = vector.load %arg18[%c16_1221, %c128_1222] : memref<32x640xbf16, #tpu.memory_space<vmem>>, vector<4x64xbf16>
    tpu.vector_store %arg18[%c16_1221, %c128_1222], %924 {strides = array<i32>} : memref<32x640xbf16, #tpu.memory_space<vmem>>, vector<4x64xbf16>,
    %c1_1223 = arith.constant 1 : index
    %c1_1224 = arith.constant 1 : index
    %c2_1225 = arith.constant 2 : index
    %c0_1226 = arith.constant 0 : index
    %926 = vector.load %arg17[%c1_1223, %c1_1224, %c2_1225, %c0_1226] : memref<2x6x6x64xf32, #tpu.memory_space<vmem>>, vector<1x1x4x64xf32>
    %927 = vector.shape_cast %926 : vector<1x1x4x64xf32> to vector<4x64xf32>
    %928 = arith.truncf %927 : vector<4x64xf32> to vector<4x64xbf16>
    %c20_1227 = arith.constant 20 : index
    %c128_1228 = arith.constant 128 : index
    %929 = vector.load %arg18[%c20_1227, %c128_1228] : memref<32x640xbf16, #tpu.memory_space<vmem>>, vector<4x64xbf16>
    tpu.vector_store %arg18[%c20_1227, %c128_1228], %928 {strides = array<i32>} : memref<32x640xbf16, #tpu.memory_space<vmem>>, vector<4x64xbf16>,
    %c1_1229 = arith.constant 1 : index
    %c2_1230 = arith.constant 2 : index
    %c2_1231 = arith.constant 2 : index
    %c0_1232 = arith.constant 0 : index
    %930 = vector.load %arg17[%c1_1229, %c2_1230, %c2_1231, %c0_1232] : memref<2x6x6x64xf32, #tpu.memory_space<vmem>>, vector<1x1x4x64xf32>
    %931 = vector.shape_cast %930 : vector<1x1x4x64xf32> to vector<4x64xf32>
    %932 = arith.truncf %931 : vector<4x64xf32> to vector<4x64xbf16>
    %c24_1233 = arith.constant 24 : index
    %c128_1234 = arith.constant 128 : index
    %933 = vector.load %arg18[%c24_1233, %c128_1234] : memref<32x640xbf16, #tpu.memory_space<vmem>>, vector<4x64xbf16>
    tpu.vector_store %arg18[%c24_1233, %c128_1234], %932 {strides = array<i32>} : memref<32x640xbf16, #tpu.memory_space<vmem>>, vector<4x64xbf16>,
    %c1_1235 = arith.constant 1 : index
    %c3_1236 = arith.constant 3 : index
    %c2_1237 = arith.constant 2 : index
    %c0_1238 = arith.constant 0 : index
    %934 = vector.load %arg17[%c1_1235, %c3_1236, %c2_1237, %c0_1238] : memref<2x6x6x64xf32, #tpu.memory_space<vmem>>, vector<1x1x4x64xf32>
    %935 = vector.shape_cast %934 : vector<1x1x4x64xf32> to vector<4x64xf32>
    %936 = arith.truncf %935 : vector<4x64xf32> to vector<4x64xbf16>
    %c28_1239 = arith.constant 28 : index
    %c128_1240 = arith.constant 128 : index
    %937 = vector.load %arg18[%c28_1239, %c128_1240] : memref<32x640xbf16, #tpu.memory_space<vmem>>, vector<4x64xbf16>
    tpu.vector_store %arg18[%c28_1239, %c128_1240], %936 {strides = array<i32>} : memref<32x640xbf16, #tpu.memory_space<vmem>>, vector<4x64xbf16>,
    %c0_1241 = arith.constant 0 : index
    %c1_1242 = arith.constant 1 : index
    %c0_1243 = arith.constant 0 : index
    %c0_1244 = arith.constant 0 : index
    %938 = vector.load %arg17[%c0_1241, %c1_1242, %c0_1243, %c0_1244] : memref<2x6x6x64xf32, #tpu.memory_space<vmem>>, vector<1x1x4x64xf32>
    %939 = vector.shape_cast %938 : vector<1x1x4x64xf32> to vector<4x64xf32>
    %940 = arith.truncf %939 : vector<4x64xf32> to vector<4x64xbf16>
    %c0_1245 = arith.constant 0 : index
    %c192_1246 = arith.constant 192 : index
    %941 = vector.load %arg18[%c0_1245, %c192_1246] : memref<32x640xbf16, #tpu.memory_space<vmem>>, vector<4x64xbf16>
    tpu.vector_store %arg18[%c0_1245, %c192_1246], %940 {strides = array<i32>} : memref<32x640xbf16, #tpu.memory_space<vmem>>, vector<4x64xbf16>,
    %c0_1247 = arith.constant 0 : index
    %c2_1248 = arith.constant 2 : index
    %c0_1249 = arith.constant 0 : index
    %c0_1250 = arith.constant 0 : index
    %942 = vector.load %arg17[%c0_1247, %c2_1248, %c0_1249, %c0_1250] : memref<2x6x6x64xf32, #tpu.memory_space<vmem>>, vector<1x1x4x64xf32>
    %943 = vector.shape_cast %942 : vector<1x1x4x64xf32> to vector<4x64xf32>
    %944 = arith.truncf %943 : vector<4x64xf32> to vector<4x64xbf16>
    %c4_1251 = arith.constant 4 : index
    %c192_1252 = arith.constant 192 : index
    %945 = vector.load %arg18[%c4_1251, %c192_1252] : memref<32x640xbf16, #tpu.memory_space<vmem>>, vector<4x64xbf16>
    tpu.vector_store %arg18[%c4_1251, %c192_1252], %944 {strides = array<i32>} : memref<32x640xbf16, #tpu.memory_space<vmem>>, vector<4x64xbf16>,
    %c0_1253 = arith.constant 0 : index
    %c3_1254 = arith.constant 3 : index
    %c0_1255 = arith.constant 0 : index
    %c0_1256 = arith.constant 0 : index
    %946 = vector.load %arg17[%c0_1253, %c3_1254, %c0_1255, %c0_1256] : memref<2x6x6x64xf32, #tpu.memory_space<vmem>>, vector<1x1x4x64xf32>
    %947 = vector.shape_cast %946 : vector<1x1x4x64xf32> to vector<4x64xf32>
    %948 = arith.truncf %947 : vector<4x64xf32> to vector<4x64xbf16>
    %c8_1257 = arith.constant 8 : index
    %c192_1258 = arith.constant 192 : index
    %949 = vector.load %arg18[%c8_1257, %c192_1258] : memref<32x640xbf16, #tpu.memory_space<vmem>>, vector<4x64xbf16>
    tpu.vector_store %arg18[%c8_1257, %c192_1258], %948 {strides = array<i32>} : memref<32x640xbf16, #tpu.memory_space<vmem>>, vector<4x64xbf16>,
    %c0_1259 = arith.constant 0 : index
    %c4_1260 = arith.constant 4 : index
    %c0_1261 = arith.constant 0 : index
    %c0_1262 = arith.constant 0 : index
    %950 = vector.load %arg17[%c0_1259, %c4_1260, %c0_1261, %c0_1262] : memref<2x6x6x64xf32, #tpu.memory_space<vmem>>, vector<1x1x4x64xf32>
    %951 = vector.shape_cast %950 : vector<1x1x4x64xf32> to vector<4x64xf32>
    %952 = arith.truncf %951 : vector<4x64xf32> to vector<4x64xbf16>
    %c12_1263 = arith.constant 12 : index
    %c192_1264 = arith.constant 192 : index
    %953 = vector.load %arg18[%c12_1263, %c192_1264] : memref<32x640xbf16, #tpu.memory_space<vmem>>, vector<4x64xbf16>
    tpu.vector_store %arg18[%c12_1263, %c192_1264], %952 {strides = array<i32>} : memref<32x640xbf16, #tpu.memory_space<vmem>>, vector<4x64xbf16>,
    %c1_1265 = arith.constant 1 : index
    %c1_1266 = arith.constant 1 : index
    %c0_1267 = arith.constant 0 : index
    %c0_1268 = arith.constant 0 : index
    %954 = vector.load %arg17[%c1_1265, %c1_1266, %c0_1267, %c0_1268] : memref<2x6x6x64xf32, #tpu.memory_space<vmem>>, vector<1x1x4x64xf32>
    %955 = vector.shape_cast %954 : vector<1x1x4x64xf32> to vector<4x64xf32>
    %956 = arith.truncf %955 : vector<4x64xf32> to vector<4x64xbf16>
    %c16_1269 = arith.constant 16 : index
    %c192_1270 = arith.constant 192 : index
    %957 = vector.load %arg18[%c16_1269, %c192_1270] : memref<32x640xbf16, #tpu.memory_space<vmem>>, vector<4x64xbf16>
    tpu.vector_store %arg18[%c16_1269, %c192_1270], %956 {strides = array<i32>} : memref<32x640xbf16, #tpu.memory_space<vmem>>, vector<4x64xbf16>,
    %c1_1271 = arith.constant 1 : index
    %c2_1272 = arith.constant 2 : index
    %c0_1273 = arith.constant 0 : index
    %c0_1274 = arith.constant 0 : index
    %958 = vector.load %arg17[%c1_1271, %c2_1272, %c0_1273, %c0_1274] : memref<2x6x6x64xf32, #tpu.memory_space<vmem>>, vector<1x1x4x64xf32>
    %959 = vector.shape_cast %958 : vector<1x1x4x64xf32> to vector<4x64xf32>
    %960 = arith.truncf %959 : vector<4x64xf32> to vector<4x64xbf16>
    %c20_1275 = arith.constant 20 : index
    %c192_1276 = arith.constant 192 : index
    %961 = vector.load %arg18[%c20_1275, %c192_1276] : memref<32x640xbf16, #tpu.memory_space<vmem>>, vector<4x64xbf16>
    tpu.vector_store %arg18[%c20_1275, %c192_1276], %960 {strides = array<i32>} : memref<32x640xbf16, #tpu.memory_space<vmem>>, vector<4x64xbf16>,
    %c1_1277 = arith.constant 1 : index
    %c3_1278 = arith.constant 3 : index
    %c0_1279 = arith.constant 0 : index
    %c0_1280 = arith.constant 0 : index
    %962 = vector.load %arg17[%c1_1277, %c3_1278, %c0_1279, %c0_1280] : memref<2x6x6x64xf32, #tpu.memory_space<vmem>>, vector<1x1x4x64xf32>
    %963 = vector.shape_cast %962 : vector<1x1x4x64xf32> to vector<4x64xf32>
    %964 = arith.truncf %963 : vector<4x64xf32> to vector<4x64xbf16>
    %c24_1281 = arith.constant 24 : index
    %c192_1282 = arith.constant 192 : index
    %965 = vector.load %arg18[%c24_1281, %c192_1282] : memref<32x640xbf16, #tpu.memory_space<vmem>>, vector<4x64xbf16>
    tpu.vector_store %arg18[%c24_1281, %c192_1282], %964 {strides = array<i32>} : memref<32x640xbf16, #tpu.memory_space<vmem>>, vector<4x64xbf16>,
    %c1_1283 = arith.constant 1 : index
    %c4_1284 = arith.constant 4 : index
    %c0_1285 = arith.constant 0 : index
    %c0_1286 = arith.constant 0 : index
    %966 = vector.load %arg17[%c1_1283, %c4_1284, %c0_1285, %c0_1286] : memref<2x6x6x64xf32, #tpu.memory_space<vmem>>, vector<1x1x4x64xf32>
    %967 = vector.shape_cast %966 : vector<1x1x4x64xf32> to vector<4x64xf32>
    %968 = arith.truncf %967 : vector<4x64xf32> to vector<4x64xbf16>
    %c28_1287 = arith.constant 28 : index
    %c192_1288 = arith.constant 192 : index
    %969 = vector.load %arg18[%c28_1287, %c192_1288] : memref<32x640xbf16, #tpu.memory_space<vmem>>, vector<4x64xbf16>
    tpu.vector_store %arg18[%c28_1287, %c192_1288], %968 {strides = array<i32>} : memref<32x640xbf16, #tpu.memory_space<vmem>>, vector<4x64xbf16>,
    %c0_1289 = arith.constant 0 : index
    %c1_1290 = arith.constant 1 : index
    %c1_1291 = arith.constant 1 : index
    %c0_1292 = arith.constant 0 : index
    %970 = vector.load %arg17[%c0_1289, %c1_1290, %c1_1291, %c0_1292] : memref<2x6x6x64xf32, #tpu.memory_space<vmem>>, vector<1x1x4x64xf32>
    %971 = vector.shape_cast %970 : vector<1x1x4x64xf32> to vector<4x64xf32>
    %972 = arith.truncf %971 : vector<4x64xf32> to vector<4x64xbf16>
    %c0_1293 = arith.constant 0 : index
    %c256_1294 = arith.constant 256 : index
    %973 = vector.load %arg18[%c0_1293, %c256_1294] : memref<32x640xbf16, #tpu.memory_space<vmem>>, vector<4x64xbf16>
    tpu.vector_store %arg18[%c0_1293, %c256_1294], %972 {strides = array<i32>} : memref<32x640xbf16, #tpu.memory_space<vmem>>, vector<4x64xbf16>,
    %c0_1295 = arith.constant 0 : index
    %c2_1296 = arith.constant 2 : index
    %c1_1297 = arith.constant 1 : index
    %c0_1298 = arith.constant 0 : index
    %974 = vector.load %arg17[%c0_1295, %c2_1296, %c1_1297, %c0_1298] : memref<2x6x6x64xf32, #tpu.memory_space<vmem>>, vector<1x1x4x64xf32>
    %975 = vector.shape_cast %974 : vector<1x1x4x64xf32> to vector<4x64xf32>
    %976 = arith.truncf %975 : vector<4x64xf32> to vector<4x64xbf16>
    %c4_1299 = arith.constant 4 : index
    %c256_1300 = arith.constant 256 : index
    %977 = vector.load %arg18[%c4_1299, %c256_1300] : memref<32x640xbf16, #tpu.memory_space<vmem>>, vector<4x64xbf16>
    tpu.vector_store %arg18[%c4_1299, %c256_1300], %976 {strides = array<i32>} : memref<32x640xbf16, #tpu.memory_space<vmem>>, vector<4x64xbf16>,
    %c0_1301 = arith.constant 0 : index
    %c3_1302 = arith.constant 3 : index
    %c1_1303 = arith.constant 1 : index
    %c0_1304 = arith.constant 0 : index
    %978 = vector.load %arg17[%c0_1301, %c3_1302, %c1_1303, %c0_1304] : memref<2x6x6x64xf32, #tpu.memory_space<vmem>>, vector<1x1x4x64xf32>
    %979 = vector.shape_cast %978 : vector<1x1x4x64xf32> to vector<4x64xf32>
    %980 = arith.truncf %979 : vector<4x64xf32> to vector<4x64xbf16>
    %c8_1305 = arith.constant 8 : index
    %c256_1306 = arith.constant 256 : index
    %981 = vector.load %arg18[%c8_1305, %c256_1306] : memref<32x640xbf16, #tpu.memory_space<vmem>>, vector<4x64xbf16>
    tpu.vector_store %arg18[%c8_1305, %c256_1306], %980 {strides = array<i32>} : memref<32x640xbf16, #tpu.memory_space<vmem>>, vector<4x64xbf16>,
    %c0_1307 = arith.constant 0 : index
    %c4_1308 = arith.constant 4 : index
    %c1_1309 = arith.constant 1 : index
    %c0_1310 = arith.constant 0 : index
    %982 = vector.load %arg17[%c0_1307, %c4_1308, %c1_1309, %c0_1310] : memref<2x6x6x64xf32, #tpu.memory_space<vmem>>, vector<1x1x4x64xf32>
    %983 = vector.shape_cast %982 : vector<1x1x4x64xf32> to vector<4x64xf32>
    %984 = arith.truncf %983 : vector<4x64xf32> to vector<4x64xbf16>
    %c12_1311 = arith.constant 12 : index
    %c256_1312 = arith.constant 256 : index
    %985 = vector.load %arg18[%c12_1311, %c256_1312] : memref<32x640xbf16, #tpu.memory_space<vmem>>, vector<4x64xbf16>
    tpu.vector_store %arg18[%c12_1311, %c256_1312], %984 {strides = array<i32>} : memref<32x640xbf16, #tpu.memory_space<vmem>>, vector<4x64xbf16>,
    %c1_1313 = arith.constant 1 : index
    %c1_1314 = arith.constant 1 : index
    %c1_1315 = arith.constant 1 : index
    %c0_1316 = arith.constant 0 : index
    %986 = vector.load %arg17[%c1_1313, %c1_1314, %c1_1315, %c0_1316] : memref<2x6x6x64xf32, #tpu.memory_space<vmem>>, vector<1x1x4x64xf32>
    %987 = vector.shape_cast %986 : vector<1x1x4x64xf32> to vector<4x64xf32>
    %988 = arith.truncf %987 : vector<4x64xf32> to vector<4x64xbf16>
    %c16_1317 = arith.constant 16 : index
    %c256_1318 = arith.constant 256 : index
    %989 = vector.load %arg18[%c16_1317, %c256_1318] : memref<32x640xbf16, #tpu.memory_space<vmem>>, vector<4x64xbf16>
    tpu.vector_store %arg18[%c16_1317, %c256_1318], %988 {strides = array<i32>} : memref<32x640xbf16, #tpu.memory_space<vmem>>, vector<4x64xbf16>,
    %c1_1319 = arith.constant 1 : index
    %c2_1320 = arith.constant 2 : index
    %c1_1321 = arith.constant 1 : index
    %c0_1322 = arith.constant 0 : index
    %990 = vector.load %arg17[%c1_1319, %c2_1320, %c1_1321, %c0_1322] : memref<2x6x6x64xf32, #tpu.memory_space<vmem>>, vector<1x1x4x64xf32>
    %991 = vector.shape_cast %990 : vector<1x1x4x64xf32> to vector<4x64xf32>
    %992 = arith.truncf %991 : vector<4x64xf32> to vector<4x64xbf16>
    %c20_1323 = arith.constant 20 : index
    %c256_1324 = arith.constant 256 : index
    %993 = vector.load %arg18[%c20_1323, %c256_1324] : memref<32x640xbf16, #tpu.memory_space<vmem>>, vector<4x64xbf16>
    tpu.vector_store %arg18[%c20_1323, %c256_1324], %992 {strides = array<i32>} : memref<32x640xbf16, #tpu.memory_space<vmem>>, vector<4x64xbf16>,
    %c1_1325 = arith.constant 1 : index
    %c3_1326 = arith.constant 3 : index
    %c1_1327 = arith.constant 1 : index
    %c0_1328 = arith.constant 0 : index
    %994 = vector.load %arg17[%c1_1325, %c3_1326, %c1_1327, %c0_1328] : memref<2x6x6x64xf32, #tpu.memory_space<vmem>>, vector<1x1x4x64xf32>
    %995 = vector.shape_cast %994 : vector<1x1x4x64xf32> to vector<4x64xf32>
    %996 = arith.truncf %995 : vector<4x64xf32> to vector<4x64xbf16>
    %c24_1329 = arith.constant 24 : index
    %c256_1330 = arith.constant 256 : index
    %997 = vector.load %arg18[%c24_1329, %c256_1330] : memref<32x640xbf16, #tpu.memory_space<vmem>>, vector<4x64xbf16>
    tpu.vector_store %arg18[%c24_1329, %c256_1330], %996 {strides = array<i32>} : memref<32x640xbf16, #tpu.memory_space<vmem>>, vector<4x64xbf16>,
    %c1_1331 = arith.constant 1 : index
    %c4_1332 = arith.constant 4 : index
    %c1_1333 = arith.constant 1 : index
    %c0_1334 = arith.constant 0 : index
    %998 = vector.load %arg17[%c1_1331, %c4_1332, %c1_1333, %c0_1334] : memref<2x6x6x64xf32, #tpu.memory_space<vmem>>, vector<1x1x4x64xf32>
    %999 = vector.shape_cast %998 : vector<1x1x4x64xf32> to vector<4x64xf32>
    %1000 = arith.truncf %999 : vector<4x64xf32> to vector<4x64xbf16>
    %c28_1335 = arith.constant 28 : index
    %c256_1336 = arith.constant 256 : index
    %1001 = vector.load %arg18[%c28_1335, %c256_1336] : memref<32x640xbf16, #tpu.memory_space<vmem>>, vector<4x64xbf16>
    tpu.vector_store %arg18[%c28_1335, %c256_1336], %1000 {strides = array<i32>} : memref<32x640xbf16, #tpu.memory_space<vmem>>, vector<4x64xbf16>,
    %c0_1337 = arith.constant 0 : index
    %c1_1338 = arith.constant 1 : index
    %c2_1339 = arith.constant 2 : index
    %c0_1340 = arith.constant 0 : index
    %1002 = vector.load %arg17[%c0_1337, %c1_1338, %c2_1339, %c0_1340] : memref<2x6x6x64xf32, #tpu.memory_space<vmem>>, vector<1x1x4x64xf32>
    %1003 = vector.shape_cast %1002 : vector<1x1x4x64xf32> to vector<4x64xf32>
    %1004 = arith.truncf %1003 : vector<4x64xf32> to vector<4x64xbf16>
    %c0_1341 = arith.constant 0 : index
    %c320_1342 = arith.constant 320 : index
    %1005 = vector.load %arg18[%c0_1341, %c320_1342] : memref<32x640xbf16, #tpu.memory_space<vmem>>, vector<4x64xbf16>
    tpu.vector_store %arg18[%c0_1341, %c320_1342], %1004 {strides = array<i32>} : memref<32x640xbf16, #tpu.memory_space<vmem>>, vector<4x64xbf16>,
    %c0_1343 = arith.constant 0 : index
    %c2_1344 = arith.constant 2 : index
    %c2_1345 = arith.constant 2 : index
    %c0_1346 = arith.constant 0 : index
    %1006 = vector.load %arg17[%c0_1343, %c2_1344, %c2_1345, %c0_1346] : memref<2x6x6x64xf32, #tpu.memory_space<vmem>>, vector<1x1x4x64xf32>
    %1007 = vector.shape_cast %1006 : vector<1x1x4x64xf32> to vector<4x64xf32>
    %1008 = arith.truncf %1007 : vector<4x64xf32> to vector<4x64xbf16>
    %c4_1347 = arith.constant 4 : index
    %c320_1348 = arith.constant 320 : index
    %1009 = vector.load %arg18[%c4_1347, %c320_1348] : memref<32x640xbf16, #tpu.memory_space<vmem>>, vector<4x64xbf16>
    tpu.vector_store %arg18[%c4_1347, %c320_1348], %1008 {strides = array<i32>} : memref<32x640xbf16, #tpu.memory_space<vmem>>, vector<4x64xbf16>,
    %c0_1349 = arith.constant 0 : index
    %c3_1350 = arith.constant 3 : index
    %c2_1351 = arith.constant 2 : index
    %c0_1352 = arith.constant 0 : index
    %1010 = vector.load %arg17[%c0_1349, %c3_1350, %c2_1351, %c0_1352] : memref<2x6x6x64xf32, #tpu.memory_space<vmem>>, vector<1x1x4x64xf32>
    %1011 = vector.shape_cast %1010 : vector<1x1x4x64xf32> to vector<4x64xf32>
    %1012 = arith.truncf %1011 : vector<4x64xf32> to vector<4x64xbf16>
    %c8_1353 = arith.constant 8 : index
    %c320_1354 = arith.constant 320 : index
    %1013 = vector.load %arg18[%c8_1353, %c320_1354] : memref<32x640xbf16, #tpu.memory_space<vmem>>, vector<4x64xbf16>
    tpu.vector_store %arg18[%c8_1353, %c320_1354], %1012 {strides = array<i32>} : memref<32x640xbf16, #tpu.memory_space<vmem>>, vector<4x64xbf16>,
    %c0_1355 = arith.constant 0 : index
    %c4_1356 = arith.constant 4 : index
    %c2_1357 = arith.constant 2 : index
    %c0_1358 = arith.constant 0 : index
    %1014 = vector.load %arg17[%c0_1355, %c4_1356, %c2_1357, %c0_1358] : memref<2x6x6x64xf32, #tpu.memory_space<vmem>>, vector<1x1x4x64xf32>
    %1015 = vector.shape_cast %1014 : vector<1x1x4x64xf32> to vector<4x64xf32>
    %1016 = arith.truncf %1015 : vector<4x64xf32> to vector<4x64xbf16>
    %c12_1359 = arith.constant 12 : index
    %c320_1360 = arith.constant 320 : index
    %1017 = vector.load %arg18[%c12_1359, %c320_1360] : memref<32x640xbf16, #tpu.memory_space<vmem>>, vector<4x64xbf16>
    tpu.vector_store %arg18[%c12_1359, %c320_1360], %1016 {strides = array<i32>} : memref<32x640xbf16, #tpu.memory_space<vmem>>, vector<4x64xbf16>,
    %c1_1361 = arith.constant 1 : index
    %c1_1362 = arith.constant 1 : index
    %c2_1363 = arith.constant 2 : index
    %c0_1364 = arith.constant 0 : index
    %1018 = vector.load %arg17[%c1_1361, %c1_1362, %c2_1363, %c0_1364] : memref<2x6x6x64xf32, #tpu.memory_space<vmem>>, vector<1x1x4x64xf32>
    %1019 = vector.shape_cast %1018 : vector<1x1x4x64xf32> to vector<4x64xf32>
    %1020 = arith.truncf %1019 : vector<4x64xf32> to vector<4x64xbf16>
    %c16_1365 = arith.constant 16 : index
    %c320_1366 = arith.constant 320 : index
    %1021 = vector.load %arg18[%c16_1365, %c320_1366] : memref<32x640xbf16, #tpu.memory_space<vmem>>, vector<4x64xbf16>
    tpu.vector_store %arg18[%c16_1365, %c320_1366], %1020 {strides = array<i32>} : memref<32x640xbf16, #tpu.memory_space<vmem>>, vector<4x64xbf16>,
    %c1_1367 = arith.constant 1 : index
    %c2_1368 = arith.constant 2 : index
    %c2_1369 = arith.constant 2 : index
    %c0_1370 = arith.constant 0 : index
    %1022 = vector.load %arg17[%c1_1367, %c2_1368, %c2_1369, %c0_1370] : memref<2x6x6x64xf32, #tpu.memory_space<vmem>>, vector<1x1x4x64xf32>
    %1023 = vector.shape_cast %1022 : vector<1x1x4x64xf32> to vector<4x64xf32>
    %1024 = arith.truncf %1023 : vector<4x64xf32> to vector<4x64xbf16>
    %c20_1371 = arith.constant 20 : index
    %c320_1372 = arith.constant 320 : index
    %1025 = vector.load %arg18[%c20_1371, %c320_1372] : memref<32x640xbf16, #tpu.memory_space<vmem>>, vector<4x64xbf16>
    tpu.vector_store %arg18[%c20_1371, %c320_1372], %1024 {strides = array<i32>} : memref<32x640xbf16, #tpu.memory_space<vmem>>, vector<4x64xbf16>,
    %c1_1373 = arith.constant 1 : index
    %c3_1374 = arith.constant 3 : index
    %c2_1375 = arith.constant 2 : index
    %c0_1376 = arith.constant 0 : index
    %1026 = vector.load %arg17[%c1_1373, %c3_1374, %c2_1375, %c0_1376] : memref<2x6x6x64xf32, #tpu.memory_space<vmem>>, vector<1x1x4x64xf32>
    %1027 = vector.shape_cast %1026 : vector<1x1x4x64xf32> to vector<4x64xf32>
    %1028 = arith.truncf %1027 : vector<4x64xf32> to vector<4x64xbf16>
    %c24_1377 = arith.constant 24 : index
    %c320_1378 = arith.constant 320 : index
    %1029 = vector.load %arg18[%c24_1377, %c320_1378] : memref<32x640xbf16, #tpu.memory_space<vmem>>, vector<4x64xbf16>
    tpu.vector_store %arg18[%c24_1377, %c320_1378], %1028 {strides = array<i32>} : memref<32x640xbf16, #tpu.memory_space<vmem>>, vector<4x64xbf16>,
    %c1_1379 = arith.constant 1 : index
    %c4_1380 = arith.constant 4 : index
    %c2_1381 = arith.constant 2 : index
    %c0_1382 = arith.constant 0 : index
    %1030 = vector.load %arg17[%c1_1379, %c4_1380, %c2_1381, %c0_1382] : memref<2x6x6x64xf32, #tpu.memory_space<vmem>>, vector<1x1x4x64xf32>
    %1031 = vector.shape_cast %1030 : vector<1x1x4x64xf32> to vector<4x64xf32>
    %1032 = arith.truncf %1031 : vector<4x64xf32> to vector<4x64xbf16>
    %c28_1383 = arith.constant 28 : index
    %c320_1384 = arith.constant 320 : index
    %1033 = vector.load %arg18[%c28_1383, %c320_1384] : memref<32x640xbf16, #tpu.memory_space<vmem>>, vector<4x64xbf16>
    tpu.vector_store %arg18[%c28_1383, %c320_1384], %1032 {strides = array<i32>} : memref<32x640xbf16, #tpu.memory_space<vmem>>, vector<4x64xbf16>,
    %c0_1385 = arith.constant 0 : index
    %c2_1386 = arith.constant 2 : index
    %c0_1387 = arith.constant 0 : index
    %c0_1388 = arith.constant 0 : index
    %1034 = vector.load %arg17[%c0_1385, %c2_1386, %c0_1387, %c0_1388] : memref<2x6x6x64xf32, #tpu.memory_space<vmem>>, vector<1x1x4x64xf32>
    %1035 = vector.shape_cast %1034 : vector<1x1x4x64xf32> to vector<4x64xf32>
    %1036 = arith.truncf %1035 : vector<4x64xf32> to vector<4x64xbf16>
    %c0_1389 = arith.constant 0 : index
    %c384_1390 = arith.constant 384 : index
    %1037 = vector.load %arg18[%c0_1389, %c384_1390] : memref<32x640xbf16, #tpu.memory_space<vmem>>, vector<4x64xbf16>
    tpu.vector_store %arg18[%c0_1389, %c384_1390], %1036 {strides = array<i32>} : memref<32x640xbf16, #tpu.memory_space<vmem>>, vector<4x64xbf16>,
    %c0_1391 = arith.constant 0 : index
    %c3_1392 = arith.constant 3 : index
    %c0_1393 = arith.constant 0 : index
    %c0_1394 = arith.constant 0 : index
    %1038 = vector.load %arg17[%c0_1391, %c3_1392, %c0_1393, %c0_1394] : memref<2x6x6x64xf32, #tpu.memory_space<vmem>>, vector<1x1x4x64xf32>
    %1039 = vector.shape_cast %1038 : vector<1x1x4x64xf32> to vector<4x64xf32>
    %1040 = arith.truncf %1039 : vector<4x64xf32> to vector<4x64xbf16>
    %c4_1395 = arith.constant 4 : index
    %c384_1396 = arith.constant 384 : index
    %1041 = vector.load %arg18[%c4_1395, %c384_1396] : memref<32x640xbf16, #tpu.memory_space<vmem>>, vector<4x64xbf16>
    tpu.vector_store %arg18[%c4_1395, %c384_1396], %1040 {strides = array<i32>} : memref<32x640xbf16, #tpu.memory_space<vmem>>, vector<4x64xbf16>,
    %c0_1397 = arith.constant 0 : index
    %c4_1398 = arith.constant 4 : index
    %c0_1399 = arith.constant 0 : index
    %c0_1400 = arith.constant 0 : index
    %1042 = vector.load %arg17[%c0_1397, %c4_1398, %c0_1399, %c0_1400] : memref<2x6x6x64xf32, #tpu.memory_space<vmem>>, vector<1x1x4x64xf32>
    %1043 = vector.shape_cast %1042 : vector<1x1x4x64xf32> to vector<4x64xf32>
    %1044 = arith.truncf %1043 : vector<4x64xf32> to vector<4x64xbf16>
    %c8_1401 = arith.constant 8 : index
    %c384_1402 = arith.constant 384 : index
    %1045 = vector.load %arg18[%c8_1401, %c384_1402] : memref<32x640xbf16, #tpu.memory_space<vmem>>, vector<4x64xbf16>
    tpu.vector_store %arg18[%c8_1401, %c384_1402], %1044 {strides = array<i32>} : memref<32x640xbf16, #tpu.memory_space<vmem>>, vector<4x64xbf16>,
    %c0_1403 = arith.constant 0 : index
    %c5_1404 = arith.constant 5 : index
    %c0_1405 = arith.constant 0 : index
    %c0_1406 = arith.constant 0 : index
    %1046 = vector.load %arg17[%c0_1403, %c5_1404, %c0_1405, %c0_1406] : memref<2x6x6x64xf32, #tpu.memory_space<vmem>>, vector<1x1x4x64xf32>
    %1047 = vector.shape_cast %1046 : vector<1x1x4x64xf32> to vector<4x64xf32>
    %1048 = arith.truncf %1047 : vector<4x64xf32> to vector<4x64xbf16>
    %c12_1407 = arith.constant 12 : index
    %c384_1408 = arith.constant 384 : index
    %1049 = vector.load %arg18[%c12_1407, %c384_1408] : memref<32x640xbf16, #tpu.memory_space<vmem>>, vector<4x64xbf16>
    tpu.vector_store %arg18[%c12_1407, %c384_1408], %1048 {strides = array<i32>} : memref<32x640xbf16, #tpu.memory_space<vmem>>, vector<4x64xbf16>,
    %c1_1409 = arith.constant 1 : index
    %c2_1410 = arith.constant 2 : index
    %c0_1411 = arith.constant 0 : index
    %c0_1412 = arith.constant 0 : index
    %1050 = vector.load %arg17[%c1_1409, %c2_1410, %c0_1411, %c0_1412] : memref<2x6x6x64xf32, #tpu.memory_space<vmem>>, vector<1x1x4x64xf32>
    %1051 = vector.shape_cast %1050 : vector<1x1x4x64xf32> to vector<4x64xf32>
    %1052 = arith.truncf %1051 : vector<4x64xf32> to vector<4x64xbf16>
    %c16_1413 = arith.constant 16 : index
    %c384_1414 = arith.constant 384 : index
    %1053 = vector.load %arg18[%c16_1413, %c384_1414] : memref<32x640xbf16, #tpu.memory_space<vmem>>, vector<4x64xbf16>
    tpu.vector_store %arg18[%c16_1413, %c384_1414], %1052 {strides = array<i32>} : memref<32x640xbf16, #tpu.memory_space<vmem>>, vector<4x64xbf16>,
    %c1_1415 = arith.constant 1 : index
    %c3_1416 = arith.constant 3 : index
    %c0_1417 = arith.constant 0 : index
    %c0_1418 = arith.constant 0 : index
    %1054 = vector.load %arg17[%c1_1415, %c3_1416, %c0_1417, %c0_1418] : memref<2x6x6x64xf32, #tpu.memory_space<vmem>>, vector<1x1x4x64xf32>
    %1055 = vector.shape_cast %1054 : vector<1x1x4x64xf32> to vector<4x64xf32>
    %1056 = arith.truncf %1055 : vector<4x64xf32> to vector<4x64xbf16>
    %c20_1419 = arith.constant 20 : index
    %c384_1420 = arith.constant 384 : index
    %1057 = vector.load %arg18[%c20_1419, %c384_1420] : memref<32x640xbf16, #tpu.memory_space<vmem>>, vector<4x64xbf16>
    tpu.vector_store %arg18[%c20_1419, %c384_1420], %1056 {strides = array<i32>} : memref<32x640xbf16, #tpu.memory_space<vmem>>, vector<4x64xbf16>,
    %c1_1421 = arith.constant 1 : index
    %c4_1422 = arith.constant 4 : index
    %c0_1423 = arith.constant 0 : index
    %c0_1424 = arith.constant 0 : index
    %1058 = vector.load %arg17[%c1_1421, %c4_1422, %c0_1423, %c0_1424] : memref<2x6x6x64xf32, #tpu.memory_space<vmem>>, vector<1x1x4x64xf32>
    %1059 = vector.shape_cast %1058 : vector<1x1x4x64xf32> to vector<4x64xf32>
    %1060 = arith.truncf %1059 : vector<4x64xf32> to vector<4x64xbf16>
    %c24_1425 = arith.constant 24 : index
    %c384_1426 = arith.constant 384 : index
    %1061 = vector.load %arg18[%c24_1425, %c384_1426] : memref<32x640xbf16, #tpu.memory_space<vmem>>, vector<4x64xbf16>
    tpu.vector_store %arg18[%c24_1425, %c384_1426], %1060 {strides = array<i32>} : memref<32x640xbf16, #tpu.memory_space<vmem>>, vector<4x64xbf16>,
    %c1_1427 = arith.constant 1 : index
    %c5_1428 = arith.constant 5 : index
    %c0_1429 = arith.constant 0 : index
    %c0_1430 = arith.constant 0 : index
    %1062 = vector.load %arg17[%c1_1427, %c5_1428, %c0_1429, %c0_1430] : memref<2x6x6x64xf32, #tpu.memory_space<vmem>>, vector<1x1x4x64xf32>
    %1063 = vector.shape_cast %1062 : vector<1x1x4x64xf32> to vector<4x64xf32>
    %1064 = arith.truncf %1063 : vector<4x64xf32> to vector<4x64xbf16>
    %c28_1431 = arith.constant 28 : index
    %c384_1432 = arith.constant 384 : index
    %1065 = vector.load %arg18[%c28_1431, %c384_1432] : memref<32x640xbf16, #tpu.memory_space<vmem>>, vector<4x64xbf16>
    tpu.vector_store %arg18[%c28_1431, %c384_1432], %1064 {strides = array<i32>} : memref<32x640xbf16, #tpu.memory_space<vmem>>, vector<4x64xbf16>,
    %c0_1433 = arith.constant 0 : index
    %c2_1434 = arith.constant 2 : index
    %c1_1435 = arith.constant 1 : index
    %c0_1436 = arith.constant 0 : index
    %1066 = vector.load %arg17[%c0_1433, %c2_1434, %c1_1435, %c0_1436] : memref<2x6x6x64xf32, #tpu.memory_space<vmem>>, vector<1x1x4x64xf32>
    %1067 = vector.shape_cast %1066 : vector<1x1x4x64xf32> to vector<4x64xf32>
    %1068 = arith.truncf %1067 : vector<4x64xf32> to vector<4x64xbf16>
    %c0_1437 = arith.constant 0 : index
    %c448_1438 = arith.constant 448 : index
    %1069 = vector.load %arg18[%c0_1437, %c448_1438] : memref<32x640xbf16, #tpu.memory_space<vmem>>, vector<4x64xbf16>
    tpu.vector_store %arg18[%c0_1437, %c448_1438], %1068 {strides = array<i32>} : memref<32x640xbf16, #tpu.memory_space<vmem>>, vector<4x64xbf16>,
    %c0_1439 = arith.constant 0 : index
    %c3_1440 = arith.constant 3 : index
    %c1_1441 = arith.constant 1 : index
    %c0_1442 = arith.constant 0 : index
    %1070 = vector.load %arg17[%c0_1439, %c3_1440, %c1_1441, %c0_1442] : memref<2x6x6x64xf32, #tpu.memory_space<vmem>>, vector<1x1x4x64xf32>
    %1071 = vector.shape_cast %1070 : vector<1x1x4x64xf32> to vector<4x64xf32>
    %1072 = arith.truncf %1071 : vector<4x64xf32> to vector<4x64xbf16>
    %c4_1443 = arith.constant 4 : index
    %c448_1444 = arith.constant 448 : index
    %1073 = vector.load %arg18[%c4_1443, %c448_1444] : memref<32x640xbf16, #tpu.memory_space<vmem>>, vector<4x64xbf16>
    tpu.vector_store %arg18[%c4_1443, %c448_1444], %1072 {strides = array<i32>} : memref<32x640xbf16, #tpu.memory_space<vmem>>, vector<4x64xbf16>,
    %c0_1445 = arith.constant 0 : index
    %c4_1446 = arith.constant 4 : index
    %c1_1447 = arith.constant 1 : index
    %c0_1448 = arith.constant 0 : index
    %1074 = vector.load %arg17[%c0_1445, %c4_1446, %c1_1447, %c0_1448] : memref<2x6x6x64xf32, #tpu.memory_space<vmem>>, vector<1x1x4x64xf32>
    %1075 = vector.shape_cast %1074 : vector<1x1x4x64xf32> to vector<4x64xf32>
    %1076 = arith.truncf %1075 : vector<4x64xf32> to vector<4x64xbf16>
    %c8_1449 = arith.constant 8 : index
    %c448_1450 = arith.constant 448 : index
    %1077 = vector.load %arg18[%c8_1449, %c448_1450] : memref<32x640xbf16, #tpu.memory_space<vmem>>, vector<4x64xbf16>
    tpu.vector_store %arg18[%c8_1449, %c448_1450], %1076 {strides = array<i32>} : memref<32x640xbf16, #tpu.memory_space<vmem>>, vector<4x64xbf16>,
    %c0_1451 = arith.constant 0 : index
    %c5_1452 = arith.constant 5 : index
    %c1_1453 = arith.constant 1 : index
    %c0_1454 = arith.constant 0 : index
    %1078 = vector.load %arg17[%c0_1451, %c5_1452, %c1_1453, %c0_1454] : memref<2x6x6x64xf32, #tpu.memory_space<vmem>>, vector<1x1x4x64xf32>
    %1079 = vector.shape_cast %1078 : vector<1x1x4x64xf32> to vector<4x64xf32>
    %1080 = arith.truncf %1079 : vector<4x64xf32> to vector<4x64xbf16>
    %c12_1455 = arith.constant 12 : index
    %c448_1456 = arith.constant 448 : index
    %1081 = vector.load %arg18[%c12_1455, %c448_1456] : memref<32x640xbf16, #tpu.memory_space<vmem>>, vector<4x64xbf16>
    tpu.vector_store %arg18[%c12_1455, %c448_1456], %1080 {strides = array<i32>} : memref<32x640xbf16, #tpu.memory_space<vmem>>, vector<4x64xbf16>,
    %c1_1457 = arith.constant 1 : index
    %c2_1458 = arith.constant 2 : index
    %c1_1459 = arith.constant 1 : index
    %c0_1460 = arith.constant 0 : index
    %1082 = vector.load %arg17[%c1_1457, %c2_1458, %c1_1459, %c0_1460] : memref<2x6x6x64xf32, #tpu.memory_space<vmem>>, vector<1x1x4x64xf32>
    %1083 = vector.shape_cast %1082 : vector<1x1x4x64xf32> to vector<4x64xf32>
    %1084 = arith.truncf %1083 : vector<4x64xf32> to vector<4x64xbf16>
    %c16_1461 = arith.constant 16 : index
    %c448_1462 = arith.constant 448 : index
    %1085 = vector.load %arg18[%c16_1461, %c448_1462] : memref<32x640xbf16, #tpu.memory_space<vmem>>, vector<4x64xbf16>
    tpu.vector_store %arg18[%c16_1461, %c448_1462], %1084 {strides = array<i32>} : memref<32x640xbf16, #tpu.memory_space<vmem>>, vector<4x64xbf16>,
    %c1_1463 = arith.constant 1 : index
    %c3_1464 = arith.constant 3 : index
    %c1_1465 = arith.constant 1 : index
    %c0_1466 = arith.constant 0 : index
    %1086 = vector.load %arg17[%c1_1463, %c3_1464, %c1_1465, %c0_1466] : memref<2x6x6x64xf32, #tpu.memory_space<vmem>>, vector<1x1x4x64xf32>
    %1087 = vector.shape_cast %1086 : vector<1x1x4x64xf32> to vector<4x64xf32>
    %1088 = arith.truncf %1087 : vector<4x64xf32> to vector<4x64xbf16>
    %c20_1467 = arith.constant 20 : index
    %c448_1468 = arith.constant 448 : index
    %1089 = vector.load %arg18[%c20_1467, %c448_1468] : memref<32x640xbf16, #tpu.memory_space<vmem>>, vector<4x64xbf16>
    tpu.vector_store %arg18[%c20_1467, %c448_1468], %1088 {strides = array<i32>} : memref<32x640xbf16, #tpu.memory_space<vmem>>, vector<4x64xbf16>,
    %c1_1469 = arith.constant 1 : index
    %c4_1470 = arith.constant 4 : index
    %c1_1471 = arith.constant 1 : index
    %c0_1472 = arith.constant 0 : index
    %1090 = vector.load %arg17[%c1_1469, %c4_1470, %c1_1471, %c0_1472] : memref<2x6x6x64xf32, #tpu.memory_space<vmem>>, vector<1x1x4x64xf32>
    %1091 = vector.shape_cast %1090 : vector<1x1x4x64xf32> to vector<4x64xf32>
    %1092 = arith.truncf %1091 : vector<4x64xf32> to vector<4x64xbf16>
    %c24_1473 = arith.constant 24 : index
    %c448_1474 = arith.constant 448 : index
    %1093 = vector.load %arg18[%c24_1473, %c448_1474] : memref<32x640xbf16, #tpu.memory_space<vmem>>, vector<4x64xbf16>
    tpu.vector_store %arg18[%c24_1473, %c448_1474], %1092 {strides = array<i32>} : memref<32x640xbf16, #tpu.memory_space<vmem>>, vector<4x64xbf16>,
    %c1_1475 = arith.constant 1 : index
    %c5_1476 = arith.constant 5 : index
    %c1_1477 = arith.constant 1 : index
    %c0_1478 = arith.constant 0 : index
    %1094 = vector.load %arg17[%c1_1475, %c5_1476, %c1_1477, %c0_1478] : memref<2x6x6x64xf32, #tpu.memory_space<vmem>>, vector<1x1x4x64xf32>
    %1095 = vector.shape_cast %1094 : vector<1x1x4x64xf32> to vector<4x64xf32>
    %1096 = arith.truncf %1095 : vector<4x64xf32> to vector<4x64xbf16>
    %c28_1479 = arith.constant 28 : index
    %c448_1480 = arith.constant 448 : index
    %1097 = vector.load %arg18[%c28_1479, %c448_1480] : memref<32x640xbf16, #tpu.memory_space<vmem>>, vector<4x64xbf16>
    tpu.vector_store %arg18[%c28_1479, %c448_1480], %1096 {strides = array<i32>} : memref<32x640xbf16, #tpu.memory_space<vmem>>, vector<4x64xbf16>,
    %c0_1481 = arith.constant 0 : index
    %c2_1482 = arith.constant 2 : index
    %c2_1483 = arith.constant 2 : index
    %c0_1484 = arith.constant 0 : index
    %1098 = vector.load %arg17[%c0_1481, %c2_1482, %c2_1483, %c0_1484] : memref<2x6x6x64xf32, #tpu.memory_space<vmem>>, vector<1x1x4x64xf32>
    %1099 = vector.shape_cast %1098 : vector<1x1x4x64xf32> to vector<4x64xf32>
    %1100 = arith.truncf %1099 : vector<4x64xf32> to vector<4x64xbf16>
    %c0_1485 = arith.constant 0 : index
    %c512 = arith.constant 512 : index
    %1101 = vector.load %arg18[%c0_1485, %c512] : memref<32x640xbf16, #tpu.memory_space<vmem>>, vector<4x64xbf16>
    tpu.vector_store %arg18[%c0_1485, %c512], %1100 {strides = array<i32>} : memref<32x640xbf16, #tpu.memory_space<vmem>>, vector<4x64xbf16>,
    %c0_1486 = arith.constant 0 : index
    %c3_1487 = arith.constant 3 : index
    %c2_1488 = arith.constant 2 : index
    %c0_1489 = arith.constant 0 : index
    %1102 = vector.load %arg17[%c0_1486, %c3_1487, %c2_1488, %c0_1489] : memref<2x6x6x64xf32, #tpu.memory_space<vmem>>, vector<1x1x4x64xf32>
    %1103 = vector.shape_cast %1102 : vector<1x1x4x64xf32> to vector<4x64xf32>
    %1104 = arith.truncf %1103 : vector<4x64xf32> to vector<4x64xbf16>
    %c4_1490 = arith.constant 4 : index
    %c512_1491 = arith.constant 512 : index
    %1105 = vector.load %arg18[%c4_1490, %c512_1491] : memref<32x640xbf16, #tpu.memory_space<vmem>>, vector<4x64xbf16>
    tpu.vector_store %arg18[%c4_1490, %c512_1491], %1104 {strides = array<i32>} : memref<32x640xbf16, #tpu.memory_space<vmem>>, vector<4x64xbf16>,
    %c0_1492 = arith.constant 0 : index
    %c4_1493 = arith.constant 4 : index
    %c2_1494 = arith.constant 2 : index
    %c0_1495 = arith.constant 0 : index
    %1106 = vector.load %arg17[%c0_1492, %c4_1493, %c2_1494, %c0_1495] : memref<2x6x6x64xf32, #tpu.memory_space<vmem>>, vector<1x1x4x64xf32>
    %1107 = vector.shape_cast %1106 : vector<1x1x4x64xf32> to vector<4x64xf32>
    %1108 = arith.truncf %1107 : vector<4x64xf32> to vector<4x64xbf16>
    %c8_1496 = arith.constant 8 : index
    %c512_1497 = arith.constant 512 : index
    %1109 = vector.load %arg18[%c8_1496, %c512_1497] : memref<32x640xbf16, #tpu.memory_space<vmem>>, vector<4x64xbf16>
    tpu.vector_store %arg18[%c8_1496, %c512_1497], %1108 {strides = array<i32>} : memref<32x640xbf16, #tpu.memory_space<vmem>>, vector<4x64xbf16>,
    %c0_1498 = arith.constant 0 : index
    %c5_1499 = arith.constant 5 : index
    %c2_1500 = arith.constant 2 : index
    %c0_1501 = arith.constant 0 : index
    %1110 = vector.load %arg17[%c0_1498, %c5_1499, %c2_1500, %c0_1501] : memref<2x6x6x64xf32, #tpu.memory_space<vmem>>, vector<1x1x4x64xf32>
    %1111 = vector.shape_cast %1110 : vector<1x1x4x64xf32> to vector<4x64xf32>
    %1112 = arith.truncf %1111 : vector<4x64xf32> to vector<4x64xbf16>
    %c12_1502 = arith.constant 12 : index
    %c512_1503 = arith.constant 512 : index
    %1113 = vector.load %arg18[%c12_1502, %c512_1503] : memref<32x640xbf16, #tpu.memory_space<vmem>>, vector<4x64xbf16>
    tpu.vector_store %arg18[%c12_1502, %c512_1503], %1112 {strides = array<i32>} : memref<32x640xbf16, #tpu.memory_space<vmem>>, vector<4x64xbf16>,
    %c1_1504 = arith.constant 1 : index
    %c2_1505 = arith.constant 2 : index
    %c2_1506 = arith.constant 2 : index
    %c0_1507 = arith.constant 0 : index
    %1114 = vector.load %arg17[%c1_1504, %c2_1505, %c2_1506, %c0_1507] : memref<2x6x6x64xf32, #tpu.memory_space<vmem>>, vector<1x1x4x64xf32>
    %1115 = vector.shape_cast %1114 : vector<1x1x4x64xf32> to vector<4x64xf32>
    %1116 = arith.truncf %1115 : vector<4x64xf32> to vector<4x64xbf16>
    %c16_1508 = arith.constant 16 : index
    %c512_1509 = arith.constant 512 : index
    %1117 = vector.load %arg18[%c16_1508, %c512_1509] : memref<32x640xbf16, #tpu.memory_space<vmem>>, vector<4x64xbf16>
    tpu.vector_store %arg18[%c16_1508, %c512_1509], %1116 {strides = array<i32>} : memref<32x640xbf16, #tpu.memory_space<vmem>>, vector<4x64xbf16>,
    %c1_1510 = arith.constant 1 : index
    %c3_1511 = arith.constant 3 : index
    %c2_1512 = arith.constant 2 : index
    %c0_1513 = arith.constant 0 : index
    %1118 = vector.load %arg17[%c1_1510, %c3_1511, %c2_1512, %c0_1513] : memref<2x6x6x64xf32, #tpu.memory_space<vmem>>, vector<1x1x4x64xf32>
    %1119 = vector.shape_cast %1118 : vector<1x1x4x64xf32> to vector<4x64xf32>
    %1120 = arith.truncf %1119 : vector<4x64xf32> to vector<4x64xbf16>
    %c20_1514 = arith.constant 20 : index
    %c512_1515 = arith.constant 512 : index
    %1121 = vector.load %arg18[%c20_1514, %c512_1515] : memref<32x640xbf16, #tpu.memory_space<vmem>>, vector<4x64xbf16>
    tpu.vector_store %arg18[%c20_1514, %c512_1515], %1120 {strides = array<i32>} : memref<32x640xbf16, #tpu.memory_space<vmem>>, vector<4x64xbf16>,
    %c1_1516 = arith.constant 1 : index
    %c4_1517 = arith.constant 4 : index
    %c2_1518 = arith.constant 2 : index
    %c0_1519 = arith.constant 0 : index
    %1122 = vector.load %arg17[%c1_1516, %c4_1517, %c2_1518, %c0_1519] : memref<2x6x6x64xf32, #tpu.memory_space<vmem>>, vector<1x1x4x64xf32>
    %1123 = vector.shape_cast %1122 : vector<1x1x4x64xf32> to vector<4x64xf32>
    %1124 = arith.truncf %1123 : vector<4x64xf32> to vector<4x64xbf16>
    %c24_1520 = arith.constant 24 : index
    %c512_1521 = arith.constant 512 : index
    %1125 = vector.load %arg18[%c24_1520, %c512_1521] : memref<32x640xbf16, #tpu.memory_space<vmem>>, vector<4x64xbf16>
    tpu.vector_store %arg18[%c24_1520, %c512_1521], %1124 {strides = array<i32>} : memref<32x640xbf16, #tpu.memory_space<vmem>>, vector<4x64xbf16>,
    %c1_1522 = arith.constant 1 : index
    %c5_1523 = arith.constant 5 : index
    %c2_1524 = arith.constant 2 : index
    %c0_1525 = arith.constant 0 : index
    %1126 = vector.load %arg17[%c1_1522, %c5_1523, %c2_1524, %c0_1525] : memref<2x6x6x64xf32, #tpu.memory_space<vmem>>, vector<1x1x4x64xf32>
    %1127 = vector.shape_cast %1126 : vector<1x1x4x64xf32> to vector<4x64xf32>
    %1128 = arith.truncf %1127 : vector<4x64xf32> to vector<4x64xbf16>
    %c28_1526 = arith.constant 28 : index
    %c512_1527 = arith.constant 512 : index
    %1129 = vector.load %arg18[%c28_1526, %c512_1527] : memref<32x640xbf16, #tpu.memory_space<vmem>>, vector<4x64xbf16>
    tpu.vector_store %arg18[%c28_1526, %c512_1527], %1128 {strides = array<i32>} : memref<32x640xbf16, #tpu.memory_space<vmem>>, vector<4x64xbf16>,
    %c0_1528 = arith.constant 0 : index
    %c0_1529 = arith.constant 0 : index
    %1130 = vector.load %arg18[%c0_1528, %c0_1529] : memref<32x640xbf16, #tpu.memory_space<vmem>>, vector<32x640xbf16>
    %c0_1530 = arith.constant 0 : index
    %c0_1531 = arith.constant 0 : index
    %1131 = vector.load %arg6[%c0_1530, %c0_1531] : memref<640x64xbf16, #tpu.memory_space<vmem>>, vector<640x64xbf16>
    %cst_1532 = arith.constant dense<0.000000e+00> : vector<32x64xf32>
    %1132 = tpu.matmul %1130, %1131, %cst_1532 {dimension_numbers = #tpu.dot_dimension_numbers<[1], [0], [0], [1], [0, 0, 1, 1], [], []>} : vector<32x640xbf16>, vector<640x64xbf16>, vector<32x64xf32> -> vector<32x64xf32>
    %c0_1533 = arith.constant 0 : index
    %c0_1534 = arith.constant 0 : index
    %1133 = vector.load %arg7[%c0_1533, %c0_1534] : memref<1x64xf32, #tpu.memory_space<vmem>>, vector<1x64xf32>
    %1134 = vector.broadcast %1133 : vector<1x64xf32> to vector<32x64xf32>
    %1135 = arith.addf %1132, %1134 : vector<32x64xf32>
    %cst_1535 = arith.constant 0.000000e+00 : f32
    %1136 = vector.broadcast %cst_1535 : f32 to vector<32x64xf32>
    %1137 = arith.maximumf %1135, %1136 : vector<32x64xf32>
    %c0_1536 = arith.constant 0 : index
    %c0_1537 = arith.constant 0 : index
    %1138 = vector.load %arg19[%c0_1536, %c0_1537] : memref<32x64xf32, #tpu.memory_space<vmem>>, vector<32x64xf32>
    tpu.vector_store %arg19[%c0_1536, %c0_1537], %1137 {strides = array<i32>} : memref<32x64xf32, #tpu.memory_space<vmem>>, vector<32x64xf32>,
    %c0_1538 = arith.constant 0 : index
    %c0_1539 = arith.constant 0 : index
    %1139 = tpu.strided_load %arg19[%c0_1538, %c0_1539] {strides = array<i32: 16, 1>} : memref<32x64xf32, #tpu.memory_space<vmem>>, vector<2x64xf32>
    %1140 = arith.truncf %1139 : vector<2x64xf32> to vector<2x64xbf16>
    %c0_1540 = arith.constant 0 : index
    %c0_1541 = arith.constant 0 : index
    %1141 = vector.load %arg20[%c0_1540, %c0_1541] : memref<2x1024xbf16, #tpu.memory_space<vmem>>, vector<2x64xbf16>
    tpu.vector_store %arg20[%c0_1540, %c0_1541], %1140 {strides = array<i32>} : memref<2x1024xbf16, #tpu.memory_space<vmem>>, vector<2x64xbf16>,
    %c1_1542 = arith.constant 1 : index
    %c0_1543 = arith.constant 0 : index
    %1142 = tpu.strided_load %arg19[%c1_1542, %c0_1543] {strides = array<i32: 16, 1>} : memref<32x64xf32, #tpu.memory_space<vmem>>, vector<2x64xf32>
    %1143 = arith.truncf %1142 : vector<2x64xf32> to vector<2x64xbf16>
    %c0_1544 = arith.constant 0 : index
    %c64_1545 = arith.constant 64 : index
    %1144 = vector.load %arg20[%c0_1544, %c64_1545] : memref<2x1024xbf16, #tpu.memory_space<vmem>>, vector<2x64xbf16>
    tpu.vector_store %arg20[%c0_1544, %c64_1545], %1143 {strides = array<i32>} : memref<2x1024xbf16, #tpu.memory_space<vmem>>, vector<2x64xbf16>,
    %c2_1546 = arith.constant 2 : index
    %c0_1547 = arith.constant 0 : index
    %1145 = tpu.strided_load %arg19[%c2_1546, %c0_1547] {strides = array<i32: 16, 1>} : memref<32x64xf32, #tpu.memory_space<vmem>>, vector<2x64xf32>
    %1146 = arith.truncf %1145 : vector<2x64xf32> to vector<2x64xbf16>
    %c0_1548 = arith.constant 0 : index
    %c128_1549 = arith.constant 128 : index
    %1147 = vector.load %arg20[%c0_1548, %c128_1549] : memref<2x1024xbf16, #tpu.memory_space<vmem>>, vector<2x64xbf16>
    tpu.vector_store %arg20[%c0_1548, %c128_1549], %1146 {strides = array<i32>} : memref<2x1024xbf16, #tpu.memory_space<vmem>>, vector<2x64xbf16>,
    %c3_1550 = arith.constant 3 : index
    %c0_1551 = arith.constant 0 : index
    %1148 = tpu.strided_load %arg19[%c3_1550, %c0_1551] {strides = array<i32: 16, 1>} : memref<32x64xf32, #tpu.memory_space<vmem>>, vector<2x64xf32>
    %1149 = arith.truncf %1148 : vector<2x64xf32> to vector<2x64xbf16>
    %c0_1552 = arith.constant 0 : index
    %c192_1553 = arith.constant 192 : index
    %1150 = vector.load %arg20[%c0_1552, %c192_1553] : memref<2x1024xbf16, #tpu.memory_space<vmem>>, vector<2x64xbf16>
    tpu.vector_store %arg20[%c0_1552, %c192_1553], %1149 {strides = array<i32>} : memref<2x1024xbf16, #tpu.memory_space<vmem>>, vector<2x64xbf16>,
    %c4_1554 = arith.constant 4 : index
    %c0_1555 = arith.constant 0 : index
    %1151 = tpu.strided_load %arg19[%c4_1554, %c0_1555] {strides = array<i32: 16, 1>} : memref<32x64xf32, #tpu.memory_space<vmem>>, vector<2x64xf32>
    %1152 = arith.truncf %1151 : vector<2x64xf32> to vector<2x64xbf16>
    %c0_1556 = arith.constant 0 : index
    %c256_1557 = arith.constant 256 : index
    %1153 = vector.load %arg20[%c0_1556, %c256_1557] : memref<2x1024xbf16, #tpu.memory_space<vmem>>, vector<2x64xbf16>
    tpu.vector_store %arg20[%c0_1556, %c256_1557], %1152 {strides = array<i32>} : memref<2x1024xbf16, #tpu.memory_space<vmem>>, vector<2x64xbf16>,
    %c5_1558 = arith.constant 5 : index
    %c0_1559 = arith.constant 0 : index
    %1154 = tpu.strided_load %arg19[%c5_1558, %c0_1559] {strides = array<i32: 16, 1>} : memref<32x64xf32, #tpu.memory_space<vmem>>, vector<2x64xf32>
    %1155 = arith.truncf %1154 : vector<2x64xf32> to vector<2x64xbf16>
    %c0_1560 = arith.constant 0 : index
    %c320_1561 = arith.constant 320 : index
    %1156 = vector.load %arg20[%c0_1560, %c320_1561] : memref<2x1024xbf16, #tpu.memory_space<vmem>>, vector<2x64xbf16>
    tpu.vector_store %arg20[%c0_1560, %c320_1561], %1155 {strides = array<i32>} : memref<2x1024xbf16, #tpu.memory_space<vmem>>, vector<2x64xbf16>,
    %c6_1562 = arith.constant 6 : index
    %c0_1563 = arith.constant 0 : index
    %1157 = tpu.strided_load %arg19[%c6_1562, %c0_1563] {strides = array<i32: 16, 1>} : memref<32x64xf32, #tpu.memory_space<vmem>>, vector<2x64xf32>
    %1158 = arith.truncf %1157 : vector<2x64xf32> to vector<2x64xbf16>
    %c0_1564 = arith.constant 0 : index
    %c384_1565 = arith.constant 384 : index
    %1159 = vector.load %arg20[%c0_1564, %c384_1565] : memref<2x1024xbf16, #tpu.memory_space<vmem>>, vector<2x64xbf16>
    tpu.vector_store %arg20[%c0_1564, %c384_1565], %1158 {strides = array<i32>} : memref<2x1024xbf16, #tpu.memory_space<vmem>>, vector<2x64xbf16>,
    %c7_1566 = arith.constant 7 : index
    %c0_1567 = arith.constant 0 : index
    %1160 = tpu.strided_load %arg19[%c7_1566, %c0_1567] {strides = array<i32: 16, 1>} : memref<32x64xf32, #tpu.memory_space<vmem>>, vector<2x64xf32>
    %1161 = arith.truncf %1160 : vector<2x64xf32> to vector<2x64xbf16>
    %c0_1568 = arith.constant 0 : index
    %c448_1569 = arith.constant 448 : index
    %1162 = vector.load %arg20[%c0_1568, %c448_1569] : memref<2x1024xbf16, #tpu.memory_space<vmem>>, vector<2x64xbf16>
    tpu.vector_store %arg20[%c0_1568, %c448_1569], %1161 {strides = array<i32>} : memref<2x1024xbf16, #tpu.memory_space<vmem>>, vector<2x64xbf16>,
    %c8_1570 = arith.constant 8 : index
    %c0_1571 = arith.constant 0 : index
    %1163 = tpu.strided_load %arg19[%c8_1570, %c0_1571] {strides = array<i32: 16, 1>} : memref<32x64xf32, #tpu.memory_space<vmem>>, vector<2x64xf32>
    %1164 = arith.truncf %1163 : vector<2x64xf32> to vector<2x64xbf16>
    %c0_1572 = arith.constant 0 : index
    %c512_1573 = arith.constant 512 : index
    %1165 = vector.load %arg20[%c0_1572, %c512_1573] : memref<2x1024xbf16, #tpu.memory_space<vmem>>, vector<2x64xbf16>
    tpu.vector_store %arg20[%c0_1572, %c512_1573], %1164 {strides = array<i32>} : memref<2x1024xbf16, #tpu.memory_space<vmem>>, vector<2x64xbf16>,
    %c9_1574 = arith.constant 9 : index
    %c0_1575 = arith.constant 0 : index
    %1166 = tpu.strided_load %arg19[%c9_1574, %c0_1575] {strides = array<i32: 16, 1>} : memref<32x64xf32, #tpu.memory_space<vmem>>, vector<2x64xf32>
    %1167 = arith.truncf %1166 : vector<2x64xf32> to vector<2x64xbf16>
    %c0_1576 = arith.constant 0 : index
    %c576_1577 = arith.constant 576 : index
    %1168 = vector.load %arg20[%c0_1576, %c576_1577] : memref<2x1024xbf16, #tpu.memory_space<vmem>>, vector<2x64xbf16>
    tpu.vector_store %arg20[%c0_1576, %c576_1577], %1167 {strides = array<i32>} : memref<2x1024xbf16, #tpu.memory_space<vmem>>, vector<2x64xbf16>,
    %c10 = arith.constant 10 : index
    %c0_1578 = arith.constant 0 : index
    %1169 = tpu.strided_load %arg19[%c10, %c0_1578] {strides = array<i32: 16, 1>} : memref<32x64xf32, #tpu.memory_space<vmem>>, vector<2x64xf32>
    %1170 = arith.truncf %1169 : vector<2x64xf32> to vector<2x64xbf16>
    %c0_1579 = arith.constant 0 : index
    %c640 = arith.constant 640 : index
    %1171 = vector.load %arg20[%c0_1579, %c640] : memref<2x1024xbf16, #tpu.memory_space<vmem>>, vector<2x64xbf16>
    tpu.vector_store %arg20[%c0_1579, %c640], %1170 {strides = array<i32>} : memref<2x1024xbf16, #tpu.memory_space<vmem>>, vector<2x64xbf16>,
    %c11 = arith.constant 11 : index
    %c0_1580 = arith.constant 0 : index
    %1172 = tpu.strided_load %arg19[%c11, %c0_1580] {strides = array<i32: 16, 1>} : memref<32x64xf32, #tpu.memory_space<vmem>>, vector<2x64xf32>
    %1173 = arith.truncf %1172 : vector<2x64xf32> to vector<2x64xbf16>
    %c0_1581 = arith.constant 0 : index
    %c704 = arith.constant 704 : index
    %1174 = vector.load %arg20[%c0_1581, %c704] : memref<2x1024xbf16, #tpu.memory_space<vmem>>, vector<2x64xbf16>
    tpu.vector_store %arg20[%c0_1581, %c704], %1173 {strides = array<i32>} : memref<2x1024xbf16, #tpu.memory_space<vmem>>, vector<2x64xbf16>,
    %c12_1582 = arith.constant 12 : index
    %c0_1583 = arith.constant 0 : index
    %1175 = tpu.strided_load %arg19[%c12_1582, %c0_1583] {strides = array<i32: 16, 1>} : memref<32x64xf32, #tpu.memory_space<vmem>>, vector<2x64xf32>
    %1176 = arith.truncf %1175 : vector<2x64xf32> to vector<2x64xbf16>
    %c0_1584 = arith.constant 0 : index
    %c768 = arith.constant 768 : index
    %1177 = vector.load %arg20[%c0_1584, %c768] : memref<2x1024xbf16, #tpu.memory_space<vmem>>, vector<2x64xbf16>
    tpu.vector_store %arg20[%c0_1584, %c768], %1176 {strides = array<i32>} : memref<2x1024xbf16, #tpu.memory_space<vmem>>, vector<2x64xbf16>,
    %c13 = arith.constant 13 : index
    %c0_1585 = arith.constant 0 : index
    %1178 = tpu.strided_load %arg19[%c13, %c0_1585] {strides = array<i32: 16, 1>} : memref<32x64xf32, #tpu.memory_space<vmem>>, vector<2x64xf32>
    %1179 = arith.truncf %1178 : vector<2x64xf32> to vector<2x64xbf16>
    %c0_1586 = arith.constant 0 : index
    %c832 = arith.constant 832 : index
    %1180 = vector.load %arg20[%c0_1586, %c832] : memref<2x1024xbf16, #tpu.memory_space<vmem>>, vector<2x64xbf16>
    tpu.vector_store %arg20[%c0_1586, %c832], %1179 {strides = array<i32>} : memref<2x1024xbf16, #tpu.memory_space<vmem>>, vector<2x64xbf16>,
    %c14 = arith.constant 14 : index
    %c0_1587 = arith.constant 0 : index
    %1181 = tpu.strided_load %arg19[%c14, %c0_1587] {strides = array<i32: 16, 1>} : memref<32x64xf32, #tpu.memory_space<vmem>>, vector<2x64xf32>
    %1182 = arith.truncf %1181 : vector<2x64xf32> to vector<2x64xbf16>
    %c0_1588 = arith.constant 0 : index
    %c896 = arith.constant 896 : index
    %1183 = vector.load %arg20[%c0_1588, %c896] : memref<2x1024xbf16, #tpu.memory_space<vmem>>, vector<2x64xbf16>
    tpu.vector_store %arg20[%c0_1588, %c896], %1182 {strides = array<i32>} : memref<2x1024xbf16, #tpu.memory_space<vmem>>, vector<2x64xbf16>,
    %c15 = arith.constant 15 : index
    %c0_1589 = arith.constant 0 : index
    %1184 = tpu.strided_load %arg19[%c15, %c0_1589] {strides = array<i32: 16, 1>} : memref<32x64xf32, #tpu.memory_space<vmem>>, vector<2x64xf32>
    %1185 = arith.truncf %1184 : vector<2x64xf32> to vector<2x64xbf16>
    %c0_1590 = arith.constant 0 : index
    %c960 = arith.constant 960 : index
    %1186 = vector.load %arg20[%c0_1590, %c960] : memref<2x1024xbf16, #tpu.memory_space<vmem>>, vector<2x64xbf16>
    tpu.vector_store %arg20[%c0_1590, %c960], %1185 {strides = array<i32>} : memref<2x1024xbf16, #tpu.memory_space<vmem>>, vector<2x64xbf16>,
    %c0_1591 = arith.constant 0 : index
    %c0_1592 = arith.constant 0 : index
    %1187 = vector.load %arg20[%c0_1591, %c0_1592] : memref<2x1024xbf16, #tpu.memory_space<vmem>>, vector<2x1024xbf16>
    %c0_1593 = arith.constant 0 : index
    %c0_1594 = arith.constant 0 : index
    %1188 = vector.load %arg8[%c0_1593, %c0_1594] : memref<1024x64xbf16, #tpu.memory_space<vmem>>, vector<1024x64xbf16>
    %cst_1595 = arith.constant dense<0.000000e+00> : vector<2x64xf32>
    %1189 = tpu.matmul %1187, %1188, %cst_1595 {dimension_numbers = #tpu.dot_dimension_numbers<[1], [0], [0], [1], [0, 0, 1, 1], [], []>} : vector<2x1024xbf16>, vector<1024x64xbf16>, vector<2x64xf32> -> vector<2x64xf32>
    %c0_1596 = arith.constant 0 : index
    %c0_1597 = arith.constant 0 : index
    %1190 = vector.load %arg9[%c0_1596, %c0_1597] : memref<1x64xf32, #tpu.memory_space<vmem>>, vector<1x64xf32>
    %1191 = vector.broadcast %1190 : vector<1x64xf32> to vector<2x64xf32>
    %1192 = arith.addf %1189, %1191 : vector<2x64xf32>
    %cst_1598 = arith.constant 0.000000e+00 : f32
    %1193 = vector.broadcast %cst_1598 : f32 to vector<2x64xf32>
    %1194 = arith.maximumf %1192, %1193 : vector<2x64xf32>
    %1195 = arith.truncf %1194 : vector<2x64xf32> to vector<2x64xbf16>
    %c0_1599 = arith.constant 0 : index
    %c0_1600 = arith.constant 0 : index
    %1196 = vector.load %arg10[%c0_1599, %c0_1600] : memref<64x128xbf16, #tpu.memory_space<vmem>>, vector<64x128xbf16>
    %cst_1601 = arith.constant dense<0.000000e+00> : vector<2x128xf32>
    %1197 = tpu.matmul %1195, %1196, %cst_1601 {dimension_numbers = #tpu.dot_dimension_numbers<[1], [0], [0], [1], [0, 0, 1, 1], [], []>} : vector<2x64xbf16>, vector<64x128xbf16>, vector<2x128xf32> -> vector<2x128xf32>
    %c0_1602 = arith.constant 0 : index
    %c0_1603 = arith.constant 0 : index
    %1198 = vector.load %arg11[%c0_1602, %c0_1603] : memref<1x128xf32, #tpu.memory_space<vmem>>, vector<1x128xf32>
    %1199 = vector.broadcast %1198 : vector<1x128xf32> to vector<2x128xf32>
    %1200 = arith.addf %1197, %1199 : vector<2x128xf32>
    %c0_1604 = arith.constant 0 : index
    %c0_1605 = arith.constant 0 : index
    %1201 = vector.load %arg12[%c0_1604, %c0_1605] : memref<2x128xf32, #tpu.memory_space<vmem>>, vector<2x128xf32>
    tpu.vector_store %arg12[%c0_1604, %c0_1605], %1200 {strides = array<i32>} : memref<2x128xf32, #tpu.memory_space<vmem>>, vector<2x128xf32>,
    return
  }
  func.func @transform_0(%arg0: i32) -> (i32, i32) {
    %c0_i32 = arith.constant 0 : i32
    %c0_i32_0 = arith.constant 0 : i32
    return %arg0, %c0_i32 : i32, i32
  }
  func.func @transform_1(%arg0: i32) -> (i32, i32) {
    %c0_i32 = arith.constant 0 : i32
    %c0_i32_0 = arith.constant 0 : i32
    %c0_i32_1 = arith.constant 0 : i32
    return %c0_i32, %c0_i32_0 : i32, i32
  }
  func.func @transform_2(%arg0: i32) -> (i32, i32) {
    %c0_i32 = arith.constant 0 : i32
    %c0_i32_0 = arith.constant 0 : i32
    %c0_i32_1 = arith.constant 0 : i32
    return %c0_i32, %c0_i32_0 : i32, i32
  }
  func.func @transform_3(%arg0: i32) -> (i32, i32) {
    %c0_i32 = arith.constant 0 : i32
    %c0_i32_0 = arith.constant 0 : i32
    %c0_i32_1 = arith.constant 0 : i32
    return %c0_i32, %c0_i32_0 : i32, i32
  }
  func.func @transform_4(%arg0: i32) -> (i32, i32) {
    %c0_i32 = arith.constant 0 : i32
    %c0_i32_0 = arith.constant 0 : i32
    %c0_i32_1 = arith.constant 0 : i32
    return %c0_i32, %c0_i32_0 : i32, i32
  }
  func.func @transform_5(%arg0: i32) -> (i32, i32) {
    %c0_i32 = arith.constant 0 : i32
    %c0_i32_0 = arith.constant 0 : i32
    %c0_i32_1 = arith.constant 0 : i32
    return %c0_i32, %c0_i32_0 : i32, i32
  }
  func.func @transform_6(%arg0: i32) -> (i32, i32) {
    %c0_i32 = arith.constant 0 : i32
    %c0_i32_0 = arith.constant 0 : i32
    %c0_i32_1 = arith.constant 0 : i32
    return %c0_i32, %c0_i32_0 : i32, i32
  }
  func.func @transform_7(%arg0: i32) -> (i32, i32) {
    %c0_i32 = arith.constant 0 : i32
    %c0_i32_0 = arith.constant 0 : i32
    %c0_i32_1 = arith.constant 0 : i32
    return %c0_i32, %c0_i32_0 : i32, i32
  }
  func.func @transform_8(%arg0: i32) -> (i32, i32) {
    %c0_i32 = arith.constant 0 : i32
    %c0_i32_0 = arith.constant 0 : i32
    %c0_i32_1 = arith.constant 0 : i32
    return %c0_i32, %c0_i32_0 : i32, i32
  }
  func.func @transform_9(%arg0: i32) -> (i32, i32) {
    %c0_i32 = arith.constant 0 : i32
    %c0_i32_0 = arith.constant 0 : i32
    %c0_i32_1 = arith.constant 0 : i32
    return %c0_i32, %c0_i32_0 : i32, i32
  }
  func.func @transform_10(%arg0: i32) -> (i32, i32) {
    %c0_i32 = arith.constant 0 : i32
    %c0_i32_0 = arith.constant 0 : i32
    %c0_i32_1 = arith.constant 0 : i32
    return %c0_i32, %c0_i32_0 : i32, i32
  }
  func.func @transform_11(%arg0: i32) -> (i32, i32) {
    %c0_i32 = arith.constant 0 : i32
    %c0_i32_0 = arith.constant 0 : i32
    return %arg0, %c0_i32 : i32, i32
  }
}

</mosaic_0001>

<bundles_post_ra>
// kernel: conv2d_model_forward.1
= control target key start
LH: loop header
LB: loop body
LE: loop exit
PB: predicated region body
PF: predicated region fallthrough
CT: control target
= control target key end

     0   :  { %vm356_vm0 = vcmask 130048   ;;  %vm40_vm1 = vcmask 261120   ;;  %vm42_vm2 = vcmask 254976   ;;  %v6077_v22 = vmov 0.0   ;;  %s6079_s29 = smov 64   ;;  %s6080_s30 = smov 96   ;;  %s7671_s0 = inlined_call_operand.vmem [shape: bf16[512,16], index: 0, kind: input, shape index: {}]   ;;  %s7672_s1 = inlined_call_operand.vmem [shape: bf16[16,32], index: 1, kind: input, shape index: {}]   ;;  %s7673_s2 = inlined_call_operand.vmem [shape: f32[1,32], index: 2, kind: input, shape index: {}]   ;;  %s7674_s3 = inlined_call_operand.vmem [shape: bf16[384,64], index: 3, kind: input, shape index: {}]   ;;  %s7675_s4 = inlined_call_operand.vmem [shape: f32[1,64], index: 4, kind: input, shape index: {}]   ;;  %s7676_s5 = inlined_call_operand.vmem [shape: bf16[640,64], index: 5, kind: input, shape index: {}]   ;;  %s7677_s6 = inlined_call_operand.vmem [shape: f32[1,64], index: 6, kind: input, shape index: {}]   ;;  %s7678_s7 = inlined_call_operand.vmem [shape: bf16[1024,64], index: 7, kind: input, shape index: {}]   ;;  %s7679_s8 = inlined_call_operand.vmem [shape: f32[1,64], index: 8, kind: input, shape index: {}]   ;;  %s7680_s9 = inlined_call_operand.vmem [shape: bf16[64,128], index: 9, kind: input, shape index: {}]   ;;  %s7681_s10 = inlined_call_operand.vmem [shape: f32[1,128], index: 10, kind: input, shape index: {}]   ;;  %s7682_s11 = inlined_call_operand.hbm [shape: f32[2,128], index: 11, kind: output, shape index: {}]  }
   0x1   :  { %v5848_v0 = vld [vmem:[%s7672_s1] sm:$0xff]   ;;  %v5850_v2 = vld [vmem:[%s7671_s0 + $0x8] sm:$0xff]   ;;  %v5851_v3 = vld [vmem:[%s7671_s0 + $0x10] sm:$0xff]   ;;  %41 = vst.msk [vmem:[#allocation3] sm:$0xff] %vm40_vm1, %v6077_v22  ;;  %s6078_s1 = smov 32   ;;  %vm95_vm3 = vcmask 1043712  }
   0x2   :  { %v5849_v1 = vld [vmem:[%s7671_s0] sm:$0xff]   ;;  %5710 = vmatprep.subr.bf16.mxu0 %v5848_v0  ;;  %v5852_v4 = vld [vmem:[%s7671_s0 + $0x18] sm:$0xff]   ;;  %v5854_v6 = vld [vmem:[%s7671_s0 + $0x28] sm:$0xff]   ;;  %43 = vst.msk [vmem:[#allocation3 + $0x8] sm:$0x3] %vm42_vm2, %v6077_v22  ;;  %v6081_v45 = vmov 0  }
   0x3   :  { %5711 = vmatpush3.bf16.msra.mxu0 %v5848_v0  ;;  %5712 = vmatprep.mubr.msk.bf16.mxu0 %vm356_vm0, %v5849_v1  ;;  %v5853_v5 = vld [vmem:[%s7671_s0 + $0x20] sm:$0xff]   ;;  %v5855_v7 = vld [vmem:[%s7671_s0 + $0x30] sm:$0xff]   ;;  %v5856_v8 = vld [vmem:[%s7671_s0 + $0x38] sm:$0xff]   ;;  %44 = vst.msk [vmem:[#allocation3 + $0x10] sm:$0xff] %vm40_vm1, %v6077_v22 }
   0x4   :  { %v5857_v9 = vld [vmem:[%s7671_s0 + $0x40] sm:$0xff]   ;;  %v5858_v10 = vld [vmem:[%s7671_s0 + $0x48] sm:$0xff]   ;;  %v5859_v11 = vld [vmem:[%s7671_s0 + $0x50] sm:$0xff]   ;;  %45 = vst.msk [vmem:[#allocation3 + $0x18] sm:$0x3] %vm42_vm2, %v6077_v22 }
   0x5   :  { %v5860_v12 = vld [vmem:[%s7671_s0 + $0x58] sm:$0xff]   ;;  %v5861_v13 = vld [vmem:[%s7671_s0 + $0x60] sm:$0xff]   ;;  %v5862_v14 = vld [vmem:[%s7671_s0 + $0x68] sm:$0xff]   ;;  %46 = vst.msk [vmem:[#allocation3 + $0x20] sm:$0xff] %vm40_vm1, %v6077_v22 }
   0x6   :  { %5713 = vmatmul.mubr.msk.bf16.vlgmr.msra.gmra.mxu0 %vm356_vm0, %v5850_v2  ;;  %v5863_v15 = vld [vmem:[%s7671_s0 + $0x70] sm:$0xff]   ;;  %v5864_v16 = vld [vmem:[%s7671_s0 + $0x78] sm:$0xff]   ;;  %v5865_v17 = vld [vmem:[%s7671_s0 + $0x80] sm:$0xff]   ;;  %47 = vst.msk [vmem:[#allocation3 + $0x28] sm:$0x3] %vm42_vm2, %v6077_v22 }
   0x7   :  { %5716 = vmatprep.mubr.msk.bf16.mxu0 %vm356_vm0, %v5851_v3  ;;  %v5866_v18 = vld [vmem:[%s7671_s0 + $0x88] sm:$0xff]   ;;  %v5867_v19 = vld [vmem:[%s7671_s0 + $0x90] sm:$0xff]   ;;  %v5868_v20 = vld [vmem:[%s7671_s0 + $0x98] sm:$0xff]   ;;  %48 = vst.msk [vmem:[#allocation3 + $0x30] sm:$0xff] %vm40_vm1, %v6077_v22 }
   0x8   :  { %v5869_v21 = vld [vmem:[%s7671_s0 + $0xa0] sm:$0xff]   ;;  %49 = vst.msk [vmem:[#allocation3 + $0x38] sm:$0x3] %vm42_vm2, %v6077_v22  ;;  %51 = vst.msk [vmem:[#allocation3 + $0x48] sm:$0x3] %vm42_vm2, %v6077_v22  ;;  %v5870_v23 = vld [vmem:[%s7671_s0 + $0xa8] sm:$0xff]  }
   0x9   :  { %50 = vst.msk [vmem:[#allocation3 + $0x40] sm:$0xff] %vm40_vm1, %v6077_v22  ;;  %52 = vst.msk [vmem:[#allocation3 + $0x50] sm:$0xff] %vm40_vm1, %v6077_v22  ;;  %v5871_v24 = vld [vmem:[%s7671_s0 + $0xb0] sm:$0xff]   ;;  %v1127_v25 = vld [vmem:[#allocation3 + $0x1] sm:$0xff] }
   0xa   :  { %53 = vst.msk [vmem:[#allocation3 + $0x58] sm:$0x3] %vm42_vm2, %v6077_v22  ;;  %55 = vst.msk [vmem:[#allocation3 + $0x68] sm:$0x3] %vm42_vm2, %v6077_v22  ;;  %v5290_v26 = vpack.c.bf16 %v1127_v25, %v1127_v25  ;;  %v5872_v27 = vld [vmem:[%s7671_s0 + $0xb8] sm:$0xff]   ;;  %v1272_v29 = vld [vmem:[#allocation3 + $0x2] sm:$0xff] }
   0xb   :  { %54 = vst.msk [vmem:[#allocation3 + $0x60] sm:$0xff] %vm40_vm1, %v6077_v22  ;;  %56 = vst.msk [vmem:[#allocation3 + $0x70] sm:$0xff] %vm40_vm1, %v6077_v22  ;;  %v5306_v31 = vpack.c.bf16 %v1272_v29, %v1272_v29  ;;  %v5873_v32 = vld [vmem:[%s7671_s0 + $0xc0] sm:$0xff]   ;;  %v5874_v37 = vld [vmem:[%s7671_s0 + $0xc8] sm:$0xff]  }
   0xc   :  { %57 = vst.msk [vmem:[#allocation3 + $0x78] sm:$0x3] %vm42_vm2, %v6077_v22  ;;  %59 = vst.msk [vmem:[#allocation3 + $0x88] sm:$0x3] %vm42_vm2, %v6077_v22  ;;  %1132 = vrot.lane.b32.xlu0 %v5290_v26, %s6078_s1  ;;  %v5875_v40 = vld [vmem:[%s7671_s0 + $0xd0] sm:$0xff]   ;;  %v5876_v43 = vld [vmem:[%s7671_s0 + $0xd8] sm:$0xff]  }
   0xd   :  { %58 = vst.msk [vmem:[#allocation3 + $0x80] sm:$0xff] %vm40_vm1, %v6077_v22  ;;  %60 = vst.msk [vmem:[#allocation3 + $0x90] sm:$0xff] %vm40_vm1, %v6077_v22  ;;  %v5877_v44 = vld [vmem:[%s7671_s0 + $0xe0] sm:$0xff]   ;;  %v5878_v46 = vld [vmem:[%s7671_s0 + $0xe8] sm:$0xff]  }
   0xe   :  { %5717 = vmatmul.mubr.msk.bf16.gmra.mxu0 %vm356_vm0, %v5852_v4  ;;  %61 = vst.msk [vmem:[#allocation3 + $0x98] sm:$0x3] %vm42_vm2, %v6077_v22  ;;  %63 = vst.msk [vmem:[#allocation3 + $0xa8] sm:$0x3] %vm42_vm2, %v6077_v22  ;;  %v5879_v47 = vld [vmem:[%s7671_s0 + $0xf0] sm:$0xff]   ;;  %v5880_v48 = vld [vmem:[%s7671_s0 + $0xf8] sm:$0xff]  }
   0xf   :  { %5720 = vmatprep.mubr.msk.bf16.mxu0 %vm356_vm0, %v5853_v5  ;;  %62 = vst.msk [vmem:[#allocation3 + $0xa0] sm:$0xff] %vm40_vm1, %v6077_v22  ;;  %64 = vst.msk [vmem:[#allocation3 + $0xb0] sm:$0xff] %vm40_vm1, %v6077_v22 }
  0x10   :  { %65 = vst.msk [vmem:[#allocation3 + $0xb8] sm:$0x3] %vm42_vm2, %v6077_v22  ;;  %67 = vst.msk [vmem:[#allocation3 + $0xc8] sm:$0x3] %vm42_vm2, %v6077_v22  ;;  %1277 = vrot.lane.b32.xlu0 %v5306_v31, %s6079_s29 }
  0x11   :  { %66 = vst.msk [vmem:[#allocation3 + $0xc0] sm:$0xff] %vm40_vm1, %v6077_v22  ;;  %68 = vst.msk [vmem:[#allocation3 + $0xd0] sm:$0xff] %vm40_vm1, %v6077_v22 }
  0x12   :  { %69 = vst.msk [vmem:[#allocation3 + $0xd8] sm:$0x3] %vm42_vm2, %v6077_v22  ;;  %71 = vst.msk [vmem:[#allocation3 + $0xe8] sm:$0x3] %vm42_vm2, %v6077_v22 }
  0x13   :  { %70 = vst.msk [vmem:[#allocation3 + $0xe0] sm:$0xff] %vm40_vm1, %v6077_v22  ;;  %72 = vst.msk [vmem:[#allocation3 + $0xf0] sm:$0xff] %vm40_vm1, %v6077_v22 }
  0x14   :  { %73 = vst.msk [vmem:[#allocation3 + $0xf8] sm:$0x3] %vm42_vm2, %v6077_v22  ;;  %75 = vst.msk [vmem:[#allocation3 + $0x108] sm:$0x3] %vm42_vm2, %v6077_v22  ;;  %v1818_v28 = vld [vmem:[#allocation3 + $0x90] sm:$0xff] }
  0x15   :  { %74 = vst.msk [vmem:[#allocation3 + $0x100] sm:$0xff] %vm40_vm1, %v6077_v22  ;;  %76 = vst.msk [vmem:[#allocation3 + $0x110] sm:$0xff] %vm40_vm1, %v6077_v22  ;;  %v5361_v30 = vpack.c.bf16 %v1818_v28, %v1818_v28  ;;  %v1963_v33 = vld [vmem:[#allocation3 + $0x91] sm:$0xff] }
  0x16   :  { %5721 = vmatmul.mubr.msk.bf16.gmra.mxu0 %vm356_vm0, %v5854_v6  ;;  %77 = vst.msk [vmem:[#allocation3 + $0x118] sm:$0x3] %vm42_vm2, %v6077_v22  ;;  %79 = vst.msk [vmem:[#allocation3 + $0x128] sm:$0x3] %vm42_vm2, %v6077_v22  ;;  %v1200_v34 = vld [vmem:[#allocation3 + $0xa1] sm:$0xff]  ;;  %v5377_v35 = vpack.c.bf16 %v1963_v33, %v1963_v33 }
  0x17   :  { %5724 = vmatprep.mubr.msk.bf16.mxu0 %vm356_vm0, %v5855_v7  ;;  %78 = vst.msk [vmem:[#allocation3 + $0x120] sm:$0xff] %vm40_vm1, %v6077_v22  ;;  %80 = vst.msk [vmem:[#allocation3 + $0x130] sm:$0xff] %vm40_vm1, %v6077_v22  ;;  %1823 = vrot.lane.b32.xlu1 %v5361_v30, %s6079_s29  ;;  %v5298_v36 = vpack.c.bf16 %v1200_v34, %v1200_v34  ;;  %v1345_v39 = vld [vmem:[#allocation3 + $0xa2] sm:$0xff] }
  0x18   :  { %81 = vst.msk [vmem:[#allocation3 + $0x138] sm:$0x3] %vm42_vm2, %v6077_v22  ;;  %v5314_v42 = vpack.c.bf16 %v1345_v39, %v1345_v39 }
  0x19   :  { %1205 = vrot.lane.b32.xlu0 %v5298_v36, %s6078_s1  ;;  %96 = vst.msk [vmem:[#allocation4 + $0x8] sm:$0xf] %vm95_vm3, %v6081_v45  ;;  %97 = vst.msk [vmem:[#allocation4 + $0x14] sm:$0xf] %vm95_vm3, %v6081_v45 }
  0x1a   :  { %98 = vst.msk [vmem:[#allocation4 + $0x20] sm:$0xf] %vm95_vm3, %v6081_v45  ;;  %99 = vst.msk [vmem:[#allocation4 + $0x2c] sm:$0xf] %vm95_vm3, %v6081_v45 }
  0x1b   :  { %1968 = vrot.lane.b32.xlu1 %v5377_v35, %s6080_s30  ;;  %100 = vst.msk [vmem:[#allocation4 + $0x38] sm:$0xf] %vm95_vm3, %v6081_v45  ;;  %101 = vst.msk [vmem:[#allocation4 + $0x44] sm:$0xf] %vm95_vm3, %v6081_v45 }
  0x1c   :  { %102 = vst.msk [vmem:[#allocation4 + $0x50] sm:$0xf] %vm95_vm3, %v6081_v45  ;;  %103 = vst.msk [vmem:[#allocation4 + $0x5c] sm:$0xf] %vm95_vm3, %v6081_v45 }
  0x1d   :  { %1350 = vrot.lane.b32.xlu0 %v5314_v42, %s6079_s29  ;;  %104 = vst.msk [vmem:[#allocation4 + $0x68] sm:$0xf] %vm95_vm3, %v6081_v45  ;;  %105 = vst.msk [vmem:[#allocation4 + $0x74] sm:$0xf] %vm95_vm3, %v6081_v45 }
  0x1e   :  { %5725 = vmatmul.mubr.msk.bf16.gmra.mxu0 %vm356_vm0, %v5856_v8  ;;  %v1891_v38 = vld [vmem:[#allocation3 + $0x130] sm:$0xff]  ;;  %106 = vst.msk [vmem:[#allocation4 + $0x80] sm:$0xf] %vm95_vm3, %v6081_v45  ;;  %107 = vst.msk [vmem:[#allocation4 + $0x8c] sm:$0xf] %vm95_vm3, %v6081_v45 }
  0x1f   :  { %5728 = vmatprep.mubr.msk.bf16.mxu0 %vm356_vm0, %v5857_v9  ;;  %v5369_v41 = vpack.c.bf16 %v1891_v38, %v1891_v38  ;;  %108 = vst.msk [vmem:[#allocation4 + $0x98] sm:$0xf] %vm95_vm3, %v6081_v45  ;;  %109 = vst.msk [vmem:[#allocation4 + $0xa4] sm:$0xf] %vm95_vm3, %v6081_v45 }
  0x20   :  { %110 = vst.msk [vmem:[#allocation4 + $0xb0] sm:$0xf] %vm95_vm3, %v6081_v45  ;;  %111 = vst.msk [vmem:[#allocation4 + $0xbc] sm:$0xf] %vm95_vm3, %v6081_v45 }
  0x21   :  { %1896 = vrot.lane.b32.xlu1 %v5369_v41, %s6079_s29 }
  0x26   :  { %5729 = vmatmul.mubr.msk.bf16.gmra.mxu0 %vm356_vm0, %v5858_v10 }
  0x27   :  { %5732 = vmatprep.mubr.msk.bf16.mxu0 %vm356_vm0, %v5859_v11 }
  0x2e   :  { %5733 = vmatmul.mubr.msk.bf16.gmra.mxu0 %vm356_vm0, %v5860_v12 }
  0x2f   :  { %5736 = vmatprep.mubr.msk.bf16.mxu0 %vm356_vm0, %v5861_v13 }
  0x36   :  { %5737 = vmatmul.mubr.msk.bf16.gmra.mxu0 %vm356_vm0, %v5862_v14 }
  0x37   :  { %5740 = vmatprep.mubr.msk.bf16.mxu0 %vm356_vm0, %v5863_v15 }
  0x3e   :  { %5741 = vmatmul.mubr.msk.bf16.gmra.mxu0 %vm356_vm0, %v5864_v16 }
  0x3f   :  { %5744 = vmatprep.mubr.msk.bf16.mxu0 %vm356_vm0, %v5865_v17 }
  0x46   :  { %5745 = vmatmul.mubr.msk.bf16.gmra.mxu0 %vm356_vm0, %v5866_v18 }
  0x47   :  { %5748 = vmatprep.mubr.msk.bf16.mxu0 %vm356_vm0, %v5867_v19 }
  0x4e   :  { %5749 = vmatmul.mubr.msk.bf16.gmra.mxu0 %vm356_vm0, %v5868_v20 }
  0x4f   :  { %5752 = vmatprep.mubr.msk.bf16.mxu0 %vm356_vm0, %v5869_v21 }
  0x56   :  { %5753 = vmatmul.mubr.msk.bf16.gmra.mxu0 %vm356_vm0, %v5870_v23 }
  0x57   :  { %5756 = vmatprep.mubr.msk.bf16.mxu0 %vm356_vm0, %v5871_v24 }
  0x5e   :  { %5757 = vmatmul.mubr.msk.bf16.gmra.mxu0 %vm356_vm0, %v5872_v27 }
  0x5f   :  { %5760 = vmatprep.mubr.msk.bf16.mxu0 %vm356_vm0, %v5873_v32 }
  0x66   :  { %5761 = vmatmul.mubr.msk.bf16.gmra.mxu0 %vm356_vm0, %v5874_v37 }
  0x67   :  { %5764 = vmatprep.mubr.msk.bf16.mxu0 %vm356_vm0, %v5875_v40 }
  0x6e   :  { %5765 = vmatmul.mubr.msk.bf16.gmra.mxu0 %vm356_vm0, %v5876_v43 }
  0x6f   :  { %5768 = vmatprep.mubr.msk.bf16.mxu0 %vm356_vm0, %v5877_v44 }
  0x76   :  { %5769 = vmatmul.mubr.msk.bf16.gmra.mxu0 %vm356_vm0, %v5878_v46 }
  0x77   :  { %5772 = vmatprep.mubr.msk.bf16.mxu0 %vm356_vm0, %v5879_v47 }
  0x7e   :  { %5773 = vmatmul.mubr.msk.bf16.gmra.mxu0 %vm356_vm0, %v5880_v48 }
  0x7f   :  { %16 = vsyncpa [#allocation11], 0  ;;  %v2065_v49 = vld [vmem:[#allocation3 + $0x92] sm:$0xff]  ;;  %vm1079_vm4 = vcmask 257024   ;;  %v6399_v51 = vld [vmem:[%s7673_s2] ss:$0 sm:$0xff]  ;;  %v1133_v59 = vpop.permute.xlu0 %1132 }
  0x80   :  { %v2066_v50 = vpack.c.bf16 %v2065_v49, %v2065_v49  ;;  %v1077_v54 = vld [vmem:[#allocation3] sm:$0xff]  ;;  %vm1135_vm5 = vcmask 519424   ;;  %vm1280_vm6 = vcmask 781824   ;;  %v5881_v25 = vld [vmem:[%s7674_s3 + $0x78] sm:$0xff]   ;;  %v5883_v38 = vld [vmem:[%s7674_s3 + $0x70] sm:$0xff]   ;;  %vm1425_vm7 = vcmask 1044224  }
  0x81   :  { %v1078_v56 = vpack.c.bf16 %v1077_v54, %v1077_v54  ;;  %v1103_v6 = vld [vmem:[#allocation3 + $0xa0] sm:$0xff]  ;;  %v5882_v29 = vld [vmem:[%s7674_s3 + $0x38] sm:$0xff]   ;;  %5471 = vmatprep.subr.bf16.mxu1 %v5881_v25  ;;  %v5884_v40 = vld [vmem:[%s7674_s3 + $0x30] sm:$0xff]   ;;  %vm82_vm8 = vcmask 521216   ;;  %vm112_vm9 = vcmask 1043968   ;;  %vm2793_vm10 = vcmask 519170  }
  0x82   :  { %2067 = vst.msk [vmem:[#allocation4 + $0x5c] sm:$0xf] %vm1079_vm4, %v2066_v50  ;;  %v1104_v8 = vpack.c.bf16 %v1103_v6, %v1103_v6  ;;  %5472 = vmatpush3.bf16.msra.mxu1 %v5882_v29  ;;  %v5885_v49 = vld [vmem:[%s7674_s3 + $0x68] sm:$0xff]   ;;  %v5891_v29 = vld [vmem:[%s7674_s3 + $0x50] sm:$0xff]   ;;  %vm2784_vm11 = vcmask 517120   ;;  %vm2661_vm12 = vcmask 523264  }
  0x83   :  { %1080 = vst.msk [vmem:[#allocation4] sm:$0xf] %vm1079_vm4, %v1078_v56  ;;  %v1278_v2 = vpop.permute.xlu0 %1277  ;;  %5473 = vmatprep.subr.bf16.mxu1 %v5883_v38  ;;  %v5886_v54 = vld [vmem:[%s7674_s3 + $0x28] sm:$0xff]   ;;  %v5892_v38 = vld [vmem:[%s7674_s3 + $0x10] sm:$0xff]   ;;  %vm2837_vm13 = vcmask 1041920   ;;  %vm2689_vm14 = vcmask 519168  }
  0x84   :  { %1136 = vst.msk [vmem:[#allocation4] sm:$0xf] %vm1135_vm5, %v1133_v59  ;;  %vm2848_vm15 = vcmask 1043970   ;;  %vm3861_vm0 = vcmask 516096   ;;  %vm6083_vm2 = vmmov 0  }
  0x85   :  { %1281 = vst.msk [vmem:[#allocation4] sm:$0xf] %vm1280_vm6, %v1278_v2 }
  0x86   :  { %1105 = vst.msk [vmem:[#allocation4 + $0x60] sm:$0xf] %vm1079_vm4, %v1104_v8  ;;  %5474 = vmatpush3.bf16.msra.mxu1 %v5884_v40  ;;  %v5888_v8 = vld [vmem:[%s7674_s3 + $0x20] sm:$0xff]  }
  0x87   :  { %5475 = vmatprep.subr.bf16.mxu1 %v5885_v49  ;;  %v5893_v49 = vld [vmem:[%s7674_s3 + $0x48] sm:$0xff]   ;;  %83 = vst.msk [vmem:[#allocation6] sm:$0x3f] %vm82_vm8, %v6077_v22  ;;  %84 = vst.msk [vmem:[#allocation6 + $0x8] sm:$0x3f] %vm82_vm8, %v6077_v22 }
  0x88   :  { %85 = vst.msk [vmem:[#allocation6 + $0x10] sm:$0x3f] %vm82_vm8, %v6077_v22  ;;  %86 = vst.msk [vmem:[#allocation6 + $0x18] sm:$0x3f] %vm82_vm8, %v6077_v22 }
  0x89   :  { %87 = vst.msk [vmem:[#allocation6 + $0x20] sm:$0x3f] %vm82_vm8, %v6077_v22  ;;  %88 = vst.msk [vmem:[#allocation6 + $0x28] sm:$0x3f] %vm82_vm8, %v6077_v22 }
  0x8a   :  { %5476 = vmatpush3.bf16.msra.mxu1 %v5886_v54  ;;  %v5894_v54 = vld [vmem:[%s7674_s3 + $0x8] sm:$0xff]   ;;  %89 = vst.msk [vmem:[#allocation6 + $0x30] sm:$0x3f] %vm82_vm8, %v6077_v22  ;;  %90 = vst.msk [vmem:[#allocation6 + $0x38] sm:$0x3f] %vm82_vm8, %v6077_v22 }
  0x8b   :  { %v1206_v12 = vpop.permute.xlu0 %1205  ;;  %91 = vst.msk [vmem:[#allocation6 + $0x40] sm:$0x3f] %vm82_vm8, %v6077_v22  ;;  %92 = vst.msk [vmem:[#allocation6 + $0x48] sm:$0x3f] %vm82_vm8, %v6077_v22 }
  0x8c   :  { %1208 = vst.msk [vmem:[#allocation4 + $0x60] sm:$0xf] %vm1135_vm5, %v1206_v12 }
  0x8d   :  { %93 = vst.msk [vmem:[#allocation6 + $0x50] sm:$0x3f] %vm82_vm8, %v6077_v22  ;;  %94 = vst.msk [vmem:[#allocation6 + $0x58] sm:$0x3f] %vm82_vm8, %v6077_v22 }
  0x8e   :  { %113 = vst.msk [vmem:[#allocation7 + $0x10] sm:$0xf] %vm112_vm9, %v6081_v45  ;;  %114 = vst.msk [vmem:[#allocation7 + $0x24] sm:$0xf] %vm112_vm9, %v6081_v45 }
  0x8f   :  { %v1351_v21 = vpop.permute.xlu0 %1350  ;;  %115 = vst.msk [vmem:[#allocation7 + $0x38] sm:$0xf] %vm112_vm9, %v6081_v45  ;;  %116 = vst.msk [vmem:[#allocation7 + $0x4c] sm:$0xf] %vm112_vm9, %v6081_v45 }
  0x90   :  { %1353 = vst.msk [vmem:[#allocation4 + $0x60] sm:$0xf] %vm1280_vm6, %v1351_v21 }
  0xc6   :  { %v5714_v52 = vpop.f32.mrf.mxu0 }
  0xc7   :  { %v496_v53 = vadd.f32 %v5714_v52, %v6399_v51 }
  0xc8   :  { %v487_v55 = vpop.f32.mrf.mxu0 }
  0xc9   :  { %v744_v57 = vmax.f32 %v496_v53, 0.0  ;;  %v488_v58 = vadd.f32 %v6399_v51, %v487_v55 }
  0xca   :  { %v5715_v60 = vpop.f32.mrf.mxu0 }
  0xcb   :  { %808 = vst.msk [vmem:[#allocation2 + $0x10] sm:$0xff] %vm40_vm1, %v744_v57  ;;  %v742_v61 = vmax.f32 %v488_v58, 0.0  ;;  %v499_v62 = vadd.f32 %v5715_v60, %v6399_v51 }
  0xcc   :  { %v490_v63 = vpop.f32.mrf.mxu0 }
  0xcd   :  { %806 = vst.msk [vmem:[#allocation2] sm:$0xff] %vm40_vm1, %v742_v61  ;;  %v745_v0 = vmax.f32 %v499_v62, 0.0  ;;  %v491_v1 = vadd.f32 %v6399_v51, %v490_v63  ;;  %v5887_v63 = vld [vmem:[%s7674_s3 + $0x60] sm:$0xff]  }
  0xce   :  { %v5718_v3 = vpop.f32.mrf.mxu0  ;;  %5477 = vmatprep.subr.bf16.mxu1 %v5887_v63 }
  0xcf   :  { %809 = vst.msk [vmem:[#allocation2 + $0x18] sm:$0xff] %vm40_vm1, %v745_v0  ;;  %v743_v4 = vmax.f32 %v491_v1, 0.0  ;;  %v512_v5 = vadd.f32 %v5718_v3, %v6399_v51  ;;  %5478 = vmatpush3.bf16.msra.mxu1 %v5888_v8 }
  0xd0   :  { %v503_v7 = vpop.f32.mrf.mxu0 }
  0xd1   :  { %807 = vst.msk [vmem:[#allocation2 + $0x8] sm:$0xff] %vm40_vm1, %v743_v4  ;;  %v748_v9 = vmax.f32 %v512_v5, 0.0  ;;  %v504_v10 = vadd.f32 %v6399_v51, %v503_v7 }
  0xd2   :  { %v5719_v11 = vpop.f32.mrf.mxu0 }
  0xd3   :  { %812 = vst.msk [vmem:[#allocation2 + $0x30] sm:$0xff] %vm40_vm1, %v748_v9  ;;  %v746_v13 = vmax.f32 %v504_v10, 0.0  ;;  %v515_v14 = vadd.f32 %v5719_v11, %v6399_v51 }
  0xd4   :  { %v506_v15 = vpop.f32.mrf.mxu0 }
  0xd5   :  { %810 = vst.msk [vmem:[#allocation2 + $0x20] sm:$0xff] %vm40_vm1, %v746_v13  ;;  %v749_v16 = vmax.f32 %v515_v14, 0.0  ;;  %v507_v17 = vadd.f32 %v6399_v51, %v506_v15  ;;  %v5889_v15 = vld [vmem:[%s7674_s3 + $0x58] sm:$0xff]  }
  0xd6   :  { %v875_v18 = vld [vmem:[#allocation2 + $0x10] ss:$2 sm:$0xff]  ;;  %v877_v19 = vld [vmem:[#allocation2 + $0x11] ss:$2 sm:$0xff]  ;;  %v5722_v20 = vpop.f32.mrf.mxu0  ;;  %5479 = vmatprep.subr.bf16.mxu1 %v5889_v15 }
  0xd7   :  { %813 = vst.msk [vmem:[#allocation2 + $0x38] sm:$0xff] %vm40_vm1, %v749_v16  ;;  %v747_v23 = vmax.f32 %v507_v17, 0.0  ;;  %v528_v24 = vadd.f32 %v5722_v20, %v6399_v51  ;;  %v878_v30 = vmax.f32 %v875_v18, %v877_v19  ;;  %v5890_v19 = vld [vmem:[%s7674_s3 + $0x18] sm:$0xff]  }
  0xd8   :  { %v870_v26 = vld [vmem:[#allocation2] ss:$2 sm:$0xff]  ;;  %v872_v27 = vld [vmem:[#allocation2 + $0x1] ss:$2 sm:$0xff]  ;;  %v519_v28 = vpop.f32.mrf.mxu0  ;;  %5480 = vmatpush3.bf16.msra.mxu1 %v5890_v19 }
  0xd9   :  { %v873_v31 = vmax.f32 %v870_v26, %v872_v27  ;;  %811 = vst.msk [vmem:[#allocation2 + $0x28] sm:$0xff] %vm40_vm1, %v747_v23  ;;  %v752_v32 = vmax.f32 %v528_v24, 0.0  ;;  %v520_v33 = vadd.f32 %v6399_v51, %v519_v28  ;;  %5481 = vmatprep.subr.bf16.mxu1 %v5891_v29 }
  0xda   :  { %v5723_v34 = vpop.f32.mrf.mxu0 }
  0xdb   :  { %v879_v35 = vmax.f32 %v873_v31, %v878_v30  ;;  %816 = vst.msk [vmem:[#allocation2 + $0x50] sm:$0xff] %vm40_vm1, %v752_v32  ;;  %v750_v36 = vmax.f32 %v520_v33, 0.0  ;;  %v531_v37 = vadd.f32 %v5723_v34, %v6399_v51 }
  0xdc   :  { %v522_v39 = vpop.f32.mrf.mxu0  ;;  %5482 = vmatpush3.bf16.msra.mxu1 %v5892_v38 }
  0xdd   :  { %814 = vst.msk [vmem:[#allocation2 + $0x40] sm:$0xff] %vm40_vm1, %v750_v36  ;;  %881 = vst.msk [vmem:[#allocation3 + $0x11] sm:$0xff] %vm40_vm1, %v879_v35  ;;  %v753_v41 = vmax.f32 %v531_v37, 0.0  ;;  %v523_v42 = vadd.f32 %v6399_v51, %v522_v39  ;;  %5483 = vmatprep.subr.bf16.mxu1 %v5893_v49 }
  0xde   :  { %v888_v43 = vld [vmem:[#allocation2 + $0x30] ss:$2 sm:$0xff]  ;;  %v890_v44 = vld [vmem:[#allocation2 + $0x31] ss:$2 sm:$0xff]  ;;  %v5726_v46 = vpop.f32.mrf.mxu0 }
  0xdf   :  { %817 = vst.msk [vmem:[#allocation2 + $0x58] sm:$0xff] %vm40_vm1, %v753_v41  ;;  %v751_v47 = vmax.f32 %v523_v42, 0.0  ;;  %v544_v48 = vadd.f32 %v5726_v46, %v6399_v51  ;;  %v891_v55 = vmax.f32 %v888_v43, %v890_v44 }
  0xe0   :  { %v883_v50 = vld [vmem:[#allocation2 + $0x20] ss:$2 sm:$0xff]  ;;  %v885_v52 = vld [vmem:[#allocation2 + $0x21] ss:$2 sm:$0xff]  ;;  %v535_v53 = vpop.f32.mrf.mxu0  ;;  %5484 = vmatpush3.bf16.msra.mxu1 %v5894_v54 }
  0xe1   :  { %v886_v56 = vmax.f32 %v883_v50, %v885_v52  ;;  %815 = vst.msk [vmem:[#allocation2 + $0x48] sm:$0xff] %vm40_vm1, %v751_v47  ;;  %v756_v57 = vmax.f32 %v544_v48, 0.0  ;;  %v536_v58 = vadd.f32 %v6399_v51, %v535_v53 }
  0xe2   :  { %v5727_v59 = vpop.f32.mrf.mxu0 }
  0xe3   :  { %v892_v60 = vmax.f32 %v886_v56, %v891_v55  ;;  %820 = vst.msk [vmem:[#allocation2 + $0x70] sm:$0xff] %vm40_vm1, %v756_v57  ;;  %v754_v61 = vmax.f32 %v536_v58, 0.0  ;;  %v547_v62 = vadd.f32 %v5727_v59, %v6399_v51 }
  0xe4   :  { %v538_v0 = vpop.f32.mrf.mxu0  ;;  %v1610_v1 = vld [vmem:[#allocation3 + $0x12] sm:$0xff] }
  0xe5   :  { %v1137_v2 = vld [vmem:[#allocation3 + $0x11] sm:$0xff]  ;;  %894 = vst.msk [vmem:[#allocation3 + $0x21] sm:$0xff] %vm40_vm1, %v892_v60  ;;  %818 = vst.msk [vmem:[#allocation2 + $0x60] sm:$0xff] %vm40_vm1, %v754_v61  ;;  %v757_v4 = vmax.f32 %v547_v62, 0.0  ;;  %v539_v5 = vadd.f32 %v6399_v51, %v538_v0  ;;  %v5338_v6 = vpack.c.bf16 %v1610_v1, %v1610_v1  ;;  %v5895_v62 = vld [vmem:[%s7674_s3 + $0x40] sm:$0xff]  }
  0xe6   :  { %v1417_v3 = vld [vmem:[#allocation3 + $0x10] sm:$0xff]  ;;  %v5291_v7 = vpack.c.bf16 %v1137_v2, %v1137_v2  ;;  %v5730_v11 = vpop.f32.mrf.mxu0  ;;  %5485 = vmatprep.subr.bf16.mxu1 %v5895_v62 }
  0xe7   :  { %v901_v9 = vld [vmem:[#allocation2 + $0x50] ss:$2 sm:$0xff]  ;;  %v903_v10 = vld [vmem:[#allocation2 + $0x51] ss:$2 sm:$0xff]  ;;  %v5322_v12 = vpack.c.bf16 %v1417_v3, %v1417_v3  ;;  %821 = vst.msk [vmem:[#allocation2 + $0x78] sm:$0xff] %vm40_vm1, %v757_v4  ;;  %v755_v13 = vmax.f32 %v539_v5, 0.0  ;;  %v560_v14 = vadd.f32 %v5730_v11, %v6399_v51  ;;  %1615 = vrot.lane.b32.xlu1 %v5338_v6, %s6078_s1 }
  0xe8   :  { %1142 = vrot.lane.b32.xlu0 %v5291_v7, %s6078_s1  ;;  %1564 = vst.msk [vmem:[#allocation4 + $0x4] sm:$0xf] %vm1079_vm4, %v5291_v7  ;;  %v896_v16 = vld [vmem:[#allocation2 + $0x40] ss:$2 sm:$0xff]  ;;  %v898_v17 = vld [vmem:[#allocation2 + $0x41] ss:$2 sm:$0xff]  ;;  %v551_v18 = vpop.f32.mrf.mxu0  ;;  %v904_v20 = vmax.f32 %v901_v9, %v903_v10 }
  0xe9   :  { %1083 = vst.msk [vmem:[#allocation4 + $0xc] sm:$0xf] %vm1079_vm4, %v5322_v12  ;;  %v899_v21 = vmax.f32 %v896_v16, %v898_v17  ;;  %v760_v23 = vmax.f32 %v560_v14, 0.0  ;;  %v552_v24 = vadd.f32 %v6399_v51, %v551_v18  ;;  %v5896_v7 = vld [vmem:[%s7674_s3] sm:$0xff]  }
  0xea   :  { %819 = vst.msk [vmem:[#allocation2 + $0x68] sm:$0xff] %vm40_vm1, %v755_v13  ;;  %v5731_v25 = vpop.f32.mrf.mxu0  ;;  %5486 = vmatpush3.bf16.msra.mxu1 %v5896_v7 }
  0xeb   :  { %v905_v26 = vmax.f32 %v899_v21, %v904_v20  ;;  %824 = vst.msk [vmem:[#allocation2 + $0x90] sm:$0xff] %vm40_vm1, %v760_v23  ;;  %v758_v27 = vmax.f32 %v552_v24, 0.0  ;;  %v563_v28 = vadd.f32 %v5731_v25, %v6399_v51  ;;  %1287 = vrot.lane.b32.xlu1 %v5338_v6, %s6079_s29 }
  0xec   :  { %1422 = vrot.lane.b32.xlu0 %v5322_v12, %s6080_s30  ;;  %v554_v30 = vpop.f32.mrf.mxu0  ;;  %v1619_v31 = vld [vmem:[#allocation3 + $0x22] sm:$0xff] }
  0xed   :  { %v1754_v32 = vld [vmem:[#allocation3 + $0x20] sm:$0xff]  ;;  %907 = vst.msk [vmem:[#allocation3 + $0x31] sm:$0xff] %vm40_vm1, %v905_v26  ;;  %822 = vst.msk [vmem:[#allocation2 + $0x80] sm:$0xff] %vm40_vm1, %v758_v27  ;;  %v761_v34 = vmax.f32 %v563_v28, 0.0  ;;  %v555_v35 = vadd.f32 %v6399_v51, %v554_v30  ;;  %v6487_v36 = vpack.c.bf16 %v1619_v31, %v1619_v31 }
  0xee   :  { %v1900_v33 = vld [vmem:[#allocation3 + $0x21] sm:$0xff]  ;;  %v5354_v37 = vpack.c.bf16 %v1754_v32, %v1754_v32  ;;  %v914_v40 = vld [vmem:[#allocation2 + $0x70] ss:$2 sm:$0xff]  ;;  %v916_v41 = vld [vmem:[#allocation2 + $0x71] ss:$2 sm:$0xff]  ;;  %v5734_v42 = vpop.f32.mrf.mxu0 }
  0xef   :  { %v2044_v39 = vld [vmem:[#allocation3 + $0x22] sm:$0xff]  ;;  %v5370_v43 = vpack.c.bf16 %v1900_v33, %v1900_v33  ;;  %v917_v46 = vmax.f32 %v914_v40, %v916_v41  ;;  %825 = vst.msk [vmem:[#allocation2 + $0x98] sm:$0xff] %vm40_vm1, %v761_v34  ;;  %v759_v47 = vmax.f32 %v555_v35, 0.0  ;;  %1624 = vrot.lane.b32.xlu1 %v6487_v36, %s6078_s1  ;;  %v576_v48 = vadd.f32 %v5734_v42, %v6399_v51 }
  0xf0   :  { %v2045_v44 = vpack.c.bf16 %v2044_v39, %v2044_v39  ;;  %1759 = vrot.lane.b32.xlu0 %v5354_v37, %s6079_s29  ;;  %1086 = vst.msk [vmem:[#allocation4 + $0x18] sm:$0xf] %vm1079_vm4, %v5354_v37  ;;  %v567_v53 = vpop.f32.mrf.mxu0 }
  0xf1   :  { %v909_v50 = vld [vmem:[#allocation2 + $0x60] ss:$2 sm:$0xff]  ;;  %v911_v52 = vld [vmem:[#allocation2 + $0x61] ss:$2 sm:$0xff]  ;;  %1567 = vst.msk [vmem:[#allocation4 + $0x10] sm:$0xf] %vm1079_vm4, %v5370_v43  ;;  %v568_v57 = vadd.f32 %v6399_v51, %v567_v53 }
  0xf2   :  { %2046 = vst.msk [vmem:[#allocation4 + $0x8] sm:$0xf] %vm1079_vm4, %v2045_v44  ;;  %v912_v55 = vmax.f32 %v909_v50, %v911_v52  ;;  %v764_v56 = vmax.f32 %v576_v48, 0.0  ;;  %v5735_v58 = vpop.f32.mrf.mxu0 }
  0xf3   :  { %823 = vst.msk [vmem:[#allocation2 + $0x88] sm:$0xff] %vm40_vm1, %v759_v47  ;;  %v762_v60 = vmax.f32 %v568_v57, 0.0  ;;  %1432 = vrot.lane.b32.xlu1 %v5354_v37, %s6080_s30  ;;  %v579_v61 = vadd.f32 %v5735_v58, %v6399_v51 }
  0xf4   :  { %v918_v59 = vmax.f32 %v912_v55, %v917_v46  ;;  %828 = vst.msk [vmem:[#allocation2 + $0xb0] sm:$0xff] %vm40_vm1, %v764_v56  ;;  %1905 = vrot.lane.b32.xlu0 %v5370_v43, %s6080_s30  ;;  %v570_v63 = vpop.f32.mrf.mxu0  ;;  %v1763_v0 = vld [vmem:[#allocation3 + $0x30] sm:$0xff] }
  0xf5   :  { %v1909_v1 = vld [vmem:[#allocation3 + $0x31] sm:$0xff]  ;;  %826 = vst.msk [vmem:[#allocation2 + $0xa0] sm:$0xff] %vm40_vm1, %v762_v60  ;;  %v765_v2 = vmax.f32 %v579_v61, 0.0  ;;  %v571_v3 = vadd.f32 %v6399_v51, %v570_v63  ;;  %v6518_v4 = vpack.c.bf16 %v1763_v0, %v1763_v0 }
  0xf6   :  { %920 = vst.msk [vmem:[#allocation3 + $0x41] sm:$0xff] %vm40_vm1, %v918_v59  ;;  %v1087_v5 = vld [vmem:[#allocation3 + $0x30] sm:$0xff]  ;;  %v5738_v10 = vpop.f32.mrf.mxu0  ;;  %v5371_v25 = vpack.c.bf16 %v1909_v1, %v1909_v1 }
  0xf7   :  { %v1568_v6 = vld [vmem:[#allocation3 + $0x31] sm:$0xff]  ;;  %v1088_v11 = vpack.c.bf16 %v1087_v5, %v1087_v5  ;;  %829 = vst.msk [vmem:[#allocation2 + $0xb8] sm:$0xff] %vm40_vm1, %v765_v2  ;;  %v763_v15 = vmax.f32 %v571_v3, 0.0  ;;  %1768 = vrot.lane.b32.xlu1 %v6518_v4, %s6079_s29  ;;  %v592_v16 = vadd.f32 %v5738_v10, %v6399_v51 }
  0xf8   :  { %v927_v8 = vld [vmem:[#allocation2 + $0x90] ss:$2 sm:$0xff]  ;;  %v929_v9 = vld [vmem:[#allocation2 + $0x91] ss:$2 sm:$0xff]  ;;  %v1569_v12 = vpack.c.bf16 %v1568_v6, %v1568_v6  ;;  %1151 = vrot.lane.b32.xlu0 %v5370_v43, %s6078_s1  ;;  %v583_v20 = vpop.f32.mrf.mxu0 }
  0xf9   :  { %v2047_v13 = vld [vmem:[#allocation3 + $0x32] sm:$0xff]  ;;  %v930_v14 = vmax.f32 %v927_v8, %v929_v9  ;;  %1089 = vst.msk [vmem:[#allocation4 + $0x24] sm:$0xf] %vm1079_vm4, %v1088_v11  ;;  %v768_v23 = vmax.f32 %v592_v16, 0.0  ;;  %v584_v24 = vadd.f32 %v6399_v51, %v583_v20 }
  0xfa   :  { %v2048_v17 = vpack.c.bf16 %v2047_v13, %v2047_v13  ;;  %v922_v18 = vld [vmem:[#allocation2 + $0x80] ss:$2 sm:$0xff]  ;;  %v924_v19 = vld [vmem:[#allocation2 + $0x81] ss:$2 sm:$0xff]  ;;  %1570 = vst.msk [vmem:[#allocation4 + $0x1c] sm:$0xf] %vm1079_vm4, %v1569_v12  ;;  %v5739_v26 = vpop.f32.mrf.mxu0 }
  0xfb   :  { %v925_v21 = vmax.f32 %v922_v18, %v924_v19  ;;  %827 = vst.msk [vmem:[#allocation2 + $0xa8] sm:$0xff] %vm40_vm1, %v763_v15  ;;  %v1628_v27 = vld [vmem:[#allocation3 + $0x32] sm:$0xff]  ;;  %832 = vst.msk [vmem:[#allocation2 + $0xd0] sm:$0xff] %vm40_vm1, %v768_v23  ;;  %v766_v29 = vmax.f32 %v584_v24, 0.0  ;;  %1914 = vrot.lane.b32.xlu1 %v5371_v25, %s6080_s30  ;;  %v595_v30 = vadd.f32 %v5739_v26, %v6399_v51 }
  0xfc   :  { %2049 = vst.msk [vmem:[#allocation4 + $0x14] sm:$0xf] %vm1079_vm4, %v2048_v17  ;;  %1296 = vrot.lane.b32.xlu0 %v6487_v36, %s6079_s29  ;;  %v586_v31 = vpop.f32.mrf.mxu0  ;;  %v5340_v34 = vpack.c.bf16 %v1628_v27, %v1628_v27  ;;  %v2089_v23 = vld [vmem:[#allocation3 + $0x132] sm:$0xff] }
  0xfd   :  { %v931_v28 = vmax.f32 %v925_v21, %v930_v14  ;;  %830 = vst.msk [vmem:[#allocation2 + $0xc0] sm:$0xff] %vm40_vm1, %v766_v29  ;;  %v769_v32 = vmax.f32 %v595_v30, 0.0  ;;  %v587_v33 = vadd.f32 %v6399_v51, %v586_v31  ;;  %v1571_v35 = vld [vmem:[#allocation3 + $0x41] sm:$0xff]  ;;  %v2090_v26 = vpack.c.bf16 %v2089_v23, %v2089_v23 }
  0xfe   :  { %v1090_v37 = vld [vmem:[#allocation3 + $0x40] sm:$0xff]  ;;  %v940_v39 = vld [vmem:[#allocation2 + $0xb0] ss:$2 sm:$0xff]  ;;  %v942_v40 = vld [vmem:[#allocation2 + $0xb1] ss:$2 sm:$0xff]  ;;  %v5742_v41 = vpop.f32.mrf.mxu0  ;;  %v1572_v42 = vpack.c.bf16 %v1571_v35, %v1571_v35 }
  0xff   :  { %933 = vst.msk [vmem:[#allocation3 + $0x51] sm:$0xff] %vm40_vm1, %v931_v28  ;;  %v2050_v38 = vld [vmem:[#allocation3 + $0x42] sm:$0xff]  ;;  %v1091_v43 = vpack.c.bf16 %v1090_v37, %v1090_v37  ;;  %v943_v44 = vmax.f32 %v940_v39, %v942_v40  ;;  %833 = vst.msk [vmem:[#allocation2 + $0xd8] sm:$0xff] %vm40_vm1, %v769_v32  ;;  %v767_v46 = vmax.f32 %v587_v33, 0.0  ;;  %1160 = vrot.lane.b32.xlu1 %v5371_v25, %s6078_s1 }
 0x100   :  { %v2051_v36 = vpack.c.bf16 %v2050_v38, %v2050_v38  ;;  %1633 = vrot.lane.b32.xlu0 %v5340_v34, %s6078_s1  ;;  %v608_v47 = vadd.f32 %v5742_v41, %v6399_v51  ;;  %v599_v50 = vpop.f32.mrf.mxu0  ;;  %1573 = vst.msk [vmem:[#allocation4 + $0x28] sm:$0xf] %vm1079_vm4, %v1572_v42  ;;  %v1637_v55 = vld [vmem:[#allocation3 + $0x42] sm:$0xff]  ;;  %2091 = vst.msk [vmem:[#allocation4 + $0xbc] sm:$0xf] %vm1079_vm4, %v2090_v26 }
 0x101   :  { %1092 = vst.msk [vmem:[#allocation4 + $0x30] sm:$0xf] %vm1079_vm4, %v1091_v43  ;;  %v600_v54 = vadd.f32 %v6399_v51, %v599_v50  ;;  %v1772_v56 = vld [vmem:[#allocation3 + $0x40] sm:$0xff]  ;;  %v6556_v62 = vpack.c.bf16 %v1637_v55, %v1637_v55 }
 0x102   :  { %v935_v48 = vld [vmem:[#allocation2 + $0xa0] ss:$2 sm:$0xff]  ;;  %v937_v49 = vld [vmem:[#allocation2 + $0xa1] ss:$2 sm:$0xff]  ;;  %2052 = vst.msk [vmem:[#allocation4 + $0x20] sm:$0xf] %vm1079_vm4, %v2051_v36  ;;  %v5743_v57 = vpop.f32.mrf.mxu0  ;;  %v5356_v63 = vpack.c.bf16 %v1772_v56, %v1772_v56 }
 0x103   :  { %v938_v52 = vmax.f32 %v935_v48, %v937_v49  ;;  %831 = vst.msk [vmem:[#allocation2 + $0xc8] sm:$0xff] %vm40_vm1, %v767_v46  ;;  %v772_v53 = vmax.f32 %v608_v47, 0.0  ;;  %1305 = vrot.lane.b32.xlu1 %v5340_v34, %s6079_s29  ;;  %v770_v59 = vmax.f32 %v600_v54, 0.0  ;;  %v611_v60 = vadd.f32 %v5743_v57, %v6399_v51  ;;  %v1918_v7 = vld [vmem:[#allocation3 + $0x41] sm:$0xff] }
 0x104   :  { %1441 = vrot.lane.b32.xlu0 %v6518_v4, %s6080_s30  ;;  %v602_v61 = vpop.f32.mrf.mxu0  ;;  %v5372_v19 = vpack.c.bf16 %v1918_v7, %v1918_v7 }
 0x105   :  { %v944_v58 = vmax.f32 %v938_v52, %v943_v44  ;;  %836 = vst.msk [vmem:[#allocation2 + $0xf0] sm:$0xff] %vm40_vm1, %v772_v53  ;;  %834 = vst.msk [vmem:[#allocation2 + $0xe0] sm:$0xff] %vm40_vm1, %v770_v59  ;;  %v773_v0 = vmax.f32 %v611_v60, 0.0  ;;  %v603_v1 = vadd.f32 %v6399_v51, %v602_v61 }
 0x106   :  { %v1093_v2 = vld [vmem:[#allocation3 + $0x50] sm:$0xff]  ;;  %v5746_v8 = vpop.f32.mrf.mxu0 }
 0x107   :  { %946 = vst.msk [vmem:[#allocation3 + $0x61] sm:$0xff] %vm40_vm1, %v944_v58  ;;  %v1574_v3 = vld [vmem:[#allocation3 + $0x51] sm:$0xff]  ;;  %v1094_v9 = vpack.c.bf16 %v1093_v2, %v1093_v2  ;;  %1642 = vrot.lane.b32.xlu1 %v6556_v62, %s6078_s1  ;;  %837 = vst.msk [vmem:[#allocation2 + $0xf8] sm:$0xff] %vm40_vm1, %v773_v0  ;;  %v771_v13 = vmax.f32 %v603_v1, 0.0  ;;  %v624_v14 = vadd.f32 %v5746_v8, %v6399_v51 }
 0x108   :  { %v2053_v5 = vld [vmem:[#allocation3 + $0x52] sm:$0xff]  ;;  %v1575_v10 = vpack.c.bf16 %v1574_v3, %v1574_v3  ;;  %1777 = vrot.lane.b32.xlu0 %v5356_v63, %s6079_s29  ;;  %v615_v17 = vpop.f32.mrf.mxu0 }
 0x109   :  { %v953_v4 = vld [vmem:[#allocation2 + $0xd0] ss:$2 sm:$0xff]  ;;  %v955_v6 = vld [vmem:[#allocation2 + $0xd1] ss:$2 sm:$0xff]  ;;  %v2054_v11 = vpack.c.bf16 %v2053_v5, %v2053_v5  ;;  %1095 = vst.msk [vmem:[#allocation4 + $0x3c] sm:$0xf] %vm1079_vm4, %v1094_v9  ;;  %v616_v21 = vadd.f32 %v6399_v51, %v615_v17 }
 0x10a   :  { %v956_v12 = vmax.f32 %v953_v4, %v955_v6  ;;  %v948_v15 = vld [vmem:[#allocation2 + $0xc0] ss:$2 sm:$0xff]  ;;  %v950_v16 = vld [vmem:[#allocation2 + $0xc1] ss:$2 sm:$0xff]  ;;  %1576 = vst.msk [vmem:[#allocation4 + $0x34] sm:$0xf] %vm1079_vm4, %v1575_v10  ;;  %v5747_v25 = vpop.f32.mrf.mxu0 }
 0x10b   :  { %2055 = vst.msk [vmem:[#allocation4 + $0x2c] sm:$0xf] %vm1079_vm4, %v2054_v11  ;;  %v951_v18 = vmax.f32 %v948_v15, %v950_v16  ;;  %v776_v20 = vmax.f32 %v624_v14, 0.0  ;;  %v1781_v24 = vld [vmem:[#allocation3 + $0x50] sm:$0xff]  ;;  %1450 = vrot.lane.b32.xlu1 %v5356_v63, %s6080_s30  ;;  %v774_v28 = vmax.f32 %v616_v21, 0.0  ;;  %v627_v29 = vadd.f32 %v5747_v25, %v6399_v51 }
 0x10c   :  { %835 = vst.msk [vmem:[#allocation2 + $0xe8] sm:$0xff] %vm40_vm1, %v771_v13  ;;  %1923 = vrot.lane.b32.xlu0 %v5372_v19, %s6080_s30  ;;  %v618_v30 = vpop.f32.mrf.mxu0  ;;  %v6576_v32 = vpack.c.bf16 %v1781_v24, %v1781_v24  ;;  %v1927_v40 = vld [vmem:[#allocation3 + $0x51] sm:$0xff] }
 0x10d   :  { %v957_v27 = vmax.f32 %v951_v18, %v956_v12  ;;  %840 = vst.msk [vmem:[#allocation2 + $0x110] sm:$0xff] %vm40_vm1, %v776_v20  ;;  %838 = vst.msk [vmem:[#allocation2 + $0x100] sm:$0xff] %vm40_vm1, %v774_v28  ;;  %v777_v33 = vmax.f32 %v627_v29, 0.0  ;;  %v619_v34 = vadd.f32 %v6399_v51, %v618_v30  ;;  %v5373_v53 = vpack.c.bf16 %v1927_v40, %v1927_v40  ;;  %v1646_v54 = vld [vmem:[#allocation3 + $0x52] sm:$0xff] }
 0x10e   :  { %v1936_v31 = vld [vmem:[#allocation3 + $0x61] sm:$0xff]  ;;  %v966_v38 = vld [vmem:[#allocation2 + $0xf0] ss:$2 sm:$0xff]  ;;  %v968_v39 = vld [vmem:[#allocation2 + $0xf1] ss:$2 sm:$0xff]  ;;  %v5750_v41 = vpop.f32.mrf.mxu0  ;;  %v5342_v61 = vpack.c.bf16 %v1646_v54, %v1646_v54 }
 0x10f   :  { %959 = vst.msk [vmem:[#allocation3 + $0x71] sm:$0xff] %vm40_vm1, %v957_v27  ;;  %v1096_v35 = vld [vmem:[#allocation3 + $0x60] sm:$0xff]  ;;  %v6580_v42 = vpack.c.bf16 %v1936_v31, %v1936_v31  ;;  %v969_v44 = vmax.f32 %v966_v38, %v968_v39  ;;  %1786 = vrot.lane.b32.xlu1 %v6576_v32, %s6079_s29  ;;  %841 = vst.msk [vmem:[#allocation2 + $0x118] sm:$0xff] %vm40_vm1, %v777_v33  ;;  %v775_v46 = vmax.f32 %v619_v34, 0.0 }
 0x110   :  { %v2056_v37 = vld [vmem:[#allocation3 + $0x62] sm:$0xff]  ;;  %v1097_v43 = vpack.c.bf16 %v1096_v35, %v1096_v35  ;;  %1169 = vrot.lane.b32.xlu0 %v5372_v19, %s6078_s1  ;;  %v640_v47 = vadd.f32 %v5750_v41, %v6399_v51  ;;  %v631_v50 = vpop.f32.mrf.mxu0 }
 0x111   :  { %v2057_v36 = vpack.c.bf16 %v2056_v37, %v2056_v37  ;;  %1579 = vst.msk [vmem:[#allocation4 + $0x40] sm:$0xf] %vm1079_vm4, %v6580_v42  ;;  %v632_v56 = vadd.f32 %v6399_v51, %v631_v50  ;;  %v1655_v19 = vld [vmem:[#allocation3 + $0x62] sm:$0xff] }
 0x112   :  { %1098 = vst.msk [vmem:[#allocation4 + $0x48] sm:$0xf] %vm1079_vm4, %v1097_v43  ;;  %v780_v55 = vmax.f32 %v640_v47, 0.0  ;;  %v5751_v57 = vpop.f32.mrf.mxu0  ;;  %v1790_v20 = vld [vmem:[#allocation3 + $0x60] sm:$0xff]  ;;  %v6622_v28 = vpack.c.bf16 %v1655_v19, %v1655_v19 }
 0x113   :  { %v961_v48 = vld [vmem:[#allocation2 + $0xe0] ss:$2 sm:$0xff]  ;;  %v963_v49 = vld [vmem:[#allocation2 + $0xe1] ss:$2 sm:$0xff]  ;;  %2058 = vst.msk [vmem:[#allocation4 + $0x38] sm:$0xf] %vm1079_vm4, %v2057_v36  ;;  %1932 = vrot.lane.b32.xlu1 %v5373_v53, %s6080_s30  ;;  %v643_v60 = vadd.f32 %v5751_v57, %v6399_v51  ;;  %v5358_v29 = vpack.c.bf16 %v1790_v20, %v1790_v20 }
 0x114   :  { %v964_v52 = vmax.f32 %v961_v48, %v963_v49  ;;  %839 = vst.msk [vmem:[#allocation2 + $0x108] sm:$0xff] %vm40_vm1, %v775_v46  ;;  %1314 = vrot.lane.b32.xlu0 %v6556_v62, %s6079_s29  ;;  %844 = vst.msk [vmem:[#allocation2 + $0x130] sm:$0xff] %vm40_vm1, %v780_v55  ;;  %v778_v59 = vmax.f32 %v632_v56, 0.0  ;;  %v634_v63 = vpop.f32.mrf.mxu0 }
 0x115   :  { %v781_v2 = vmax.f32 %v643_v60, 0.0  ;;  %v635_v3 = vadd.f32 %v6399_v51, %v634_v63 }
 0x116   :  { %v970_v58 = vmax.f32 %v964_v52, %v969_v44  ;;  %v1799_v0 = vld [vmem:[#allocation3 + $0x70] sm:$0xff]  ;;  %842 = vst.msk [vmem:[#allocation2 + $0x120] sm:$0xff] %vm40_vm1, %v778_v59  ;;  %v5754_v8 = vpop.f32.mrf.mxu0 }
 0x117   :  { %v1945_v1 = vld [vmem:[#allocation3 + $0x71] sm:$0xff]  ;;  %v6601_v5 = vpack.c.bf16 %v1799_v0, %v1799_v0  ;;  %1178 = vrot.lane.b32.xlu1 %v5373_v53, %s6078_s1  ;;  %845 = vst.msk [vmem:[#allocation2 + $0x138] sm:$0xff] %vm40_vm1, %v781_v2  ;;  %v779_v11 = vmax.f32 %v635_v3, 0.0  ;;  %v656_v12 = vadd.f32 %v5754_v8, %v6399_v51 }
 0x118   :  { %972 = vst.msk [vmem:[#allocation3 + $0x81] sm:$0xff] %vm40_vm1, %v970_v58  ;;  %v6603_v4 = vpack.c.bf16 %v1945_v1, %v1945_v1  ;;  %v2059_v62 = vld [vmem:[#allocation3 + $0x72] sm:$0xff]  ;;  %1651 = vrot.lane.b32.xlu0 %v5342_v61, %s6078_s1  ;;  %v647_v15 = vpop.f32.mrf.mxu0 }
 0x119   :  { %v979_v6 = vld [vmem:[#allocation2 + $0x110] ss:$2 sm:$0xff]  ;;  %v981_v7 = vld [vmem:[#allocation2 + $0x111] ss:$2 sm:$0xff]  ;;  %v2060_v9 = vpack.c.bf16 %v2059_v62, %v2059_v62  ;;  %1101 = vst.msk [vmem:[#allocation4 + $0x54] sm:$0xf] %vm1079_vm4, %v6601_v5  ;;  %v648_v18 = vadd.f32 %v6399_v51, %v647_v15 }
 0x11a   :  { %v982_v10 = vmax.f32 %v979_v6, %v981_v7  ;;  %1582 = vst.msk [vmem:[#allocation4 + $0x4c] sm:$0xf] %vm1079_vm4, %v6603_v4  ;;  %v784_v17 = vmax.f32 %v656_v12, 0.0  ;;  %v5755_v21 = vpop.f32.mrf.mxu0 }
 0x11b   :  { %v974_v13 = vld [vmem:[#allocation2 + $0x100] ss:$2 sm:$0xff]  ;;  %v976_v14 = vld [vmem:[#allocation2 + $0x101] ss:$2 sm:$0xff]  ;;  %2061 = vst.msk [vmem:[#allocation4 + $0x44] sm:$0xf] %vm1079_vm4, %v2060_v9  ;;  %1323 = vrot.lane.b32.xlu1 %v5342_v61, %s6079_s29  ;;  %v659_v25 = vadd.f32 %v5755_v21, %v6399_v51 }
 0x11c   :  { %v977_v16 = vmax.f32 %v974_v13, %v976_v14  ;;  %843 = vst.msk [vmem:[#allocation2 + $0x128] sm:$0xff] %vm40_vm1, %v779_v11  ;;  %1459 = vrot.lane.b32.xlu0 %v6576_v32, %s6080_s30  ;;  %848 = vst.msk [vmem:[#allocation2 + $0x150] sm:$0xff] %vm40_vm1, %v784_v17  ;;  %v782_v24 = vmax.f32 %v648_v18, 0.0  ;;  %v650_v26 = vpop.f32.mrf.mxu0 }
 0x11d   :  { %v785_v30 = vmax.f32 %v659_v25, 0.0  ;;  %v651_v31 = vadd.f32 %v6399_v51, %v650_v26 }
 0x11e   :  { %v983_v23 = vmax.f32 %v977_v16, %v982_v10  ;;  %846 = vst.msk [vmem:[#allocation2 + $0x140] sm:$0xff] %vm40_vm1, %v782_v24  ;;  %v992_v34 = vld [vmem:[#allocation2 + $0x130] ss:$2 sm:$0xff]  ;;  %v994_v32 = vld [vmem:[#allocation2 + $0x131] ss:$2 sm:$0xff]  ;;  %v5758_v35 = vpop.f32.mrf.mxu0 }
 0x11f   :  { %v1954_v27 = vld [vmem:[#allocation3 + $0x81] sm:$0xff]  ;;  %v995_v39 = vmax.f32 %v992_v34, %v994_v32  ;;  %1660 = vrot.lane.b32.xlu1 %v6622_v28, %s6078_s1  ;;  %849 = vst.msk [vmem:[#allocation2 + $0x158] sm:$0xff] %vm40_vm1, %v785_v30  ;;  %v783_v40 = vmax.f32 %v651_v31, 0.0  ;;  %v672_v41 = vadd.f32 %v5758_v35, %v6399_v51  ;;  %v1664_v10 = vld [vmem:[#allocation3 + $0x72] sm:$0xff] }
 0x120   :  { %985 = vst.msk [vmem:[#allocation3 + $0xb1] sm:$0xff] %vm40_vm1, %v983_v23  ;;  %v2062_v33 = vld [vmem:[#allocation3 + $0x82] sm:$0xff]  ;;  %v6626_v37 = vpack.c.bf16 %v1954_v27, %v1954_v27  ;;  %1795 = vrot.lane.b32.xlu0 %v5358_v29, %s6079_s29  ;;  %v663_v44 = vpop.f32.mrf.mxu0  ;;  %v5344_v18 = vpack.c.bf16 %v1664_v10, %v1664_v10 }
 0x121   :  { %v2063_v38 = vpack.c.bf16 %v2062_v33, %v2062_v33  ;;  %847 = vst.msk [vmem:[#allocation2 + $0x148] sm:$0xff] %vm40_vm1, %v783_v40  ;;  %v788_v47 = vmax.f32 %v672_v41, 0.0  ;;  %v664_v48 = vadd.f32 %v6399_v51, %v663_v44  ;;  %v1673_v35 = vld [vmem:[#allocation3 + $0x82] sm:$0xff] }
 0x122   :  { %1585 = vst.msk [vmem:[#allocation4 + $0x58] sm:$0xf] %vm1079_vm4, %v6626_v37  ;;  %v5759_v49 = vpop.f32.mrf.mxu0 }
 0x123   :  { %v987_v43 = vld [vmem:[#allocation2 + $0x120] ss:$2 sm:$0xff]  ;;  %v989_v36 = vld [vmem:[#allocation2 + $0x121] ss:$2 sm:$0xff]  ;;  %2064 = vst.msk [vmem:[#allocation4 + $0x50] sm:$0xf] %vm1079_vm4, %v2063_v38  ;;  %1468 = vrot.lane.b32.xlu1 %v5358_v29, %s6080_s30  ;;  %v675_v53 = vadd.f32 %v5759_v49, %v6399_v51 }
 0x124   :  { %v990_v46 = vmax.f32 %v987_v43, %v989_v36  ;;  %1941 = vrot.lane.b32.xlu0 %v6580_v42, %s6080_s30  ;;  %852 = vst.msk [vmem:[#allocation2 + $0x170] sm:$0xff] %vm40_vm1, %v788_v47  ;;  %v786_v52 = vmax.f32 %v664_v48, 0.0  ;;  %v666_v54 = vpop.f32.mrf.mxu0  ;;  %v1808_v38 = vld [vmem:[#allocation3 + $0x80] sm:$0xff] }
 0x125   :  { %v789_v57 = vmax.f32 %v675_v53, 0.0  ;;  %v667_v58 = vadd.f32 %v6399_v51, %v666_v54  ;;  %v5360_v47 = vpack.c.bf16 %v1808_v38, %v1808_v38 }
 0x126   :  { %v996_v50 = vmax.f32 %v990_v46, %v995_v39  ;;  %850 = vst.msk [vmem:[#allocation2 + $0x160] sm:$0xff] %vm40_vm1, %v786_v52  ;;  %v1005_v60 = vld [vmem:[#allocation2 + $0x150] ss:$2 sm:$0xff]  ;;  %v1007_v61 = vld [vmem:[#allocation2 + $0x151] ss:$2 sm:$0xff]  ;;  %v5762_v63 = vpop.f32.mrf.mxu0  ;;  %v5345_v46 = vpack.c.bf16 %v1673_v35, %v1673_v35 }
 0x127   :  { %v1209_v55 = vld [vmem:[#allocation3 + $0xb1] sm:$0xff]  ;;  %v1008_v1 = vmax.f32 %v1005_v60, %v1007_v61  ;;  %1804 = vrot.lane.b32.xlu1 %v6601_v5, %s6079_s29  ;;  %853 = vst.msk [vmem:[#allocation2 + $0x178] sm:$0xff] %vm40_vm1, %v789_v57  ;;  %v787_v2 = vmax.f32 %v667_v58, 0.0  ;;  %v688_v3 = vadd.f32 %v5762_v63, %v6399_v51 }
 0x128   :  { %v1490_v56 = vld [vmem:[#allocation3 + $0xb0] sm:$0xff]  ;;  %998 = vst.msk [vmem:[#allocation3 + $0xc1] sm:$0xff] %vm40_vm1, %v996_v50  ;;  %v6646_v59 = vpack.c.bf16 %v1209_v55, %v1209_v55  ;;  %1187 = vrot.lane.b32.xlu0 %v6580_v42, %s6078_s1  ;;  %v1000_v62 = vld [vmem:[#allocation2 + $0x140] ss:$2 sm:$0xff]  ;;  %v1002_v6 = vld [vmem:[#allocation2 + $0x141] ss:$2 sm:$0xff]  ;;  %v679_v7 = vpop.f32.mrf.mxu0 }
 0x129   :  { %v6648_v0 = vpack.c.bf16 %v1490_v56, %v1490_v56  ;;  %v1003_v8 = vmax.f32 %v1000_v62, %v1002_v6  ;;  %851 = vst.msk [vmem:[#allocation2 + $0x168] sm:$0xff] %vm40_vm1, %v787_v2  ;;  %v792_v9 = vmax.f32 %v688_v3, 0.0  ;;  %v680_v42 = vadd.f32 %v6399_v51, %v679_v7 }
 0x12a   :  { %1588 = vst.msk [vmem:[#allocation4 + $0x64] sm:$0xf] %vm1079_vm4, %v6646_v59  ;;  %v5763_v11 = vpop.f32.mrf.mxu0 }
 0x12b   :  { %1108 = vst.msk [vmem:[#allocation4 + $0x6c] sm:$0xf] %vm1079_vm4, %v6648_v0  ;;  %v1009_v12 = vmax.f32 %v1003_v8, %v1008_v1  ;;  %1950 = vrot.lane.b32.xlu1 %v6603_v4, %s6080_s30  ;;  %v790_v13 = vmax.f32 %v680_v42, 0.0  ;;  %v691_v14 = vadd.f32 %v5763_v11, %v6399_v51 }
 0x12c   :  { %1332 = vrot.lane.b32.xlu0 %v6622_v28, %s6079_s29  ;;  %856 = vst.msk [vmem:[#allocation2 + $0x190] sm:$0xff] %vm40_vm1, %v792_v9  ;;  %v682_v15 = vpop.f32.mrf.mxu0  ;;  %v1682_v9 = vld [vmem:[#allocation3 + $0xb2] sm:$0xff] }
 0x12d   :  { %1011 = vst.msk [vmem:[#allocation3 + $0xd1] sm:$0xff] %vm40_vm1, %v1009_v12  ;;  %854 = vst.msk [vmem:[#allocation2 + $0x180] sm:$0xff] %vm40_vm1, %v790_v13  ;;  %v793_v19 = vmax.f32 %v691_v14, 0.0  ;;  %v683_v20 = vadd.f32 %v6399_v51, %v682_v15 }
 0x12e   :  { %v1018_v24 = vld [vmem:[#allocation2 + $0x170] ss:$2 sm:$0xff]  ;;  %v1020_v25 = vld [vmem:[#allocation2 + $0x171] ss:$2 sm:$0xff]  ;;  %v5766_v26 = vpop.f32.mrf.mxu0 }
 0x12f   :  { %v1827_v16 = vld [vmem:[#allocation3 + $0xc0] sm:$0xff]  ;;  %1196 = vrot.lane.b32.xlu1 %v6603_v4, %s6078_s1  ;;  %v1021_v29 = vmax.f32 %v1018_v24, %v1020_v25  ;;  %857 = vst.msk [vmem:[#allocation2 + $0x198] sm:$0xff] %vm40_vm1, %v793_v19  ;;  %v791_v30 = vmax.f32 %v683_v20, 0.0  ;;  %v704_v31 = vadd.f32 %v5766_v26, %v6399_v51 }
 0x130   :  { %v1972_v17 = vld [vmem:[#allocation3 + $0xc1] sm:$0xff]  ;;  %v6671_v21 = vpack.c.bf16 %v1827_v16, %v1827_v16  ;;  %1669 = vrot.lane.b32.xlu0 %v5344_v18, %s6078_s1  ;;  %v695_v32 = vpop.f32.mrf.mxu0  ;;  %v6689_v51 = vld [vmem:[%s7673_s2] ss:$0 sm:$0xff]  ;;  %v5346_v16 = vpack.c.bf16 %v1682_v9, %v1682_v9 }
 0x131   :  { %v2068_v23 = vld [vmem:[#allocation3 + $0xc2] sm:$0xff]  ;;  %v6673_v27 = vpack.c.bf16 %v1972_v17, %v1972_v17  ;;  %855 = vst.msk [vmem:[#allocation2 + $0x188] sm:$0xff] %vm40_vm1, %v791_v30  ;;  %v796_v39 = vmax.f32 %v704_v31, 0.0  ;;  %v696_v40 = vadd.f32 %v6689_v51, %v695_v32 }
 0x132   :  { %v2069_v28 = vpack.c.bf16 %v2068_v23, %v2068_v23  ;;  %1111 = vst.msk [vmem:[#allocation4 + $0x78] sm:$0xf] %vm1079_vm4, %v6671_v21  ;;  %v1013_v33 = vld [vmem:[#allocation2 + $0x160] ss:$2 sm:$0xff]  ;;  %v1015_v34 = vld [vmem:[#allocation2 + $0x161] ss:$2 sm:$0xff]  ;;  %v5767_v41 = vpop.f32.mrf.mxu0 }
 0x133   :  { %1591 = vst.msk [vmem:[#allocation4 + $0x70] sm:$0xf] %vm1079_vm4, %v6673_v27  ;;  %v1016_v4 = vmax.f32 %v1013_v33, %v1015_v34  ;;  %1341 = vrot.lane.b32.xlu1 %v5344_v18, %s6079_s29  ;;  %v794_v36 = vmax.f32 %v696_v40, 0.0  ;;  %v707_v44 = vadd.f32 %v6689_v51, %v5767_v41 }
 0x134   :  { %2070 = vst.msk [vmem:[#allocation4 + $0x68] sm:$0xf] %vm1079_vm4, %v2069_v28  ;;  %1477 = vrot.lane.b32.xlu0 %v6601_v5, %s6080_s30  ;;  %v698_v48 = vpop.f32.mrf.mxu0  ;;  %v1836_v49 = vld [vmem:[#allocation3 + $0xd0] sm:$0xff] }
 0x135   :  { %v1022_v43 = vmax.f32 %v1016_v4, %v1021_v29  ;;  %860 = vst.msk [vmem:[#allocation2 + $0x1b0] sm:$0xff] %vm40_vm1, %v796_v39  ;;  %v1981_v50 = vld [vmem:[#allocation3 + $0xd1] sm:$0xff]  ;;  %858 = vst.msk [vmem:[#allocation2 + $0x1a0] sm:$0xff] %vm40_vm1, %v794_v36  ;;  %v797_v52 = vmax.f32 %v707_v44, 0.0  ;;  %v699_v53 = vadd.f32 %v6689_v51, %v698_v48  ;;  %v6700_v54 = vpack.c.bf16 %v1836_v49, %v1836_v49 }
 0x136   :  { %v6702_v5 = vpack.c.bf16 %v1981_v50, %v1981_v50  ;;  %v2071_v55 = vld [vmem:[#allocation3 + $0xd2] sm:$0xff]  ;;  %v5770_v58 = vpop.f32.mrf.mxu0 }
 0x137   :  { %1024 = vst.msk [vmem:[#allocation3 + $0xe1] sm:$0xff] %vm40_vm1, %v1022_v43  ;;  %v1031_v56 = vld [vmem:[#allocation2 + $0x190] ss:$2 sm:$0xff]  ;;  %v1033_v57 = vld [vmem:[#allocation2 + $0x191] ss:$2 sm:$0xff]  ;;  %v2072_v60 = vpack.c.bf16 %v2071_v55, %v2071_v55  ;;  %1678 = vrot.lane.b32.xlu1 %v5345_v46, %s6078_s1  ;;  %861 = vst.msk [vmem:[#allocation2 + $0x1b8] sm:$0xff] %vm40_vm1, %v797_v52  ;;  %v720_v1 = vadd.f32 %v6689_v51, %v5770_v58 }
 0x138   :  { %1813 = vrot.lane.b32.xlu0 %v5360_v47, %s6079_s29  ;;  %v1034_v61 = vmax.f32 %v1031_v56, %v1033_v57  ;;  %v795_v63 = vmax.f32 %v699_v53, 0.0  ;;  %1114 = vst.msk [vmem:[#allocation4 + $0x84] sm:$0xf] %vm1079_vm4, %v6700_v54  ;;  %1594 = vst.msk [vmem:[#allocation4 + $0x7c] sm:$0xf] %vm1079_vm4, %v6702_v5  ;;  %v711_v62 = vpop.f32.mrf.mxu0  ;;  %v6756_v56 = vpop.permute.xlu1 %1823 }
 0x139   :  { %v1026_v2 = vld [vmem:[#allocation2 + $0x180] ss:$2 sm:$0xff]  ;;  %v1028_v3 = vld [vmem:[#allocation2 + $0x181] ss:$2 sm:$0xff]  ;;  %2073 = vst.msk [vmem:[#allocation4 + $0x74] sm:$0xf] %vm1079_vm4, %v2072_v60  ;;  %v712_v8 = vadd.f32 %v6689_v51, %v711_v62 }
 0x13a   :  { %v1029_v6 = vmax.f32 %v1026_v2, %v1028_v3  ;;  %859 = vst.msk [vmem:[#allocation2 + $0x1a8] sm:$0xff] %vm40_vm1, %v795_v63  ;;  %v800_v7 = vmax.f32 %v720_v1, 0.0  ;;  %v5771_v42 = vpop.f32.mrf.mxu0 }
 0x13b   :  { %1486 = vrot.lane.b32.xlu1 %v5360_v47, %s6080_s30  ;;  %v798_v11 = vmax.f32 %v712_v8, 0.0  ;;  %v723_v12 = vadd.f32 %v6689_v51, %v5771_v42 }
 0x13c   :  { %1959 = vrot.lane.b32.xlu0 %v6626_v37, %s6080_s30  ;;  %v1035_v10 = vmax.f32 %v1029_v6, %v1034_v61  ;;  %864 = vst.msk [vmem:[#allocation2 + $0x1d0] sm:$0xff] %vm40_vm1, %v800_v7  ;;  %v714_v13 = vpop.f32.mrf.mxu0  ;;  %v6770_v62 = vpop.permute.xlu1 %1968 }
 0x13d   :  { %862 = vst.msk [vmem:[#allocation2 + $0x1c0] sm:$0xff] %vm40_vm1, %v798_v11  ;;  %v801_v17 = vmax.f32 %v723_v12, 0.0  ;;  %v715_v18 = vadd.f32 %v6689_v51, %v714_v13  ;;  %v1700_v13 = vld [vmem:[#allocation3 + $0xd2] sm:$0xff] }
 0x13e   :  { %v1845_v14 = vld [vmem:[#allocation3 + $0xe0] sm:$0xff]  ;;  %1037 = vst.msk [vmem:[#allocation3 + $0xf1] sm:$0xff] %vm40_vm1, %v1035_v10  ;;  %v1044_v20 = vld [vmem:[#allocation2 + $0x1b0] ss:$2 sm:$0xff]  ;;  %v1046_v23 = vld [vmem:[#allocation2 + $0x1b1] ss:$2 sm:$0xff]  ;;  %v5774_v25 = vpop.f32.mrf.mxu0 }
 0x13f   :  { %v1990_v15 = vld [vmem:[#allocation3 + $0xe1] sm:$0xff]  ;;  %v6723_v19 = vpack.c.bf16 %v1845_v14, %v1845_v14  ;;  %1214 = vrot.lane.b32.xlu1 %v6646_v59, %s6078_s1  ;;  %v1047_v28 = vmax.f32 %v1044_v20, %v1046_v23  ;;  %865 = vst.msk [vmem:[#allocation2 + $0x1d8] sm:$0xff] %vm40_vm1, %v801_v17  ;;  %v799_v29 = vmax.f32 %v715_v18, 0.0  ;;  %v736_v30 = vadd.f32 %v6689_v51, %v5774_v25 }
 0x140   :  { %v2074_v37 = vld [vmem:[#allocation3 + $0xe2] sm:$0xff]  ;;  %v6725_v24 = vpack.c.bf16 %v1990_v15, %v1990_v15  ;;  %1687 = vrot.lane.b32.xlu0 %v5346_v16, %s6078_s1  ;;  %v727_v34 = vpop.f32.mrf.mxu0  ;;  %v5348_v18 = vpack.c.bf16 %v1700_v13, %v1700_v13 }
 0x141   :  { %v2075_v26 = vpack.c.bf16 %v2074_v37, %v2074_v37  ;;  %1117 = vst.msk [vmem:[#allocation4 + $0x90] sm:$0xf] %vm1079_vm4, %v6723_v19  ;;  %v1039_v31 = vld [vmem:[#allocation2 + $0x1a0] ss:$2 sm:$0xff]  ;;  %v1041_v33 = vld [vmem:[#allocation2 + $0x1a1] ss:$2 sm:$0xff]  ;;  %v728_v35 = vadd.f32 %v6689_v51, %v727_v34 }
 0x142   :  { %1597 = vst.msk [vmem:[#allocation4 + $0x88] sm:$0xf] %vm1079_vm4, %v6725_v24  ;;  %v1691_v59 = vld [vmem:[#allocation3 + $0xc2] sm:$0xff]  ;;  %v1042_v32 = vmax.f32 %v1039_v31, %v1041_v33  ;;  %v804_v4 = vmax.f32 %v736_v30, 0.0  ;;  %v5775_v38 = vpop.f32.mrf.mxu0 }
 0x143   :  { %2076 = vst.msk [vmem:[#allocation4 + $0x80] sm:$0xf] %vm1079_vm4, %v2075_v26  ;;  %1359 = vrot.lane.b32.xlu1 %v5346_v16, %s6079_s29  ;;  %v802_v40 = vmax.f32 %v728_v35, 0.0  ;;  %v739_v41 = vadd.f32 %v6689_v51, %v5775_v38  ;;  %v5347_v43 = vpack.c.bf16 %v1691_v59, %v1691_v59 }
 0x144   :  { %863 = vst.msk [vmem:[#allocation2 + $0x1c8] sm:$0xff] %vm40_vm1, %v799_v29  ;;  %1495 = vrot.lane.b32.xlu0 %v6648_v0, %s6080_s30  ;;  %v1048_v39 = vmax.f32 %v1042_v32, %v1047_v28  ;;  %868 = vst.msk [vmem:[#allocation2 + $0x1f0] sm:$0xff] %vm40_vm1, %v804_v4  ;;  %v730_v46 = vpop.f32.mrf.mxu0  ;;  %v1709_v28 = vld [vmem:[#allocation3 + $0xe2] sm:$0xff] }
 0x145   :  { %v1854_v36 = vld [vmem:[#allocation3 + $0xf0] sm:$0xff]  ;;  %866 = vst.msk [vmem:[#allocation2 + $0x1e0] sm:$0xff] %vm40_vm1, %v802_v40  ;;  %v805_v0 = vmax.f32 %v739_v41, 0.0  ;;  %v731_v50 = vadd.f32 %v6689_v51, %v730_v46  ;;  %v5349_v34 = vpack.c.bf16 %v1709_v28, %v1709_v28 }
 0x146   :  { %v1999_v44 = vld [vmem:[#allocation3 + $0xf1] sm:$0xff]  ;;  %1050 = vst.msk [vmem:[#allocation3 + $0x101] sm:$0xff] %vm40_vm1, %v1048_v39  ;;  %v6745_v48 = vpack.c.bf16 %v1854_v36, %v1854_v36 }
 0x147   :  { %v1718_v47 = vld [vmem:[#allocation3 + $0xf2] sm:$0xff]  ;;  %v6748_v49 = vpack.c.bf16 %v1999_v44, %v1999_v44  ;;  %1696 = vrot.lane.b32.xlu1 %v5347_v43, %s6078_s1  ;;  %869 = vst.msk [vmem:[#allocation2 + $0x1f8] sm:$0xff] %vm40_vm1, %v805_v0  ;;  %v803_v58 = vmax.f32 %v731_v50, 0.0  ;;  %v5912_v50 = vld [vmem:[%s7674_s3 + $0xa8] sm:$0xff]  }
 0x148   :  { %v1057_v52 = vld [vmem:[#allocation2 + $0x1d0] ss:$2 sm:$0xff]  ;;  %v1059_v53 = vld [vmem:[#allocation2 + $0x1d1] ss:$2 sm:$0xff]  ;;  %v6751_v55 = vpack.c.bf16 %v1718_v47, %v1718_v47  ;;  %1832 = vrot.lane.b32.xlu0 %v6671_v21, %s6079_s29  ;;  %1120 = vst.msk [vmem:[#allocation4 + $0x9c] sm:$0xf] %vm1079_vm4, %v6745_v48 }
 0x149   :  { %v1060_v57 = vmax.f32 %v1057_v52, %v1059_v53  ;;  %1600 = vst.msk [vmem:[#allocation4 + $0x94] sm:$0xf] %vm1079_vm4, %v6748_v49 }
 0x14a   :  { %2079 = vst.msk [vmem:[#allocation4 + $0x8c] sm:$0xf] %vm1079_vm4, %v6751_v55 }
 0x14b   :  { %v1052_v51 = vld [vmem:[#allocation2 + $0x1c0] ss:$2 sm:$0xff]  ;;  %v1054_v60 = vld [vmem:[#allocation2 + $0x1c1] ss:$2 sm:$0xff]  ;;  %867 = vst.msk [vmem:[#allocation2 + $0x1e8] sm:$0xff] %vm40_vm1, %v803_v58  ;;  %1504 = vrot.lane.b32.xlu1 %v6671_v21, %s6080_s30 }
 0x14c   :  { %v1055_v61 = vmax.f32 %v1052_v51, %v1054_v60  ;;  %1977 = vrot.lane.b32.xlu0 %v6673_v27, %s6080_s30  ;;  %v5914_v51 = vld [vmem:[%s7674_s3 + $0x98] sm:$0xff]  }
 0x14d   :  { %v1727_v1 = vld [vmem:[#allocation3 + $0x102] sm:$0xff] }
 0x14e   :  { %v1061_v63 = vmax.f32 %v1055_v61, %v1060_v57  ;;  %v1863_v2 = vld [vmem:[#allocation3 + $0x100] sm:$0xff]  ;;  %v6773_v6 = vpack.c.bf16 %v1727_v1, %v1727_v1  ;;  %v1070_v9 = vld [vmem:[#allocation2 + $0x1f0] ss:$2 sm:$0xff]  ;;  %v1072_v42 = vld [vmem:[#allocation2 + $0x1f1] ss:$2 sm:$0xff] }
 0x14f   :  { %v2008_v3 = vld [vmem:[#allocation3 + $0x101] sm:$0xff]  ;;  %v6775_v7 = vpack.c.bf16 %v1863_v2, %v1863_v2  ;;  %1841 = vrot.lane.b32.xlu1 %v6700_v54, %s6079_s29  ;;  %v1073_v21 = vmax.f32 %v1070_v9, %v1072_v42 }
 0x150   :  { %1063 = vst.msk [vmem:[#allocation3 + $0x111] sm:$0xff] %vm40_vm1, %v1061_v63  ;;  %v6777_v8 = vpack.c.bf16 %v2008_v3, %v2008_v3  ;;  %1223 = vrot.lane.b32.xlu0 %v6673_v27, %s6078_s1  ;;  %v6792_v27 = vpop.permute.xlu1 %1896  ;;  %v5917_v63 = vld [vmem:[%s7674_s3 + $0x90] sm:$0xff]  }
 0x151   :  { %1123 = vst.msk [vmem:[#allocation4 + $0xa8] sm:$0xf] %vm1079_vm4, %v6775_v7  ;;  %2082 = vst.msk [vmem:[#allocation4 + $0x98] sm:$0xf] %vm1079_vm4, %v6773_v6 }
 0x152   :  { %1603 = vst.msk [vmem:[#allocation4 + $0xa0] sm:$0xf] %vm1079_vm4, %v6777_v8  ;;  %v1065_v10 = vld [vmem:[#allocation2 + $0x1e0] ss:$2 sm:$0xff]  ;;  %v1067_v11 = vld [vmem:[#allocation2 + $0x1e1] ss:$2 sm:$0xff] }
 0x153   :  { %v1068_v12 = vmax.f32 %v1065_v10, %v1067_v11  ;;  %1986 = vrot.lane.b32.xlu1 %v6702_v5, %s6080_s30 }
 0x154   :  { %1368 = vrot.lane.b32.xlu0 %v5347_v43, %s6079_s29 }
 0x155   :  { %v1074_v14 = vmax.f32 %v1068_v12, %v1073_v21  ;;  %v2035_v12 = vld [vmem:[#allocation3 + $0x131] sm:$0xff] }
 0x157   :  { %v1872_v15 = vld [vmem:[#allocation3 + $0x110] sm:$0xff]  ;;  %1076 = vst.msk [vmem:[#allocation3 + $0x121] sm:$0xff] %vm40_vm1, %v1074_v14  ;;  %1232 = vrot.lane.b32.xlu1 %v6702_v5, %s6078_s1  ;;  %v6815_v5 = vld [vmem:[%s7674_s3 + $0xb8] sm:$0xff]   ;;  %vm3884_vm1 = vcmask 1040896  }
 0x158   :  { %v2017_v16 = vld [vmem:[#allocation3 + $0x111] sm:$0xff]  ;;  %v6795_v37 = vpack.c.bf16 %v1872_v15, %v1872_v15  ;;  %1705 = vrot.lane.b32.xlu0 %v5348_v18, %s6078_s1  ;;  %5776 = vmatprep.subr.bf16.mxu1 %v6815_v5  ;;  %v5385_v15 = vpack.c.bf16 %v2035_v12, %v2035_v12 }
 0x159   :  { %v1736_v17 = vld [vmem:[#allocation3 + $0x112] sm:$0xff]  ;;  %v6797_v20 = vpack.c.bf16 %v2017_v16, %v2017_v16  ;;  %v1616_v25 = vpop.permute.xlu1 %1615  ;;  %v5921_v16 = vld [vmem:[%s7674_s3 + $0x80] sm:$0xff]  }
 0x15a   :  { %v6799_v23 = vpack.c.bf16 %v1736_v17, %v1736_v17  ;;  %1126 = vst.msk [vmem:[#allocation4 + $0xb4] sm:$0xf] %vm1079_vm4, %v6795_v37  ;;  %v1143_v26 = vpop.permute.xlu0 %1142 }
 0x15b   :  { %1606 = vst.msk [vmem:[#allocation4 + $0xac] sm:$0xf] %vm1079_vm4, %v6797_v20  ;;  %1377 = vrot.lane.b32.xlu1 %v5348_v18, %s6079_s29 }
 0x15c   :  { %2085 = vst.msk [vmem:[#allocation4 + $0xa4] sm:$0xf] %vm1079_vm4, %v6799_v23  ;;  %1513 = vrot.lane.b32.xlu0 %v6700_v54, %s6080_s30 }
 0x15d   :  { %1618 = vst.msk [vmem:[#allocation4 + $0x4] sm:$0xf] %vm1135_vm5, %v1616_v25  ;;  %1145 = vst.msk [vmem:[#allocation4 + $0xc] sm:$0xf] %vm1135_vm5, %v1143_v26  ;;  %v1288_v31 = vpop.permute.xlu1 %1287 }
 0x15e   :  { %v1745_v29 = vld [vmem:[#allocation3 + $0x122] sm:$0xff]  ;;  %v1423_v33 = vpop.permute.xlu0 %1422  ;;  %1290 = vst.msk [vmem:[#allocation4 + $0xc] sm:$0xf] %vm1280_vm6, %v1288_v31 }
 0x15f   :  { %v2026_v30 = vld [vmem:[#allocation3 + $0x121] sm:$0xff]  ;;  %v6821_v59 = vpack.c.bf16 %v1745_v29, %v1745_v29  ;;  %1426 = vst.msk [vmem:[#allocation4] sm:$0xf] %vm1425_vm7, %v1423_v33  ;;  %1714 = vrot.lane.b32.xlu1 %v5349_v34, %s6078_s1 }
 0x160   :  { %v6823_v32 = vpack.c.bf16 %v2026_v30, %v2026_v30  ;;  %1850 = vrot.lane.b32.xlu0 %v6723_v19, %s6079_s29  ;;  %v1881_v3 = vld [vmem:[#allocation3 + $0x120] sm:$0xff] }
 0x161   :  { %2088 = vst.msk [vmem:[#allocation4 + $0xb0] sm:$0xf] %vm1079_vm4, %v6821_v59  ;;  %v1625_v54 = vpop.permute.xlu1 %1624  ;;  %v5368_v9 = vpack.c.bf16 %v1881_v3, %v1881_v3 }
 0x162   :  { %1609 = vst.msk [vmem:[#allocation4 + $0xb8] sm:$0xf] %vm1079_vm4, %v6823_v32  ;;  %v1760_v4 = vpop.permute.xlu0 %1759 }
 0x163   :  { %1627 = vst.msk [vmem:[#allocation4 + $0x10] sm:$0xf] %vm1135_vm5, %v1625_v54  ;;  %1522 = vrot.lane.b32.xlu1 %v6723_v19, %s6080_s30 }
 0x164   :  { %1762 = vst.msk [vmem:[#allocation4 + $0x4] sm:$0xf] %vm1280_vm6, %v1760_v4  ;;  %1995 = vrot.lane.b32.xlu0 %v6725_v24, %s6080_s30 }
 0x165   :  { %v1433_v35 = vpop.permute.xlu1 %1432 }
 0x166   :  { %v1906_v38 = vpop.permute.xlu0 %1905  ;;  %1435 = vst.msk [vmem:[#allocation4 + $0xc] sm:$0xf] %vm1425_vm7, %v1433_v35 }
 0x167   :  { %1908 = vst.msk [vmem:[#allocation4 + $0x4] sm:$0xf] %vm1425_vm7, %v1906_v38  ;;  %1859 = vrot.lane.b32.xlu1 %v6745_v48, %s6079_s29 }
 0x168   :  { %1241 = vrot.lane.b32.xlu0 %v6725_v24, %s6078_s1 }
 0x169   :  { %v1769_v39 = vpop.permute.xlu1 %1768 }
 0x16a   :  { %v1152_v40 = vpop.permute.xlu0 %1151  ;;  %1771 = vst.msk [vmem:[#allocation4 + $0x10] sm:$0xf] %vm1280_vm6, %v1769_v39 }
 0x16b   :  { %1154 = vst.msk [vmem:[#allocation4 + $0x18] sm:$0xf] %vm1135_vm5, %v1152_v40  ;;  %2004 = vrot.lane.b32.xlu1 %v6748_v49, %s6080_s30 }
 0x16c   :  { %1386 = vrot.lane.b32.xlu0 %v5349_v34, %s6079_s29 }
 0x16d   :  { %v1915_v19 = vpop.permute.xlu1 %1914  ;;  %v5897_v46 = vld [vmem:[#allocation4] ss:$12 sps:$4 sm:$0xff]  }
 0x16e   :  { %v1297_v41 = vpop.permute.xlu0 %1296  ;;  %1917 = vst.msk [vmem:[#allocation4 + $0x10] sm:$0xf] %vm1425_vm7, %v1915_v19 }
 0x16f   :  { %1299 = vst.msk [vmem:[#allocation4 + $0x18] sm:$0xf] %vm1280_vm6, %v1297_v41  ;;  %1250 = vrot.lane.b32.xlu1 %v6748_v49, %s6078_s1  ;;  %v5909_v49 = vld [vmem:[%s7674_s3 + $0xb0] sm:$0xff]  }
 0x170   :  { %1723 = vrot.lane.b32.xlu0 %v6751_v55, %s6078_s1 }
 0x171   :  { %v1161_v24 = vpop.permute.xlu1 %1160 }
 0x172   :  { %v1634_v43 = vpop.permute.xlu0 %1633  ;;  %1163 = vst.msk [vmem:[#allocation4 + $0x24] sm:$0xf] %vm1135_vm5, %v1161_v24 }
 0x173   :  { %1636 = vst.msk [vmem:[#allocation4 + $0x1c] sm:$0xf] %vm1135_vm5, %v1634_v43  ;;  %1395 = vrot.lane.b32.xlu1 %v6751_v55, %s6079_s29  ;;  %v5913_v55 = vld [vmem:[%s7674_s3 + $0xa0] sm:$0xff]  }
 0x174   :  { %1531 = vrot.lane.b32.xlu0 %v6745_v48, %s6080_s30 }
 0x175   :  { %v1306_v36 = vpop.permute.xlu1 %1305  ;;  %v5899_v47 = vld [vmem:[#allocation4 + $0x4] ss:$12 sps:$4 sm:$0xff]  }
 0x176   :  { %v1442_v44 = vpop.permute.xlu0 %1441  ;;  %1308 = vst.msk [vmem:[#allocation4 + $0x24] sm:$0xf] %vm1280_vm6, %v1306_v36  ;;  %2483 = vmatprep.mubr.bf16.mxu1 %v5899_v47 }
 0x177   :  { %1444 = vst.msk [vmem:[#allocation4 + $0x18] sm:$0xf] %vm1425_vm7, %v1442_v44  ;;  %1732 = vrot.lane.b32.xlu1 %v6773_v6, %s6078_s1  ;;  %2484 = vmatmul.mubr.bf16.vlgmr.msra.gmra.mxu1 %v5897_v46 }
 0x178   :  { %1868 = vrot.lane.b32.xlu0 %v6775_v7, %s6079_s29  ;;  %5777 = vmatpush3.bf16.msra.mxu1 %v6815_v5 }
 0x179   :  { %v1643_v48 = vpop.permute.xlu1 %1642  ;;  %5778 = vmatprep.subr.bf16.mxu1 %v5909_v49 }
 0x17a   :  { %v1778_v0 = vpop.permute.xlu0 %1777  ;;  %1645 = vst.msk [vmem:[#allocation4 + $0x28] sm:$0xf] %vm1135_vm5, %v1643_v48 }
 0x17b   :  { %1780 = vst.msk [vmem:[#allocation4 + $0x1c] sm:$0xf] %vm1280_vm6, %v1778_v0  ;;  %1540 = vrot.lane.b32.xlu1 %v6775_v7, %s6080_s30 }
 0x17c   :  { %2013 = vrot.lane.b32.xlu0 %v6777_v8, %s6080_s30  ;;  %5779 = vmatpush3.bf16.msra.mxu1 %v5909_v49 }
 0x17d   :  { %v1451_v52 = vpop.permute.xlu1 %1450  ;;  %5780 = vmatprep.subr.bf16.mxu1 %v5912_v50 }
 0x17e   :  { %v1924_v53 = vpop.permute.xlu0 %1923  ;;  %1453 = vst.msk [vmem:[#allocation4 + $0x24] sm:$0xf] %vm1425_vm7, %v1451_v52 }
 0x17f   :  { %1926 = vst.msk [vmem:[#allocation4 + $0x1c] sm:$0xf] %vm1425_vm7, %v1924_v53  ;;  %1877 = vrot.lane.b32.xlu1 %v6795_v37, %s6079_s29 }
 0x180   :  { %1259 = vrot.lane.b32.xlu0 %v6777_v8, %s6078_s1  ;;  %5781 = vmatpush3.bf16.msra.mxu1 %v5912_v50 }
 0x181   :  { %v1787_v57 = vpop.permute.xlu1 %1786  ;;  %5782 = vmatprep.subr.bf16.mxu1 %v5913_v55 }
 0x182   :  { %v1170_v58 = vpop.permute.xlu0 %1169  ;;  %1789 = vst.msk [vmem:[#allocation4 + $0x28] sm:$0xf] %vm1280_vm6, %v1787_v57 }
 0x183   :  { %1172 = vst.msk [vmem:[#allocation4 + $0x30] sm:$0xf] %vm1135_vm5, %v1170_v58  ;;  %2022 = vrot.lane.b32.xlu1 %v6797_v20, %s6080_s30 }
 0x184   :  { %1404 = vrot.lane.b32.xlu0 %v6773_v6, %s6079_s29  ;;  %5783 = vmatpush3.bf16.msra.mxu1 %v5913_v55  ;;  %v5918_v6 = vld [vmem:[%s7674_s3 + $0x88] sm:$0xff]   ;;  %s6084_s3 = smov [#allocation10]  }
 0x185   :  { %v1933_v60 = vpop.permute.xlu1 %1932  ;;  %5784 = vmatprep.subr.bf16.mxu1 %v5914_v51 }
 0x186   :  { %v1315_v61 = vpop.permute.xlu0 %1314  ;;  %1935 = vst.msk [vmem:[#allocation4 + $0x28] sm:$0xf] %vm1425_vm7, %v1933_v60  ;;  %v2096_v42 = vld [vmem:[#allocation4 + $0x18] sm:$0xff] }
 0x187   :  { %1317 = vst.msk [vmem:[#allocation4 + $0x30] sm:$0xf] %vm1280_vm6, %v1315_v61  ;;  %1268 = vrot.lane.b32.xlu1 %v6797_v20, %s6078_s1 }
 0x188   :  { %1741 = vrot.lane.b32.xlu0 %v6799_v23, %s6078_s1  ;;  %5785 = vmatpush3.bf16.msra.mxu1 %v5914_v51 }
 0x189   :  { %v1179_v1 = vpop.permute.xlu1 %1178  ;;  %5786 = vmatprep.subr.bf16.mxu1 %v5917_v63 }
 0x18a   :  { %v1652_v2 = vpop.permute.xlu0 %1651  ;;  %1181 = vst.msk [vmem:[#allocation4 + $0x3c] sm:$0xf] %vm1135_vm5, %v1179_v1 }
 0x18b   :  { %1654 = vst.msk [vmem:[#allocation4 + $0x34] sm:$0xf] %vm1135_vm5, %v1652_v2  ;;  %1413 = vrot.lane.b32.xlu1 %v6799_v23, %s6079_s29 }
 0x18c   :  { %1549 = vrot.lane.b32.xlu0 %v6795_v37, %s6080_s30  ;;  %5787 = vmatpush3.bf16.msra.mxu1 %v5917_v63 }
 0x18d   :  { %v1324_v7 = vpop.permute.xlu1 %1323  ;;  %v2098_v21 = vld [vmem:[#allocation4 + $0x24] sm:$0xff]  ;;  %5788 = vmatprep.subr.bf16.mxu1 %v5918_v6 }
 0x18e   :  { %v1460_v8 = vpop.permute.xlu0 %1459  ;;  %v5900_v10 = vld [vmem:[#allocation4 + $0x1c] ss:$12 sps:$4 sm:$0xff]   ;;  %1326 = vst.msk [vmem:[#allocation4 + $0x3c] sm:$0xf] %vm1280_vm6, %v1324_v7  ;;  %v5071_v11 = vcombine.low %v2096_v42, %v2098_v21 }
 0x18f   :  { %1462 = vst.msk [vmem:[#allocation4 + $0x30] sm:$0xf] %vm1425_vm7, %v1460_v8  ;;  %1750 = vrot.lane.b32.xlu1 %v6821_v59, %s6078_s1  ;;  %2491 = vmatprep.mubr.bf16.mxu1 %v5900_v10 }
 0x190   :  { %1886 = vrot.lane.b32.xlu0 %v5368_v9, %s6079_s29  ;;  %2492 = vmatmul.mubr.bf16.gmra.mxu1 %v5071_v11 }
 0x191   :  { %v1661_v13 = vpop.permute.xlu1 %1660  ;;  %5789 = vmatpush3.bf16.msra.mxu1 %v5918_v6 }
 0x192   :  { %v1796_v14 = vpop.permute.xlu0 %1795  ;;  %1663 = vst.msk [vmem:[#allocation4 + $0x40] sm:$0xf] %vm1135_vm5, %v1661_v13  ;;  %5790 = vmatprep.subr.bf16.mxu1 %v5921_v16 }
 0x193   :  { %1798 = vst.msk [vmem:[#allocation4 + $0x34] sm:$0xf] %vm1280_vm6, %v1796_v14  ;;  %1558 = vrot.lane.b32.xlu1 %v5368_v9, %s6080_s30 }
 0x194   :  { %2031 = vrot.lane.b32.xlu0 %v6823_v32, %s6080_s30 }
 0x195   :  { %v1469_v17 = vpop.permute.xlu1 %1468  ;;  %5791 = vmatpush3.bf16.msra.mxu1 %v5921_v16 }
 0x196   :  { %v1942_v18 = vpop.permute.xlu0 %1941  ;;  %1471 = vst.msk [vmem:[#allocation4 + $0x3c] sm:$0xf] %vm1425_vm7, %v1469_v17 }
 0x197   :  { %1944 = vst.msk [vmem:[#allocation4 + $0x34] sm:$0xf] %vm1425_vm7, %v1942_v18  ;;  %2040 = vrot.lane.b32.xlu1 %v5385_v15, %s6080_s30  ;;  %s4897_s30 = sshll.u32 %s6084_s3, 4  ;;  %s4898_s30 = int_to_ptr.vmem [resolvable:$true] %s4897_s30 }
 0x198   :  { %s6055_s22 = scalar_lea.vmem %s4898_s30, 32  ;;  %p6060_p1 = scmp.lt.s32.totalorder %s4898_s30, %s4898_s30 }
 0x199   :  { %v1805_v37 = vpop.permute.xlu1 %1804  ;;  %p6056_p0 = scmp.ne.s32.totalorder %s4898_s30, %s6055_s22  ;;  %p6061_p2 = scmp.lt.s32.totalorder %s6055_s22, %s6055_s22 }
 0x19a   :  { %v1188_v20 = vpop.permute.xlu0 %1187  ;;  %1807 = vst.msk [vmem:[#allocation4 + $0x40] sm:$0xf] %vm1280_vm6, %v1805_v37 }
 0x19b   :  { %1190 = vst.msk [vmem:[#allocation4 + $0x48] sm:$0xf] %vm1135_vm5, %v1188_v20  ;;  %p6062_p3 = por %p6061_p2, %p6060_p1 }
 0x19d   :  { %v1951_v23 = vpop.permute.xlu1 %1950  ;;  %p6063_p4 = pnand %p6062_p3, %p6056_p0 }
 0x19e   :  { %v1333_v25 = vpop.permute.xlu0 %1332  ;;  %1953 = vst.msk [vmem:[#allocation4 + $0x40] sm:$0xf] %vm1425_vm7, %v1951_v23  ;;  %v2100_v30 = vld [vmem:[#allocation4 + $0x30] sm:$0xff] }
 0x19f   :  { %1335 = vst.msk [vmem:[#allocation4 + $0x48] sm:$0xf] %vm1280_vm6, %v1333_v25 }
 0x1a1   :  { %v1197_v26 = vpop.permute.xlu1 %1196 }
 0x1a2   :  { %v1670_v28 = vpop.permute.xlu0 %1669  ;;  %1199 = vst.msk [vmem:[#allocation4 + $0x54] sm:$0xf] %vm1135_vm5, %v1197_v26 }
 0x1a3   :  { %1672 = vst.msk [vmem:[#allocation4 + $0x4c] sm:$0xf] %vm1135_vm5, %v1670_v28 }
 0x1a5   :  { %v1342_v5 = vpop.permute.xlu1 %1341  ;;  %v2102_v31 = vld [vmem:[#allocation4 + $0x3c] sm:$0xff] }
 0x1a6   :  { %v1478_v29 = vpop.permute.xlu0 %1477  ;;  %v5902_v33 = vld [vmem:[#allocation4 + $0x34] ss:$12 sps:$4 sm:$0xff]   ;;  %1344 = vst.msk [vmem:[#allocation4 + $0x54] sm:$0xf] %vm1280_vm6, %v1342_v5  ;;  %v5074_v34 = vcombine.low %v2100_v30, %v2102_v31 }
 0x1a7   :  { %1480 = vst.msk [vmem:[#allocation4 + $0x48] sm:$0xf] %vm1425_vm7, %v1478_v29  ;;  %2499 = vmatprep.mubr.bf16.mxu1 %v5902_v33 }
 0x1a8   :  { %2500 = vmatmul.mubr.bf16.gmra.mxu1 %v5074_v34 }
 0x1a9   :  { %v1679_v59 = vpop.permute.xlu1 %1678 }
 0x1aa   :  { %v1814_v32 = vpop.permute.xlu0 %1813  ;;  %1681 = vst.msk [vmem:[#allocation4 + $0x58] sm:$0xf] %vm1135_vm5, %v1679_v59 }
 0x1ab   :  { %1816 = vst.msk [vmem:[#allocation4 + $0x4c] sm:$0xf] %vm1280_vm6, %v1814_v32  ;;  %1826 = vst.msk [vmem:[#allocation4 + $0x58] sm:$0xf] %vm1280_vm6, %v6756_v56 }
 0x1ac   :  { %1971 = vst.msk [vmem:[#allocation4 + $0x58] sm:$0xf] %vm1425_vm7, %v6770_v62 }
 0x1ad   :  { %v1487_v54 = vpop.permute.xlu1 %1486 }
 0x1ae   :  { %v1960_v4 = vpop.permute.xlu0 %1959  ;;  %1489 = vst.msk [vmem:[#allocation4 + $0x54] sm:$0xf] %vm1425_vm7, %v1487_v54 }
 0x1af   :  { %1962 = vst.msk [vmem:[#allocation4 + $0x4c] sm:$0xf] %vm1425_vm7, %v1960_v4 }
 0x1b1   :  { %v1215_v35 = vpop.permute.xlu1 %1214 }
 0x1b2   :  { %v1688_v38 = vpop.permute.xlu0 %1687  ;;  %1217 = vst.msk [vmem:[#allocation4 + $0x6c] sm:$0xf] %vm1135_vm5, %v1215_v35 }
 0x1b3   :  { %1690 = vst.msk [vmem:[#allocation4 + $0x64] sm:$0xf] %vm1135_vm5, %v1688_v38 }
 0x1b5   :  { %v1360_v39 = vpop.permute.xlu1 %1359  ;;  %v2106_v41 = vld [vmem:[#allocation4 + $0x54] sm:$0xff] }
 0x1b6   :  { %v1496_v40 = vpop.permute.xlu0 %1495  ;;  %v2104_v19 = vld [vmem:[#allocation4 + $0x48] sm:$0xff]  ;;  %1362 = vst.msk [vmem:[#allocation4 + $0x6c] sm:$0xf] %vm1280_vm6, %v1360_v39 }
 0x1b7   :  { %v5904_v56 = vld [vmem:[#allocation4 + $0x4c] ss:$12 sps:$4 sm:$0xff]   ;;  %1498 = vst.msk [vmem:[#allocation4 + $0x60] sm:$0xf] %vm1425_vm7, %v1496_v40  ;;  %v5077_v62 = vcombine.low %v2104_v19, %v2106_v41  ;;  %v5923_v39 = vld [vmem:[#allocation4 + $0x8] ss:$12 sps:$4 sm:$0xff]  }
 0x1b8   :  { %2507 = vmatprep.mubr.bf16.mxu1 %v5904_v56  ;;  %v5924_v40 = vld [vmem:[#allocation4 + $0x20] ss:$12 sps:$4 sm:$0xff]   ;;  %v5925_v19 = vld [vmem:[#allocation4 + $0x38] ss:$12 sps:$4 sm:$0xff]   ;;  %v5927_v41 = vld [vmem:[#allocation4 + $0x68] ss:$12 sps:$4 sm:$0xff]  }
 0x1b9   :  { %2508 = vmatmul.mubr.bf16.gmra.mxu1 %v5077_v62  ;;  %v1697_v24 = vpop.permute.xlu1 %1696  ;;  %v5928_v56 = vld [vmem:[#allocation4 + $0x80] ss:$12 sps:$4 sm:$0xff]   ;;  %v5929_v62 = vld [vmem:[#allocation4 + $0x98] ss:$12 sps:$4 sm:$0xff]  }
 0x1ba   :  { %v1833_v43 = vpop.permute.xlu0 %1832  ;;  %1699 = vst.msk [vmem:[#allocation4 + $0x70] sm:$0xf] %vm1135_vm5, %v1697_v24  ;;  %v5930_v24 = vld [vmem:[#allocation4 + $0xb0] ss:$12 sps:$4 sm:$0xff]  }
 0x1bb   :  { %1835 = vst.msk [vmem:[#allocation4 + $0x64] sm:$0xf] %vm1280_vm6, %v1833_v43 }
 0x1bd   :  { %v1505_v36 = vpop.permute.xlu1 %1504 }
 0x1be   :  { %v1978_v44 = vpop.permute.xlu0 %1977  ;;  %1507 = vst.msk [vmem:[#allocation4 + $0x6c] sm:$0xf] %vm1425_vm7, %v1505_v36  ;;  %v2829_v36 = vld [vmem:[#allocation6 + $0x1] sm:$0xf] }
 0x1bf   :  { %1980 = vst.msk [vmem:[#allocation4 + $0x64] sm:$0xf] %vm1425_vm7, %v1978_v44  ;;  %v5390_v44 = vpack.c.bf16 %v2829_v36, %v2829_v36 }
 0x1c1   :  { %v1842_v46 = vpop.permute.xlu1 %1841  ;;  %2834 = vrot.lane.b32.xlu0 %v5390_v44, %s6079_s29  ;;  %v7118_v44 = vld [vmem:[%s7675_s4] ss:$0 sm:$0xff] }
 0x1c2   :  { %v1224_v47 = vpop.permute.xlu0 %1223  ;;  %1844 = vst.msk [vmem:[#allocation4 + $0x70] sm:$0xf] %vm1280_vm6, %v1842_v46 }
 0x1c3   :  { %1226 = vst.msk [vmem:[#allocation4 + $0x78] sm:$0xf] %vm1135_vm5, %v1224_v47  ;;  %v2869_v47 = vld [vmem:[#allocation6 + $0x31] sm:$0xf] }
 0x1c5   :  { %v1987_v49 = vpop.permute.xlu1 %1986 }
 0x1c6   :  { %v1369_v48 = vpop.permute.xlu0 %1368  ;;  %1989 = vst.msk [vmem:[#allocation4 + $0x70] sm:$0xf] %vm1425_vm7, %v1987_v49  ;;  %v2108_v55 = vld [vmem:[#allocation4 + $0x60] sm:$0xff]  ;;  %v3221_v49 = vld [vmem:[#allocation6 + $0x29] sm:$0xf] }
 0x1c7   :  { %1371 = vst.msk [vmem:[#allocation4 + $0x78] sm:$0xf] %vm1280_vm6, %v1369_v48  ;;  %v5394_v48 = vpack.c.bf16 %v2869_v47, %v2869_v47 }
 0x1c9   :  { %v1233_v0 = vpop.permute.xlu1 %1232  ;;  %2874 = vrot.lane.b32.xlu0 %v5394_v48, %s6079_s29 }
 0x1ca   :  { %v1706_v50 = vpop.permute.xlu0 %1705  ;;  %1235 = vst.msk [vmem:[#allocation4 + $0x84] sm:$0xf] %vm1135_vm5, %v1233_v0  ;;  %v5429_v0 = vpack.c.bf16 %v3221_v49, %v3221_v49 }
 0x1cb   :  { %1708 = vst.msk [vmem:[#allocation4 + $0x7c] sm:$0xf] %vm1135_vm5, %v1706_v50 }
 0x1cd   :  { %v1378_v52 = vpop.permute.xlu1 %1377  ;;  %v2110_v57 = vld [vmem:[#allocation4 + $0x6c] sm:$0xff] }
 0x1ce   :  { %v1514_v53 = vpop.permute.xlu0 %1513  ;;  %v5906_v58 = vld [vmem:[#allocation4 + $0x64] ss:$12 sps:$4 sm:$0xff]   ;;  %1380 = vst.msk [vmem:[#allocation4 + $0x84] sm:$0xf] %vm1280_vm6, %v1378_v52  ;;  %v5080_v51 = vcombine.low %v2108_v55, %v2110_v57  ;;  %v3226_v52 = vrot.slane %v5429_v0, 6 }
 0x1cf   :  { %1516 = vst.msk [vmem:[#allocation4 + $0x78] sm:$0xf] %vm1425_vm7, %v1514_v53  ;;  %2515 = vmatprep.mubr.bf16.mxu1 %v5906_v58 }
 0x1d0   :  { %2516 = vmatmul.mubr.bf16.gmra.mxu1 %v5080_v51  ;;  %3227 = vrot.lane.b32.xlu1 %v3226_v52, %s6079_s29 }
 0x1d1   :  { %v1715_v60 = vpop.permute.xlu1 %1714 }
 0x1d2   :  { %v1851_v61 = vpop.permute.xlu0 %1850  ;;  %1717 = vst.msk [vmem:[#allocation4 + $0x88] sm:$0xf] %vm1135_vm5, %v1715_v60 }
 0x1d3   :  { %1853 = vst.msk [vmem:[#allocation4 + $0x7c] sm:$0xf] %vm1280_vm6, %v1851_v61 }
 0x1d5   :  { %v1523_v63 = vpop.permute.xlu1 %1522 }
 0x1d6   :  { %v1996_v1 = vpop.permute.xlu0 %1995  ;;  %1525 = vst.msk [vmem:[#allocation4 + $0x84] sm:$0xf] %vm1425_vm7, %v1523_v63 }
 0x1d7   :  { %1998 = vst.msk [vmem:[#allocation4 + $0x7c] sm:$0xf] %vm1425_vm7, %v1996_v1 }
 0x1d9   :  { %v1860_v2 = vpop.permute.xlu1 %1859 }
 0x1da   :  { %v1242_v3 = vpop.permute.xlu0 %1241  ;;  %1862 = vst.msk [vmem:[#allocation4 + $0x88] sm:$0xf] %vm1280_vm6, %v1860_v2 }
 0x1db   :  { %1244 = vst.msk [vmem:[#allocation4 + $0x90] sm:$0xf] %vm1135_vm5, %v1242_v3 }
 0x1dd   :  { %v2005_v6 = vpop.permute.xlu1 %2004 }
 0x1de   :  { %v1387_v7 = vpop.permute.xlu0 %1386  ;;  %2007 = vst.msk [vmem:[#allocation4 + $0x88] sm:$0xf] %vm1425_vm7, %v2005_v6  ;;  %v2112_v10 = vld [vmem:[#allocation4 + $0x78] sm:$0xff]  ;;  %v3283_v6 = vld [vmem:[#allocation6 + $0x2a] sm:$0xf] }
 0x1df   :  { %1389 = vst.msk [vmem:[#allocation4 + $0x90] sm:$0xf] %vm1280_vm6, %v1387_v7  ;;  %v5435_v7 = vpack.c.bf16 %v3283_v6, %v3283_v6 }
 0x1e1   :  { %v1251_v8 = vpop.permute.xlu1 %1250 }
 0x1e2   :  { %v1724_v9 = vpop.permute.xlu0 %1723  ;;  %1253 = vst.msk [vmem:[#allocation4 + $0x9c] sm:$0xf] %vm1135_vm5, %v1251_v8 }
 0x1e3   :  { %1726 = vst.msk [vmem:[#allocation4 + $0x94] sm:$0xf] %vm1135_vm5, %v1724_v9  ;;  %v3288_v9 = vrot.slane %v5435_v7, 6 }
 0x1e5   :  { %v1396_v42 = vpop.permute.xlu1 %1395  ;;  %v2114_v11 = vld [vmem:[#allocation4 + $0x84] sm:$0xff]  ;;  %3290 = vst.msk [vmem:[#allocation7 + $0x24] sm:$0xc] %vm2793_vm10, %v3288_v9 }
 0x1e6   :  { %v1532_v21 = vpop.permute.xlu0 %1531  ;;  %v5910_v12 = vld [vmem:[#allocation4 + $0x7c] ss:$12 sps:$4 sm:$0xff]   ;;  %1398 = vst.msk [vmem:[#allocation4 + $0x9c] sm:$0xf] %vm1280_vm6, %v1396_v42  ;;  %v5083_v13 = vcombine.low %v2112_v10, %v2114_v11 }
 0x1e7   :  { %1534 = vst.msk [vmem:[#allocation4 + $0x90] sm:$0xf] %vm1425_vm7, %v1532_v21  ;;  %2523 = vmatprep.mubr.bf16.mxu1 %v5910_v12  ;;  %v5931_v21 = vld [vmem:[%s7676_s5 + $0xf8] sm:$0xff]  }
 0x1e8   :  { %2524 = vmatmul.mubr.bf16.gmra.mxu1 %v5083_v13  ;;  %v5932_v10 = vld [vmem:[%s7676_s5 + $0xb8] sm:$0xff]   ;;  %5579 = vmatprep.subr.bf16.mxu0 %v5931_v21 }
 0x1e9   :  { %v1733_v14 = vpop.permute.xlu1 %1732  ;;  %5580 = vmatpush3.bf16.msra.mxu0 %v5932_v10  ;;  %v3305_v12 = vld [vmem:[#allocation6 + $0x5a] sm:$0xf] }
 0x1ea   :  { %v1869_v15 = vpop.permute.xlu0 %1868  ;;  %1735 = vst.msk [vmem:[#allocation4 + $0xa0] sm:$0xf] %vm1135_vm5, %v1733_v14  ;;  %v5437_v14 = vpack.c.bf16 %v3305_v12, %v3305_v12 }
 0x1eb   :  { %1871 = vst.msk [vmem:[#allocation4 + $0x94] sm:$0xf] %vm1280_vm6, %v1869_v15 }
 0x1ec   :  { %v3310_v15 = vrot.slane %v5437_v14, 6 }
 0x1ed   :  { %v1541_v16 = vpop.permute.xlu1 %1540 }
 0x1ee   :  { %v2014_v17 = vpop.permute.xlu0 %2013  ;;  %1543 = vst.msk [vmem:[#allocation4 + $0x9c] sm:$0xf] %vm1425_vm7, %v1541_v16 }
 0x1ef   :  { %2016 = vst.msk [vmem:[#allocation4 + $0x94] sm:$0xf] %vm1425_vm7, %v2014_v17  ;;  %v5933_v17 = vld [vmem:[%s7676_s5 + $0xf0] sm:$0xff]  }
 0x1f0   :  { %3312 = vst.msk [vmem:[#allocation7 + $0x4c] sm:$0xc] %vm2793_vm10, %v3310_v15  ;;  %5581 = vmatprep.subr.bf16.mxu0 %v5933_v17 }
 0x1f1   :  { %v1878_v18 = vpop.permute.xlu1 %1877 }
 0x1f2   :  { %v1260_v37 = vpop.permute.xlu0 %1259  ;;  %1880 = vst.msk [vmem:[#allocation4 + $0xa0] sm:$0xf] %vm1280_vm6, %v1878_v18  ;;  %v5934_v18 = vld [vmem:[%s7676_s5 + $0xb0] sm:$0xff]  }
 0x1f3   :  { %1262 = vst.msk [vmem:[#allocation4 + $0xa8] sm:$0xf] %vm1135_vm5, %v1260_v37  ;;  %v5935_v37 = vld [vmem:[%s7676_s5 + $0xe8] sm:$0xff]   ;;  %5582 = vmatpush3.bf16.msra.mxu0 %v5934_v18 }
 0x1f4   :  { %5583 = vmatprep.subr.bf16.mxu0 %v5935_v37 }
 0x1f5   :  { %v2023_v20 = vpop.permute.xlu1 %2022 }
 0x1f6   :  { %v1405_v23 = vpop.permute.xlu0 %1404  ;;  %2025 = vst.msk [vmem:[#allocation4 + $0xa0] sm:$0xf] %vm1425_vm7, %v2023_v20  ;;  %v2116_v29 = vld [vmem:[#allocation4 + $0x90] sm:$0xff] }
 0x1f7   :  { %1407 = vst.msk [vmem:[#allocation4 + $0xa8] sm:$0xf] %vm1280_vm6, %v1405_v23  ;;  %v2782_v23 = vld [vmem:[#allocation6] sm:$0xf] }
 0x1f9   :  { %v1269_v25 = vpop.permute.xlu1 %1268 }
 0x1fa   :  { %v1742_v26 = vpop.permute.xlu0 %1741  ;;  %1271 = vst.msk [vmem:[#allocation4 + $0xb4] sm:$0xf] %vm1135_vm5, %v1269_v25  ;;  %v2807_v25 = vld [vmem:[#allocation6 + $0x30] sm:$0xf] }
 0x1fb   :  { %1744 = vst.msk [vmem:[#allocation4 + $0xac] sm:$0xf] %vm1135_vm5, %v1742_v26  ;;  %v5936_v26 = vld [vmem:[%s7676_s5 + $0xa8] sm:$0xff]  }
 0x1fc   :  { %5584 = vmatpush3.bf16.msra.mxu0 %v5936_v26 }
 0x1fd   :  { %v1414_v28 = vpop.permute.xlu1 %1413  ;;  %v2118_v30 = vld [vmem:[#allocation4 + $0x9c] sm:$0xff] }
 0x1fe   :  { %v1550_v5 = vpop.permute.xlu0 %1549  ;;  %v5915_v31 = vld [vmem:[#allocation4 + $0x94] ss:$12 sps:$4 sm:$0xff]   ;;  %1416 = vst.msk [vmem:[#allocation4 + $0xb4] sm:$0xf] %vm1280_vm6, %v1414_v28  ;;  %v5086_v33 = vcombine.low %v2116_v29, %v2118_v30  ;;  %v2783_v28 = vpack.c.bf16 %v2782_v23, %v2782_v23  ;;  %v3162_v29 = vld [vmem:[#allocation6 + $0x28] sm:$0xf] }
 0x1ff   :  { %1552 = vst.msk [vmem:[#allocation4 + $0xa8] sm:$0xf] %vm1425_vm7, %v1550_v5  ;;  %2531 = vmatprep.mubr.bf16.mxu1 %v5915_v31  ;;  %v2808_v5 = vpack.c.bf16 %v2807_v25, %v2807_v25  ;;  %v5937_v30 = vld [vmem:[%s7676_s5 + $0xe0] sm:$0xff]   ;;  %v5423_v31 = vpack.c.bf16 %v3162_v29, %v3162_v29 }
 0x200   :  { %2532 = vmatmul.mubr.bf16.gmra.mxu1 %v5086_v33  ;;  %2785 = vst.msk [vmem:[#allocation7] sm:$0x3] %vm2784_vm11, %v2783_v28  ;;  %5585 = vmatprep.subr.bf16.mxu0 %v5937_v30 }
 0x201   :  { %v1751_v34 = vpop.permute.xlu1 %1750  ;;  %2809 = vst.msk [vmem:[#allocation7 + $0x28] sm:$0x3] %vm2784_vm11, %v2808_v5 }
 0x202   :  { %v1887_v59 = vpop.permute.xlu0 %1886  ;;  %1753 = vst.msk [vmem:[#allocation4 + $0xb8] sm:$0xf] %vm1135_vm5, %v1751_v34  ;;  %v3167_v34 = vrot.slane %v5423_v31, 6 }
 0x203   :  { %1889 = vst.msk [vmem:[#allocation4 + $0xac] sm:$0xf] %vm1280_vm6, %v1887_v59  ;;  %1899 = vst.msk [vmem:[#allocation4 + $0xb8] sm:$0xf] %vm1280_vm6, %v6792_v27  ;;  %v5926_v27 = vld [vmem:[#allocation4 + $0x50] ss:$12 sps:$4 sm:$0xff]  }
 0x204   :  { %v5938_v59 = vld [vmem:[%s7676_s5 + $0xa0] sm:$0xff]   ;;  %3169 = vst.msk [vmem:[#allocation7 + $0x20] sm:$0xc] %vm2793_vm10, %v3167_v34 }
 0x205   :  { %v1559_v32 = vpop.permute.xlu1 %1558  ;;  %5586 = vmatpush3.bf16.msra.mxu0 %v5938_v59 }
 0x206   :  { %v2032_v54 = vpop.permute.xlu0 %2031  ;;  %1561 = vst.msk [vmem:[#allocation4 + $0xb4] sm:$0xf] %vm1425_vm7, %v1559_v32  ;;  %v5939_v32 = vld [vmem:[%s7676_s5 + $0xd8] sm:$0xff]  }
 0x207   :  { %2034 = vst.msk [vmem:[#allocation4 + $0xac] sm:$0xf] %vm1425_vm7, %v2032_v54  ;;  %5587 = vmatprep.subr.bf16.mxu0 %v5939_v32 }
 0x209   :  { %v2041_v4 = vpop.permute.xlu1 %2040 }
 0x20a   :  { %2043 = vst.msk [vmem:[#allocation4 + $0xb8] sm:$0xf] %vm1425_vm7, %v2041_v4  ;;  %v5940_v4 = vld [vmem:[%s7676_s5 + $0x98] sm:$0xff]  }
 0x20b   :  { %5588 = vmatpush3.bf16.msra.mxu0 %v5940_v4 }
 0x20d   :  { %v5922_v38 = vld [vmem:[#allocation4 + $0xa8] ss:$12 sps:$4 sm:$0xff]  }
 0x211   :  { %v5919_v35 = vld [vmem:[#allocation4 + $0xac] ss:$12 sps:$4 sm:$0xff]  }
 0x212   :  { %2539 = vmatprep.mubr.bf16.mxu1 %v5919_v35 }
 0x213   :  { %2540 = vmatmul.mubr.bf16.gmra.mxu1 %v5922_v38 }
 0x214   :  { %5792 = vmatprep.mubr.bf16.mxu1 %v5923_v39 }
 0x21b   :  { %5793 = vmatmul.mubr.bf16.vlgmr.msra.gmra.mxu1 %v5924_v40 }
 0x21c   :  { %5796 = vmatprep.mubr.bf16.mxu1 %v5925_v19 }
 0x223   :  { %5797 = vmatmul.mubr.bf16.gmra.mxu1 %v5926_v27 }
 0x224   :  { %5800 = vmatprep.mubr.bf16.mxu1 %v5927_v41 }
 0x22b   :  { %5801 = vmatmul.mubr.bf16.gmra.mxu1 %v5928_v56 }
 0x22c   :  { %5804 = vmatprep.mubr.bf16.mxu1 %v5929_v62 }
 0x233   :  { %5805 = vmatmul.mubr.bf16.gmra.mxu1 %v5930_v24 }
 0x237   :  { %v7009_v43 = vpop.f32.mrf.mxu1 }
 0x239   :  { %v7011_v46 = vpop.f32.mrf.mxu1 }
 0x23a   :  { %v5489_v24 = vadd.f32 %v7011_v46, %v7009_v43 }
 0x23b   :  { %v7014_v50 = vpop.f32.mrf.mxu1 }
 0x23d   :  { %v7018_v53 = vpop.f32.mrf.mxu1 }
 0x23e   :  { %v5492_v0 = vadd.f32 %v7018_v53, %v7014_v50 }
 0x240   :  { %v2489_v53 = vadd.f32 %v5492_v0, %v7118_v44 }
 0x250   :  { %v7020_v55 = vpop.f32.mrf.mxu1 }
 0x252   :  { %v7022_v57 = vpop.f32.mrf.mxu1 }
 0x253   :  { %v5495_v56 = vadd.f32 %v7022_v57, %v7020_v55  ;;  %v2486_v55 = vadd.f32 %v5489_v24, %v7118_v44 }
 0x254   :  { %v7024_v58 = vpop.f32.mrf.mxu1 }
 0x255   :  { %v2494_v49 = vadd.f32 %v5495_v56, %v7118_v44 }
 0x256   :  { %v7026_v51 = vpop.f32.mrf.mxu1 }
 0x257   :  { %v5498_v47 = vadd.f32 %v7026_v51, %v7024_v58 }
 0x259   :  { %v2497_v7 = vadd.f32 %v5498_v47, %v7118_v44 }
 0x268   :  { %v7028_v60 = vpop.f32.mrf.mxu1 }
 0x26a   :  { %v7034_v61 = vpop.f32.mrf.mxu1 }
 0x26b   :  { %v5501_v58 = vadd.f32 %v7034_v61, %v7028_v60 }
 0x26c   :  { %v7036_v63 = vpop.f32.mrf.mxu1 }
 0x26d   :  { %v2502_v17 = vadd.f32 %v5501_v58, %v7118_v44 }
 0x26e   :  { %v7038_v1 = vpop.f32.mrf.mxu1 }
 0x26f   :  { %v5504_v60 = vadd.f32 %v7038_v1, %v7036_v63  ;;  %v2835_v1 = vpop.permute.xlu0 %2834 }
 0x270   :  { %2838 = vst.msk [vmem:[#allocation7] sm:$0x3] %vm2837_vm13, %v2835_v1 }
 0x271   :  { %v2505_v29 = vadd.f32 %v5504_v60, %v7118_v44 }
 0x279   :  { %v7040_v2 = vpop.f32.mrf.mxu1 }
 0x27b   :  { %v7042_v3 = vpop.f32.mrf.mxu1 }
 0x27c   :  { %v5507_v46 = vadd.f32 %v7042_v3, %v7040_v2 }
 0x27d   :  { %v7044_v8 = vpop.f32.mrf.mxu1 }
 0x27e   :  { %v2510_v12 = vadd.f32 %v5507_v46, %v7118_v44 }
 0x27f   :  { %v7047_v42 = vpop.f32.mrf.mxu1 }
 0x280   :  { %v5510_v10 = vadd.f32 %v7047_v42, %v7044_v8 }
 0x282   :  { %v2513_v23 = vadd.f32 %v5510_v10, %v7118_v44 }
 0x290   :  { %v7049_v45 = vpop.f32.mrf.mxu1 }
 0x292   :  { %v7057_v11 = vpop.f32.mrf.mxu1 }
 0x293   :  { %v5513_v25 = vadd.f32 %v7057_v11, %v7049_v45 }
 0x294   :  { %v7059_v13 = vpop.f32.mrf.mxu1 }
 0x295   :  { %v2518_v47 = vadd.f32 %v5513_v25, %v7118_v44 }
 0x296   :  { %v7061_v16 = vpop.f32.mrf.mxu1 }
 0x297   :  { %v5516_v32 = vadd.f32 %v7061_v16, %v7059_v13 }
 0x2a8   :  { %v7073_v20 = vpop.f32.mrf.mxu1 }
 0x2aa   :  { %v5518_v33 = vpop.f32.mrf.mxu1 }
 0x2ab   :  { %v5519_v8 = vadd.f32 %v5518_v33, %v7073_v20 }
 0x2ac   :  { %v7090_v54 = vpop.f32.mrf.mxu1 }
 0x2ad   :  { %v2526_v59 = vadd.f32 %v5519_v8, %v7118_v44 }
 0x2ae   :  { %v5521_v35 = vpop.f32.mrf.mxu1 }
 0x2af   :  { %v5522_v20 = vadd.f32 %v5521_v35, %v7090_v54  ;;  %v2875_v54 = vpop.permute.xlu0 %2874 }
 0x2b0   :  { %2877 = vst.msk [vmem:[#allocation7 + $0x28] sm:$0x3] %vm2837_vm13, %v2875_v54 }
 0x2b1   :  { %v2529_v46 = vadd.f32 %v5522_v20, %v7118_v44 }
 0x2c0   :  { %v7095_v38 = vpop.f32.mrf.mxu1 }
 0x2c2   :  { %v7097_v39 = vpop.f32.mrf.mxu1 }
 0x2c4   :  { %v7099_v40 = vpop.f32.mrf.mxu1 }
 0x2c6   :  { %v7101_v19 = vpop.f32.mrf.mxu1 }
 0x2d3   :  { %v7103_v27 = vpop.f32.mrf.mxu1 }
 0x2d5   :  { %v7105_v41 = vpop.f32.mrf.mxu1 }
 0x2d7   :  { %v7109_v62 = vpop.f32.mrf.mxu1 }
 0x2d9   :  { %v7113_v36 = vpop.f32.mrf.mxu1 }
 0x2db   :  { %v5794_v48 = vpop.f32.mrf.mxu1 }
 0x2dc   :  { %v2591_v52 = vadd.f32 %v5794_v48, %v2494_v49 }
 0x2dd   :  { %v2582_v43 = vpop.f32.mrf.mxu1 }
 0x2de   :  { %v2647_v57 = vmax.f32 %v2591_v52, 0.0  ;;  %v2583_v6 = vadd.f32 %v2582_v43, %v2486_v55  ;;  %v5531_v52 = vadd.f32 %v7105_v41, %v7103_v27  ;;  %v5525_v27 = vadd.f32 %v7097_v39, %v7095_v38 }
 0x2df   :  { %v5795_v9 = vpop.f32.mrf.mxu1 }
 0x2e0   :  { %2664 = vst.msk [vmem:[#allocation5 + $0x10] sm:$0xff] %vm2661_vm12, %v2647_v57  ;;  %v2645_v51 = vmax.f32 %v2583_v6, 0.0  ;;  %v2594_v50 = vadd.f32 %v5795_v9, %v2497_v7  ;;  %v3228_v57 = vpop.permute.xlu1 %3227 }
 0x2e1   :  { %v2585_v21 = vpop.f32.mrf.mxu1  ;;  %3230 = vst.msk [vmem:[#allocation7 + $0x20] sm:$0xc] %vm2848_vm15, %v3228_v57  ;;  %v5946_v57 = vld [vmem:[%s7676_s5 + $0x28] sm:$0xff]  }
 0x2e2   :  { %2662 = vst.msk [vmem:[#allocation5] sm:$0xff] %vm2661_vm12, %v2645_v51  ;;  %v2648_v2 = vmax.f32 %v2594_v50, 0.0  ;;  %v2586_v3 = vadd.f32 %v2585_v21, %v2489_v53  ;;  %v5941_v51 = vld [vmem:[%s7676_s5 + $0x78] sm:$0xff]  }
 0x2e3   :  { %v5798_v14 = vpop.f32.mrf.mxu1  ;;  %5551 = vmatprep.subr.bf16.mxu1 %v5941_v51 }
 0x2e4   :  { %2665 = vst.msk [vmem:[#allocation5 + $0x18] sm:$0xff] %vm2661_vm12, %v2648_v2  ;;  %v2646_v61 = vmax.f32 %v2586_v3, 0.0  ;;  %v2607_v15 = vadd.f32 %v5798_v14, %v2510_v12  ;;  %v2521_v2 = vadd.f32 %v5516_v32, %v7118_v44  ;;  %v5534_v3 = vadd.f32 %v7113_v36, %v7109_v62  ;;  %v5943_v62 = vld [vmem:[%s7676_s5 + $0x70] sm:$0xff]  }
 0x2e5   :  { %v2598_v18 = vpop.f32.mrf.mxu1  ;;  %v5528_v36 = vadd.f32 %v7101_v19, %v7099_v40 }
 0x2e6   :  { %2663 = vst.msk [vmem:[#allocation5 + $0x8] sm:$0xff] %vm2661_vm12, %v2646_v61  ;;  %v2651_v42 = vmax.f32 %v2607_v15, 0.0  ;;  %v2599_v37 = vadd.f32 %v2598_v18, %v2502_v17  ;;  %v2542_v15 = vadd.f32 %v5531_v52, %v7118_v44  ;;  %v5942_v17 = vld [vmem:[%s7676_s5 + $0x38] sm:$0xff]   ;;  %v2545_v20 = vadd.f32 %v5534_v3, %v7118_v44 }
 0x2e7   :  { %v5799_v63 = vpop.f32.mrf.mxu1  ;;  %v2692_v26 = vld [vmem:[#allocation5 + $0x10] ss:$2 sm:$0xf]  ;;  %v2694_v30 = vld [vmem:[#allocation5 + $0x11] ss:$2 sm:$0xf]  ;;  %5552 = vmatpush3.bf16.msra.mxu1 %v5942_v17  ;;  %v2537_v54 = vadd.f32 %v5528_v36, %v7118_v44 }
 0x2e8   :  { %2668 = vst.msk [vmem:[#allocation5 + $0x30] sm:$0xff] %vm2661_vm12, %v2651_v42  ;;  %v2649_v28 = vmax.f32 %v2599_v37, 0.0  ;;  %v2610_v5 = vadd.f32 %v5799_v63, %v2513_v23  ;;  %v2695_v35 = vmax.f32 %v2692_v26, %v2694_v30  ;;  %v2534_v37 = vadd.f32 %v5525_v27, %v7118_v44  ;;  %5553 = vmatprep.subr.bf16.mxu1 %v5943_v62 }
 0x2e9   :  { %v2678_v31 = vld [vmem:[#allocation5] ss:$2 sm:$0xf]  ;;  %v2601_v33 = vpop.f32.mrf.mxu1  ;;  %v2680_v34 = vld [vmem:[#allocation5 + $0x1] ss:$2 sm:$0xf] }
 0x2ea   :  { %2666 = vst.msk [vmem:[#allocation5 + $0x20] sm:$0xff] %vm2661_vm12, %v2649_v28  ;;  %v2652_v45 = vmax.f32 %v2610_v5, 0.0  ;;  %v2602_v11 = vadd.f32 %v2601_v33, %v2505_v29  ;;  %v2681_v55 = vmax.f32 %v2678_v31, %v2680_v34  ;;  %v5944_v33 = vld [vmem:[%s7676_s5 + $0x30] sm:$0xff]   ;;  %v2907_v34 = vld [vmem:[#allocation6 + $0x2] sm:$0xf] }
 0x2eb   :  { %v2697_v4 = vld [vmem:[#allocation5 + $0x18] ss:$2 sm:$0xf]  ;;  %v2699_v56 = vld [vmem:[#allocation5 + $0x19] ss:$2 sm:$0xf]  ;;  %v5802_v24 = vpop.f32.mrf.mxu1  ;;  %5554 = vmatpush3.bf16.msra.mxu1 %v5944_v33 }
 0x2ec   :  { %v2700_v49 = vmax.f32 %v2697_v4, %v2699_v56  ;;  %2669 = vst.msk [vmem:[#allocation5 + $0x38] sm:$0xff] %vm2661_vm12, %v2652_v45  ;;  %v2650_v48 = vmax.f32 %v2602_v11, 0.0  ;;  %v2623_v0 = vadd.f32 %v5802_v24, %v2526_v59  ;;  %v5945_v45 = vld [vmem:[%s7676_s5 + $0x68] sm:$0xff]   ;;  %v2908_v4 = vpack.c.bf16 %v2907_v34, %v2907_v34 }
 0x2ed   :  { %v2683_v43 = vld [vmem:[#allocation5 + $0x8] ss:$2 sm:$0xf]  ;;  %v2685_v13 = vld [vmem:[#allocation5 + $0x9] ss:$2 sm:$0xf]  ;;  %v2614_v16 = vpop.f32.mrf.mxu1  ;;  %5555 = vmatprep.subr.bf16.mxu1 %v5945_v45 }
 0x2ee   :  { %v2701_v6 = vmax.f32 %v2695_v35, %v2700_v49  ;;  %v2686_v7 = vmax.f32 %v2683_v43, %v2685_v13  ;;  %2667 = vst.msk [vmem:[#allocation5 + $0x28] sm:$0xff] %vm2661_vm12, %v2650_v48  ;;  %v2655_v9 = vmax.f32 %v2623_v0, 0.0  ;;  %v2615_v58 = vadd.f32 %v2614_v16, %v2518_v47 }
 0x2ef   :  { %v5803_v41 = vpop.f32.mrf.mxu1  ;;  %v2718_v53 = vld [vmem:[#allocation5 + $0x30] ss:$2 sm:$0xf]  ;;  %v2720_v12 = vld [vmem:[#allocation5 + $0x31] ss:$2 sm:$0xf]  ;;  %5556 = vmatpush3.bf16.msra.mxu1 %v5946_v57 }
 0x2f0   :  { %v2687_v50 = vmax.f32 %v2681_v55, %v2686_v7  ;;  %2672 = vst.msk [vmem:[#allocation5 + $0x50] sm:$0xff] %vm2661_vm12, %v2655_v9  ;;  %v2653_v21 = vmax.f32 %v2615_v58, 0.0  ;;  %v2626_v10 = vadd.f32 %v5803_v41, %v2529_v46  ;;  %v2721_v23 = vmax.f32 %v2718_v53, %v2720_v12 }
 0x2f1   :  { %2703 = vst.msk [vmem:[#allocation6 + $0x11] sm:$0xf] %vm2689_vm14, %v2701_v6  ;;  %v2705_v14 = vld [vmem:[#allocation5 + $0x20] ss:$2 sm:$0xf]  ;;  %v2617_v60 = vpop.f32.mrf.mxu1 }
 0x2f2   :  { %v2707_v61 = vld [vmem:[#allocation5 + $0x21] ss:$2 sm:$0xf]  ;;  %2670 = vst.msk [vmem:[#allocation5 + $0x40] sm:$0xff] %vm2661_vm12, %v2653_v21  ;;  %v2656_v38 = vmax.f32 %v2626_v10, 0.0  ;;  %v2618_v39 = vadd.f32 %v2617_v60, %v2521_v2 }
 0x2f3   :  { %2690 = vst.msk [vmem:[#allocation6 + $0x9] sm:$0xf] %vm2689_vm14, %v2687_v50  ;;  %v2723_v18 = vld [vmem:[#allocation5 + $0x38] ss:$2 sm:$0xf]  ;;  %v5806_v42 = vpop.f32.mrf.mxu1  ;;  %v2708_v26 = vmax.f32 %v2705_v14, %v2707_v61  ;;  %v5947_v61 = vld [vmem:[%s7676_s5 + $0xd0] sm:$0xff]  }
 0x2f4   :  { %v2725_v8 = vld [vmem:[#allocation5 + $0x39] ss:$2 sm:$0xf]  ;;  %2673 = vst.msk [vmem:[#allocation5 + $0x58] sm:$0xff] %vm2661_vm12, %v2656_v38  ;;  %v2654_v63 = vmax.f32 %v2618_v39, 0.0  ;;  %v2639_v1 = vadd.f32 %v5806_v42, %v2542_v15  ;;  %5589 = vmatprep.subr.bf16.mxu0 %v5947_v61 }
 0x2f5   :  { %v2726_v25 = vmax.f32 %v2723_v18, %v2725_v8  ;;  %v2710_v28 = vld [vmem:[#allocation5 + $0x28] ss:$2 sm:$0xf]  ;;  %v2712_v5 = vld [vmem:[#allocation5 + $0x29] ss:$2 sm:$0xf]  ;;  %v2630_v29 = vpop.f32.mrf.mxu1 }
 0x2f6   :  { %v2713_v19 = vmax.f32 %v2710_v28, %v2712_v5  ;;  %2671 = vst.msk [vmem:[#allocation5 + $0x48] sm:$0xff] %vm2661_vm12, %v2654_v63  ;;  %v2659_v30 = vmax.f32 %v2639_v1, 0.0  ;;  %v2631_v31 = vadd.f32 %v2630_v29, %v2534_v37  ;;  %v5948_v18 = vld [vmem:[%s7676_s5 + $0x60] sm:$0xff]  }
 0x2f7   :  { %v2727_v40 = vmax.f32 %v2721_v23, %v2726_v25  ;;  %v2744_v11 = vld [vmem:[#allocation5 + $0x50] ss:$2 sm:$0xf]  ;;  %v2746_v59 = vld [vmem:[#allocation5 + $0x51] ss:$2 sm:$0xf]  ;;  %v5807_v32 = vpop.f32.mrf.mxu1  ;;  %5557 = vmatprep.subr.bf16.mxu1 %v5948_v18 }
 0x2f8   :  { %v2714_v56 = vmax.f32 %v2708_v26, %v2713_v19  ;;  %2676 = vst.msk [vmem:[#allocation5 + $0x70] sm:$0xff] %vm2661_vm12, %v2659_v30  ;;  %v2657_v24 = vmax.f32 %v2631_v31, 0.0  ;;  %v2642_v47 = vadd.f32 %v5807_v32, %v2545_v20  ;;  %v2850_v35 = vld [vmem:[#allocation6 + $0x11] sm:$0xf]  ;;  %v2747_v58 = vmax.f32 %v2744_v11, %v2746_v59 }
 0x2f9   :  { %2729 = vst.msk [vmem:[#allocation6 + $0x21] sm:$0xf] %vm2689_vm14, %v2727_v40  ;;  %v2960_v49 = vld [vmem:[#allocation6 + $0x10] sm:$0xf]  ;;  %v2633_v52 = vpop.f32.mrf.mxu1  ;;  %v5392_v55 = vpack.c.bf16 %v2850_v35, %v2850_v35 }
 0x2fa   :  { %v2731_v48 = vld [vmem:[#allocation5 + $0x40] ss:$2 sm:$0xf]  ;;  %v2733_v0 = vld [vmem:[#allocation5 + $0x41] ss:$2 sm:$0xf]  ;;  %v5403_v43 = vpack.c.bf16 %v2960_v49, %v2960_v49  ;;  %v2634_v16 = vadd.f32 %v2633_v52, %v2537_v54 }
 0x2fb   :  { %2909 = vst.msk [vmem:[#allocation7 + $0x4] sm:$0x3] %vm2784_vm11, %v2908_v4  ;;  %v2660_v13 = vmax.f32 %v2642_v47, 0.0  ;;  %v3193_v44 = vld [vmem:[#allocation6 + $0x11] sm:$0xf]  ;;  %2855 = vrot.lane.b32.xlu0 %v5392_v55, %s6079_s29  ;;  %v2734_v2 = vmax.f32 %v2731_v48, %v2733_v0 }
 0x2fc   :  { %2674 = vst.msk [vmem:[#allocation5 + $0x60] sm:$0xff] %vm2661_vm12, %v2657_v24  ;;  %v3080_v46 = vld [vmem:[#allocation6 + $0x12] sm:$0xf]  ;;  %v2749_v6 = vld [vmem:[#allocation5 + $0x58] ss:$2 sm:$0xf]  ;;  %v5426_v10 = vpack.c.bf16 %v3193_v44, %v3193_v44 }
 0x2fd   :  { %2716 = vst.msk [vmem:[#allocation6 + $0x19] sm:$0xf] %vm2689_vm14, %v2714_v56  ;;  %v2751_v7 = vld [vmem:[#allocation5 + $0x59] ss:$2 sm:$0xf]  ;;  %v5415_v9 = vpack.c.bf16 %v3080_v46, %v3080_v46  ;;  %v2658_v27 = vmax.f32 %v2634_v16, 0.0 }
 0x2fe   :  { %v2752_v51 = vmax.f32 %v2749_v6, %v2751_v7  ;;  %2677 = vst.msk [vmem:[#allocation5 + $0x78] sm:$0xff] %vm2661_vm12, %v2660_v13  ;;  %v2965_v41 = vrot.slane %v5403_v43, 6  ;;  %v2839_v50 = vld [vmem:[#allocation6 + $0x9] sm:$0xf]  ;;  %v2795_v60 = vld [vmem:[#allocation6 + $0x10] sm:$0xf] }
 0x2ff   :  { %v2736_v53 = vld [vmem:[#allocation5 + $0x48] ss:$2 sm:$0xf]  ;;  %v2738_v21 = vld [vmem:[#allocation5 + $0x49] ss:$2 sm:$0xf]  ;;  %3198 = vrot.lane.b32.xlu0 %v5426_v10, %s6079_s29  ;;  %v2796_v39 = vpack.c.bf16 %v2795_v60, %v2795_v60  ;;  %v5391_v62 = vpack.c.bf16 %v2839_v50, %v2839_v50 }
 0x300   :  { %v2753_v3 = vmax.f32 %v2747_v58, %v2752_v51  ;;  %v2739_v12 = vmax.f32 %v2736_v53, %v2738_v21  ;;  %2675 = vst.msk [vmem:[#allocation5 + $0x68] sm:$0xff] %vm2661_vm12, %v2658_v27  ;;  %2966 = vrot.lane.b32.xlu1 %v2965_v41, %s6079_s29  ;;  %v2951_v14 = vld [vmem:[#allocation6 + $0x8] sm:$0xf]  ;;  %v3085_v38 = vrot.slane %v5415_v9, 6  ;;  %v2979_v37 = vld [vmem:[#allocation6 + $0x20] sm:$0xf] }
 0x301   :  { %v2770_v17 = vld [vmem:[#allocation5 + $0x70] ss:$2 sm:$0xf]  ;;  %v3071_v36 = vld [vmem:[#allocation6 + $0xa] sm:$0xf]  ;;  %v5402_v42 = vpack.c.bf16 %v2951_v14, %v2951_v14  ;;  %v2844_v5 = vrot.slane %v5391_v62, 6  ;;  %v5405_v29 = vpack.c.bf16 %v2979_v37, %v2979_v37 }
 0x302   :  { %v2740_v15 = vmax.f32 %v2734_v2, %v2739_v12  ;;  %2755 = vst.msk [vmem:[#allocation6 + $0x41] sm:$0xf] %vm2689_vm14, %v2753_v3  ;;  %v2772_v8 = vld [vmem:[#allocation5 + $0x71] ss:$2 sm:$0xf]  ;;  %v5414_v31 = vpack.c.bf16 %v3071_v36, %v3071_v36  ;;  %v5950_v24 = vld [vmem:[%s7676_s5 + $0x20] sm:$0xff]  }
 0x303   :  { %2797 = vst.msk [vmem:[#allocation7 + $0x14] sm:$0x3] %vm2784_vm11, %v2796_v39  ;;  %v2757_v23 = vld [vmem:[#allocation5 + $0x60] ss:$2 sm:$0xf]  ;;  %2956 = vrot.lane.b32.xlu0 %v5402_v42, %s6079_s29  ;;  %v2773_v26 = vmax.f32 %v2770_v17, %v2772_v8  ;;  %v5949_v40 = vld [vmem:[%s7676_s5 + $0x90] sm:$0xff]   ;;  %5558 = vmatpush3.bf16.msra.mxu1 %v5950_v24 }
 0x304   :  { %v2759_v25 = vld [vmem:[#allocation5 + $0x61] ss:$2 sm:$0xf]  ;;  %2742 = vst.msk [vmem:[#allocation6 + $0x39] sm:$0xf] %vm2689_vm14, %v2740_v15  ;;  %3086 = vrot.lane.b32.xlu1 %v3085_v38, %s6079_s29  ;;  %5590 = vmatpush3.bf16.msra.mxu0 %v5949_v40  ;;  %v2984_v54 = vrot.slane %v5405_v29, 6 }
 0x305   :  { %v2775_v63 = vld [vmem:[#allocation5 + $0x78] ss:$2 sm:$0xf]  ;;  %v2777_v1 = vld [vmem:[#allocation5 + $0x79] ss:$2 sm:$0xf]  ;;  %v2760_v33 = vmax.f32 %v2757_v23, %v2759_v25 }
 0x306   :  { %v2778_v28 = vmax.f32 %v2775_v63, %v2777_v1  ;;  %v3099_v20 = vld [vmem:[#allocation6 + $0x22] sm:$0xf]  ;;  %v2910_v59 = vld [vmem:[#allocation6 + $0xa] sm:$0xf]  ;;  %v3147_v32 = vld [vmem:[#allocation6 + $0x10] sm:$0xf] }
 0x307   :  { %v2762_v19 = vld [vmem:[#allocation5 + $0x68] ss:$2 sm:$0xf]  ;;  %v2764_v30 = vld [vmem:[#allocation5 + $0x69] ss:$2 sm:$0xf]  ;;  %3076 = vrot.lane.b32.xlu0 %v5414_v31, %s6079_s29  ;;  %v5398_v4 = vpack.c.bf16 %v2910_v59, %v2910_v59  ;;  %v3148_v56 = vpack.c.bf16 %v3147_v32, %v3147_v32  ;;  %v5417_v35 = vpack.c.bf16 %v3099_v20, %v3099_v20 }
 0x308   :  { %v2779_v34 = vmax.f32 %v2773_v26, %v2778_v28  ;;  %v2765_v45 = vmax.f32 %v2762_v19, %v2764_v30  ;;  %2845 = vrot.lane.b32.xlu1 %v2844_v5, %s6079_s29  ;;  %v3212_v11 = vld [vmem:[#allocation6 + $0x21] sm:$0xf]  ;;  %v2859_v49 = vld [vmem:[#allocation6 + $0x19] sm:$0xf]  ;;  %v3030_v48 = vld [vmem:[#allocation6 + $0x11] sm:$0xf] }
 0x309   :  { %v5428_v0 = vpack.c.bf16 %v3212_v11, %v3212_v11  ;;  %v2970_v52 = vld [vmem:[#allocation6 + $0x18] sm:$0xf]  ;;  %3149 = vst.msk [vmem:[#allocation7 + $0xc] sm:$0x3] %vm2784_vm11, %v3148_v56  ;;  %v5410_v55 = vpack.c.bf16 %v3030_v48, %v3030_v48  ;;  %v2786_v43 = vld [vmem:[#allocation6 + $0x8] sm:$0xf]  ;;  %v5393_v44 = vpack.c.bf16 %v2859_v49, %v2859_v49 }
 0x30a   :  { %v2766_v47 = vmax.f32 %v2760_v33, %v2765_v45  ;;  %2781 = vst.msk [vmem:[#allocation6 + $0x51] sm:$0xf] %vm2689_vm14, %v2779_v34  ;;  %v3027_v13 = vld [vmem:[#allocation6 + $0x9] sm:$0xf]  ;;  %v5951_v16 = vld [vmem:[%s7676_s5 + $0x58] sm:$0xff]   ;;  %v2915_v57 = vrot.slane %v5398_v4, 6  ;;  %v5386_v7 = vpack.c.bf16 %v2786_v43, %v2786_v43  ;;  %v5404_v2 = vpack.c.bf16 %v2970_v52, %v2970_v52 }
 0x30b   :  { %3217 = vrot.lane.b32.xlu0 %v5428_v0, %s6079_s29  ;;  %v7234_v46 = vld [vmem:[#allocation6 + $0x19] sm:$0xf]  ;;  %v3035_v6 = vrot.slane %v5410_v55, 6  ;;  %v3104_v51 = vrot.slane %v5417_v35, 6  ;;  %v3028_v41 = vpack.c.bf16 %v3027_v13, %v3027_v13  ;;  %v3158_v53 = vld [vmem:[#allocation6 + $0x20] sm:$0xf]  ;;  %5559 = vmatprep.subr.bf16.mxu1 %v5951_v16 }
 0x30c   :  { %2768 = vst.msk [vmem:[#allocation6 + $0x49] sm:$0xf] %vm2689_vm14, %v2766_v47  ;;  %2985 = vrot.lane.b32.xlu1 %v2984_v54, %s6079_s29  ;;  %v2921_v9 = vld [vmem:[#allocation6 + $0x1a] sm:$0xf]  ;;  %v3041_v21 = vld [vmem:[#allocation6 + $0x21] sm:$0xf]  ;;  %v3159_v12 = vpack.c.bf16 %v3158_v53, %v3158_v53  ;;  %v5427_v23 = vpack.c.bf16 %v7234_v46, %v7234_v46 }
 0x30d   :  { %v5952_v58 = vld [vmem:[%s7676_s5 + $0x18] sm:$0xff]   ;;  %v5399_v50 = vpack.c.bf16 %v2921_v9, %v2921_v9  ;;  %v5953_v10 = vld [vmem:[%s7676_s5 + $0x50] sm:$0xff]   ;;  %2917 = vst.msk [vmem:[#allocation7 + $0x4] sm:$0xc] %vm2793_vm10, %v2915_v57  ;;  %3037 = vst.msk [vmem:[#allocation7 + $0x8] sm:$0xc] %vm2793_vm10, %v3035_v6  ;;  %v5411_v14 = vpack.c.bf16 %v3041_v21, %v3041_v21 }
 0x30e   :  { %v3090_v27 = vld [vmem:[#allocation6 + $0x1a] sm:$0xf]  ;;  %v2791_v3 = vrot.slane %v5386_v7, 6  ;;  %5560 = vmatpush3.bf16.msra.mxu1 %v5952_v58  ;;  %v2918_v60 = vld [vmem:[#allocation6 + $0x12] sm:$0xf]  ;;  %v5955_v62 = vld [vmem:[%s7676_s5 + $0x48] sm:$0xff]  }
 0x30f   :  { %v2798_v61 = vld [vmem:[#allocation6 + $0x18] sm:$0xf]  ;;  %v5954_v38 = vld [vmem:[%s7676_s5 + $0x10] sm:$0xff]   ;;  %3029 = vst.msk [vmem:[#allocation7 + $0x8] sm:$0x3] %vm2784_vm11, %v3028_v41  ;;  %v2926_v39 = vrot.slane %v5399_v50, 6  ;;  %v2919_v15 = vpack.c.bf16 %v2918_v60, %v2918_v60  ;;  %5561 = vmatprep.subr.bf16.mxu1 %v5953_v10  ;;  %2975 = vrot.lane.b32.xlu0 %v5404_v2, %s6079_s29  ;;  %v5416_v28 = vpack.c.bf16 %v3090_v27, %v3090_v27 }
 0x310   :  { %3105 = vrot.lane.b32.xlu1 %v3104_v51, %s6079_s29  ;;  %v3038_v17 = vld [vmem:[#allocation6 + $0x19] sm:$0xf]  ;;  %v2864_v18 = vrot.slane %v5393_v44, 6  ;;  %2794 = vst.msk [vmem:[#allocation7] sm:$0xc] %vm2793_vm10, %v2791_v3  ;;  %v5387_v8 = vpack.c.bf16 %v2798_v61, %v2798_v61  ;;  %v3046_v63 = vrot.slane %v5411_v14, 6 }
 0x311   :  { %v3150_v36 = vld [vmem:[#allocation6 + $0x18] sm:$0xf]  ;;  %3160 = vst.msk [vmem:[#allocation7 + $0x20] sm:$0x3] %vm2784_vm11, %v3159_v12  ;;  %v3039_v42 = vpack.c.bf16 %v3038_v17, %v3038_v17  ;;  %v2998_v25 = vld [vmem:[#allocation6 + $0x40] sm:$0xf] }
 0x312   :  { %v5422_v37 = vpack.c.bf16 %v3150_v36, %v3150_v36  ;;  %2928 = vst.msk [vmem:[#allocation7 + $0x18] sm:$0xc] %vm2793_vm10, %v2926_v39  ;;  %v2818_v1 = vld [vmem:[#allocation6 + $0x40] sm:$0xf]  ;;  %v5957_v26 = vld [vmem:[%s7676_s5 + $0xc8] sm:$0xff]   ;;  %5562 = vmatpush3.bf16.msra.mxu1 %v5954_v38  ;;  %v5407_v30 = vpack.c.bf16 %v2998_v25, %v2998_v25  ;;  %v2803_v34 = vrot.slane %v5387_v8, 6 }
 0x313   :  { %2920 = vst.msk [vmem:[#allocation7 + $0x18] sm:$0x3] %vm2784_vm11, %v2919_v15  ;;  %3040 = vst.msk [vmem:[#allocation7 + $0x1c] sm:$0x3] %vm2784_vm11, %v3039_v42  ;;  %v5956_v5 = vld [vmem:[%s7676_s5 + $0x8] sm:$0xff]   ;;  %v2819_v29 = vpack.c.bf16 %v2818_v1, %v2818_v1  ;;  %5563 = vmatprep.subr.bf16.mxu1 %v5955_v62  ;;  %v5958_v40 = vld [vmem:[%s7676_s5 + $0x40] sm:$0xff]   ;;  %3095 = vrot.lane.b32.xlu0 %v5416_v28, %s6079_s29 }
 0x314   :  { %2865 = vrot.lane.b32.xlu1 %v2864_v18, %s6079_s29  ;;  %v2888_v20 = vld [vmem:[#allocation6 + $0x41] sm:$0xf]  ;;  %3048 = vst.msk [vmem:[#allocation7 + $0x1c] sm:$0xc] %vm2793_vm10, %v3046_v63  ;;  %v5959_v19 = vld [vmem:[%s7676_s5 + $0x88] sm:$0xff]   ;;  %v3155_v45 = vrot.slane %v5422_v37, 6  ;;  %5591 = vmatprep.subr.bf16.mxu0 %v5957_v26 }
 0x315   :  { %v7275_v31 = vld [vmem:[#allocation6 + $0x41] sm:$0xf]  ;;  %2820 = vst.msk [vmem:[#allocation7 + $0x3c] sm:$0x3] %vm2784_vm11, %v2819_v29  ;;  %v2932_v11 = vld [vmem:[#allocation6 + $0x3a] sm:$0xf]  ;;  %5592 = vmatpush3.bf16.msra.mxu0 %v5959_v19  ;;  %v5396_v54 = vpack.c.bf16 %v2888_v20, %v2888_v20 }
 0x316   :  { %v7277_v33 = vld [vmem:[#allocation6 + $0x42] sm:$0xf]  ;;  %v3207_v32 = vrot.slane %v5427_v23, 6  ;;  %v5400_v4 = vpack.c.bf16 %v2932_v11, %v2932_v11  ;;  %v7286_v35 = vld [vmem:[#allocation6 + $0x39] sm:$0xf]  ;;  %5564 = vmatpush3.bf16.msra.mxu1 %v5956_v5  ;;  %v3003_v46 = vrot.slane %v5407_v30, 6  ;;  %v5430_v51 = vpack.c.bf16 %v7275_v31, %v7275_v31 }
 0x317   :  { %v5964_v59 = vld [vmem:[%s7676_s5 + $0xc0] sm:$0xff]   ;;  %2805 = vst.msk [vmem:[#allocation7 + $0x14] sm:$0xc] %vm2793_vm10, %v2803_v34  ;;  %3157 = vst.msk [vmem:[#allocation7 + $0xc] sm:$0xc] %vm2793_vm10, %v3155_v45  ;;  %5565 = vmatprep.subr.bf16.mxu1 %v5958_v40  ;;  %v7297_v13 = vld [vmem:[%s7676_s5 + $0x138] sm:$0xff]   ;;  %2893 = vrot.lane.b32.xlu0 %v5396_v54, %s6079_s29  ;;  %v5419_v27 = vpack.c.bf16 %v7277_v33, %v7277_v33  ;;  %v5395_v39 = vpack.c.bf16 %v7286_v35, %v7286_v35 }
 0x318   :  { %v3170_v56 = vld [vmem:[#allocation6 + $0x40] sm:$0xf]  ;;  %5593 = vmatprep.subr.bf16.mxu0 %v5964_v59  ;;  %v2929_v52 = vld [vmem:[#allocation6 + $0x32] sm:$0xf]  ;;  %3208 = vrot.lane.b32.xlu1 %v3207_v32, %s6079_s29  ;;  %v2937_v55 = vrot.slane %v5400_v4, 6 }
 0x319   :  { %v3052_v24 = vld [vmem:[#allocation6 + $0x41] sm:$0xf]  ;;  %v3171_v48 = vpack.c.bf16 %v3170_v56, %v3170_v56  ;;  %v2930_v43 = vpack.c.bf16 %v2929_v52, %v2929_v52  ;;  %v2810_v16 = vld [vmem:[#allocation6 + $0x38] sm:$0xf]  ;;  %v2943_v9 = vld [vmem:[#allocation6 + $0x4a] sm:$0xf] }
 0x31a   :  { %v5965_v47 = vld [vmem:[%s7676_s5 + $0x80] sm:$0xff]   ;;  %v5412_v0 = vpack.c.bf16 %v3052_v24, %v3052_v24  ;;  %v3049_v44 = vld [vmem:[#allocation6 + $0x39] sm:$0xf]  ;;  %v5388_v6 = vpack.c.bf16 %v2810_v16, %v2810_v16  ;;  %2939 = vst.msk [vmem:[#allocation7 + $0x2c] sm:$0xc] %vm2793_vm10, %v2937_v55  ;;  %v5401_v50 = vpack.c.bf16 %v2943_v9, %v2943_v9  ;;  %v3123_v1 = vrot.slane %v5419_v27, 6 }
 0x31b   :  { %v5960_v49 = vld [vmem:[%s7676_s5] sm:$0xff]   ;;  %3172 = vst.msk [vmem:[#allocation7 + $0x34] sm:$0x3] %vm2784_vm11, %v3171_v48  ;;  %v3050_v7 = vpack.c.bf16 %v3049_v44, %v3049_v44  ;;  %v2989_v41 = vld [vmem:[#allocation6 + $0x38] sm:$0xf]  ;;  %5594 = vmatpush3.bf16.msra.mxu0 %v5965_v47  ;;  %3236 = vrot.lane.b32.xlu0 %v5430_v51, %s6079_s29  ;;  %v2883_v11 = vrot.slane %v5395_v39, 6 }
 0x31c   :  { %v3057_v57 = vrot.slane %v5412_v0, 6  ;;  %v2940_v58 = vld [vmem:[#allocation6 + $0x42] sm:$0xf]  ;;  %2931 = vst.msk [vmem:[#allocation7 + $0x2c] sm:$0x3] %vm2784_vm11, %v2930_v43  ;;  %5566 = vmatpush3.bf16.msra.mxu1 %v5960_v49  ;;  %v2815_v3 = vrot.slane %v5388_v6, 6  ;;  %3004 = vrot.lane.b32.xlu1 %v3003_v46, %s6079_s29  ;;  %v5406_v40 = vpack.c.bf16 %v2989_v41, %v2989_v41 }
 0x31d   :  { %v2941_v53 = vpack.c.bf16 %v2940_v58, %v2940_v58  ;;  %v3063_v21 = vld [vmem:[#allocation6 + $0x51] sm:$0xf]  ;;  %v3060_v10 = vld [vmem:[#allocation6 + $0x49] sm:$0xf]  ;;  %3051 = vst.msk [vmem:[#allocation7 + $0x30] sm:$0x3] %vm2784_vm11, %v3050_v7  ;;  %5808 = vmatprep.subr.bf16.mxu1 %v7297_v13 }
 0x31e   :  { %v2821_v2 = vld [vmem:[#allocation6 + $0x48] sm:$0xf]  ;;  %3059 = vst.msk [vmem:[#allocation7 + $0x30] sm:$0xc] %vm2793_vm10, %v3057_v57  ;;  %v5413_v12 = vpack.c.bf16 %v3063_v21, %v3063_v21  ;;  %v3061_v14 = vpack.c.bf16 %v3060_v10, %v3060_v10  ;;  %v3181_v61 = vld [vmem:[#allocation6 + $0x50] sm:$0xf] }
 0x31f   :  { %v5389_v60 = vpack.c.bf16 %v2821_v2, %v2821_v2  ;;  %v3173_v38 = vld [vmem:[#allocation6 + $0x48] sm:$0xf]  ;;  %v2948_v15 = vrot.slane %v5401_v50, 6  ;;  %2942 = vst.msk [vmem:[#allocation7 + $0x40] sm:$0x3] %vm2784_vm11, %v2941_v53  ;;  %v3182_v17 = vpack.c.bf16 %v3181_v61, %v3181_v61  ;;  %2994 = vrot.lane.b32.xlu0 %v5406_v40, %s6079_s29 }
 0x320   :  { %v5424_v62 = vpack.c.bf16 %v3173_v38, %v3173_v38  ;;  %v3269_v36 = vld [vmem:[#allocation6 + $0x12] sm:$0xf]  ;;  %v3272_v18 = vld [vmem:[#allocation6 + $0x1a] sm:$0xf]  ;;  %2817 = vst.msk [vmem:[#allocation7 + $0x28] sm:$0xc] %vm2793_vm10, %v2815_v3  ;;  %3124 = vrot.lane.b32.xlu1 %v3123_v1, %s6079_s29 }
 0x321   :  { %v3068_v8 = vrot.slane %v5413_v12, 6  ;;  %3062 = vst.msk [vmem:[#allocation7 + $0x44] sm:$0x3] %vm2784_vm11, %v3061_v14  ;;  %v2826_v42 = vrot.slane %v5389_v60, 6  ;;  %v3270_v37 = vpack.c.bf16 %v3269_v36, %v3269_v36  ;;  %v5434_v23 = vpack.c.bf16 %v3272_v18, %v3272_v18  ;;  %v3280_v25 = vld [vmem:[#allocation6 + $0x22] sm:$0xf] }
 0x322   :  { %v3291_v63 = vld [vmem:[#allocation6 + $0x42] sm:$0xf]  ;;  %2950 = vst.msk [vmem:[#allocation7 + $0x40] sm:$0xc] %vm2793_vm10, %v2948_v15  ;;  %v3178_v26 = vrot.slane %v5424_v62, 6  ;;  %v3281_v28 = vpack.c.bf16 %v3280_v25, %v3280_v25  ;;  %v5971_v1 = vld [vmem:[%s7676_s5 + $0x128] sm:$0xff]  }
 0x323   :  { %3183 = vst.msk [vmem:[#allocation7 + $0x48] sm:$0x3] %vm2784_vm11, %v3182_v17  ;;  %v3292_v5 = vpack.c.bf16 %v3291_v63, %v3291_v63  ;;  %v3294_v29 = vld [vmem:[#allocation6 + $0x4a] sm:$0xf]  ;;  %v3302_v20 = vld [vmem:[#allocation6 + $0x52] sm:$0xf] }
 0x324   :  { %v3017_v19 = vld [vmem:[#allocation6 + $0x50] sm:$0xf]  ;;  %3070 = vst.msk [vmem:[#allocation7 + $0x44] sm:$0xc] %vm2793_vm10, %v3068_v8  ;;  %2828 = vst.msk [vmem:[#allocation7 + $0x3c] sm:$0xc] %vm2793_vm10, %v2826_v42  ;;  %v5436_v31 = vpack.c.bf16 %v3294_v29, %v3294_v29  ;;  %v3303_v33 = vpack.c.bf16 %v3302_v20, %v3302_v20  ;;  %2884 = vrot.lane.b32.xlu1 %v2883_v11, %s6079_s29 }
 0x325   :  { %3271 = vst.msk [vmem:[#allocation7 + $0x10] sm:$0x3] %vm2784_vm11, %v3270_v37  ;;  %v3277_v30 = vrot.slane %v5434_v23, 6  ;;  %v3109_v34 = vld [vmem:[#allocation6 + $0x3a] sm:$0xf]  ;;  %v5409_v59 = vpack.c.bf16 %v3017_v19, %v3017_v19  ;;  %v5970_v42 = vld [vmem:[%s7676_s5 + $0x130] sm:$0xff]  }
 0x326   :  { %3180 = vst.msk [vmem:[#allocation7 + $0x34] sm:$0xc] %vm2793_vm10, %v3178_v26  ;;  %v3299_v45 = vrot.slane %v5436_v31, 6  ;;  %v5418_v32 = vpack.c.bf16 %v3109_v34, %v3109_v34  ;;  %v3137_v4 = vld [vmem:[#allocation6 + $0x52] sm:$0xf]  ;;  %v5973_v20 = vld [vmem:[%s7676_s5 + $0x118] sm:$0xff]  }
 0x327   :  { %3282 = vst.msk [vmem:[#allocation7 + $0x24] sm:$0x3] %vm2784_vm11, %v3281_v28  ;;  %3293 = vst.msk [vmem:[#allocation7 + $0x38] sm:$0x3] %vm2784_vm11, %v3292_v5  ;;  %v3008_v56 = vld [vmem:[#allocation6 + $0x48] sm:$0xf]  ;;  %v5421_v47 = vpack.c.bf16 %v3137_v4, %v3137_v4 }
 0x328   :  { %3279 = vst.msk [vmem:[#allocation7 + $0x10] sm:$0xc] %vm2793_vm10, %v3277_v30  ;;  %3301 = vst.msk [vmem:[#allocation7 + $0x38] sm:$0xc] %vm2793_vm10, %v3299_v45  ;;  %3114 = vrot.lane.b32.xlu0 %v5418_v32, %s6079_s29  ;;  %v3022_v24 = vrot.slane %v5409_v59, 6  ;;  %v5408_v54 = vpack.c.bf16 %v3008_v56, %v3008_v56  ;;  %v5974_v30 = vld [vmem:[%s7676_s5 + $0x110] sm:$0xff]  }
 0x329   :  { %3304 = vst.msk [vmem:[#allocation7 + $0x4c] sm:$0x3] %vm2784_vm11, %v3303_v33  ;;  %v2897_v35 = vld [vmem:[#allocation6 + $0x49] sm:$0xf]  ;;  %v3185_v49 = vld [vmem:[#allocation6 + $0x58] sm:$0xf] }
 0x32a   :  { %3023 = vrot.lane.b32.xlu1 %v3022_v24, %s6079_s29  ;;  %v3128_v48 = vld [vmem:[#allocation6 + $0x4a] sm:$0xf]  ;;  %v5425_v0 = vpack.c.bf16 %v3185_v49, %v3185_v49  ;;  %v3142_v52 = vrot.slane %v5421_v47, 6  ;;  %v5397_v55 = vpack.c.bf16 %v2897_v35, %v2897_v35  ;;  %v3250_v46 = vld [vmem:[#allocation6 + $0x51] sm:$0xf]  ;;  %v5980_v11 = vld [vmem:[%s7676_s5 + $0x100] sm:$0xff]  }
 0x32b   :  { %v5420_v16 = vpack.c.bf16 %v3128_v48, %v3128_v48  ;;  %v3240_v44 = vld [vmem:[#allocation6 + $0x49] sm:$0xf]  ;;  %v3259_v57 = vld [vmem:[#allocation6 + $0x59] sm:$0xf]  ;;  %v5432_v9 = vpack.c.bf16 %v3250_v46, %v3250_v46 }
 0x32c   :  { %3013 = vrot.lane.b32.xlu0 %v5408_v54, %s6079_s29  ;;  %v3190_v43 = vrot.slane %v5425_v0, 6  ;;  %v2902_v6 = vrot.slane %v5397_v55, 6  ;;  %v5431_v7 = vpack.c.bf16 %v3240_v44, %v3240_v44  ;;  %v5433_v58 = vpack.c.bf16 %v3259_v57, %v3259_v57  ;;  %v5978_v34 = vld [vmem:[%s7676_s5 + $0x108] sm:$0xff]   ;;  %v5985_v35 = vld [vmem:[%s7678_s7 + $0x78] sm:$0xff]   ;;  %v5990_v55 = vld [vmem:[%s7678_s7 + $0x30] sm:$0xff]  }
 0x32d   :  { %v5986_v49 = vld [vmem:[%s7678_s7 + $0x38] sm:$0xff]   ;;  %5617 = vmatprep.subr.bf16.mxu0 %v5985_v35 }
 0x32e   :  { %3143 = vrot.lane.b32.xlu1 %v3142_v52, %s6079_s29  ;;  %3192 = vst.msk [vmem:[#allocation7 + $0x48] sm:$0xc] %vm2793_vm10, %v3190_v43  ;;  %v3245_v51 = vrot.slane %v5431_v7, 6  ;;  %v3264_v27 = vrot.slane %v5433_v58, 6  ;;  %v5987_v48 = vld [vmem:[%s7678_s7 + $0xf8] sm:$0xff]   ;;  %v5989_v52 = vld [vmem:[%s7678_s7 + $0x70] sm:$0xff]  }
 0x32f   :  { %v5979_v56 = vld [vmem:[#allocation7 + $0x10] ss:$20 sps:$4 sm:$0xff]   ;;  %v5988_v0 = vld [vmem:[%s7678_s7 + $0xb8] sm:$0xff]  }
 0x330   :  { %3133 = vrot.lane.b32.xlu0 %v5420_v16, %s6079_s29  ;;  %v5984_v54 = vld [vmem:[#allocation7 + $0x38] ss:$20 sps:$4 sm:$0xff]  }
 0x332   :  { %2903 = vrot.lane.b32.xlu1 %v2902_v6, %s6079_s29 }
 0x334   :  { %3255 = vrot.lane.b32.xlu0 %v5432_v9, %s6079_s29 }
 0x336   :  { %3246 = vrot.lane.b32.xlu1 %v3245_v51, %s6079_s29 }
 0x33a   :  { %3265 = vrot.lane.b32.xlu1 %v3264_v27, %s6079_s29  ;;  %v5168_v27 = vld [vmem:[%s7677_s6] ss:$0 sm:$0xff] }
 0x36d   :  { %v2856_v41 = vpop.permute.xlu0 %2855 }
 0x36e   :  { %2858 = vst.msk [vmem:[#allocation7 + $0x14] sm:$0x3] %vm2837_vm13, %v2856_v41 }
 0x371   :  { %v3199_v53 = vpop.permute.xlu0 %3198 }
 0x372   :  { %v2967_v50 = vpop.permute.xlu1 %2966  ;;  %3201 = vst.msk [vmem:[#allocation7 + $0xc] sm:$0x3] %vm2837_vm13, %v3199_v53 }
 0x373   :  { %2969 = vst.msk [vmem:[#allocation7 + $0x4] sm:$0xc] %vm2848_vm15, %v2967_v50 }
 0x375   :  { %v2957_v10 = vpop.permute.xlu0 %2956 }
 0x376   :  { %v3087_v21 = vpop.permute.xlu1 %3086  ;;  %2959 = vst.msk [vmem:[#allocation7 + $0x4] sm:$0x3] %vm2837_vm13, %v2957_v10 }
 0x377   :  { %3089 = vst.msk [vmem:[#allocation7 + $0x8] sm:$0xc] %vm2848_vm15, %v3087_v21 }
 0x379   :  { %v3077_v3 = vpop.permute.xlu0 %3076 }
 0x37a   :  { %v2846_v2 = vpop.permute.xlu1 %2845  ;;  %3079 = vst.msk [vmem:[#allocation7 + $0x8] sm:$0x3] %vm2837_vm13, %v3077_v3 }
 0x37b   :  { %2849 = vst.msk [vmem:[#allocation7] sm:$0xc] %vm2848_vm15, %v2846_v2 }
 0x37d   :  { %v3218_v14 = vpop.permute.xlu0 %3217 }
 0x37e   :  { %v2986_v12 = vpop.permute.xlu1 %2985  ;;  %3220 = vst.msk [vmem:[#allocation7 + $0x20] sm:$0x3] %vm2837_vm13, %v3218_v14 }
 0x37f   :  { %2988 = vst.msk [vmem:[#allocation7 + $0x18] sm:$0xc] %vm2848_vm15, %v2986_v12 }
 0x381   :  { %v2976_v61 = vpop.permute.xlu0 %2975 }
 0x382   :  { %v3106_v60 = vpop.permute.xlu1 %3105  ;;  %2978 = vst.msk [vmem:[#allocation7 + $0x18] sm:$0x3] %vm2837_vm13, %v2976_v61 }
 0x383   :  { %3108 = vst.msk [vmem:[#allocation7 + $0x1c] sm:$0xc] %vm2848_vm15, %v3106_v60 }
 0x385   :  { %v3096_v39 = vpop.permute.xlu0 %3095 }
 0x386   :  { %v2866_v38 = vpop.permute.xlu1 %2865  ;;  %3098 = vst.msk [vmem:[#allocation7 + $0x1c] sm:$0x3] %vm2837_vm13, %v3096_v39 }
 0x387   :  { %2868 = vst.msk [vmem:[#allocation7 + $0x14] sm:$0xc] %vm2848_vm15, %v2866_v38 }
 0x389   :  { %v2894_v17 = vpop.permute.xlu0 %2893  ;;  %v5963_v18 = vld [vmem:[#allocation7 + $0x4] ss:$20 sps:$4 sm:$0xff]  }
 0x38a   :  { %v3209_v15 = vpop.permute.xlu1 %3208  ;;  %2896 = vst.msk [vmem:[#allocation7 + $0x3c] sm:$0x3] %vm2837_vm13, %v2894_v17  ;;  %3736 = vmatprep.mubr.bf16.mxu1 %v5963_v18 }
 0x38b   :  { %3211 = vst.msk [vmem:[#allocation7 + $0xc] sm:$0xc] %vm2848_vm15, %v3209_v15 }
 0x38d   :  { %v3237_v8 = vpop.permute.xlu0 %3236  ;;  %v5966_v23 = vld [vmem:[#allocation7 + $0x8] ss:$20 sps:$4 sm:$0xff]  }
 0x38e   :  { %v3005_v62 = vpop.permute.xlu1 %3004  ;;  %v5961_v36 = vld [vmem:[#allocation7] ss:$20 sps:$4 sm:$0xff]   ;;  %3239 = vst.msk [vmem:[#allocation7 + $0x34] sm:$0x3] %vm2837_vm13, %v3237_v8 }
 0x38f   :  { %3007 = vst.msk [vmem:[#allocation7 + $0x2c] sm:$0xc] %vm2848_vm15, %v3005_v62  ;;  %3737 = vmatmul.mubr.bf16.vlgmr.msra.gmra.mxu1 %v5961_v36 }
 0x390   :  { %5809 = vmatpush3.bf16.msra.mxu1 %v7297_v13  ;;  %v5972_v13 = vld [vmem:[%s7676_s5 + $0x120] sm:$0xff]  }
 0x391   :  { %v2995_v63 = vpop.permute.xlu0 %2994  ;;  %5810 = vmatprep.subr.bf16.mxu1 %v5970_v42 }
 0x392   :  { %v3125_v37 = vpop.permute.xlu1 %3124  ;;  %v5968_v25 = vld [vmem:[#allocation7 + $0xc] ss:$20 sps:$4 sm:$0xff]   ;;  %2997 = vst.msk [vmem:[#allocation7 + $0x2c] sm:$0x3] %vm2837_vm13, %v2995_v63 }
 0x393   :  { %3127 = vst.msk [vmem:[#allocation7 + $0x30] sm:$0xc] %vm2848_vm15, %v3125_v37  ;;  %3785 = vmatprep.mubr.bf16.mxu0 %v5968_v25 }
 0x394   :  { %3786 = vmatmul.mubr.bf16.vlgmr.msra.gmra.mxu0 %v5966_v23  ;;  %5811 = vmatpush3.bf16.msra.mxu1 %v5970_v42 }
 0x395   :  { %5812 = vmatprep.subr.bf16.mxu1 %v5971_v1  ;;  %5618 = vmatpush3.bf16.msra.mxu0 %v5986_v49  ;;  %v5998_v49 = vld [vmem:[%s7678_s7 + $0x20] sm:$0xff]  }
 0x396   :  { %v2885_v26 = vpop.permute.xlu1 %2884  ;;  %5619 = vmatprep.subr.bf16.mxu0 %v5989_v52 }
 0x397   :  { %2887 = vst.msk [vmem:[#allocation7 + $0x28] sm:$0xc] %vm2848_vm15, %v2885_v26 }
 0x398   :  { %5813 = vmatpush3.bf16.msra.mxu1 %v5971_v1 }
 0x399   :  { %5814 = vmatprep.subr.bf16.mxu1 %v5972_v13  ;;  %5620 = vmatpush3.bf16.msra.mxu0 %v5990_v55 }
 0x39a   :  { %v3115_v28 = vpop.permute.xlu0 %3114 }
 0x39b   :  { %3117 = vst.msk [vmem:[#allocation7 + $0x30] sm:$0x3] %vm2837_vm13, %v3115_v28 }
 0x39c   :  { %v3024_v5 = vpop.permute.xlu1 %3023  ;;  %5815 = vmatpush3.bf16.msra.mxu1 %v5972_v13 }
 0x39d   :  { %3026 = vst.msk [vmem:[#allocation7 + $0x40] sm:$0xc] %vm2848_vm15, %v3024_v5  ;;  %5816 = vmatprep.subr.bf16.mxu1 %v5973_v20 }
 0x39e   :  { %v3014_v29 = vpop.permute.xlu0 %3013 }
 0x39f   :  { %3016 = vst.msk [vmem:[#allocation7 + $0x40] sm:$0x3] %vm2837_vm13, %v3014_v29  ;;  %v3870_v29 = vlaneseq }
 0x3a0   :  { %v3144_v40 = vpop.permute.xlu1 %3143  ;;  %5817 = vmatpush3.bf16.msra.mxu1 %v5973_v20 }
 0x3a1   :  { %3146 = vst.msk [vmem:[#allocation7 + $0x44] sm:$0xc] %vm2848_vm15, %v3144_v40  ;;  %5818 = vmatprep.subr.bf16.mxu1 %v5974_v30 }
 0x3a2   :  { %v3134_v19 = vpop.permute.xlu0 %3133 }
 0x3a3   :  { %3136 = vst.msk [vmem:[#allocation7 + $0x44] sm:$0x3] %vm2837_vm13, %v3134_v19 }
 0x3a4   :  { %v2904_v31 = vpop.permute.xlu1 %2903  ;;  %5819 = vmatpush3.bf16.msra.mxu1 %v5974_v30  ;;  %v6082_v30 = vmov 1966171168  }
 0x3a5   :  { %2906 = vst.msk [vmem:[#allocation7 + $0x3c] sm:$0xc] %vm2848_vm15, %v2904_v31  ;;  %5820 = vmatprep.subr.bf16.mxu1 %v5978_v34  ;;  %v3868_v31 = vunpack.c.l.s4 %v6082_v30  ;;  %v6004_v30 = vld [vmem:[%s7678_s7 + $0x98] sm:$0xff]  }
 0x3a6   :  { %v3256_v33 = vpop.permute.xlu0 %3255  ;;  %v5975_v32 = vld [vmem:[#allocation7 + $0x2c] ss:$20 sps:$4 sm:$0xff]  }
 0x3a7   :  { %3258 = vst.msk [vmem:[#allocation7 + $0x48] sm:$0x3] %vm2837_vm13, %v3256_v33  ;;  %3744 = vmatprep.mubr.bf16.mxu1 %v5975_v32  ;;  %v3869_v32 = vunpack.c.0.s8 %v3868_v31  ;;  %v6006_v31 = vld [vmem:[%s7678_s7 + $0x10] sm:$0xff]  }
 0x3a8   :  { %v3247_v45 = vpop.permute.xlu1 %3246  ;;  %5821 = vmatpush3.bf16.msra.mxu1 %v5978_v34  ;;  %v5991_v34 = vld [vmem:[%s7678_s7 + $0xf0] sm:$0xff]  }
 0x3a9   :  { %3249 = vst.msk [vmem:[#allocation7 + $0x34] sm:$0xc] %vm2848_vm15, %v3247_v45  ;;  %5822 = vmatprep.subr.bf16.mxu1 %v5980_v11  ;;  %v5992_v45 = vld [vmem:[%s7678_s7 + $0xb0] sm:$0xff]  }
 0x3aa   :  { %v5983_v47 = vld [vmem:[#allocation7 + $0x30] ss:$20 sps:$4 sm:$0xff]  }
 0x3ac   :  { %v3266_v59 = vpop.permute.xlu1 %3265  ;;  %v5977_v4 = vld [vmem:[#allocation7 + $0x28] ss:$20 sps:$4 sm:$0xff]   ;;  %5823 = vmatpush3.bf16.msra.mxu1 %v5980_v11 }
 0x3ad   :  { %3268 = vst.msk [vmem:[#allocation7 + $0x48] sm:$0xc] %vm2848_vm15, %v3266_v59  ;;  %3745 = vmatmul.mubr.bf16.gmra.mxu1 %v5977_v4  ;;  %5639 = vmatprep.subr.bf16.mxu1 %v5987_v48  ;;  %v5993_v11 = vld [vmem:[%s7678_s7 + $0x68] sm:$0xff]   ;;  %v3871_v4 = vshrl.u32 %v3870_v29, 7 }
 0x3ae   :  { %5824 = vmatprep.mubr.bf16.mxu1 %v5979_v56  ;;  %v5994_v56 = vld [vmem:[%s7678_s7 + $0x28] sm:$0xff]   ;;  %5621 = vmatprep.subr.bf16.mxu0 %v5993_v11 }
 0x3af   :  { %5622 = vmatpush3.bf16.msra.mxu0 %v5994_v56  ;;  %v7438_v35 = vsub.s32 %v3869_v32, %v3871_v4  ;;  %v6009_v32 = vld [vmem:[%s7678_s7 + $0x48] sm:$0xff]   ;;  %v6008_v4 = vld [vmem:[%s7678_s7 + $0x90] sm:$0xff]  }
 0x3b0   :  { %v6010_v56 = vld [vmem:[%s7678_s7 + $0x8] sm:$0xff]  }
 0x3b4   :  { %v5981_v24 = vld [vmem:[#allocation7 + $0x34] ss:$20 sps:$4 sm:$0xff]  }
 0x3b5   :  { %3793 = vmatprep.mubr.bf16.mxu0 %v5981_v24  ;;  %5825 = vmatmul.mubr.bf16.vlgmr.msra.gmra.mxu1 %v5984_v54  ;;  %v5995_v24 = vld [vmem:[%s7678_s7 + $0xe8] sm:$0xff]   ;;  %v5997_v54 = vld [vmem:[%s7678_s7 + $0x60] sm:$0xff]  }
 0x3b6   :  { %3794 = vmatmul.mubr.bf16.gmra.mxu0 %v5983_v47  ;;  %5640 = vmatpush3.bf16.msra.mxu1 %v5988_v0  ;;  %v5996_v47 = vld [vmem:[%s7678_s7 + $0xa8] sm:$0xff]  }
 0x3b7   :  { %5641 = vmatprep.subr.bf16.mxu1 %v5991_v34  ;;  %5623 = vmatprep.subr.bf16.mxu0 %v5997_v54 }
 0x3b8   :  { %5624 = vmatpush3.bf16.msra.mxu0 %v5998_v49  ;;  %v6013_v49 = vld [vmem:[%s7678_s7 + $0x40] sm:$0xff]  }
 0x3ba   :  { %5642 = vmatpush3.bf16.msra.mxu1 %v5992_v45 }
 0x3bb   :  { %5643 = vmatprep.subr.bf16.mxu1 %v5995_v24  ;;  %v6011_v24 = vld [vmem:[%s7678_s7 + $0xc8] sm:$0xff]  }
 0x3be   :  { %5644 = vmatpush3.bf16.msra.mxu1 %v5996_v47 }
 0x44f   :  { %v5567_v43 = vpop.f32.mrf.mxu1 }
 0x451   :  { %v5568_v16 = vpop.f32.mrf.mxu1 }
 0x452   :  { %v5569_v51 = vadd.f32 %v5568_v16, %v5567_v43 }
 0x453   :  { %v5570_v44 = vpop.f32.mrf.mxu1 }
 0x454   :  { %v5595_v46 = vpop.f32.mrf.mxu0  ;;  %v3739_v2 = vadd.f32 %v5569_v51, %v5168_v27 }
 0x455   :  { %v5571_v57 = vpop.f32.mrf.mxu1 }
 0x456   :  { %v5596_v6 = vpop.f32.mrf.mxu0  ;;  %v5572_v53 = vadd.f32 %v5571_v57, %v5570_v44 }
 0x457   :  { %v5597_v50 = vadd.f32 %v5596_v6, %v5595_v46 }
 0x458   :  { %v5598_v9 = vpop.f32.mrf.mxu0  ;;  %v3742_v38 = vadd.f32 %v5572_v53, %v5168_v27 }
 0x459   :  { %v3788_v61 = vadd.f32 %v5597_v50, %v3739_v2 }
 0x45a   :  { %v5599_v21 = vpop.f32.mrf.mxu0 }
 0x45b   :  { %v5600_v60 = vadd.f32 %v5599_v21, %v5598_v9 }
 0x45d   :  { %v3791_v25 = vadd.f32 %v5600_v60, %v3742_v38 }
 0x46d   :  { %v5573_v7 = vpop.f32.mrf.mxu1 }
 0x46f   :  { %v5574_v58 = vpop.f32.mrf.mxu1 }
 0x470   :  { %v5575_v3 = vadd.f32 %v5574_v58, %v5573_v7 }
 0x471   :  { %v5576_v41 = vpop.f32.mrf.mxu1 }
 0x472   :  { %v3747_v17 = vadd.f32 %v5575_v3, %v5168_v27 }
 0x473   :  { %v5577_v10 = vpop.f32.mrf.mxu1 }
 0x474   :  { %v5578_v62 = vadd.f32 %v5577_v10, %v5576_v41 }
 0x475   :  { %v5826_v14 = vpop.f32.mrf.mxu1 }
 0x476   :  { %v5601_v12 = vpop.f32.mrf.mxu0  ;;  %v3750_v26 = vadd.f32 %v5578_v62, %v5168_v27 }
 0x477   :  { %v3836_v15 = vpop.f32.mrf.mxu1 }
 0x478   :  { %v5602_v39 = vpop.f32.mrf.mxu0  ;;  %v3837_v18 = vadd.f32 %v3836_v15, %v3788_v61 }
 0x479   :  { %v5603_v36 = vadd.f32 %v5602_v39, %v5601_v12  ;;  %v5827_v42 = vpop.f32.mrf.mxu1 }
 0x47a   :  { %v5604_v8 = vpop.f32.mrf.mxu0  ;;  %v3851_v23 = vmax.f32 %v3837_v18, 0.0  ;;  %v5999_v18 = vld [vmem:[%s7678_s7 + $0xe0] sm:$0xff]  }
 0x47b   :  { %v3796_v37 = vadd.f32 %v5603_v36, %v3747_v17  ;;  %v3839_v1 = vpop.f32.mrf.mxu1  ;;  %5645 = vmatprep.subr.bf16.mxu1 %v5999_v18  ;;  %v6025_v18 = vld [vmem:[%s7678_s7 + $0x1b0] sm:$0xff]  }
 0x47c   :  { %v5605_v63 = vpop.f32.mrf.mxu0  ;;  %3855 = vst.msk [vmem:[#allocation8] sm:$0xff] %vm2661_vm12, %v3851_v23  ;;  %v3840_v5 = vadd.f32 %v3839_v1, %v3791_v25  ;;  %v6002_v1 = vld [vmem:[%s7678_s7 + $0x18] sm:$0xff]  }
 0x47d   :  { %v3845_v28 = vadd.f32 %v5826_v14, %v3796_v37  ;;  %v5606_v13 = vadd.f32 %v5605_v63, %v5604_v8  ;;  %v6000_v8 = vld [vmem:[%s7678_s7 + $0xa0] sm:$0xff]   ;;  %v6001_v63 = vld [vmem:[%s7678_s7 + $0x58] sm:$0xff]  }
 0x47e   :  { %v3852_v19 = vmax.f32 %v3840_v5, 0.0  ;;  %5646 = vmatpush3.bf16.msra.mxu1 %v6000_v8  ;;  %5625 = vmatprep.subr.bf16.mxu0 %v6001_v63  ;;  %v6028_v8 = vld [vmem:[%s7678_s7 + $0x1e8] sm:$0xff]   ;;  %v6031_v63 = vld [vmem:[%s7678_s7 + $0x120] sm:$0xff]  }
 0x47f   :  { %v3853_v20 = vmax.f32 %v3845_v28, 0.0  ;;  %v3799_v40 = vadd.f32 %v5606_v13, %v3750_v26  ;;  %5626 = vmatpush3.bf16.msra.mxu0 %v6002_v1  ;;  %v6034_v1 = vld [vmem:[%s7678_s7 + $0x158] sm:$0xff]  }
 0x480   :  { %3856 = vst.msk [vmem:[#allocation8 + $0x8] sm:$0xff] %vm2661_vm12, %v3852_v19  ;;  %v6005_v19 = vld [vmem:[%s7678_s7 + $0x50] sm:$0xff]  }
 0x481   :  { %3857 = vst.msk [vmem:[#allocation8 + $0x10] sm:$0xff] %vm2661_vm12, %v3853_v20  ;;  %v3848_v33 = vadd.f32 %v5827_v42, %v3799_v40  ;;  %v6003_v40 = vld [vmem:[%s7678_s7 + $0xd8] sm:$0xff]   ;;  %5627 = vmatprep.subr.bf16.mxu0 %v6005_v19  ;;  %v6042_v19 = vld [vmem:[%s7678_s7 + $0x148] sm:$0xff]  }
 0x482   :  { %5647 = vmatprep.subr.bf16.mxu1 %v6003_v40  ;;  %v6039_v40 = vld [vmem:[%s7678_s7 + $0x110] sm:$0xff]  }
 0x483   :  { %v3854_v59 = vmax.f32 %v3848_v33, 0.0  ;;  %v6007_v33 = vld [vmem:[%s7678_s7 + $0xd0] sm:$0xff]   ;;  %5648 = vmatpush3.bf16.msra.mxu1 %v6004_v30  ;;  %5628 = vmatpush3.bf16.msra.mxu0 %v6006_v31  ;;  %v6044_v31 = vld [vmem:[%s7678_s7 + $0x1c8] sm:$0xff]  }
 0x484   :  { %5649 = vmatprep.subr.bf16.mxu1 %v6007_v33  ;;  %5629 = vmatprep.subr.bf16.mxu0 %v6009_v32  ;;  %v6041_v30 = vld [vmem:[%s7678_s7 + $0x190] sm:$0xff]   ;;  %v6043_v33 = vld [vmem:[%s7678_s7 + $0x108] sm:$0xff]   ;;  %v6049_v32 = vld [vmem:[%s7678_s7 + $0x180] sm:$0xff]  }
 0x485   :  { %3858 = vst.msk [vmem:[#allocation8 + $0x18] sm:$0xff] %vm2661_vm12, %v3854_v59 }
 0x487   :  { %5650 = vmatpush3.bf16.msra.mxu1 %v6008_v4  ;;  %5630 = vmatpush3.bf16.msra.mxu0 %v6010_v56 }
 0x488   :  { %v3891_v48 = vld [vmem:[#allocation8 + $0x3] ss:$16 sm:$0x3]  ;;  %v3864_v0 = vld [vmem:[#allocation8 + $0x1] ss:$16 sm:$0x3]  ;;  %5651 = vmatprep.subr.bf16.mxu1 %v6011_v24  ;;  %5631 = vmatprep.subr.bf16.mxu0 %v6013_v49 }
 0x489   :  { %v3892_v52 = vpack.c.bf16 %v3891_v48, %v3891_v48  ;;  %v3865_v55 = vpack.c.bf16 %v3864_v0, %v3864_v0  ;;  %v3943_v43 = vld [vmem:[#allocation8 + $0x7] ss:$16 sm:$0x3]  ;;  %v3917_v16 = vld [vmem:[#allocation8 + $0x5] ss:$16 sm:$0x3] }
 0x48a   :  { %v3944_v44 = vpack.c.bf16 %v3943_v43, %v3943_v43  ;;  %v3918_v46 = vpack.c.bf16 %v3917_v16, %v3917_v16  ;;  %v3887_v57 = vld [vmem:[#allocation8 + $0x2] ss:$16 sm:$0x3]  ;;  %v3859_v6 = vld [vmem:[#allocation8] ss:$16 sm:$0x3] }
 0x48b   :  { %v3900_v7 = vrot.slane %v3892_v52, %v7438_v35  ;;  %v3873_v9 = vrot.slane %v3865_v55, %v7438_v35  ;;  %v3888_v58 = vpack.c.bf16 %v3887_v57, %v3887_v57  ;;  %v3860_v51 = vpack.c.bf16 %v3859_v6, %v3859_v6  ;;  %v3939_v27 = vld [vmem:[#allocation8 + $0x6] ss:$16 sm:$0x3]  ;;  %v3913_v41 = vld [vmem:[#allocation8 + $0x4] ss:$16 sm:$0x3] }
 0x48c   :  { %v3952_v50 = vrot.slane %v3944_v44, %v7438_v35  ;;  %v3926_v53 = vrot.slane %v3918_v46, %v7438_v35  ;;  %v3995_v21 = vld [vmem:[#allocation8 + $0xb] ss:$16 sm:$0x3]  ;;  %v3969_v10 = vld [vmem:[#allocation8 + $0x9] ss:$16 sm:$0x3]  ;;  %v3940_v2 = vpack.c.bf16 %v3939_v27, %v3939_v27  ;;  %v3914_v3 = vpack.c.bf16 %v3913_v41, %v3913_v41 }
 0x48d   :  { %v3907_v12 = vrot.slane %v3900_v7, %v7438_v35  ;;  %v3880_v14 = vrot.slane %v3873_v9, %v7438_v35  ;;  %v3996_v60 = vpack.c.bf16 %v3995_v21, %v3995_v21  ;;  %v3970_v61 = vpack.c.bf16 %v3969_v10, %v3969_v10  ;;  %v4047_v38 = vld [vmem:[#allocation8 + $0xf] ss:$16 sm:$0x3]  ;;  %v4021_v39 = vld [vmem:[#allocation8 + $0xd] ss:$16 sm:$0x3] }
 0x48e   :  { %3889 = vst.msk [vmem:[#allocation9 + $0x1] sm:$0x1] %vm3861_vm0, %v3888_v58  ;;  %3862 = vst.msk [vmem:[#allocation9] sm:$0x1] %vm3861_vm0, %v3860_v51  ;;  %v3959_v62 = vrot.slane %v3952_v50, %v7438_v35  ;;  %v3933_v37 = vrot.slane %v3926_v53, %v7438_v35  ;;  %v4048_v23 = vpack.c.bf16 %v4047_v38, %v4047_v38  ;;  %v6012_v48 = vld [vmem:[%s7678_s7 + $0x88] sm:$0xff]   ;;  %v6015_v0 = vld [vmem:[%s7678_s7 + $0xc0] sm:$0xff]  }
 0x48f   :  { %3941 = vst.msk [vmem:[#allocation9 + $0x3] sm:$0x1] %vm3861_vm0, %v3940_v2  ;;  %3915 = vst.msk [vmem:[#allocation9 + $0x2] sm:$0x1] %vm3861_vm0, %v3914_v3  ;;  %3908 = vrot.lane.b32.xlu1 %v3907_v12, %s6079_s29  ;;  %3881 = vrot.lane.b32.xlu0 %v3880_v14, %s6079_s29  ;;  %v4004_v13 = vrot.slane %v3996_v60, %v7438_v35  ;;  %v3978_v5 = vrot.slane %v3970_v61, %v7438_v35  ;;  %v6014_v52 = vld [vmem:[%s7678_s7] sm:$0xff]   ;;  %v6017_v55 = vld [vmem:[%s7678_s7 + $0x178] sm:$0xff]  }
 0x490   :  { %v3991_v15 = vld [vmem:[#allocation8 + $0xa] ss:$16 sm:$0x3]  ;;  %v3965_v17 = vld [vmem:[#allocation8 + $0x8] ss:$16 sm:$0x3]  ;;  %v4022_v29 = vpack.c.bf16 %v4021_v39, %v4021_v39  ;;  %v4056_v11 = vrot.slane %v4048_v23, %v7438_v35  ;;  %5652 = vmatpush3.bf16.msra.mxu1 %v6012_v48  ;;  %5632 = vmatpush3.bf16.msra.mxu0 %v6014_v52 }
 0x491   :  { %v3992_v36 = vpack.c.bf16 %v3991_v15, %v3991_v15  ;;  %v4043_v42 = vld [vmem:[#allocation8 + $0xe] ss:$16 sm:$0x3]  ;;  %v3966_v25 = vpack.c.bf16 %v3965_v17, %v3965_v17  ;;  %v4017_v28 = vld [vmem:[#allocation8 + $0xc] ss:$16 sm:$0x3]  ;;  %v4011_v34 = vrot.slane %v4004_v13, %v7438_v35  ;;  %v3985_v45 = vrot.slane %v3978_v5, %v7438_v35  ;;  %5653 = vmatprep.subr.bf16.mxu1 %v6015_v0 }
 0x492   :  { %v4044_v26 = vpack.c.bf16 %v4043_v42, %v4043_v42  ;;  %v4018_v20 = vpack.c.bf16 %v4017_v28, %v4017_v28  ;;  %v4030_v59 = vrot.slane %v4022_v29, %v7438_v35  ;;  %v4063_v47 = vrot.slane %v4056_v11, %v7438_v35  ;;  %v6016_v43 = vld [vmem:[%s7678_s7 + $0x80] sm:$0xff]   ;;  %v6020_v16 = vld [vmem:[%s7678_s7 + $0x1f8] sm:$0xff]   ;;  %5661 = vmatprep.subr.bf16.mxu0 %v6017_v55  ;;  %v6022_v38 = vld [vmem:[%s7678_s7 + $0x170] sm:$0xff]  }
 0x493   :  { %3993 = vst.msk [vmem:[#allocation9 + $0x5] sm:$0x1] %vm3861_vm0, %v3992_v36  ;;  %3967 = vst.msk [vmem:[#allocation9 + $0x4] sm:$0x1] %vm3861_vm0, %v3966_v25  ;;  %3960 = vrot.lane.b32.xlu1 %v3959_v62, %s6079_s29  ;;  %3934 = vrot.lane.b32.xlu0 %v3933_v37, %s6079_s29  ;;  %v6018_v3 = vld [vmem:[%s7678_s7 + $0x138] sm:$0xff]   ;;  %v6024_v15 = vld [vmem:[%s7678_s7 + $0x1f0] sm:$0xff]  }
 0x494   :  { %4045 = vst.msk [vmem:[#allocation9 + $0x7] sm:$0x1] %vm3861_vm0, %v4044_v26  ;;  %4019 = vst.msk [vmem:[#allocation9 + $0x6] sm:$0x1] %vm3861_vm0, %v4018_v20  ;;  %v4037_v54 = vrot.slane %v4030_v59, %v7438_v35  ;;  %5654 = vmatpush3.bf16.msra.mxu1 %v6016_v43  ;;  %v6021_v61 = vld [vmem:[%s7678_s7 + $0x1b8] sm:$0xff]   ;;  %v6023_v62 = vld [vmem:[%s7678_s7 + $0x130] sm:$0xff]  }
 0x495   :  { %5683 = vmatprep.subr.bf16.mxu1 %v6020_v16  ;;  %v6026_v36 = vld [vmem:[%s7678_s7 + $0x168] sm:$0xff]   ;;  %v6030_v37 = vld [vmem:[%s7678_s7 + $0x160] sm:$0xff]   ;;  %v6036_v28 = vld [vmem:[%s7678_s7 + $0x1d8] sm:$0xff]  }
 0x496   :  { %v6027_v42 = vld [vmem:[%s7678_s7 + $0x128] sm:$0xff]   ;;  %v6032_v25 = vld [vmem:[%s7678_s7 + $0x1e0] sm:$0xff]   ;;  %v6035_v13 = vld [vmem:[%s7678_s7 + $0x118] sm:$0xff]  }
 0x497   :  { %4012 = vrot.lane.b32.xlu1 %v4011_v34, %s6079_s29  ;;  %3986 = vrot.lane.b32.xlu0 %v3985_v45, %s6079_s29  ;;  %v6029_v23 = vld [vmem:[%s7678_s7 + $0x1a8] sm:$0xff]   ;;  %v6033_v26 = vld [vmem:[%s7678_s7 + $0x1a0] sm:$0xff]  }
 0x498   :  { %v6038_v5 = vld [vmem:[%s7678_s7 + $0x150] sm:$0xff]   ;;  %v6037_v29 = vld [vmem:[%s7678_s7 + $0x198] sm:$0xff]   ;;  %v6046_v34 = vld [vmem:[%s7678_s7 + $0x140] sm:$0xff]  }
 0x499   :  { %v6040_v20 = vld [vmem:[%s7678_s7 + $0x1d0] sm:$0xff]   ;;  %v6045_v45 = vld [vmem:[%s7678_s7 + $0x188] sm:$0xff]   ;;  %v6048_v11 = vld [vmem:[%s7678_s7 + $0x1c0] sm:$0xff]  }
 0x49a   :  { %v6047_v59 = vld [vmem:[%s7678_s7 + $0x100] sm:$0xff]   ;;  %v6050_v24 = vld [vmem:[%s7680_s9 + $0x18] sm:$0xff]  }
 0x49b   :  { %4064 = vrot.lane.b32.xlu1 %v4063_v47, %s6079_s29  ;;  %4038 = vrot.lane.b32.xlu0 %v4037_v54, %s6079_s29  ;;  %v6051_v47 = vld [vmem:[%s7680_s9 + $0x10] sm:$0xff]   ;;  %v6053_v54 = vld [vmem:[%s7680_s9] sm:$0xff]  }
 0x501   :  { %v3909_v44 = vpop.permute.xlu1 %3908  ;;  %v3882_v46 = vpop.permute.xlu0 %3881 }
 0x502   :  { %3911 = vst.msk [vmem:[#allocation9 + $0x1] sm:$0x1] %vm3884_vm1, %v3909_v44  ;;  %3885 = vst.msk [vmem:[#allocation9] sm:$0x1] %vm3884_vm1, %v3882_v46 }
 0x505   :  { %v3961_v57 = vpop.permute.xlu1 %3960  ;;  %v3935_v6 = vpop.permute.xlu0 %3934 }
 0x506   :  { %3963 = vst.msk [vmem:[#allocation9 + $0x3] sm:$0x1] %vm3884_vm1, %v3961_v57  ;;  %3937 = vst.msk [vmem:[#allocation9 + $0x2] sm:$0x1] %vm3884_vm1, %v3935_v6  ;;  %v5219_v57 = vld [vmem:[%s7679_s8] ss:$0 sm:$0xff] }
 0x509   :  { %v4013_v7 = vpop.permute.xlu1 %4012  ;;  %v3987_v9 = vpop.permute.xlu0 %3986 }
 0x50a   :  { %4015 = vst.msk [vmem:[#allocation9 + $0x5] sm:$0x1] %vm3884_vm1, %v4013_v7  ;;  %3989 = vst.msk [vmem:[#allocation9 + $0x4] sm:$0x1] %vm3884_vm1, %v3987_v9 }
 0x50d   :  { %v4065_v58 = vpop.permute.xlu1 %4064  ;;  %v4039_v51 = vpop.permute.xlu0 %4038 }
 0x50e   :  { %4067 = vst.msk [vmem:[#allocation9 + $0x7] sm:$0x1] %vm3884_vm1, %v4065_v58  ;;  %4041 = vst.msk [vmem:[#allocation9 + $0x6] sm:$0x1] %vm3884_vm1, %v4039_v51 }
 0x515   :  { %v4068_v27 = vld [vmem:[#allocation9] sm:$0xff] }
 0x516   :  { %v4212_v41 = vrot.slane %v4068_v27, %v7438_v35  ;;  %v4205_v50 = vcombine.high %v4068_v27, %v4068_v27 }
 0x518   :  { %v4220_v53 = vcombine.high %v4212_v41, %v4212_v41  ;;  %v7545_v21 = vrot.slane %v4205_v50, %v7438_v35  ;;  %v4228_v10 = vrot.slane %v4212_v41, %v7438_v35 }
 0x51a   :  { %v4242_v2 = vrot.slane %v4220_v53, %v7438_v35  ;;  %v4221_v12 = vcombine.high %v7545_v21, %v7545_v21  ;;  %v4250_v39 = vcombine.high %v4228_v10, %v4228_v10  ;;  %v4235_v4 = vrot.slane %v7545_v21, %v7438_v35 }
 0x51c   :  { %4678 = vmatprep.mubr.bf16.mxu0 %v4242_v2  ;;  %v4252_v14 = vcombine.high %v4242_v2, %v4242_v2  ;;  %v4249_v60 = vrot.slane %v4221_v12, %v7438_v35  ;;  %v4251_v56 = vcombine.high %v4235_v4, %v4235_v4  ;;  %v6052_v35 = vld [vmem:[%s7680_s9 + $0x8] sm:$0xff]  }
 0x51d   :  { %4679 = vmatmul.mubr.bf16.vlgmr.msra.gmra.mxu0 %v4228_v10 }
 0x51e   :  { %5662 = vmatpush3.bf16.msra.mxu0 %v6018_v3  ;;  %4718 = vmatprep.mubr.bf16.mxu1 %v4252_v14  ;;  %v4253_v17 = vcombine.high %v4249_v60, %v4249_v60 }
 0x51f   :  { %4758 = vmatprep.mubr.bf16.mxu0 %v4249_v60  ;;  %4719 = vmatmul.mubr.bf16.vlgmr.msra.gmra.mxu1 %v4250_v39 }
 0x520   :  { %5684 = vmatpush3.bf16.msra.mxu1 %v6021_v61  ;;  %5663 = vmatprep.subr.bf16.mxu0 %v6022_v38  ;;  %v5284_v61 = vld [vmem:[%s7681_s10] ss:$0 sm:$0xff] }
 0x521   :  { %4798 = vmatprep.mubr.bf16.mxu1 %v4253_v17  ;;  %5685 = vmatprep.subr.bf16.mxu1 %v6024_v15 }
 0x522   :  { %5664 = vmatpush3.bf16.msra.mxu0 %v6023_v62 }
 0x523   :  { %5665 = vmatprep.subr.bf16.mxu0 %v6026_v36 }
 0x524   :  { %5686 = vmatpush3.bf16.msra.mxu1 %v6025_v18 }
 0x525   :  { %5687 = vmatprep.subr.bf16.mxu1 %v6028_v8 }
 0x526   :  { %5666 = vmatpush3.bf16.msra.mxu0 %v6027_v42 }
 0x527   :  { %5667 = vmatprep.subr.bf16.mxu0 %v6030_v37 }
 0x528   :  { %5688 = vmatpush3.bf16.msra.mxu1 %v6029_v23 }
 0x529   :  { %5689 = vmatprep.subr.bf16.mxu1 %v6032_v25 }
 0x52a   :  { %5668 = vmatpush3.bf16.msra.mxu0 %v6031_v63 }
 0x52b   :  { %5669 = vmatprep.subr.bf16.mxu0 %v6034_v1 }
 0x52c   :  { %5690 = vmatpush3.bf16.msra.mxu1 %v6033_v26 }
 0x52d   :  { %5691 = vmatprep.subr.bf16.mxu1 %v6036_v28 }
 0x52e   :  { %5670 = vmatpush3.bf16.msra.mxu0 %v6035_v13 }
 0x52f   :  { %5671 = vmatprep.subr.bf16.mxu0 %v6038_v5 }
 0x530   :  { %5692 = vmatpush3.bf16.msra.mxu1 %v6037_v29 }
 0x531   :  { %5693 = vmatprep.subr.bf16.mxu1 %v6040_v20 }
 0x532   :  { %5672 = vmatpush3.bf16.msra.mxu0 %v6039_v40 }
 0x533   :  { %5673 = vmatprep.subr.bf16.mxu0 %v6042_v19 }
 0x534   :  { %5694 = vmatpush3.bf16.msra.mxu1 %v6041_v30 }
 0x535   :  { %5695 = vmatprep.subr.bf16.mxu1 %v6044_v31 }
 0x536   :  { %5674 = vmatpush3.bf16.msra.mxu0 %v6043_v33 }
 0x537   :  { %5675 = vmatprep.subr.bf16.mxu0 %v6046_v34 }
 0x538   :  { %5696 = vmatpush3.bf16.msra.mxu1 %v6045_v45 }
 0x539   :  { %5697 = vmatprep.subr.bf16.mxu1 %v6048_v11 }
 0x53a   :  { %5676 = vmatpush3.bf16.msra.mxu0 %v6047_v59 }
 0x53b   :  { %5828 = vmatprep.subr.bf16.mxu0 %v6077_v22 }
 0x53c   :  { %5698 = vmatpush3.bf16.msra.mxu1 %v6049_v32 }
 0x53d   :  { %4759 = vmatmul.mubr.bf16.vlgmr.msra.gmra.mxu0 %v4235_v4 }
 0x53e   :  { %5829 = vmatpush3.bf16.msra.mxu0 %v6050_v24  ;;  %5836 = vmatprep.mubr.msk.bf16.mxu0 %vm6083_vm2, %v6077_v22 }
 0x53f   :  { %4799 = vmatmul.mubr.bf16.vlgmr.msra.gmra.mxu1 %v4251_v56  ;;  %5830 = vmatprep.subr.bf16.mxu0 %v6077_v22 }
 0x542   :  { %5831 = vmatpush3.bf16.msra.mxu0 %v6051_v47 }
 0x543   :  { %5832 = vmatprep.subr.bf16.mxu0 %v6077_v22 }
 0x546   :  { %5833 = vmatpush3.bf16.msra.mxu0 %v6052_v35 }
 0x547   :  { %5834 = vmatprep.subr.bf16.mxu0 %v6077_v22 }
 0x54a   :  { %5835 = vmatpush3.bf16.msra.mxu0 %v6053_v54 }
 0x5dd   :  { %v5633_v49 = vpop.f32.mrf.mxu0 }
 0x5df   :  { %v5634_v48 = vpop.f32.mrf.mxu0  ;;  %v5655_v0 = vpop.f32.mrf.mxu1 }
 0x5e0   :  { %v5635_v46 = vadd.f32 %v5634_v48, %v5633_v49 }
 0x5e1   :  { %v5636_v52 = vpop.f32.mrf.mxu0  ;;  %v5656_v55 = vpop.f32.mrf.mxu1 }
 0x5e2   :  { %v4681_v6 = vadd.f32 %v5635_v46, %v5219_v57  ;;  %v5657_v7 = vadd.f32 %v5656_v55, %v5655_v0 }
 0x5e3   :  { %v5637_v43 = vpop.f32.mrf.mxu0  ;;  %v5658_v16 = vpop.f32.mrf.mxu1 }
 0x5e4   :  { %v4721_v22 = vadd.f32 %v5657_v7, %v4681_v6 }
 0x5e5   :  { %v5659_v44 = vpop.f32.mrf.mxu1 }
 0x5fd   :  { %v5677_v9 = vpop.f32.mrf.mxu0 }
 0x5ff   :  { %v5678_v58 = vpop.f32.mrf.mxu0  ;;  %v5699_v51 = vpop.f32.mrf.mxu1 }
 0x600   :  { %v5679_v27 = vadd.f32 %v5678_v58, %v5677_v9 }
 0x601   :  { %v5680_v41 = vpop.f32.mrf.mxu0  ;;  %v5700_v50 = vpop.f32.mrf.mxu1 }
 0x602   :  { %v4761_v53 = vadd.f32 %v5679_v27, %v4721_v22  ;;  %v5701_v21 = vadd.f32 %v5700_v50, %v5699_v51 }
 0x603   :  { %v5681_v10 = vpop.f32.mrf.mxu0  ;;  %v5702_v2 = vpop.f32.mrf.mxu1 }
 0x604   :  { %v4801_v3 = vadd.f32 %v5701_v21, %v4761_v53 }
 0x605   :  { %v5703_v12 = vpop.f32.mrf.mxu1 }
 0x606   :  { %v4806_v14 = vmax.f32 %v4801_v3, 0.0 }
 0x608   :  { %v4807_v60 = vpack.c.bf16 %v4806_v14, %v4806_v14 }
 0x60a   :  { %5837 = vmatmul.mubr.msk.bf16.vlgmr.msra.gmra.mxu0 %vm2661_vm12, %v4807_v60 }
 0x6ca   :  { %v4884_v38 = vpop.f32.mrf.mxu0 }
 0x6cb   :  { %v4885_v39 = vadd.f32 %v5284_v61, %v4884_v38 }
 0x6cc   :  { %v5838_v15 = vpop.f32.mrf.mxu0 }
 0x6cd   :  { %4890 = vst [vmem:[#allocation10] sm:$0x3] %v4885_v39 }
 0x6ce   :  { %v4887_v17 = vpop.f32.mrf.mxu0 }
 0x6cf   :  { %6066 = shalt.err (!%p6063_p4)
}
 0x6d0   :  { %4900 = dma.vmem_to_hbm [thread:$0]  %s4898_s30, 32, %s7682_s11, [#allocation11]   ;;  %v5839_v62 = vpop.f32.mrf.mxu0 }
 0x6d1   :  { %6075 = dma.done.wait [#allocation11], 32  }
 0x6d2   :  { %6076 = vsyncadd [#allocation11], 4294967264 }
 0x6d3   :  { %4904 = vsyncpa [#allocation11], 1 }

</bundles_post_ra>
